<compile_context>
chip_gen: v5e
topology: v5e:2x2
jax: 0.10.0
libtpu: 0.0.40
codegen_flags: <defaults>
</compile_context>

<pallas_src>
import math

import jax
import jax.numpy as jnp
import numpy as np
from jax import lax
from jax.experimental import pallas as pl
from jax.experimental.pallas import tpu as pltpu

EPS = 1e-5
LANE = 128

_VMEM_LIMIT = None


def _vmem_limit_bytes():
    """Generation-aware VMEM budget (don't cap v5e/v6e at a v7x-sized limit)."""
    global _VMEM_LIMIT
    if _VMEM_LIMIT is None:
        limit = 48 * 1024 * 1024                      # safe default (v7x: 64 MiB phys)
        try:
            cap = getattr(pltpu.get_tpu_info(), "vmem_capacity_bytes", None)
            if cap:
                limit = min(max(limit, (int(cap) * 3) // 4), 100 * 1024 * 1024)
        except Exception:
            pass
        _VMEM_LIMIT = limit
    return _VMEM_LIMIT


def _cparams(dimension_semantics):
    return pltpu.CompilerParams(dimension_semantics=dimension_semantics,
                                vmem_limit_bytes=_vmem_limit_bytes())


# ------------------------------ small helpers ------------------------------ #

def _round_up(n, m):
    return ((n + m - 1) // m) * m


def _pad_axis(a, axis, target):
    if a.shape[axis] == target:
        return a
    pad = [(0, 0)] * a.ndim
    pad[axis] = (0, target - a.shape[axis])
    return jnp.pad(a, pad)


def _choose_rows(m, cap=512):
    """Pixel-row tile: largest divisor of m <= cap, preferring multiples of 16
    (bf16 sublane packing), then 8; falls back to one full block."""
    if m <= cap:
        return m
    for step in (16, 8):
        start = cap - cap % step
        for t in range(start, step - 1, -step):
            if m % t == 0:
                return t
    return m


def _choose_cout(cout):
    """Output-channel tile: 256-wide N fills the v6e/v7x 256x256 MXU half;
    channel counts here are always multiples of 128."""
    return 256 if cout % 256 == 0 else cout


def _pw_weight(w, cin_p, cout_p):
    """torch (O, I, 1, 1) -> (I_pad, O_pad) bf16 matmul weight."""
    wm = jnp.transpose(w[:, :, 0, 0], (1, 0))
    return _pad_axis(_pad_axis(wm, 0, cin_p), 1, cout_p).astype(jnp.bfloat16)


def _spatial_weight(w, cin_p, cout_p):
    """torch (O, I, KH, KW) -> (KH*KW, I_pad, O_pad) bf16, tap-major (ky, kx)."""
    o, i, kh, kw = w.shape
    wm = jnp.transpose(w, (2, 3, 1, 0)).reshape(kh * kw, i, o)
    return _pad_axis(_pad_axis(wm, 1, cin_p), 2, cout_p).astype(jnp.bfloat16)


def _bn_vec(v, c_p):
    return _pad_axis(v.astype(jnp.float32).reshape(-1), 0, c_p)


def _fold_bn(stats, g, b, count):
    """Combine per-tile / per-image partial (sum, sum_sq) into BN (scale, shift).

    Training-mode batch statistics (biased variance, eps=1e-5).  The partials
    are tiny (K, 2, C) arrays, so this cross-tile / cross-core reduction runs
    in plain XLA between the matmul pass and the apply pass.
    (Single-pass E[y^2]-mean^2 in f32; easy to swap for Welford if drift at
    very large pixel counts ever matters.)
    """
    s = jnp.sum(stats[:, 0, :], axis=0)
    ss = jnp.sum(stats[:, 1, :], axis=0)
    mean = s / count
    var = jnp.maximum(ss / count - mean * mean, 0.0)
    scale = g * lax.rsqrt(var + EPS)
    shift = b - mean * scale
    return scale.reshape(1, -1), shift.reshape(1, -1)


# ------------------------------ Pallas kernels ------------------------------ #

def _matmul_kernel(x_ref, w_ref, y_ref):
    y_ref[...] = jnp.dot(x_ref[...], w_ref[...],
                         preferred_element_type=jnp.float32).astype(y_ref.dtype)


def _matmul_stats_kernel(x_ref, w_ref, y_ref, st_ref):
    yb = jnp.dot(x_ref[...], w_ref[...],
                 preferred_element_type=jnp.float32).astype(y_ref.dtype)
    y_ref[...] = yb
    y32 = yb.astype(jnp.float32)
    st_ref[0, 0, :] = jnp.sum(y32, axis=0)
    st_ref[0, 1, :] = jnp.sum(y32 * y32, axis=0)


def _bnrelu_matmul_stats_kernel(x_ref, w_ref, isc_ref, ish_ref, y_ref, st_ref):
    # Previous stage's BN + ReLU applied to the input tile on the fly, so the
    # post-BN activation never round-trips through HBM.
    xin = jnp.maximum(x_ref[...].astype(jnp.float32) * isc_ref[...]
                      + ish_ref[...], 0.0).astype(jnp.bfloat16)
    yb = jnp.dot(xin, w_ref[...],
                 preferred_element_type=jnp.float32).astype(y_ref.dtype)
    y_ref[...] = yb
    y32 = yb.astype(jnp.float32)
    st_ref[0, 0, :] = jnp.sum(y32, axis=0)
    st_ref[0, 1, :] = jnp.sum(y32 * y32, axis=0)


def pallas_pointwise(x, w, *, with_stats=True, in_affine=None,
                     out_dtype=jnp.bfloat16):
    """1x1 conv as a tiled (M, Cin) @ (Cin, Cout) matmul (single pass).

    Emits per-tile BN partial sums as a second output so the grid stays fully
    "parallel" (v7x megacore) and the reduction is done in XLA.
    """
    m, cin = x.shape
    cout = w.shape[1]
    tm = _choose_rows(m)
    nt = m // tm

    in_specs = [pl.BlockSpec((tm, cin), lambda i: (i, 0)),
                pl.BlockSpec((cin, cout), lambda i: (0, 0))]
    args = [x, w]
    if in_affine is not None:
        assert with_stats
        isc, ish = in_affine
        in_specs += [pl.BlockSpec((1, cin), lambda i: (0, 0)),
                     pl.BlockSpec((1, cin), lambda i: (0, 0))]
        args += [isc, ish]
        kernel = _bnrelu_matmul_stats_kernel
    else:
        kernel = _matmul_stats_kernel if with_stats else _matmul_kernel

    if not with_stats:
        return pl.pallas_call(
            kernel,
            grid=(nt,),
            in_specs=in_specs,
            out_specs=pl.BlockSpec((tm, cout), lambda i: (i, 0)),
            out_shape=jax.ShapeDtypeStruct((m, cout), out_dtype),
            compiler_params=_cparams(("parallel",)),
        )(*args)

    return pl.pallas_call(
        kernel,
        grid=(nt,),
        in_specs=in_specs,
        out_specs=(pl.BlockSpec((tm, cout), lambda i: (i, 0)),
                   pl.BlockSpec((1, 2, cout), lambda i: (i, 0, 0))),
        out_shape=(jax.ShapeDtypeStruct((m, cout), out_dtype),
                   jax.ShapeDtypeStruct((nt, 2, cout), jnp.float32)),
        compiler_params=_cparams(("parallel",)),
    )(*args)


def _make_spatial_kernel(kh, kw, stride, ho, wo, cin, tn):
    def kernel(x_ref, w_ref, y_ref, st_ref):
        # 9 shifted tap matmuls read straight from the VMEM block, run ONCE
        # (BN is applied later / fused into conv3's input read).  Stride-2
        # taps index one of the four host-split phase planes with static,
        # contiguous slices -- no strided VMEM reads.
        acc = jnp.zeros((ho * wo, tn), jnp.float32)
        for ky in range(kh):
            for kx in range(kw):
                py, oy = ky % stride, ky // stride
                px, ox = kx % stride, kx // stride
                tap = x_ref[0, py, px, oy:oy + ho, ox:ox + wo, :]
                acc = acc + jnp.dot(tap.reshape(ho * wo, cin),
                                    w_ref[ky * kw + kx],
                                    preferred_element_type=jnp.float32)
        yb = acc.astype(y_ref.dtype)
        y_ref[...] = yb.reshape(1, ho, wo, tn)
        y32 = yb.astype(jnp.float32)
        st_ref[0, 0, :] = jnp.sum(y32, axis=0)
        st_ref[0, 1, :] = jnp.sum(y32 * y32, axis=0)
    return kernel


def pallas_spatial_conv(x_ph, w_taps, *, kh, kw, stride, ho, wo):
    """KxK conv (stride 1|2, halo already in x_ph) -> pre-BN output (bf16) +
    per-(image, cout-tile) BN partial sums.

    Grid = (image, cout_tile), both "parallel"; weight blocks (kh*kw, cin, tn)
    keep the per-step VMEM footprint within the v7x budget at real CORnet
    widths and give >=256-wide MXU N on v6e/v7x when channels allow.
    """
    n, sy, sx, hq, wq, cin = x_ph.shape
    cout = w_taps.shape[-1]
    tn = _choose_cout(cout)
    nct = cout // tn
    kernel = _make_spatial_kernel(kh, kw, stride, ho, wo, cin, tn)
    return pl.pallas_call(
        kernel,
        grid=(n, nct),
        in_specs=[pl.BlockSpec((1, sy, sx, hq, wq, cin),
                               lambda i, j: (i, 0, 0, 0, 0, 0)),
                  pl.BlockSpec((kh * kw, cin, tn), lambda i, j: (0, 0, j))],
        out_specs=(pl.BlockSpec((1, ho, wo, tn), lambda i, j: (i, 0, 0, j)),
                   pl.BlockSpec((1, 2, tn), lambda i, j: (i, 0, j))),
        out_shape=(jax.ShapeDtypeStruct((n, ho, wo, cout), jnp.bfloat16),
                   jax.ShapeDtypeStruct((n, 2, cout), jnp.float32)),
        compiler_params=_cparams(("parallel", "parallel")),
    )(x_ph, w_taps)


def _make_apply_pad_kernel(h, w):
    def kernel(y_ref, sc_ref, sh_ref, o_ref):
        # BN + ReLU applied while writing straight into the (+1 halo) padded
        # conv2 input buffer: no separate jnp.pad round-trip of the c4
        # activation through HBM.
        o_ref[...] = jnp.zeros_like(o_ref)
        v = jnp.maximum(y_ref[...].astype(jnp.float32) * sc_ref[...]
                        + sh_ref[...], 0.0)
        o_ref[:, 1:1 + h, 1:1 + w, :] = v.astype(o_ref.dtype)
    return kernel


def pallas_apply_bn_relu_pad(y, scale, shift, n, h, w):
    c = y.shape[-1]
    return pl.pallas_call(
        _make_apply_pad_kernel(h, w),
        grid=(n,),
        in_specs=[pl.BlockSpec((1, h, w, c), lambda i: (i, 0, 0, 0)),
                  pl.BlockSpec((1, c), lambda i: (0, 0)),
                  pl.BlockSpec((1, c), lambda i: (0, 0))],
        out_specs=pl.BlockSpec((1, h + 2, w + 2, c), lambda i: (i, 0, 0, 0)),
        out_shape=jax.ShapeDtypeStruct((n, h + 2, w + 2, c), jnp.bfloat16),
        compiler_params=_cparams(("parallel",)),
    )(y.reshape(n, h, w, c), scale, shift)


def _apply_res_kernel(y_ref, sc_ref, sh_ref, r_ref, rsc_ref, rsh_ref, o_ref):
    # norm3 + residual (with the skip-path BN folded into rsc/rsh) + ReLU.
    y = y_ref[...].astype(jnp.float32) * sc_ref[...] + sh_ref[...]
    r = r_ref[...].astype(jnp.float32) * rsc_ref[...] + rsh_ref[...]
    o_ref[...] = jnp.maximum(y + r, 0.0).astype(o_ref.dtype)


def pallas_apply_bn_res_relu(y, scale, shift, res, res_scale, res_shift):
    m, c = y.shape
    tm = _choose_rows(m)
    return pl.pallas_call(
        _apply_res_kernel,
        grid=(m // tm,),
        in_specs=[pl.BlockSpec((tm, c), lambda i: (i, 0)),
                  pl.BlockSpec((1, c), lambda i: (0, 0)),
                  pl.BlockSpec((1, c), lambda i: (0, 0)),
                  pl.BlockSpec((tm, c), lambda i: (i, 0)),
                  pl.BlockSpec((1, c), lambda i: (0, 0)),
                  pl.BlockSpec((1, c), lambda i: (0, 0))],
        out_specs=pl.BlockSpec((tm, c), lambda i: (i, 0)),
        out_shape=jax.ShapeDtypeStruct((m, c), jnp.bfloat16),
        compiler_params=_cparams(("parallel",)),
    )(y, scale, shift, res, res_scale, res_shift)


def _phase_split(xpad):
    """(N, Hp, Wp, C) -> (N, 2, 2, ceil(Hp/2), ceil(Wp/2), C) space-to-depth
    phases, so the stride-2 3x3 conv needs only contiguous in-kernel reads
    (one cheap XLA strided copy instead of 9 strided VMEM reads per pixel)."""
    n, hp, wp, c = xpad.shape
    hq, wq = (hp + 1) // 2, (wp + 1) // 2
    rows = []
    for py in range(2):
        cols = []
        for px in range(2):
            ph = xpad[:, py::2, px::2, :]
            ph = _pad_axis(_pad_axis(ph, 1, hq), 2, wq)
            cols.append(ph)
        rows.append(jnp.stack(cols, axis=1))
    return jnp.stack(rows, axis=1)


# --------------------------- parameters (synthetic) ------------------------- #

def init_params(key, in_channels, out_channels, times, scale=4):
    c4 = out_channels * scale

    def uconv(k, o, i, kk):
        # kaiming_uniform(a=sqrt(5)) bound == 1/sqrt(fan_in)
        bound = 1.0 / math.sqrt(i * kk * kk)
        return jax.random.uniform(k, (o, i, kk, kk), jnp.float32, -bound, bound)

    ks = jax.random.split(key, 5)
    p = {
        "w_input": uconv(ks[0], out_channels, in_channels, 1),
        "w_skip": uconv(ks[1], out_channels, out_channels, 1),
        "w1": uconv(ks[2], c4, out_channels, 1),
        "w2": uconv(ks[3], c4, c4, 3),
        "w3": uconv(ks[4], out_channels, c4, 1),
        "g_skip": jnp.ones((out_channels,), jnp.float32),
        "b_skip": jnp.zeros((out_channels,), jnp.float32),
    }
    for t in range(times):
        p[f"g1_{t}"] = jnp.ones((c4,), jnp.float32)
        p[f"b1_{t}"] = jnp.zeros((c4,), jnp.float32)
        p[f"g2_{t}"] = jnp.ones((c4,), jnp.float32)
        p[f"b2_{t}"] = jnp.zeros((c4,), jnp.float32)
        p[f"g3_{t}"] = jnp.ones((out_channels,), jnp.float32)
        p[f"b3_{t}"] = jnp.zeros((out_channels,), jnp.float32)
    return p


# -------------------------------- forward pass ------------------------------ #

def corblock_s_forward(inp_nchw, params, times=1):
    n, cin, h, w_sp = inp_nchw.shape
    c = params["w_input"].shape[0]            # out_channels
    c4 = params["w1"].shape[0]                # out_channels * scale
    c_p = _round_up(c, LANE)
    c4_p = _round_up(c4, LANE)

    # conv_input (1x1 conv == matmul).  Input channels are left UN-padded
    # (HBM-bound stage); only output channels are lane-padded to 128.
    x = jnp.transpose(inp_nchw, (0, 2, 3, 1)).reshape(n * h * w_sp, cin)
    x = x.astype(jnp.bfloat16)
    w_in = _pad_axis(jnp.transpose(params["w_input"][:, :, 0, 0], (1, 0)),
                     1, c_p).astype(jnp.bfloat16)
    x = pallas_pointwise(x, w_in, with_stats=False).reshape(n, h, w_sp, c_p)

    w1 = _pw_weight(params["w1"], c_p, c4_p)
    w2 = _spatial_weight(params["w2"], c4_p, c4_p)
    w3 = _pw_weight(params["w3"], c4_p, c_p)
    w_skip = _pw_weight(params["w_skip"], c_p, c_p)
    g_skip = _bn_vec(params["g_skip"], c_p)
    b_skip = _bn_vec(params["b_skip"], c_p)

    for t in range(times):
        nb, hb, wb, _ = x.shape
        stride = 2 if t == 0 else 1
        ho = (hb + 2 - 3) // stride + 1
        wo = (wb + 2 - 3) // stride + 1
        m_in = nb * hb * wb
        m_out = nb * ho * wo

        g1 = _bn_vec(params[f"g1_{t}"], c4_p); b1 = _bn_vec(params[f"b1_{t}"], c4_p)
        g2 = _bn_vec(params[f"g2_{t}"], c4_p); b2 = _bn_vec(params[f"b2_{t}"], c4_p)
        g3 = _bn_vec(params[f"g3_{t}"], c_p);  b3 = _bn_vec(params[f"b3_{t}"], c_p)

        if t == 0:
            # skip = norm_skip(skip(x)): stride-2 1x1 conv = XLA strided
            # subsample + the plain pointwise kernel.  Its BN is folded into
            # the residual apply (post-BN skip never hits HBM).
            x_sub = x[:, ::2, ::2, :].reshape(m_out, c_p)
            res, st_skip = pallas_pointwise(x_sub, w_skip)
            res_scale, res_shift = _fold_bn(st_skip, g_skip, b_skip, float(m_out))
        else:
            res = x.reshape(m_out, c_p)
            res_scale = jnp.ones((1, c_p), jnp.float32)
            res_shift = jnp.zeros((1, c_p), jnp.float32)

        # conv1 (1x1): matmul + batch-stat partials in ONE pass; BN1 + ReLU are
        # applied while writing the haloed conv2 input.
        y1, st1 = pallas_pointwise(x.reshape(m_in, c_p), w1)
        s1, sh1 = _fold_bn(st1, g1, b1, float(m_in))
        x1_pad = pallas_apply_bn_relu_pad(y1, s1, sh1, nb, hb, wb)

        # conv2 (3x3, stride 1|2, pad 1): the 9 tap matmuls run exactly once;
        # stats come out as per-image / per-cout-tile partials reduced in XLA.
        if stride == 1:
            x_ph = x1_pad.reshape(nb, 1, 1, hb + 2, wb + 2, c4_p)
        else:
            x_ph = _phase_split(x1_pad)
        y2, st2 = pallas_spatial_conv(x_ph, w2, kh=3, kw=3, stride=stride,
                                      ho=ho, wo=wo)
        s2, sh2 = _fold_bn(st2, g2, b2, float(m_out))

        # conv3 (1x1): BN2 + ReLU fused into the matmul's input read, so the
        # post-BN conv2 activation never round-trips through HBM.
        y3, st3 = pallas_pointwise(y2.reshape(m_out, c4_p), w3,
                                   in_affine=(s2, sh2))
        s3, sh3 = _fold_bn(st3, g3, b3, float(m_out))

        # norm3 + residual (+ skip BN) + ReLU.
        x = pallas_apply_bn_res_relu(y3, s3, sh3, res, res_scale, res_shift)
        x = x.reshape(nb, ho, wo, c_p)

    # TODO(synk): PyTorch training-mode BatchNorm also updates running_mean /
    # running_var buffers as a side effect; those buffer updates are not
    # modeled (the returned activations do not depend on them).
    return jnp.transpose(x[..., :c], (0, 3, 1, 2)).astype(jnp.float32)


# --------------------------- pure-JAX reference check ----------------------- #
# Matched-precision reference: same conv decomposition (1x1 -> matmul, 3x3 ->
# 9 shifted-tap matmuls), bf16 operands / f32 accumulation, bf16 storage of
# pre-BN activations, f32 training-mode BatchNorm (biased variance, eps=1e-5).

def corblock_s_reference(inp_nchw, params, times=1):
    c = params["w_input"].shape[0]
    c4 = params["w1"].shape[0]
    bf = lambda a: a.astype(jnp.bfloat16)

    def pw(x, w):                       # x NHWC bf16, w torch (O, I, 1, 1)
        wm = jnp.transpose(w[:, :, 0, 0], (1, 0)).astype(jnp.bfloat16)
        y = jnp.dot(x.reshape(-1, x.shape[-1]), wm,
                    preferred_element_type=jnp.float32)
        return y.reshape(x.shape[:-1] + (w.shape[0],))

    def conv3(x, w, stride):            # x NHWC bf16, w torch (O, I, 3, 3)
        nb, hb, wb, ci = x.shape
        xp = jnp.pad(x, ((0, 0), (1, 1), (1, 1), (0, 0)))
        ho = (hb + 2 - 3) // stride + 1
        wo = (wb + 2 - 3) // stride + 1
        wt = jnp.transpose(w, (2, 3, 1, 0)).astype(jnp.bfloat16)
        acc = jnp.zeros((nb * ho * wo, w.shape[0]), jnp.float32)
        for ky in range(3):
            for kx in range(3):
                tap = xp[:, ky:ky + (ho - 1) * stride + 1:stride,
                         kx:kx + (wo - 1) * stride + 1:stride, :]
                acc = acc + jnp.dot(tap.reshape(-1, ci), wt[ky, kx],
                                    preferred_element_type=jnp.float32)
        return acc.reshape(nb, ho, wo, w.shape[0])

    def bn_fold(y32_flat, g, b):
        mean = jnp.mean(y32_flat, axis=0)
        var = jnp.maximum(jnp.mean(y32_flat * y32_flat, axis=0) - mean * mean,
                          0.0)
        scale = g * lax.rsqrt(var + EPS)
        return scale, b - mean * scale

    x = bf(pw(bf(jnp.transpose(inp_nchw, (0, 2, 3, 1))), params["w_input"]))
    for t in range(times):
        stride = 2 if t == 0 else 1
        if t == 0:
            ysk = bf(pw(x[:, ::2, ::2, :], params["w_skip"]))
            ssc, ssh = bn_fold(ysk.astype(jnp.float32).reshape(-1, c),
                               params["g_skip"], params["b_skip"])
            res = ysk.astype(jnp.float32).reshape(-1, c) * ssc + ssh
        else:
            res = x.reshape(-1, c).astype(jnp.float32)

        y1 = bf(pw(x, params["w1"]))
        s1, sh1 = bn_fold(y1.astype(jnp.float32).reshape(-1, c4),
                          params[f"g1_{t}"], params[f"b1_{t}"])
        x1 = bf(jnp.maximum(y1.astype(jnp.float32) * s1 + sh1, 0.0))

        y2 = bf(conv3(x1, params["w2"], stride))
        s2, sh2 = bn_fold(y2.astype(jnp.float32).reshape(-1, c4),
                          params[f"g2_{t}"], params[f"b2_{t}"])
        x2 = bf(jnp.maximum(y2.astype(jnp.float32) * s2 + sh2, 0.0))

        y3 = bf(pw(x2, params["w3"]))
        s3, sh3 = bn_fold(y3.astype(jnp.float32).reshape(-1, c),
                          params[f"g3_{t}"], params[f"b3_{t}"])
        out = jnp.maximum(y3.astype(jnp.float32).reshape(-1, c) * s3 + sh3
                          + res, 0.0)
        x = bf(out).reshape(y3.shape)
    return jnp.transpose(x, (0, 3, 1, 2)).astype(jnp.float32)


# ------------------------------------ main ---------------------------------- #

if __name__ == "__main__":
    key = jax.random.PRNGKey(0)
    k_inp, k_par = jax.random.split(key)

    in_channels, out_channels, times = 4, 8, 2
    x = jax.random.normal(k_inp, (2, in_channels, 16, 16), jnp.float32)
    params = init_params(k_par, in_channels, out_channels, times)

    fwd = jax.jit(corblock_s_forward, static_argnames=("times",))
    ref_fn = jax.jit(corblock_s_reference, static_argnames=("times",))

    out = jax.block_until_ready(fwd(x, params, times=times))
    ref = jax.block_until_ready(ref_fn(x, params, times=times))

    assert out.shape == (2, out_channels, 8, 8), out.shape
    np.testing.assert_allclose(np.asarray(out, dtype=np.float32),
                               np.asarray(ref, dtype=np.float32),
                               rtol=5e-3, atol=5e-3)
    print("KERNEL_OK")
</pallas_src>

<mosaic_0001>
module attributes {stable_mosaic.version = 11 : i64} {
  func.func @_matmul_kernel(%arg0: i32, %arg1: memref<512x4xbf16, #tpu.memory_space<vmem>>, %arg2: memref<4x128xbf16, #tpu.memory_space<vmem>>, %arg3: memref<512x128xbf16, #tpu.memory_space<vmem>>) attributes {dimension_semantics = [#tpu.dimension_semantics<parallel>], iteration_bounds = array<i64: 1>, scalar_prefetch = 0 : i64, scratch_operands = 0 : i64, tpu.core_type = #tpu.core_type<tc>, window_params = [{transform_indices = @transform_0, window_bounds = array<i64: 512, 4>}, {pipeline_mode = #tpu.pipeline_mode<synchronous>, transform_indices = @transform_1, window_bounds = array<i64: 4, 128>}, {transform_indices = @transform_2, window_bounds = array<i64: 512, 128>}]} {
    %c0 = arith.constant 0 : index
    %c0_0 = arith.constant 0 : index
    %0 = vector.load %arg1[%c0, %c0_0] : memref<512x4xbf16, #tpu.memory_space<vmem>>, vector<512x4xbf16>
    %c0_1 = arith.constant 0 : index
    %c0_2 = arith.constant 0 : index
    %1 = vector.load %arg2[%c0_1, %c0_2] : memref<4x128xbf16, #tpu.memory_space<vmem>>, vector<4x128xbf16>
    %cst = arith.constant dense<0.000000e+00> : vector<512x128xf32>
    %2 = tpu.matmul %0, %1, %cst {dimension_numbers = #tpu.dot_dimension_numbers<[1], [0], [0], [1], [0, 0, 1, 1], [], []>} : vector<512x4xbf16>, vector<4x128xbf16>, vector<512x128xf32> -> vector<512x128xf32>
    %3 = arith.truncf %2 : vector<512x128xf32> to vector<512x128xbf16>
    %c0_3 = arith.constant 0 : index
    %c0_4 = arith.constant 0 : index
    %4 = vector.load %arg3[%c0_3, %c0_4] : memref<512x128xbf16, #tpu.memory_space<vmem>>, vector<512x128xbf16>
    tpu.vector_store %arg3[%c0_3, %c0_4], %3 {strides = array<i32>} : memref<512x128xbf16, #tpu.memory_space<vmem>>, vector<512x128xbf16>,
    return
  }
  func.func @transform_0(%arg0: i32) -> (i32, i32) {
    %c0_i32 = arith.constant 0 : i32
    %c0_i32_0 = arith.constant 0 : i32
    return %arg0, %c0_i32 : i32, i32
  }
  func.func @transform_1(%arg0: i32) -> (i32, i32) {
    %c0_i32 = arith.constant 0 : i32
    %c0_i32_0 = arith.constant 0 : i32
    %c0_i32_1 = arith.constant 0 : i32
    return %c0_i32, %c0_i32_0 : i32, i32
  }
  func.func @transform_2(%arg0: i32) -> (i32, i32) {
    %c0_i32 = arith.constant 0 : i32
    %c0_i32_0 = arith.constant 0 : i32
    return %arg0, %c0_i32 : i32, i32
  }
}

module attributes {stable_mosaic.version = 11 : i64} {
  func.func @_matmul_stats_kernel(%arg0: i32, %arg1: memref<128x128xbf16, #tpu.memory_space<vmem>>, %arg2: memref<128x128xbf16, #tpu.memory_space<vmem>>, %arg3: memref<128x128xbf16, #tpu.memory_space<vmem>>, %arg4: memref<1x2x128xf32, #tpu.memory_space<vmem>>) attributes {dimension_semantics = [#tpu.dimension_semantics<parallel>], iteration_bounds = array<i64: 1>, scalar_prefetch = 0 : i64, scratch_operands = 0 : i64, tpu.core_type = #tpu.core_type<tc>, window_params = [{transform_indices = @transform_0, window_bounds = array<i64: 128, 128>}, {pipeline_mode = #tpu.pipeline_mode<synchronous>, transform_indices = @transform_1, window_bounds = array<i64: 128, 128>}, {transform_indices = @transform_2, window_bounds = array<i64: 128, 128>}, {transform_indices = @transform_3, window_bounds = array<i64: 1, 2, 128>}]} {
    %c0 = arith.constant 0 : index
    %c0_0 = arith.constant 0 : index
    %0 = vector.load %arg1[%c0, %c0_0] : memref<128x128xbf16, #tpu.memory_space<vmem>>, vector<128x128xbf16>
    %c0_1 = arith.constant 0 : index
    %c0_2 = arith.constant 0 : index
    %1 = vector.load %arg2[%c0_1, %c0_2] : memref<128x128xbf16, #tpu.memory_space<vmem>>, vector<128x128xbf16>
    %cst = arith.constant dense<0.000000e+00> : vector<128x128xf32>
    %2 = tpu.matmul %0, %1, %cst {dimension_numbers = #tpu.dot_dimension_numbers<[1], [0], [0], [1], [0, 0, 1, 1], [], []>} : vector<128x128xbf16>, vector<128x128xbf16>, vector<128x128xf32> -> vector<128x128xf32>
    %3 = arith.truncf %2 : vector<128x128xf32> to vector<128x128xbf16>
    %c0_3 = arith.constant 0 : index
    %c0_4 = arith.constant 0 : index
    %4 = vector.load %arg3[%c0_3, %c0_4] : memref<128x128xbf16, #tpu.memory_space<vmem>>, vector<128x128xbf16>
    tpu.vector_store %arg3[%c0_3, %c0_4], %3 {strides = array<i32>} : memref<128x128xbf16, #tpu.memory_space<vmem>>, vector<128x128xbf16>,
    %5 = arith.extf %3 : vector<128x128xbf16> to vector<128x128xf32>
    %cst_5 = arith.constant dense<0.000000e+00> : vector<128xf32>
    %6 = vector.multi_reduction <add>, %5, %cst_5 [0] : vector<128x128xf32> to vector<128xf32>
    %c0_6 = arith.constant 0 : index
    %c0_7 = arith.constant 0 : index
    %c0_8 = arith.constant 0 : index
    %7 = vector.load %arg4[%c0_6, %c0_7, %c0_8] : memref<1x2x128xf32, #tpu.memory_space<vmem>>, vector<1x1x128xf32>
    %8 = vector.shape_cast %7 : vector<1x1x128xf32> to vector<128xf32>
    %9 = vector.shape_cast %6 : vector<128xf32> to vector<1x1x128xf32>
    tpu.vector_store %arg4[%c0_6, %c0_7, %c0_8], %9 {strides = array<i32>} : memref<1x2x128xf32, #tpu.memory_space<vmem>>, vector<1x1x128xf32>,
    %10 = arith.mulf %5, %5 : vector<128x128xf32>
    %cst_9 = arith.constant dense<0.000000e+00> : vector<128xf32>
    %11 = vector.multi_reduction <add>, %10, %cst_9 [0] : vector<128x128xf32> to vector<128xf32>
    %c0_10 = arith.constant 0 : index
    %c1 = arith.constant 1 : index
    %c0_11 = arith.constant 0 : index
    %12 = vector.load %arg4[%c0_10, %c1, %c0_11] : memref<1x2x128xf32, #tpu.memory_space<vmem>>, vector<1x1x128xf32>
    %13 = vector.shape_cast %12 : vector<1x1x128xf32> to vector<128xf32>
    %14 = vector.shape_cast %11 : vector<128xf32> to vector<1x1x128xf32>
    tpu.vector_store %arg4[%c0_10, %c1, %c0_11], %14 {strides = array<i32>} : memref<1x2x128xf32, #tpu.memory_space<vmem>>, vector<1x1x128xf32>,
    return
  }
  func.func @transform_0(%arg0: i32) -> (i32, i32) {
    %c0_i32 = arith.constant 0 : i32
    %c0_i32_0 = arith.constant 0 : i32
    return %arg0, %c0_i32 : i32, i32
  }
  func.func @transform_1(%arg0: i32) -> (i32, i32) {
    %c0_i32 = arith.constant 0 : i32
    %c0_i32_0 = arith.constant 0 : i32
    %c0_i32_1 = arith.constant 0 : i32
    return %c0_i32, %c0_i32_0 : i32, i32
  }
  func.func @transform_2(%arg0: i32) -> (i32, i32) {
    %c0_i32 = arith.constant 0 : i32
    %c0_i32_0 = arith.constant 0 : i32
    return %arg0, %c0_i32 : i32, i32
  }
  func.func @transform_3(%arg0: i32) -> (i32, i32, i32) {
    %c0_i32 = arith.constant 0 : i32
    %c0_i32_0 = arith.constant 0 : i32
    %c0_i32_1 = arith.constant 0 : i32
    return %arg0, %c0_i32, %c0_i32_0 : i32, i32, i32
  }
}

module attributes {stable_mosaic.version = 11 : i64} {
  func.func @_matmul_stats_kernel(%arg0: i32, %arg1: memref<512x128xbf16, #tpu.memory_space<vmem>>, %arg2: memref<128x128xbf16, #tpu.memory_space<vmem>>, %arg3: memref<512x128xbf16, #tpu.memory_space<vmem>>, %arg4: memref<1x2x128xf32, #tpu.memory_space<vmem>>) attributes {dimension_semantics = [#tpu.dimension_semantics<parallel>], iteration_bounds = array<i64: 1>, scalar_prefetch = 0 : i64, scratch_operands = 0 : i64, tpu.core_type = #tpu.core_type<tc>, window_params = [{transform_indices = @transform_0, window_bounds = array<i64: 512, 128>}, {pipeline_mode = #tpu.pipeline_mode<synchronous>, transform_indices = @transform_1, window_bounds = array<i64: 128, 128>}, {transform_indices = @transform_2, window_bounds = array<i64: 512, 128>}, {transform_indices = @transform_3, window_bounds = array<i64: 1, 2, 128>}]} {
    %c0 = arith.constant 0 : index
    %c0_0 = arith.constant 0 : index
    %0 = vector.load %arg1[%c0, %c0_0] : memref<512x128xbf16, #tpu.memory_space<vmem>>, vector<512x128xbf16>
    %c0_1 = arith.constant 0 : index
    %c0_2 = arith.constant 0 : index
    %1 = vector.load %arg2[%c0_1, %c0_2] : memref<128x128xbf16, #tpu.memory_space<vmem>>, vector<128x128xbf16>
    %cst = arith.constant dense<0.000000e+00> : vector<512x128xf32>
    %2 = tpu.matmul %0, %1, %cst {dimension_numbers = #tpu.dot_dimension_numbers<[1], [0], [0], [1], [0, 0, 1, 1], [], []>} : vector<512x128xbf16>, vector<128x128xbf16>, vector<512x128xf32> -> vector<512x128xf32>
    %3 = arith.truncf %2 : vector<512x128xf32> to vector<512x128xbf16>
    %c0_3 = arith.constant 0 : index
    %c0_4 = arith.constant 0 : index
    %4 = vector.load %arg3[%c0_3, %c0_4] : memref<512x128xbf16, #tpu.memory_space<vmem>>, vector<512x128xbf16>
    tpu.vector_store %arg3[%c0_3, %c0_4], %3 {strides = array<i32>} : memref<512x128xbf16, #tpu.memory_space<vmem>>, vector<512x128xbf16>,
    %5 = arith.extf %3 : vector<512x128xbf16> to vector<512x128xf32>
    %cst_5 = arith.constant dense<0.000000e+00> : vector<128xf32>
    %6 = vector.multi_reduction <add>, %5, %cst_5 [0] : vector<512x128xf32> to vector<128xf32>
    %c0_6 = arith.constant 0 : index
    %c0_7 = arith.constant 0 : index
    %c0_8 = arith.constant 0 : index
    %7 = vector.load %arg4[%c0_6, %c0_7, %c0_8] : memref<1x2x128xf32, #tpu.memory_space<vmem>>, vector<1x1x128xf32>
    %8 = vector.shape_cast %7 : vector<1x1x128xf32> to vector<128xf32>
    %9 = vector.shape_cast %6 : vector<128xf32> to vector<1x1x128xf32>
    tpu.vector_store %arg4[%c0_6, %c0_7, %c0_8], %9 {strides = array<i32>} : memref<1x2x128xf32, #tpu.memory_space<vmem>>, vector<1x1x128xf32>,
    %10 = arith.mulf %5, %5 : vector<512x128xf32>
    %cst_9 = arith.constant dense<0.000000e+00> : vector<128xf32>
    %11 = vector.multi_reduction <add>, %10, %cst_9 [0] : vector<512x128xf32> to vector<128xf32>
    %c0_10 = arith.constant 0 : index
    %c1 = arith.constant 1 : index
    %c0_11 = arith.constant 0 : index
    %12 = vector.load %arg4[%c0_10, %c1, %c0_11] : memref<1x2x128xf32, #tpu.memory_space<vmem>>, vector<1x1x128xf32>
    %13 = vector.shape_cast %12 : vector<1x1x128xf32> to vector<128xf32>
    %14 = vector.shape_cast %11 : vector<128xf32> to vector<1x1x128xf32>
    tpu.vector_store %arg4[%c0_10, %c1, %c0_11], %14 {strides = array<i32>} : memref<1x2x128xf32, #tpu.memory_space<vmem>>, vector<1x1x128xf32>,
    return
  }
  func.func @transform_0(%arg0: i32) -> (i32, i32) {
    %c0_i32 = arith.constant 0 : i32
    %c0_i32_0 = arith.constant 0 : i32
    return %arg0, %c0_i32 : i32, i32
  }
  func.func @transform_1(%arg0: i32) -> (i32, i32) {
    %c0_i32 = arith.constant 0 : i32
    %c0_i32_0 = arith.constant 0 : i32
    %c0_i32_1 = arith.constant 0 : i32
    return %c0_i32, %c0_i32_0 : i32, i32
  }
  func.func @transform_2(%arg0: i32) -> (i32, i32) {
    %c0_i32 = arith.constant 0 : i32
    %c0_i32_0 = arith.constant 0 : i32
    return %arg0, %c0_i32 : i32, i32
  }
  func.func @transform_3(%arg0: i32) -> (i32, i32, i32) {
    %c0_i32 = arith.constant 0 : i32
    %c0_i32_0 = arith.constant 0 : i32
    %c0_i32_1 = arith.constant 0 : i32
    return %arg0, %c0_i32, %c0_i32_0 : i32, i32, i32
  }
}

module attributes {stable_mosaic.version = 11 : i64} {
  func.func @kernel(%arg0: i32, %arg1: memref<1x16x16x128xbf16, #tpu.memory_space<vmem>>, %arg2: memref<1x128xf32, #tpu.memory_space<vmem>>, %arg3: memref<1x128xf32, #tpu.memory_space<vmem>>, %arg4: memref<1x18x18x128xbf16, #tpu.memory_space<vmem>>) attributes {dimension_semantics = [#tpu.dimension_semantics<parallel>], iteration_bounds = array<i64: 2>, scalar_prefetch = 0 : i64, scratch_operands = 0 : i64, tpu.core_type = #tpu.core_type<tc>, window_params = [{transform_indices = @transform_0, window_bounds = array<i64: 1, 16, 16, 128>}, {pipeline_mode = #tpu.pipeline_mode<synchronous>, transform_indices = @transform_1, window_bounds = array<i64: 1, 128>}, {pipeline_mode = #tpu.pipeline_mode<synchronous>, transform_indices = @transform_2, window_bounds = array<i64: 1, 128>}, {transform_indices = @transform_3, window_bounds = array<i64: 1, 18, 18, 128>}]} {
    %cst = arith.constant 0.000000e+00 : bf16
    %0 = vector.broadcast %cst : bf16 to vector<1x18x18x128xbf16>
    %c0 = arith.constant 0 : index
    %c0_0 = arith.constant 0 : index
    %c0_1 = arith.constant 0 : index
    %c0_2 = arith.constant 0 : index
    %1 = vector.load %arg4[%c0, %c0_0, %c0_1, %c0_2] : memref<1x18x18x128xbf16, #tpu.memory_space<vmem>>, vector<1x18x18x128xbf16>
    tpu.vector_store %arg4[%c0, %c0_0, %c0_1, %c0_2], %0 {strides = array<i32>} : memref<1x18x18x128xbf16, #tpu.memory_space<vmem>>, vector<1x18x18x128xbf16>,
    %c0_3 = arith.constant 0 : index
    %c0_4 = arith.constant 0 : index
    %c0_5 = arith.constant 0 : index
    %c0_6 = arith.constant 0 : index
    %2 = vector.load %arg1[%c0_3, %c0_4, %c0_5, %c0_6] : memref<1x16x16x128xbf16, #tpu.memory_space<vmem>>, vector<1x16x16x128xbf16>
    %3 = arith.extf %2 : vector<1x16x16x128xbf16> to vector<1x16x16x128xf32>
    %c0_7 = arith.constant 0 : index
    %c0_8 = arith.constant 0 : index
    %4 = vector.load %arg2[%c0_7, %c0_8] : memref<1x128xf32, #tpu.memory_space<vmem>>, vector<1x128xf32>
    %5 = vector.shape_cast %4 : vector<1x128xf32> to vector<1x1x1x128xf32>
    %6 = vector.broadcast %5 : vector<1x1x1x128xf32> to vector<1x16x16x128xf32>
    %7 = arith.mulf %3, %6 : vector<1x16x16x128xf32>
    %c0_9 = arith.constant 0 : index
    %c0_10 = arith.constant 0 : index
    %8 = vector.load %arg3[%c0_9, %c0_10] : memref<1x128xf32, #tpu.memory_space<vmem>>, vector<1x128xf32>
    %9 = vector.shape_cast %8 : vector<1x128xf32> to vector<1x1x1x128xf32>
    %10 = vector.broadcast %9 : vector<1x1x1x128xf32> to vector<1x16x16x128xf32>
    %11 = arith.addf %7, %10 : vector<1x16x16x128xf32>
    %cst_11 = arith.constant 0.000000e+00 : f32
    %12 = vector.broadcast %cst_11 : f32 to vector<1x16x16x128xf32>
    %13 = arith.maximumf %11, %12 : vector<1x16x16x128xf32>
    %14 = arith.truncf %13 : vector<1x16x16x128xf32> to vector<1x16x16x128xbf16>
    %c0_12 = arith.constant 0 : index
    %c1 = arith.constant 1 : index
    %c1_13 = arith.constant 1 : index
    %c0_14 = arith.constant 0 : index
    %15 = vector.load %arg4[%c0_12, %c1, %c1_13, %c0_14] : memref<1x18x18x128xbf16, #tpu.memory_space<vmem>>, vector<1x16x16x128xbf16>
    tpu.vector_store %arg4[%c0_12, %c1, %c1_13, %c0_14], %14 {strides = array<i32>} : memref<1x18x18x128xbf16, #tpu.memory_space<vmem>>, vector<1x16x16x128xbf16>,
    return
  }
  func.func @transform_0(%arg0: i32) -> (i32, i32, i32, i32) {
    %c0_i32 = arith.constant 0 : i32
    %c0_i32_0 = arith.constant 0 : i32
    %c0_i32_1 = arith.constant 0 : i32
    %c0_i32_2 = arith.constant 0 : i32
    return %arg0, %c0_i32, %c0_i32_0, %c0_i32_1 : i32, i32, i32, i32
  }
  func.func @transform_1(%arg0: i32) -> (i32, i32) {
    %c0_i32 = arith.constant 0 : i32
    %c0_i32_0 = arith.constant 0 : i32
    %c0_i32_1 = arith.constant 0 : i32
    return %c0_i32, %c0_i32_0 : i32, i32
  }
  func.func @transform_2(%arg0: i32) -> (i32, i32) {
    %c0_i32 = arith.constant 0 : i32
    %c0_i32_0 = arith.constant 0 : i32
    %c0_i32_1 = arith.constant 0 : i32
    return %c0_i32, %c0_i32_0 : i32, i32
  }
  func.func @transform_3(%arg0: i32) -> (i32, i32, i32, i32) {
    %c0_i32 = arith.constant 0 : i32
    %c0_i32_0 = arith.constant 0 : i32
    %c0_i32_1 = arith.constant 0 : i32
    %c0_i32_2 = arith.constant 0 : i32
    return %arg0, %c0_i32, %c0_i32_0, %c0_i32_1 : i32, i32, i32, i32
  }
}

module attributes {stable_mosaic.version = 11 : i64} {
  func.func @kernel(%arg0: i32, %arg1: i32, %arg2: memref<1x2x2x9x9x128xbf16, #tpu.memory_space<vmem>>, %arg3: memref<9x128x128xbf16, #tpu.memory_space<vmem>>, %arg4: memref<1x8x8x128xbf16, #tpu.memory_space<vmem>>, %arg5: memref<1x2x128xf32, #tpu.memory_space<vmem>>) attributes {dimension_semantics = [#tpu.dimension_semantics<parallel>, #tpu.dimension_semantics<parallel>], iteration_bounds = array<i64: 2, 1>, scalar_prefetch = 0 : i64, scratch_operands = 0 : i64, tpu.core_type = #tpu.core_type<tc>, window_params = [{transform_indices = @transform_0, window_bounds = array<i64: 1, 2, 2, 9, 9, 128>}, {transform_indices = @transform_1, window_bounds = array<i64: 9, 128, 128>}, {transform_indices = @transform_2, window_bounds = array<i64: 1, 8, 8, 128>}, {transform_indices = @transform_3, window_bounds = array<i64: 1, 2, 128>}]} {
    %cst = arith.constant 0.000000e+00 : f32
    %0 = vector.broadcast %cst : f32 to vector<64x128xf32>
    %c0 = arith.constant 0 : index
    %c0_0 = arith.constant 0 : index
    %c0_1 = arith.constant 0 : index
    %c0_2 = arith.constant 0 : index
    %c0_3 = arith.constant 0 : index
    %c0_4 = arith.constant 0 : index
    %1 = vector.load %arg2[%c0, %c0_0, %c0_1, %c0_2, %c0_3, %c0_4] : memref<1x2x2x9x9x128xbf16, #tpu.memory_space<vmem>>, vector<1x1x1x8x8x128xbf16>
    %2 = vector.shape_cast %1 : vector<1x1x1x8x8x128xbf16> to vector<8x8x128xbf16>
    %3 = vector.shape_cast %2 : vector<8x8x128xbf16> to vector<64x128xbf16>
    %c0_5 = arith.constant 0 : index
    %c0_6 = arith.constant 0 : index
    %c0_7 = arith.constant 0 : index
    %4 = vector.load %arg3[%c0_5, %c0_6, %c0_7] : memref<9x128x128xbf16, #tpu.memory_space<vmem>>, vector<1x128x128xbf16>
    %5 = vector.shape_cast %4 : vector<1x128x128xbf16> to vector<128x128xbf16>
    %cst_8 = arith.constant dense<0.000000e+00> : vector<64x128xf32>
    %6 = tpu.matmul %3, %5, %cst_8 {dimension_numbers = #tpu.dot_dimension_numbers<[1], [0], [0], [1], [0, 0, 1, 1], [], []>} : vector<64x128xbf16>, vector<128x128xbf16>, vector<64x128xf32> -> vector<64x128xf32>
    %7 = arith.addf %0, %6 : vector<64x128xf32>
    %c0_9 = arith.constant 0 : index
    %c0_10 = arith.constant 0 : index
    %c1 = arith.constant 1 : index
    %c0_11 = arith.constant 0 : index
    %c0_12 = arith.constant 0 : index
    %c0_13 = arith.constant 0 : index
    %8 = vector.load %arg2[%c0_9, %c0_10, %c1, %c0_11, %c0_12, %c0_13] : memref<1x2x2x9x9x128xbf16, #tpu.memory_space<vmem>>, vector<1x1x1x8x8x128xbf16>
    %9 = vector.shape_cast %8 : vector<1x1x1x8x8x128xbf16> to vector<8x8x128xbf16>
    %10 = vector.shape_cast %9 : vector<8x8x128xbf16> to vector<64x128xbf16>
    %c1_14 = arith.constant 1 : index
    %c0_15 = arith.constant 0 : index
    %c0_16 = arith.constant 0 : index
    %11 = vector.load %arg3[%c1_14, %c0_15, %c0_16] : memref<9x128x128xbf16, #tpu.memory_space<vmem>>, vector<1x128x128xbf16>
    %12 = vector.shape_cast %11 : vector<1x128x128xbf16> to vector<128x128xbf16>
    %cst_17 = arith.constant dense<0.000000e+00> : vector<64x128xf32>
    %13 = tpu.matmul %10, %12, %cst_17 {dimension_numbers = #tpu.dot_dimension_numbers<[1], [0], [0], [1], [0, 0, 1, 1], [], []>} : vector<64x128xbf16>, vector<128x128xbf16>, vector<64x128xf32> -> vector<64x128xf32>
    %14 = arith.addf %7, %13 : vector<64x128xf32>
    %c0_18 = arith.constant 0 : index
    %c0_19 = arith.constant 0 : index
    %c0_20 = arith.constant 0 : index
    %c0_21 = arith.constant 0 : index
    %c1_22 = arith.constant 1 : index
    %c0_23 = arith.constant 0 : index
    %15 = vector.load %arg2[%c0_18, %c0_19, %c0_20, %c0_21, %c1_22, %c0_23] : memref<1x2x2x9x9x128xbf16, #tpu.memory_space<vmem>>, vector<1x1x1x8x8x128xbf16>
    %16 = vector.shape_cast %15 : vector<1x1x1x8x8x128xbf16> to vector<8x8x128xbf16>
    %17 = vector.shape_cast %16 : vector<8x8x128xbf16> to vector<64x128xbf16>
    %c2 = arith.constant 2 : index
    %c0_24 = arith.constant 0 : index
    %c0_25 = arith.constant 0 : index
    %18 = vector.load %arg3[%c2, %c0_24, %c0_25] : memref<9x128x128xbf16, #tpu.memory_space<vmem>>, vector<1x128x128xbf16>
    %19 = vector.shape_cast %18 : vector<1x128x128xbf16> to vector<128x128xbf16>
    %cst_26 = arith.constant dense<0.000000e+00> : vector<64x128xf32>
    %20 = tpu.matmul %17, %19, %cst_26 {dimension_numbers = #tpu.dot_dimension_numbers<[1], [0], [0], [1], [0, 0, 1, 1], [], []>} : vector<64x128xbf16>, vector<128x128xbf16>, vector<64x128xf32> -> vector<64x128xf32>
    %21 = arith.addf %14, %20 : vector<64x128xf32>
    %c0_27 = arith.constant 0 : index
    %c1_28 = arith.constant 1 : index
    %c0_29 = arith.constant 0 : index
    %c0_30 = arith.constant 0 : index
    %c0_31 = arith.constant 0 : index
    %c0_32 = arith.constant 0 : index
    %22 = vector.load %arg2[%c0_27, %c1_28, %c0_29, %c0_30, %c0_31, %c0_32] : memref<1x2x2x9x9x128xbf16, #tpu.memory_space<vmem>>, vector<1x1x1x8x8x128xbf16>
    %23 = vector.shape_cast %22 : vector<1x1x1x8x8x128xbf16> to vector<8x8x128xbf16>
    %24 = vector.shape_cast %23 : vector<8x8x128xbf16> to vector<64x128xbf16>
    %c3 = arith.constant 3 : index
    %c0_33 = arith.constant 0 : index
    %c0_34 = arith.constant 0 : index
    %25 = vector.load %arg3[%c3, %c0_33, %c0_34] : memref<9x128x128xbf16, #tpu.memory_space<vmem>>, vector<1x128x128xbf16>
    %26 = vector.shape_cast %25 : vector<1x128x128xbf16> to vector<128x128xbf16>
    %cst_35 = arith.constant dense<0.000000e+00> : vector<64x128xf32>
    %27 = tpu.matmul %24, %26, %cst_35 {dimension_numbers = #tpu.dot_dimension_numbers<[1], [0], [0], [1], [0, 0, 1, 1], [], []>} : vector<64x128xbf16>, vector<128x128xbf16>, vector<64x128xf32> -> vector<64x128xf32>
    %28 = arith.addf %21, %27 : vector<64x128xf32>
    %c0_36 = arith.constant 0 : index
    %c1_37 = arith.constant 1 : index
    %c1_38 = arith.constant 1 : index
    %c0_39 = arith.constant 0 : index
    %c0_40 = arith.constant 0 : index
    %c0_41 = arith.constant 0 : index
    %29 = vector.load %arg2[%c0_36, %c1_37, %c1_38, %c0_39, %c0_40, %c0_41] : memref<1x2x2x9x9x128xbf16, #tpu.memory_space<vmem>>, vector<1x1x1x8x8x128xbf16>
    %30 = vector.shape_cast %29 : vector<1x1x1x8x8x128xbf16> to vector<8x8x128xbf16>
    %31 = vector.shape_cast %30 : vector<8x8x128xbf16> to vector<64x128xbf16>
    %c4 = arith.constant 4 : index
    %c0_42 = arith.constant 0 : index
    %c0_43 = arith.constant 0 : index
    %32 = vector.load %arg3[%c4, %c0_42, %c0_43] : memref<9x128x128xbf16, #tpu.memory_space<vmem>>, vector<1x128x128xbf16>
    %33 = vector.shape_cast %32 : vector<1x128x128xbf16> to vector<128x128xbf16>
    %cst_44 = arith.constant dense<0.000000e+00> : vector<64x128xf32>
    %34 = tpu.matmul %31, %33, %cst_44 {dimension_numbers = #tpu.dot_dimension_numbers<[1], [0], [0], [1], [0, 0, 1, 1], [], []>} : vector<64x128xbf16>, vector<128x128xbf16>, vector<64x128xf32> -> vector<64x128xf32>
    %35 = arith.addf %28, %34 : vector<64x128xf32>
    %c0_45 = arith.constant 0 : index
    %c1_46 = arith.constant 1 : index
    %c0_47 = arith.constant 0 : index
    %c0_48 = arith.constant 0 : index
    %c1_49 = arith.constant 1 : index
    %c0_50 = arith.constant 0 : index
    %36 = vector.load %arg2[%c0_45, %c1_46, %c0_47, %c0_48, %c1_49, %c0_50] : memref<1x2x2x9x9x128xbf16, #tpu.memory_space<vmem>>, vector<1x1x1x8x8x128xbf16>
    %37 = vector.shape_cast %36 : vector<1x1x1x8x8x128xbf16> to vector<8x8x128xbf16>
    %38 = vector.shape_cast %37 : vector<8x8x128xbf16> to vector<64x128xbf16>
    %c5 = arith.constant 5 : index
    %c0_51 = arith.constant 0 : index
    %c0_52 = arith.constant 0 : index
    %39 = vector.load %arg3[%c5, %c0_51, %c0_52] : memref<9x128x128xbf16, #tpu.memory_space<vmem>>, vector<1x128x128xbf16>
    %40 = vector.shape_cast %39 : vector<1x128x128xbf16> to vector<128x128xbf16>
    %cst_53 = arith.constant dense<0.000000e+00> : vector<64x128xf32>
    %41 = tpu.matmul %38, %40, %cst_53 {dimension_numbers = #tpu.dot_dimension_numbers<[1], [0], [0], [1], [0, 0, 1, 1], [], []>} : vector<64x128xbf16>, vector<128x128xbf16>, vector<64x128xf32> -> vector<64x128xf32>
    %42 = arith.addf %35, %41 : vector<64x128xf32>
    %c0_54 = arith.constant 0 : index
    %c0_55 = arith.constant 0 : index
    %c0_56 = arith.constant 0 : index
    %c1_57 = arith.constant 1 : index
    %c0_58 = arith.constant 0 : index
    %c0_59 = arith.constant 0 : index
    %43 = vector.load %arg2[%c0_54, %c0_55, %c0_56, %c1_57, %c0_58, %c0_59] : memref<1x2x2x9x9x128xbf16, #tpu.memory_space<vmem>>, vector<1x1x1x8x8x128xbf16>
    %44 = vector.shape_cast %43 : vector<1x1x1x8x8x128xbf16> to vector<8x8x128xbf16>
    %45 = vector.shape_cast %44 : vector<8x8x128xbf16> to vector<64x128xbf16>
    %c6 = arith.constant 6 : index
    %c0_60 = arith.constant 0 : index
    %c0_61 = arith.constant 0 : index
    %46 = vector.load %arg3[%c6, %c0_60, %c0_61] : memref<9x128x128xbf16, #tpu.memory_space<vmem>>, vector<1x128x128xbf16>
    %47 = vector.shape_cast %46 : vector<1x128x128xbf16> to vector<128x128xbf16>
    %cst_62 = arith.constant dense<0.000000e+00> : vector<64x128xf32>
    %48 = tpu.matmul %45, %47, %cst_62 {dimension_numbers = #tpu.dot_dimension_numbers<[1], [0], [0], [1], [0, 0, 1, 1], [], []>} : vector<64x128xbf16>, vector<128x128xbf16>, vector<64x128xf32> -> vector<64x128xf32>
    %49 = arith.addf %42, %48 : vector<64x128xf32>
    %c0_63 = arith.constant 0 : index
    %c0_64 = arith.constant 0 : index
    %c1_65 = arith.constant 1 : index
    %c1_66 = arith.constant 1 : index
    %c0_67 = arith.constant 0 : index
    %c0_68 = arith.constant 0 : index
    %50 = vector.load %arg2[%c0_63, %c0_64, %c1_65, %c1_66, %c0_67, %c0_68] : memref<1x2x2x9x9x128xbf16, #tpu.memory_space<vmem>>, vector<1x1x1x8x8x128xbf16>
    %51 = vector.shape_cast %50 : vector<1x1x1x8x8x128xbf16> to vector<8x8x128xbf16>
    %52 = vector.shape_cast %51 : vector<8x8x128xbf16> to vector<64x128xbf16>
    %c7 = arith.constant 7 : index
    %c0_69 = arith.constant 0 : index
    %c0_70 = arith.constant 0 : index
    %53 = vector.load %arg3[%c7, %c0_69, %c0_70] : memref<9x128x128xbf16, #tpu.memory_space<vmem>>, vector<1x128x128xbf16>
    %54 = vector.shape_cast %53 : vector<1x128x128xbf16> to vector<128x128xbf16>
    %cst_71 = arith.constant dense<0.000000e+00> : vector<64x128xf32>
    %55 = tpu.matmul %52, %54, %cst_71 {dimension_numbers = #tpu.dot_dimension_numbers<[1], [0], [0], [1], [0, 0, 1, 1], [], []>} : vector<64x128xbf16>, vector<128x128xbf16>, vector<64x128xf32> -> vector<64x128xf32>
    %56 = arith.addf %49, %55 : vector<64x128xf32>
    %c0_72 = arith.constant 0 : index
    %c0_73 = arith.constant 0 : index
    %c0_74 = arith.constant 0 : index
    %c1_75 = arith.constant 1 : index
    %c1_76 = arith.constant 1 : index
    %c0_77 = arith.constant 0 : index
    %57 = vector.load %arg2[%c0_72, %c0_73, %c0_74, %c1_75, %c1_76, %c0_77] : memref<1x2x2x9x9x128xbf16, #tpu.memory_space<vmem>>, vector<1x1x1x8x8x128xbf16>
    %58 = vector.shape_cast %57 : vector<1x1x1x8x8x128xbf16> to vector<8x8x128xbf16>
    %59 = vector.shape_cast %58 : vector<8x8x128xbf16> to vector<64x128xbf16>
    %c8 = arith.constant 8 : index
    %c0_78 = arith.constant 0 : index
    %c0_79 = arith.constant 0 : index
    %60 = vector.load %arg3[%c8, %c0_78, %c0_79] : memref<9x128x128xbf16, #tpu.memory_space<vmem>>, vector<1x128x128xbf16>
    %61 = vector.shape_cast %60 : vector<1x128x128xbf16> to vector<128x128xbf16>
    %cst_80 = arith.constant dense<0.000000e+00> : vector<64x128xf32>
    %62 = tpu.matmul %59, %61, %cst_80 {dimension_numbers = #tpu.dot_dimension_numbers<[1], [0], [0], [1], [0, 0, 1, 1], [], []>} : vector<64x128xbf16>, vector<128x128xbf16>, vector<64x128xf32> -> vector<64x128xf32>
    %63 = arith.addf %56, %62 : vector<64x128xf32>
    %64 = arith.truncf %63 : vector<64x128xf32> to vector<64x128xbf16>
    %65 = vector.shape_cast %64 : vector<64x128xbf16> to vector<1x8x8x128xbf16>
    %c0_81 = arith.constant 0 : index
    %c0_82 = arith.constant 0 : index
    %c0_83 = arith.constant 0 : index
    %c0_84 = arith.constant 0 : index
    %66 = vector.load %arg4[%c0_81, %c0_82, %c0_83, %c0_84] : memref<1x8x8x128xbf16, #tpu.memory_space<vmem>>, vector<1x8x8x128xbf16>
    tpu.vector_store %arg4[%c0_81, %c0_82, %c0_83, %c0_84], %65 {strides = array<i32>} : memref<1x8x8x128xbf16, #tpu.memory_space<vmem>>, vector<1x8x8x128xbf16>,
    %67 = arith.extf %64 : vector<64x128xbf16> to vector<64x128xf32>
    %cst_85 = arith.constant dense<0.000000e+00> : vector<128xf32>
    %68 = vector.multi_reduction <add>, %67, %cst_85 [0] : vector<64x128xf32> to vector<128xf32>
    %c0_86 = arith.constant 0 : index
    %c0_87 = arith.constant 0 : index
    %c0_88 = arith.constant 0 : index
    %69 = vector.load %arg5[%c0_86, %c0_87, %c0_88] : memref<1x2x128xf32, #tpu.memory_space<vmem>>, vector<1x1x128xf32>
    %70 = vector.shape_cast %69 : vector<1x1x128xf32> to vector<128xf32>
    %71 = vector.shape_cast %68 : vector<128xf32> to vector<1x1x128xf32>
    tpu.vector_store %arg5[%c0_86, %c0_87, %c0_88], %71 {strides = array<i32>} : memref<1x2x128xf32, #tpu.memory_space<vmem>>, vector<1x1x128xf32>,
    %72 = arith.mulf %67, %67 : vector<64x128xf32>
    %cst_89 = arith.constant dense<0.000000e+00> : vector<128xf32>
    %73 = vector.multi_reduction <add>, %72, %cst_89 [0] : vector<64x128xf32> to vector<128xf32>
    %c0_90 = arith.constant 0 : index
    %c1_91 = arith.constant 1 : index
    %c0_92 = arith.constant 0 : index
    %74 = vector.load %arg5[%c0_90, %c1_91, %c0_92] : memref<1x2x128xf32, #tpu.memory_space<vmem>>, vector<1x1x128xf32>
    %75 = vector.shape_cast %74 : vector<1x1x128xf32> to vector<128xf32>
    %76 = vector.shape_cast %73 : vector<128xf32> to vector<1x1x128xf32>
    tpu.vector_store %arg5[%c0_90, %c1_91, %c0_92], %76 {strides = array<i32>} : memref<1x2x128xf32, #tpu.memory_space<vmem>>, vector<1x1x128xf32>,
    return
  }
  func.func @transform_0(%arg0: i32, %arg1: i32) -> (i32, i32, i32, i32, i32, i32) {
    %c0_i32 = arith.constant 0 : i32
    %c0_i32_0 = arith.constant 0 : i32
    %c0_i32_1 = arith.constant 0 : i32
    %c0_i32_2 = arith.constant 0 : i32
    %c0_i32_3 = arith.constant 0 : i32
    %c0_i32_4 = arith.constant 0 : i32
    return %arg0, %c0_i32, %c0_i32_0, %c0_i32_1, %c0_i32_2, %c0_i32_3 : i32, i32, i32, i32, i32, i32
  }
  func.func @transform_1(%arg0: i32, %arg1: i32) -> (i32, i32, i32) {
    %c0_i32 = arith.constant 0 : i32
    %c0_i32_0 = arith.constant 0 : i32
    %c0_i32_1 = arith.constant 0 : i32
    return %c0_i32, %c0_i32_0, %arg1 : i32, i32, i32
  }
  func.func @transform_2(%arg0: i32, %arg1: i32) -> (i32, i32, i32, i32) {
    %c0_i32 = arith.constant 0 : i32
    %c0_i32_0 = arith.constant 0 : i32
    %c0_i32_1 = arith.constant 0 : i32
    return %arg0, %c0_i32, %c0_i32_0, %arg1 : i32, i32, i32, i32
  }
  func.func @transform_3(%arg0: i32, %arg1: i32) -> (i32, i32, i32) {
    %c0_i32 = arith.constant 0 : i32
    %c0_i32_0 = arith.constant 0 : i32
    return %arg0, %c0_i32, %arg1 : i32, i32, i32
  }
}

module attributes {stable_mosaic.version = 11 : i64} {
  func.func @_bnrelu_matmul_stats_kernel(%arg0: i32, %arg1: memref<128x128xbf16, #tpu.memory_space<vmem>>, %arg2: memref<128x128xbf16, #tpu.memory_space<vmem>>, %arg3: memref<1x128xf32, #tpu.memory_space<vmem>>, %arg4: memref<1x128xf32, #tpu.memory_space<vmem>>, %arg5: memref<128x128xbf16, #tpu.memory_space<vmem>>, %arg6: memref<1x2x128xf32, #tpu.memory_space<vmem>>) attributes {dimension_semantics = [#tpu.dimension_semantics<parallel>], iteration_bounds = array<i64: 1>, scalar_prefetch = 0 : i64, scratch_operands = 0 : i64, tpu.core_type = #tpu.core_type<tc>, window_params = [{transform_indices = @transform_0, window_bounds = array<i64: 128, 128>}, {pipeline_mode = #tpu.pipeline_mode<synchronous>, transform_indices = @transform_1, window_bounds = array<i64: 128, 128>}, {pipeline_mode = #tpu.pipeline_mode<synchronous>, transform_indices = @transform_2, window_bounds = array<i64: 1, 128>}, {pipeline_mode = #tpu.pipeline_mode<synchronous>, transform_indices = @transform_3, window_bounds = array<i64: 1, 128>}, {transform_indices = @transform_4, window_bounds = array<i64: 128, 128>}, {transform_indices = @transform_5, window_bounds = array<i64: 1, 2, 128>}]} {
    %c0 = arith.constant 0 : index
    %c0_0 = arith.constant 0 : index
    %0 = vector.load %arg1[%c0, %c0_0] : memref<128x128xbf16, #tpu.memory_space<vmem>>, vector<128x128xbf16>
    %1 = arith.extf %0 : vector<128x128xbf16> to vector<128x128xf32>
    %c0_1 = arith.constant 0 : index
    %c0_2 = arith.constant 0 : index
    %2 = vector.load %arg3[%c0_1, %c0_2] : memref<1x128xf32, #tpu.memory_space<vmem>>, vector<1x128xf32>
    %3 = vector.broadcast %2 : vector<1x128xf32> to vector<128x128xf32>
    %4 = arith.mulf %1, %3 : vector<128x128xf32>
    %c0_3 = arith.constant 0 : index
    %c0_4 = arith.constant 0 : index
    %5 = vector.load %arg4[%c0_3, %c0_4] : memref<1x128xf32, #tpu.memory_space<vmem>>, vector<1x128xf32>
    %6 = vector.broadcast %5 : vector<1x128xf32> to vector<128x128xf32>
    %7 = arith.addf %4, %6 : vector<128x128xf32>
    %cst = arith.constant 0.000000e+00 : f32
    %8 = vector.broadcast %cst : f32 to vector<128x128xf32>
    %9 = arith.maximumf %7, %8 : vector<128x128xf32>
    %10 = arith.truncf %9 : vector<128x128xf32> to vector<128x128xbf16>
    %c0_5 = arith.constant 0 : index
    %c0_6 = arith.constant 0 : index
    %11 = vector.load %arg2[%c0_5, %c0_6] : memref<128x128xbf16, #tpu.memory_space<vmem>>, vector<128x128xbf16>
    %cst_7 = arith.constant dense<0.000000e+00> : vector<128x128xf32>
    %12 = tpu.matmul %10, %11, %cst_7 {dimension_numbers = #tpu.dot_dimension_numbers<[1], [0], [0], [1], [0, 0, 1, 1], [], []>} : vector<128x128xbf16>, vector<128x128xbf16>, vector<128x128xf32> -> vector<128x128xf32>
    %13 = arith.truncf %12 : vector<128x128xf32> to vector<128x128xbf16>
    %c0_8 = arith.constant 0 : index
    %c0_9 = arith.constant 0 : index
    %14 = vector.load %arg5[%c0_8, %c0_9] : memref<128x128xbf16, #tpu.memory_space<vmem>>, vector<128x128xbf16>
    tpu.vector_store %arg5[%c0_8, %c0_9], %13 {strides = array<i32>} : memref<128x128xbf16, #tpu.memory_space<vmem>>, vector<128x128xbf16>,
    %15 = arith.extf %13 : vector<128x128xbf16> to vector<128x128xf32>
    %cst_10 = arith.constant dense<0.000000e+00> : vector<128xf32>
    %16 = vector.multi_reduction <add>, %15, %cst_10 [0] : vector<128x128xf32> to vector<128xf32>
    %c0_11 = arith.constant 0 : index
    %c0_12 = arith.constant 0 : index
    %c0_13 = arith.constant 0 : index
    %17 = vector.load %arg6[%c0_11, %c0_12, %c0_13] : memref<1x2x128xf32, #tpu.memory_space<vmem>>, vector<1x1x128xf32>
    %18 = vector.shape_cast %17 : vector<1x1x128xf32> to vector<128xf32>
    %19 = vector.shape_cast %16 : vector<128xf32> to vector<1x1x128xf32>
    tpu.vector_store %arg6[%c0_11, %c0_12, %c0_13], %19 {strides = array<i32>} : memref<1x2x128xf32, #tpu.memory_space<vmem>>, vector<1x1x128xf32>,
    %20 = arith.mulf %15, %15 : vector<128x128xf32>
    %cst_14 = arith.constant dense<0.000000e+00> : vector<128xf32>
    %21 = vector.multi_reduction <add>, %20, %cst_14 [0] : vector<128x128xf32> to vector<128xf32>
    %c0_15 = arith.constant 0 : index
    %c1 = arith.constant 1 : index
    %c0_16 = arith.constant 0 : index
    %22 = vector.load %arg6[%c0_15, %c1, %c0_16] : memref<1x2x128xf32, #tpu.memory_space<vmem>>, vector<1x1x128xf32>
    %23 = vector.shape_cast %22 : vector<1x1x128xf32> to vector<128xf32>
    %24 = vector.shape_cast %21 : vector<128xf32> to vector<1x1x128xf32>
    tpu.vector_store %arg6[%c0_15, %c1, %c0_16], %24 {strides = array<i32>} : memref<1x2x128xf32, #tpu.memory_space<vmem>>, vector<1x1x128xf32>,
    return
  }
  func.func @transform_0(%arg0: i32) -> (i32, i32) {
    %c0_i32 = arith.constant 0 : i32
    %c0_i32_0 = arith.constant 0 : i32
    return %arg0, %c0_i32 : i32, i32
  }
  func.func @transform_1(%arg0: i32) -> (i32, i32) {
    %c0_i32 = arith.constant 0 : i32
    %c0_i32_0 = arith.constant 0 : i32
    %c0_i32_1 = arith.constant 0 : i32
    return %c0_i32, %c0_i32_0 : i32, i32
  }
  func.func @transform_2(%arg0: i32) -> (i32, i32) {
    %c0_i32 = arith.constant 0 : i32
    %c0_i32_0 = arith.constant 0 : i32
    %c0_i32_1 = arith.constant 0 : i32
    return %c0_i32, %c0_i32_0 : i32, i32
  }
  func.func @transform_3(%arg0: i32) -> (i32, i32) {
    %c0_i32 = arith.constant 0 : i32
    %c0_i32_0 = arith.constant 0 : i32
    %c0_i32_1 = arith.constant 0 : i32
    return %c0_i32, %c0_i32_0 : i32, i32
  }
  func.func @transform_4(%arg0: i32) -> (i32, i32) {
    %c0_i32 = arith.constant 0 : i32
    %c0_i32_0 = arith.constant 0 : i32
    return %arg0, %c0_i32 : i32, i32
  }
  func.func @transform_5(%arg0: i32) -> (i32, i32, i32) {
    %c0_i32 = arith.constant 0 : i32
    %c0_i32_0 = arith.constant 0 : i32
    %c0_i32_1 = arith.constant 0 : i32
    return %arg0, %c0_i32, %c0_i32_0 : i32, i32, i32
  }
}

module attributes {stable_mosaic.version = 11 : i64} {
  func.func @kernel(%arg0: i32, %arg1: memref<1x8x8x128xbf16, #tpu.memory_space<vmem>>, %arg2: memref<1x128xf32, #tpu.memory_space<vmem>>, %arg3: memref<1x128xf32, #tpu.memory_space<vmem>>, %arg4: memref<1x10x10x128xbf16, #tpu.memory_space<vmem>>) attributes {dimension_semantics = [#tpu.dimension_semantics<parallel>], iteration_bounds = array<i64: 2>, scalar_prefetch = 0 : i64, scratch_operands = 0 : i64, tpu.core_type = #tpu.core_type<tc>, window_params = [{transform_indices = @transform_0, window_bounds = array<i64: 1, 8, 8, 128>}, {pipeline_mode = #tpu.pipeline_mode<synchronous>, transform_indices = @transform_1, window_bounds = array<i64: 1, 128>}, {pipeline_mode = #tpu.pipeline_mode<synchronous>, transform_indices = @transform_2, window_bounds = array<i64: 1, 128>}, {transform_indices = @transform_3, window_bounds = array<i64: 1, 10, 10, 128>}]} {
    %cst = arith.constant 0.000000e+00 : bf16
    %0 = vector.broadcast %cst : bf16 to vector<1x10x10x128xbf16>
    %c0 = arith.constant 0 : index
    %c0_0 = arith.constant 0 : index
    %c0_1 = arith.constant 0 : index
    %c0_2 = arith.constant 0 : index
    %1 = vector.load %arg4[%c0, %c0_0, %c0_1, %c0_2] : memref<1x10x10x128xbf16, #tpu.memory_space<vmem>>, vector<1x10x10x128xbf16>
    tpu.vector_store %arg4[%c0, %c0_0, %c0_1, %c0_2], %0 {strides = array<i32>} : memref<1x10x10x128xbf16, #tpu.memory_space<vmem>>, vector<1x10x10x128xbf16>,
    %c0_3 = arith.constant 0 : index
    %c0_4 = arith.constant 0 : index
    %c0_5 = arith.constant 0 : index
    %c0_6 = arith.constant 0 : index
    %2 = vector.load %arg1[%c0_3, %c0_4, %c0_5, %c0_6] : memref<1x8x8x128xbf16, #tpu.memory_space<vmem>>, vector<1x8x8x128xbf16>
    %3 = arith.extf %2 : vector<1x8x8x128xbf16> to vector<1x8x8x128xf32>
    %c0_7 = arith.constant 0 : index
    %c0_8 = arith.constant 0 : index
    %4 = vector.load %arg2[%c0_7, %c0_8] : memref<1x128xf32, #tpu.memory_space<vmem>>, vector<1x128xf32>
    %5 = vector.shape_cast %4 : vector<1x128xf32> to vector<1x1x1x128xf32>
    %6 = vector.broadcast %5 : vector<1x1x1x128xf32> to vector<1x8x8x128xf32>
    %7 = arith.mulf %3, %6 : vector<1x8x8x128xf32>
    %c0_9 = arith.constant 0 : index
    %c0_10 = arith.constant 0 : index
    %8 = vector.load %arg3[%c0_9, %c0_10] : memref<1x128xf32, #tpu.memory_space<vmem>>, vector<1x128xf32>
    %9 = vector.shape_cast %8 : vector<1x128xf32> to vector<1x1x1x128xf32>
    %10 = vector.broadcast %9 : vector<1x1x1x128xf32> to vector<1x8x8x128xf32>
    %11 = arith.addf %7, %10 : vector<1x8x8x128xf32>
    %cst_11 = arith.constant 0.000000e+00 : f32
    %12 = vector.broadcast %cst_11 : f32 to vector<1x8x8x128xf32>
    %13 = arith.maximumf %11, %12 : vector<1x8x8x128xf32>
    %14 = arith.truncf %13 : vector<1x8x8x128xf32> to vector<1x8x8x128xbf16>
    %c0_12 = arith.constant 0 : index
    %c1 = arith.constant 1 : index
    %c1_13 = arith.constant 1 : index
    %c0_14 = arith.constant 0 : index
    %15 = vector.load %arg4[%c0_12, %c1, %c1_13, %c0_14] : memref<1x10x10x128xbf16, #tpu.memory_space<vmem>>, vector<1x8x8x128xbf16>
    tpu.vector_store %arg4[%c0_12, %c1, %c1_13, %c0_14], %14 {strides = array<i32>} : memref<1x10x10x128xbf16, #tpu.memory_space<vmem>>, vector<1x8x8x128xbf16>,
    return
  }
  func.func @transform_0(%arg0: i32) -> (i32, i32, i32, i32) {
    %c0_i32 = arith.constant 0 : i32
    %c0_i32_0 = arith.constant 0 : i32
    %c0_i32_1 = arith.constant 0 : i32
    %c0_i32_2 = arith.constant 0 : i32
    return %arg0, %c0_i32, %c0_i32_0, %c0_i32_1 : i32, i32, i32, i32
  }
  func.func @transform_1(%arg0: i32) -> (i32, i32) {
    %c0_i32 = arith.constant 0 : i32
    %c0_i32_0 = arith.constant 0 : i32
    %c0_i32_1 = arith.constant 0 : i32
    return %c0_i32, %c0_i32_0 : i32, i32
  }
  func.func @transform_2(%arg0: i32) -> (i32, i32) {
    %c0_i32 = arith.constant 0 : i32
    %c0_i32_0 = arith.constant 0 : i32
    %c0_i32_1 = arith.constant 0 : i32
    return %c0_i32, %c0_i32_0 : i32, i32
  }
  func.func @transform_3(%arg0: i32) -> (i32, i32, i32, i32) {
    %c0_i32 = arith.constant 0 : i32
    %c0_i32_0 = arith.constant 0 : i32
    %c0_i32_1 = arith.constant 0 : i32
    %c0_i32_2 = arith.constant 0 : i32
    return %arg0, %c0_i32, %c0_i32_0, %c0_i32_1 : i32, i32, i32, i32
  }
}

module attributes {stable_mosaic.version = 11 : i64} {
  func.func @_apply_res_kernel(%arg0: i32, %arg1: memref<128x128xbf16, #tpu.memory_space<vmem>>, %arg2: memref<1x128xf32, #tpu.memory_space<vmem>>, %arg3: memref<1x128xf32, #tpu.memory_space<vmem>>, %arg4: memref<128x128xbf16, #tpu.memory_space<vmem>>, %arg5: memref<1x128xf32, #tpu.memory_space<vmem>>, %arg6: memref<1x128xf32, #tpu.memory_space<vmem>>, %arg7: memref<128x128xbf16, #tpu.memory_space<vmem>>) attributes {dimension_semantics = [#tpu.dimension_semantics<parallel>], iteration_bounds = array<i64: 1>, scalar_prefetch = 0 : i64, scratch_operands = 0 : i64, tpu.core_type = #tpu.core_type<tc>, window_params = [{transform_indices = @transform_0, window_bounds = array<i64: 128, 128>}, {pipeline_mode = #tpu.pipeline_mode<synchronous>, transform_indices = @transform_1, window_bounds = array<i64: 1, 128>}, {pipeline_mode = #tpu.pipeline_mode<synchronous>, transform_indices = @transform_2, window_bounds = array<i64: 1, 128>}, {transform_indices = @transform_3, window_bounds = array<i64: 128, 128>}, {pipeline_mode = #tpu.pipeline_mode<synchronous>, transform_indices = @transform_4, window_bounds = array<i64: 1, 128>}, {pipeline_mode = #tpu.pipeline_mode<synchronous>, transform_indices = @transform_5, window_bounds = array<i64: 1, 128>}, {transform_indices = @transform_6, window_bounds = array<i64: 128, 128>}]} {
    %c0 = arith.constant 0 : index
    %c0_0 = arith.constant 0 : index
    %0 = vector.load %arg1[%c0, %c0_0] : memref<128x128xbf16, #tpu.memory_space<vmem>>, vector<128x128xbf16>
    %1 = arith.extf %0 : vector<128x128xbf16> to vector<128x128xf32>
    %c0_1 = arith.constant 0 : index
    %c0_2 = arith.constant 0 : index
    %2 = vector.load %arg2[%c0_1, %c0_2] : memref<1x128xf32, #tpu.memory_space<vmem>>, vector<1x128xf32>
    %3 = vector.broadcast %2 : vector<1x128xf32> to vector<128x128xf32>
    %4 = arith.mulf %1, %3 : vector<128x128xf32>
    %c0_3 = arith.constant 0 : index
    %c0_4 = arith.constant 0 : index
    %5 = vector.load %arg3[%c0_3, %c0_4] : memref<1x128xf32, #tpu.memory_space<vmem>>, vector<1x128xf32>
    %6 = vector.broadcast %5 : vector<1x128xf32> to vector<128x128xf32>
    %7 = arith.addf %4, %6 : vector<128x128xf32>
    %c0_5 = arith.constant 0 : index
    %c0_6 = arith.constant 0 : index
    %8 = vector.load %arg4[%c0_5, %c0_6] : memref<128x128xbf16, #tpu.memory_space<vmem>>, vector<128x128xbf16>
    %9 = arith.extf %8 : vector<128x128xbf16> to vector<128x128xf32>
    %c0_7 = arith.constant 0 : index
    %c0_8 = arith.constant 0 : index
    %10 = vector.load %arg5[%c0_7, %c0_8] : memref<1x128xf32, #tpu.memory_space<vmem>>, vector<1x128xf32>
    %11 = vector.broadcast %10 : vector<1x128xf32> to vector<128x128xf32>
    %12 = arith.mulf %9, %11 : vector<128x128xf32>
    %c0_9 = arith.constant 0 : index
    %c0_10 = arith.constant 0 : index
    %13 = vector.load %arg6[%c0_9, %c0_10] : memref<1x128xf32, #tpu.memory_space<vmem>>, vector<1x128xf32>
    %14 = vector.broadcast %13 : vector<1x128xf32> to vector<128x128xf32>
    %15 = arith.addf %12, %14 : vector<128x128xf32>
    %16 = arith.addf %7, %15 : vector<128x128xf32>
    %cst = arith.constant 0.000000e+00 : f32
    %17 = vector.broadcast %cst : f32 to vector<128x128xf32>
    %18 = arith.maximumf %16, %17 : vector<128x128xf32>
    %19 = arith.truncf %18 : vector<128x128xf32> to vector<128x128xbf16>
    %c0_11 = arith.constant 0 : index
    %c0_12 = arith.constant 0 : index
    %20 = vector.load %arg7[%c0_11, %c0_12] : memref<128x128xbf16, #tpu.memory_space<vmem>>, vector<128x128xbf16>
    tpu.vector_store %arg7[%c0_11, %c0_12], %19 {strides = array<i32>} : memref<128x128xbf16, #tpu.memory_space<vmem>>, vector<128x128xbf16>,
    return
  }
  func.func @transform_0(%arg0: i32) -> (i32, i32) {
    %c0_i32 = arith.constant 0 : i32
    %c0_i32_0 = arith.constant 0 : i32
    return %arg0, %c0_i32 : i32, i32
  }
  func.func @transform_1(%arg0: i32) -> (i32, i32) {
    %c0_i32 = arith.constant 0 : i32
    %c0_i32_0 = arith.constant 0 : i32
    %c0_i32_1 = arith.constant 0 : i32
    return %c0_i32, %c0_i32_0 : i32, i32
  }
  func.func @transform_2(%arg0: i32) -> (i32, i32) {
    %c0_i32 = arith.constant 0 : i32
    %c0_i32_0 = arith.constant 0 : i32
    %c0_i32_1 = arith.constant 0 : i32
    return %c0_i32, %c0_i32_0 : i32, i32
  }
  func.func @transform_3(%arg0: i32) -> (i32, i32) {
    %c0_i32 = arith.constant 0 : i32
    %c0_i32_0 = arith.constant 0 : i32
    return %arg0, %c0_i32 : i32, i32
  }
  func.func @transform_4(%arg0: i32) -> (i32, i32) {
    %c0_i32 = arith.constant 0 : i32
    %c0_i32_0 = arith.constant 0 : i32
    %c0_i32_1 = arith.constant 0 : i32
    return %c0_i32, %c0_i32_0 : i32, i32
  }
  func.func @transform_5(%arg0: i32) -> (i32, i32) {
    %c0_i32 = arith.constant 0 : i32
    %c0_i32_0 = arith.constant 0 : i32
    %c0_i32_1 = arith.constant 0 : i32
    return %c0_i32, %c0_i32_0 : i32, i32
  }
  func.func @transform_6(%arg0: i32) -> (i32, i32) {
    %c0_i32 = arith.constant 0 : i32
    %c0_i32_0 = arith.constant 0 : i32
    return %arg0, %c0_i32 : i32, i32
  }
}

module attributes {stable_mosaic.version = 11 : i64} {
  func.func @kernel(%arg0: i32, %arg1: i32, %arg2: memref<1x1x1x10x10x128xbf16, #tpu.memory_space<vmem>>, %arg3: memref<9x128x128xbf16, #tpu.memory_space<vmem>>, %arg4: memref<1x8x8x128xbf16, #tpu.memory_space<vmem>>, %arg5: memref<1x2x128xf32, #tpu.memory_space<vmem>>) attributes {dimension_semantics = [#tpu.dimension_semantics<parallel>, #tpu.dimension_semantics<parallel>], iteration_bounds = array<i64: 2, 1>, scalar_prefetch = 0 : i64, scratch_operands = 0 : i64, tpu.core_type = #tpu.core_type<tc>, window_params = [{transform_indices = @transform_0, window_bounds = array<i64: 1, 1, 1, 10, 10, 128>}, {transform_indices = @transform_1, window_bounds = array<i64: 9, 128, 128>}, {transform_indices = @transform_2, window_bounds = array<i64: 1, 8, 8, 128>}, {transform_indices = @transform_3, window_bounds = array<i64: 1, 2, 128>}]} {
    %cst = arith.constant 0.000000e+00 : f32
    %0 = vector.broadcast %cst : f32 to vector<64x128xf32>
    %c0 = arith.constant 0 : index
    %c0_0 = arith.constant 0 : index
    %c0_1 = arith.constant 0 : index
    %c0_2 = arith.constant 0 : index
    %c0_3 = arith.constant 0 : index
    %c0_4 = arith.constant 0 : index
    %1 = vector.load %arg2[%c0, %c0_0, %c0_1, %c0_2, %c0_3, %c0_4] : memref<1x1x1x10x10x128xbf16, #tpu.memory_space<vmem>>, vector<1x1x1x8x8x128xbf16>
    %2 = vector.shape_cast %1 : vector<1x1x1x8x8x128xbf16> to vector<8x8x128xbf16>
    %3 = vector.shape_cast %2 : vector<8x8x128xbf16> to vector<64x128xbf16>
    %c0_5 = arith.constant 0 : index
    %c0_6 = arith.constant 0 : index
    %c0_7 = arith.constant 0 : index
    %4 = vector.load %arg3[%c0_5, %c0_6, %c0_7] : memref<9x128x128xbf16, #tpu.memory_space<vmem>>, vector<1x128x128xbf16>
    %5 = vector.shape_cast %4 : vector<1x128x128xbf16> to vector<128x128xbf16>
    %cst_8 = arith.constant dense<0.000000e+00> : vector<64x128xf32>
    %6 = tpu.matmul %3, %5, %cst_8 {dimension_numbers = #tpu.dot_dimension_numbers<[1], [0], [0], [1], [0, 0, 1, 1], [], []>} : vector<64x128xbf16>, vector<128x128xbf16>, vector<64x128xf32> -> vector<64x128xf32>
    %7 = arith.addf %0, %6 : vector<64x128xf32>
    %c0_9 = arith.constant 0 : index
    %c0_10 = arith.constant 0 : index
    %c0_11 = arith.constant 0 : index
    %c0_12 = arith.constant 0 : index
    %c1 = arith.constant 1 : index
    %c0_13 = arith.constant 0 : index
    %8 = vector.load %arg2[%c0_9, %c0_10, %c0_11, %c0_12, %c1, %c0_13] : memref<1x1x1x10x10x128xbf16, #tpu.memory_space<vmem>>, vector<1x1x1x8x8x128xbf16>
    %9 = vector.shape_cast %8 : vector<1x1x1x8x8x128xbf16> to vector<8x8x128xbf16>
    %10 = vector.shape_cast %9 : vector<8x8x128xbf16> to vector<64x128xbf16>
    %c1_14 = arith.constant 1 : index
    %c0_15 = arith.constant 0 : index
    %c0_16 = arith.constant 0 : index
    %11 = vector.load %arg3[%c1_14, %c0_15, %c0_16] : memref<9x128x128xbf16, #tpu.memory_space<vmem>>, vector<1x128x128xbf16>
    %12 = vector.shape_cast %11 : vector<1x128x128xbf16> to vector<128x128xbf16>
    %cst_17 = arith.constant dense<0.000000e+00> : vector<64x128xf32>
    %13 = tpu.matmul %10, %12, %cst_17 {dimension_numbers = #tpu.dot_dimension_numbers<[1], [0], [0], [1], [0, 0, 1, 1], [], []>} : vector<64x128xbf16>, vector<128x128xbf16>, vector<64x128xf32> -> vector<64x128xf32>
    %14 = arith.addf %7, %13 : vector<64x128xf32>
    %c0_18 = arith.constant 0 : index
    %c0_19 = arith.constant 0 : index
    %c0_20 = arith.constant 0 : index
    %c0_21 = arith.constant 0 : index
    %c2 = arith.constant 2 : index
    %c0_22 = arith.constant 0 : index
    %15 = vector.load %arg2[%c0_18, %c0_19, %c0_20, %c0_21, %c2, %c0_22] : memref<1x1x1x10x10x128xbf16, #tpu.memory_space<vmem>>, vector<1x1x1x8x8x128xbf16>
    %16 = vector.shape_cast %15 : vector<1x1x1x8x8x128xbf16> to vector<8x8x128xbf16>
    %17 = vector.shape_cast %16 : vector<8x8x128xbf16> to vector<64x128xbf16>
    %c2_23 = arith.constant 2 : index
    %c0_24 = arith.constant 0 : index
    %c0_25 = arith.constant 0 : index
    %18 = vector.load %arg3[%c2_23, %c0_24, %c0_25] : memref<9x128x128xbf16, #tpu.memory_space<vmem>>, vector<1x128x128xbf16>
    %19 = vector.shape_cast %18 : vector<1x128x128xbf16> to vector<128x128xbf16>
    %cst_26 = arith.constant dense<0.000000e+00> : vector<64x128xf32>
    %20 = tpu.matmul %17, %19, %cst_26 {dimension_numbers = #tpu.dot_dimension_numbers<[1], [0], [0], [1], [0, 0, 1, 1], [], []>} : vector<64x128xbf16>, vector<128x128xbf16>, vector<64x128xf32> -> vector<64x128xf32>
    %21 = arith.addf %14, %20 : vector<64x128xf32>
    %c0_27 = arith.constant 0 : index
    %c0_28 = arith.constant 0 : index
    %c0_29 = arith.constant 0 : index
    %c1_30 = arith.constant 1 : index
    %c0_31 = arith.constant 0 : index
    %c0_32 = arith.constant 0 : index
    %22 = vector.load %arg2[%c0_27, %c0_28, %c0_29, %c1_30, %c0_31, %c0_32] : memref<1x1x1x10x10x128xbf16, #tpu.memory_space<vmem>>, vector<1x1x1x8x8x128xbf16>
    %23 = vector.shape_cast %22 : vector<1x1x1x8x8x128xbf16> to vector<8x8x128xbf16>
    %24 = vector.shape_cast %23 : vector<8x8x128xbf16> to vector<64x128xbf16>
    %c3 = arith.constant 3 : index
    %c0_33 = arith.constant 0 : index
    %c0_34 = arith.constant 0 : index
    %25 = vector.load %arg3[%c3, %c0_33, %c0_34] : memref<9x128x128xbf16, #tpu.memory_space<vmem>>, vector<1x128x128xbf16>
    %26 = vector.shape_cast %25 : vector<1x128x128xbf16> to vector<128x128xbf16>
    %cst_35 = arith.constant dense<0.000000e+00> : vector<64x128xf32>
    %27 = tpu.matmul %24, %26, %cst_35 {dimension_numbers = #tpu.dot_dimension_numbers<[1], [0], [0], [1], [0, 0, 1, 1], [], []>} : vector<64x128xbf16>, vector<128x128xbf16>, vector<64x128xf32> -> vector<64x128xf32>
    %28 = arith.addf %21, %27 : vector<64x128xf32>
    %c0_36 = arith.constant 0 : index
    %c0_37 = arith.constant 0 : index
    %c0_38 = arith.constant 0 : index
    %c1_39 = arith.constant 1 : index
    %c1_40 = arith.constant 1 : index
    %c0_41 = arith.constant 0 : index
    %29 = vector.load %arg2[%c0_36, %c0_37, %c0_38, %c1_39, %c1_40, %c0_41] : memref<1x1x1x10x10x128xbf16, #tpu.memory_space<vmem>>, vector<1x1x1x8x8x128xbf16>
    %30 = vector.shape_cast %29 : vector<1x1x1x8x8x128xbf16> to vector<8x8x128xbf16>
    %31 = vector.shape_cast %30 : vector<8x8x128xbf16> to vector<64x128xbf16>
    %c4 = arith.constant 4 : index
    %c0_42 = arith.constant 0 : index
    %c0_43 = arith.constant 0 : index
    %32 = vector.load %arg3[%c4, %c0_42, %c0_43] : memref<9x128x128xbf16, #tpu.memory_space<vmem>>, vector<1x128x128xbf16>
    %33 = vector.shape_cast %32 : vector<1x128x128xbf16> to vector<128x128xbf16>
    %cst_44 = arith.constant dense<0.000000e+00> : vector<64x128xf32>
    %34 = tpu.matmul %31, %33, %cst_44 {dimension_numbers = #tpu.dot_dimension_numbers<[1], [0], [0], [1], [0, 0, 1, 1], [], []>} : vector<64x128xbf16>, vector<128x128xbf16>, vector<64x128xf32> -> vector<64x128xf32>
    %35 = arith.addf %28, %34 : vector<64x128xf32>
    %c0_45 = arith.constant 0 : index
    %c0_46 = arith.constant 0 : index
    %c0_47 = arith.constant 0 : index
    %c1_48 = arith.constant 1 : index
    %c2_49 = arith.constant 2 : index
    %c0_50 = arith.constant 0 : index
    %36 = vector.load %arg2[%c0_45, %c0_46, %c0_47, %c1_48, %c2_49, %c0_50] : memref<1x1x1x10x10x128xbf16, #tpu.memory_space<vmem>>, vector<1x1x1x8x8x128xbf16>
    %37 = vector.shape_cast %36 : vector<1x1x1x8x8x128xbf16> to vector<8x8x128xbf16>
    %38 = vector.shape_cast %37 : vector<8x8x128xbf16> to vector<64x128xbf16>
    %c5 = arith.constant 5 : index
    %c0_51 = arith.constant 0 : index
    %c0_52 = arith.constant 0 : index
    %39 = vector.load %arg3[%c5, %c0_51, %c0_52] : memref<9x128x128xbf16, #tpu.memory_space<vmem>>, vector<1x128x128xbf16>
    %40 = vector.shape_cast %39 : vector<1x128x128xbf16> to vector<128x128xbf16>
    %cst_53 = arith.constant dense<0.000000e+00> : vector<64x128xf32>
    %41 = tpu.matmul %38, %40, %cst_53 {dimension_numbers = #tpu.dot_dimension_numbers<[1], [0], [0], [1], [0, 0, 1, 1], [], []>} : vector<64x128xbf16>, vector<128x128xbf16>, vector<64x128xf32> -> vector<64x128xf32>
    %42 = arith.addf %35, %41 : vector<64x128xf32>
    %c0_54 = arith.constant 0 : index
    %c0_55 = arith.constant 0 : index
    %c0_56 = arith.constant 0 : index
    %c2_57 = arith.constant 2 : index
    %c0_58 = arith.constant 0 : index
    %c0_59 = arith.constant 0 : index
    %43 = vector.load %arg2[%c0_54, %c0_55, %c0_56, %c2_57, %c0_58, %c0_59] : memref<1x1x1x10x10x128xbf16, #tpu.memory_space<vmem>>, vector<1x1x1x8x8x128xbf16>
    %44 = vector.shape_cast %43 : vector<1x1x1x8x8x128xbf16> to vector<8x8x128xbf16>
    %45 = vector.shape_cast %44 : vector<8x8x128xbf16> to vector<64x128xbf16>
    %c6 = arith.constant 6 : index
    %c0_60 = arith.constant 0 : index
    %c0_61 = arith.constant 0 : index
    %46 = vector.load %arg3[%c6, %c0_60, %c0_61] : memref<9x128x128xbf16, #tpu.memory_space<vmem>>, vector<1x128x128xbf16>
    %47 = vector.shape_cast %46 : vector<1x128x128xbf16> to vector<128x128xbf16>
    %cst_62 = arith.constant dense<0.000000e+00> : vector<64x128xf32>
    %48 = tpu.matmul %45, %47, %cst_62 {dimension_numbers = #tpu.dot_dimension_numbers<[1], [0], [0], [1], [0, 0, 1, 1], [], []>} : vector<64x128xbf16>, vector<128x128xbf16>, vector<64x128xf32> -> vector<64x128xf32>
    %49 = arith.addf %42, %48 : vector<64x128xf32>
    %c0_63 = arith.constant 0 : index
    %c0_64 = arith.constant 0 : index
    %c0_65 = arith.constant 0 : index
    %c2_66 = arith.constant 2 : index
    %c1_67 = arith.constant 1 : index
    %c0_68 = arith.constant 0 : index
    %50 = vector.load %arg2[%c0_63, %c0_64, %c0_65, %c2_66, %c1_67, %c0_68] : memref<1x1x1x10x10x128xbf16, #tpu.memory_space<vmem>>, vector<1x1x1x8x8x128xbf16>
    %51 = vector.shape_cast %50 : vector<1x1x1x8x8x128xbf16> to vector<8x8x128xbf16>
    %52 = vector.shape_cast %51 : vector<8x8x128xbf16> to vector<64x128xbf16>
    %c7 = arith.constant 7 : index
    %c0_69 = arith.constant 0 : index
    %c0_70 = arith.constant 0 : index
    %53 = vector.load %arg3[%c7, %c0_69, %c0_70] : memref<9x128x128xbf16, #tpu.memory_space<vmem>>, vector<1x128x128xbf16>
    %54 = vector.shape_cast %53 : vector<1x128x128xbf16> to vector<128x128xbf16>
    %cst_71 = arith.constant dense<0.000000e+00> : vector<64x128xf32>
    %55 = tpu.matmul %52, %54, %cst_71 {dimension_numbers = #tpu.dot_dimension_numbers<[1], [0], [0], [1], [0, 0, 1, 1], [], []>} : vector<64x128xbf16>, vector<128x128xbf16>, vector<64x128xf32> -> vector<64x128xf32>
    %56 = arith.addf %49, %55 : vector<64x128xf32>
    %c0_72 = arith.constant 0 : index
    %c0_73 = arith.constant 0 : index
    %c0_74 = arith.constant 0 : index
    %c2_75 = arith.constant 2 : index
    %c2_76 = arith.constant 2 : index
    %c0_77 = arith.constant 0 : index
    %57 = vector.load %arg2[%c0_72, %c0_73, %c0_74, %c2_75, %c2_76, %c0_77] : memref<1x1x1x10x10x128xbf16, #tpu.memory_space<vmem>>, vector<1x1x1x8x8x128xbf16>
    %58 = vector.shape_cast %57 : vector<1x1x1x8x8x128xbf16> to vector<8x8x128xbf16>
    %59 = vector.shape_cast %58 : vector<8x8x128xbf16> to vector<64x128xbf16>
    %c8 = arith.constant 8 : index
    %c0_78 = arith.constant 0 : index
    %c0_79 = arith.constant 0 : index
    %60 = vector.load %arg3[%c8, %c0_78, %c0_79] : memref<9x128x128xbf16, #tpu.memory_space<vmem>>, vector<1x128x128xbf16>
    %61 = vector.shape_cast %60 : vector<1x128x128xbf16> to vector<128x128xbf16>
    %cst_80 = arith.constant dense<0.000000e+00> : vector<64x128xf32>
    %62 = tpu.matmul %59, %61, %cst_80 {dimension_numbers = #tpu.dot_dimension_numbers<[1], [0], [0], [1], [0, 0, 1, 1], [], []>} : vector<64x128xbf16>, vector<128x128xbf16>, vector<64x128xf32> -> vector<64x128xf32>
    %63 = arith.addf %56, %62 : vector<64x128xf32>
    %64 = arith.truncf %63 : vector<64x128xf32> to vector<64x128xbf16>
    %65 = vector.shape_cast %64 : vector<64x128xbf16> to vector<1x8x8x128xbf16>
    %c0_81 = arith.constant 0 : index
    %c0_82 = arith.constant 0 : index
    %c0_83 = arith.constant 0 : index
    %c0_84 = arith.constant 0 : index
    %66 = vector.load %arg4[%c0_81, %c0_82, %c0_83, %c0_84] : memref<1x8x8x128xbf16, #tpu.memory_space<vmem>>, vector<1x8x8x128xbf16>
    tpu.vector_store %arg4[%c0_81, %c0_82, %c0_83, %c0_84], %65 {strides = array<i32>} : memref<1x8x8x128xbf16, #tpu.memory_space<vmem>>, vector<1x8x8x128xbf16>,
    %67 = arith.extf %64 : vector<64x128xbf16> to vector<64x128xf32>
    %cst_85 = arith.constant dense<0.000000e+00> : vector<128xf32>
    %68 = vector.multi_reduction <add>, %67, %cst_85 [0] : vector<64x128xf32> to vector<128xf32>
    %c0_86 = arith.constant 0 : index
    %c0_87 = arith.constant 0 : index
    %c0_88 = arith.constant 0 : index
    %69 = vector.load %arg5[%c0_86, %c0_87, %c0_88] : memref<1x2x128xf32, #tpu.memory_space<vmem>>, vector<1x1x128xf32>
    %70 = vector.shape_cast %69 : vector<1x1x128xf32> to vector<128xf32>
    %71 = vector.shape_cast %68 : vector<128xf32> to vector<1x1x128xf32>
    tpu.vector_store %arg5[%c0_86, %c0_87, %c0_88], %71 {strides = array<i32>} : memref<1x2x128xf32, #tpu.memory_space<vmem>>, vector<1x1x128xf32>,
    %72 = arith.mulf %67, %67 : vector<64x128xf32>
    %cst_89 = arith.constant dense<0.000000e+00> : vector<128xf32>
    %73 = vector.multi_reduction <add>, %72, %cst_89 [0] : vector<64x128xf32> to vector<128xf32>
    %c0_90 = arith.constant 0 : index
    %c1_91 = arith.constant 1 : index
    %c0_92 = arith.constant 0 : index
    %74 = vector.load %arg5[%c0_90, %c1_91, %c0_92] : memref<1x2x128xf32, #tpu.memory_space<vmem>>, vector<1x1x128xf32>
    %75 = vector.shape_cast %74 : vector<1x1x128xf32> to vector<128xf32>
    %76 = vector.shape_cast %73 : vector<128xf32> to vector<1x1x128xf32>
    tpu.vector_store %arg5[%c0_90, %c1_91, %c0_92], %76 {strides = array<i32>} : memref<1x2x128xf32, #tpu.memory_space<vmem>>, vector<1x1x128xf32>,
    return
  }
  func.func @transform_0(%arg0: i32, %arg1: i32) -> (i32, i32, i32, i32, i32, i32) {
    %c0_i32 = arith.constant 0 : i32
    %c0_i32_0 = arith.constant 0 : i32
    %c0_i32_1 = arith.constant 0 : i32
    %c0_i32_2 = arith.constant 0 : i32
    %c0_i32_3 = arith.constant 0 : i32
    %c0_i32_4 = arith.constant 0 : i32
    return %arg0, %c0_i32, %c0_i32_0, %c0_i32_1, %c0_i32_2, %c0_i32_3 : i32, i32, i32, i32, i32, i32
  }
  func.func @transform_1(%arg0: i32, %arg1: i32) -> (i32, i32, i32) {
    %c0_i32 = arith.constant 0 : i32
    %c0_i32_0 = arith.constant 0 : i32
    %c0_i32_1 = arith.constant 0 : i32
    return %c0_i32, %c0_i32_0, %arg1 : i32, i32, i32
  }
  func.func @transform_2(%arg0: i32, %arg1: i32) -> (i32, i32, i32, i32) {
    %c0_i32 = arith.constant 0 : i32
    %c0_i32_0 = arith.constant 0 : i32
    %c0_i32_1 = arith.constant 0 : i32
    return %arg0, %c0_i32, %c0_i32_0, %arg1 : i32, i32, i32, i32
  }
  func.func @transform_3(%arg0: i32, %arg1: i32) -> (i32, i32, i32) {
    %c0_i32 = arith.constant 0 : i32
    %c0_i32_0 = arith.constant 0 : i32
    return %arg0, %c0_i32, %arg1 : i32, i32, i32
  }
}

</mosaic_0001>

<bundles_post_ra>
// kernel: corblock_s_forward.13
= control target key start
LH: loop header
LB: loop body
LE: loop exit
PB: predicated region body
PF: predicated region fallthrough
CT: control target
= control target key end

     0   :  { %s570_s1 = inlined_call_operand.vmem [shape: bf16[128,128], index: 1, kind: input, shape index: {}]   ;;  %s571_s0 = inlined_call_operand.vmem [shape: bf16[128,128], index: 0, kind: input, shape index: {}]   ;;  %s572_s2 = inlined_call_operand.vmem [shape: bf16[128,128], index: 2, kind: output, shape index: {0}]   ;;  %s573_s3 = inlined_call_operand.vmem [shape: f32[1,2,128], index: 3, kind: output, shape index: {1}]  }
   0x1   :  { %v385_v0 = vld [vmem:[%s570_s1 + $0x38] sm:$0xff]  ;;  %v384_v1 = vld [vmem:[%s570_s1 + $0x30] sm:$0xff]  ;;  %v383_v2 = vld [vmem:[%s570_s1 + $0x28] sm:$0xff] }
   0x2   :  { %141 = vmatpush.bf16.msra.mxu0 %v385_v0  ;;  %433 = vmatpush.bf16.msra.mxu1 %v385_v0  ;;  %v382_v3 = vld [vmem:[%s570_s1 + $0x20] sm:$0xff]  ;;  %v381_v4 = vld [vmem:[%s570_s1 + $0x18] sm:$0xff]  ;;  %v380_v5 = vld [vmem:[%s570_s1 + $0x10] sm:$0xff] }
   0x3   :  { %434 = vmatpush.bf16.msra.mxu2 %v385_v0  ;;  %435 = vmatpush.bf16.msra.mxu3 %v385_v0  ;;  %v379_v6 = vld [vmem:[%s570_s1 + $0x8] sm:$0xff]  ;;  %v378_v7 = vld [vmem:[%s570_s1] sm:$0xff]  ;;  %v372_v9 = vld [vmem:[%s571_s0 + $0x10] sm:$0xff] }
   0x4   :  { %v370_v8 = vld [vmem:[%s571_s0] sm:$0xff]  ;;  %v376_v11 = vld [vmem:[%s571_s0 + $0x30] sm:$0xff]  ;;  %v371_v12 = vld [vmem:[%s571_s0 + $0x8] sm:$0xff] }
   0x5   :  { %v374_v10 = vld [vmem:[%s571_s0 + $0x20] sm:$0xff]  ;;  %v373_v13 = vld [vmem:[%s571_s0 + $0x18] sm:$0xff]  ;;  %v375_v14 = vld [vmem:[%s571_s0 + $0x28] sm:$0xff] }
   0x6   :  { %142 = vmatpush.bf16.msra.mxu0 %v384_v1  ;;  %436 = vmatpush.bf16.msra.mxu1 %v384_v1  ;;  %v377_v15 = vld [vmem:[%s571_s0 + $0x38] sm:$0xff] }
   0x7   :  { %437 = vmatpush.bf16.msra.mxu2 %v384_v1  ;;  %438 = vmatpush.bf16.msra.mxu3 %v384_v1 }
   0xa   :  { %143 = vmatpush.bf16.msra.mxu0 %v383_v2  ;;  %439 = vmatpush.bf16.msra.mxu1 %v383_v2 }
   0xb   :  { %440 = vmatpush.bf16.msra.mxu2 %v383_v2  ;;  %441 = vmatpush.bf16.msra.mxu3 %v383_v2 }
   0xe   :  { %144 = vmatpush.bf16.msra.mxu0 %v382_v3  ;;  %442 = vmatpush.bf16.msra.mxu1 %v382_v3 }
   0xf   :  { %443 = vmatpush.bf16.msra.mxu2 %v382_v3  ;;  %444 = vmatpush.bf16.msra.mxu3 %v382_v3 }
  0x12   :  { %145 = vmatpush.bf16.msra.mxu0 %v381_v4  ;;  %445 = vmatpush.bf16.msra.mxu1 %v381_v4 }
  0x13   :  { %446 = vmatpush.bf16.msra.mxu2 %v381_v4  ;;  %447 = vmatpush.bf16.msra.mxu3 %v381_v4 }
  0x16   :  { %146 = vmatpush.bf16.msra.mxu0 %v380_v5  ;;  %448 = vmatpush.bf16.msra.mxu1 %v380_v5 }
  0x17   :  { %449 = vmatpush.bf16.msra.mxu2 %v380_v5  ;;  %450 = vmatpush.bf16.msra.mxu3 %v380_v5 }
  0x1a   :  { %147 = vmatpush.bf16.msra.mxu0 %v379_v6  ;;  %451 = vmatpush.bf16.msra.mxu1 %v379_v6 }
  0x1b   :  { %452 = vmatpush.bf16.msra.mxu2 %v379_v6  ;;  %453 = vmatpush.bf16.msra.mxu3 %v379_v6 }
  0x1e   :  { %148 = vmatpush.bf16.msra.mxu0 %v378_v7  ;;  %454 = vmatpush.bf16.msra.mxu1 %v378_v7 }
  0x1f   :  { %455 = vmatpush.bf16.msra.mxu2 %v378_v7  ;;  %456 = vmatpush.bf16.msra.mxu3 %v378_v7 }
  0x21   :  { %149 = vmatmul.bf16.vlgmr.msra.gmra.mxu0 %v370_v8  ;;  %159 = vmatmul.bf16.vlgmr.msra.gmra.mxu1 %v372_v9 }
  0x22   :  { %169 = vmatmul.bf16.vlgmr.msra.gmra.mxu2 %v374_v10  ;;  %179 = vmatmul.bf16.vlgmr.msra.gmra.mxu3 %v376_v11 }
  0x31   :  { %154 = vmatmul.bf16.gmra.mxu0 %v371_v12  ;;  %164 = vmatmul.bf16.gmra.mxu1 %v373_v13 }
  0x32   :  { %174 = vmatmul.bf16.gmra.mxu2 %v375_v14  ;;  %184 = vmatmul.bf16.gmra.mxu3 %v377_v15 }
  0x9e   :  { %v150_v16 = vpop.f32.mrf.mxu0  ;;  %v160_v17 = vpop.f32.mrf.mxu1 }
  0x9f   :  { %v190_v27 = vpack.c.bf16 %v150_v16, %v150_v16  ;;  %v194_v36 = vpack.c.bf16 %v160_v17, %v160_v17 }
  0xa1   :  { %v222_v34 = vunpack.c.l.bf16 %v190_v27  ;;  %v226_v49 = vunpack.c.l.bf16 %v194_v36 }
  0xa3   :  { %v260_v40 = vmul.f32 %v222_v34, %v222_v34  ;;  %v264_v60 = vmul.f32 %v226_v49, %v226_v49 }
  0xa5   :  { %v170_v18 = vpop.f32.mrf.mxu2  ;;  %v525_v19 = vpop.f32.mrf.mxu3 }
  0xa6   :  { %v152_v20 = vpop.f32.mrf.mxu0  ;;  %v162_v21 = vpop.f32.mrf.mxu1  ;;  %v198_v59 = vpack.c.bf16 %v170_v18, %v170_v18 }
  0xa7   :  { %v389_v22 = vpack.c.bf16 %v152_v20, %v150_v16  ;;  %v399_v23 = vpack.c.bf16 %v162_v21, %v160_v17  ;;  %v191_v24 = vpack.c.bf16 %v152_v20, %v152_v20  ;;  %v195_v42 = vpack.c.bf16 %v162_v21, %v162_v21 }
  0xa8   :  { %v230_v9 = vunpack.c.l.bf16 %v198_v59  ;;  %v202_v20 = vpack.c.bf16 %v525_v19, %v525_v19 }
  0xa9   :  { %390 = vst [vmem:[%s572_s2] sm:$0xff] %v389_v22   ;;  %v223_v33 = vunpack.c.l.bf16 %v191_v24  ;;  %v227_v54 = vunpack.c.l.bf16 %v195_v42 }
  0xaa   :  { %427 = vst [vmem:[%s572_s2 + $0x10] sm:$0xff] %v399_v23   ;;  %v268_v21 = vmul.f32 %v230_v9, %v230_v9 }
  0xab   :  { %v261_v37 = vmul.f32 %v223_v33, %v223_v33  ;;  %v238_v41 = vadd.f32 %v223_v33, %v222_v34  ;;  %v265_v5 = vmul.f32 %v227_v54, %v227_v54 }
  0xad   :  { %v172_v25 = vpop.f32.mrf.mxu2  ;;  %v533_v26 = vpop.f32.mrf.mxu3  ;;  %v276_v50 = vadd.f32 %v261_v37, %v260_v40 }
  0xae   :  { %v155_v28 = vpop.f32.mrf.mxu0  ;;  %v165_v29 = vpop.f32.mrf.mxu1  ;;  %v409_v30 = vpack.c.bf16 %v172_v25, %v170_v18  ;;  %v419_v31 = vpack.c.bf16 %v533_v26, %v525_v19  ;;  %v199_v2 = vpack.c.bf16 %v172_v25, %v172_v25  ;;  %v203_v25 = vpack.c.bf16 %v533_v26, %v533_v26 }
  0xaf   :  { %v192_v32 = vpack.c.bf16 %v155_v28, %v155_v28  ;;  %v196_v52 = vpack.c.bf16 %v165_v29, %v165_v29 }
  0xb0   :  { %429 = vst [vmem:[%s572_s2 + $0x20] sm:$0xff] %v409_v30   ;;  %v231_v14 = vunpack.c.l.bf16 %v199_v2  ;;  %v235_v36 = vunpack.c.l.bf16 %v203_v25 }
  0xb1   :  { %431 = vst [vmem:[%s572_s2 + $0x30] sm:$0xff] %v419_v31   ;;  %v224_v35 = vunpack.c.l.bf16 %v192_v32  ;;  %v228_v61 = vunpack.c.l.bf16 %v196_v52  ;;  %v234_v31 = vunpack.c.l.bf16 %v202_v20 }
  0xb2   :  { %v269_v27 = vmul.f32 %v231_v14, %v231_v14 }
  0xb3   :  { %v262_v45 = vmul.f32 %v224_v35, %v224_v35  ;;  %v239_v51 = vadd.f32 %v238_v41, %v224_v35  ;;  %v266_v10 = vmul.f32 %v228_v61, %v228_v61  ;;  %v272_v41 = vmul.f32 %v234_v31, %v234_v31 }
  0xb5   :  { %v175_v38 = vpop.f32.mrf.mxu2  ;;  %v543_v39 = vpop.f32.mrf.mxu3  ;;  %v277_v55 = vadd.f32 %v276_v50, %v262_v45 }
  0xb6   :  { %v157_v43 = vpop.f32.mrf.mxu0  ;;  %v167_v44 = vpop.f32.mrf.mxu1  ;;  %v200_v13 = vpack.c.bf16 %v175_v38, %v175_v38  ;;  %v204_v35 = vpack.c.bf16 %v543_v39, %v543_v39 }
  0xb7   :  { %v193_v46 = vpack.c.bf16 %v157_v43, %v157_v43  ;;  %v394_v47 = vpack.c.bf16 %v157_v43, %v155_v28  ;;  %v404_v48 = vpack.c.bf16 %v167_v44, %v165_v29  ;;  %v197_v58 = vpack.c.bf16 %v167_v44, %v167_v44 }
  0xb8   :  { %v232_v24 = vunpack.c.l.bf16 %v200_v13  ;;  %v236_v26 = vunpack.c.l.bf16 %v204_v35  ;;  %v273_v44 = vmul.f32 %v235_v36, %v235_v36 }
  0xb9   :  { %426 = vst [vmem:[%s572_s2 + $0x8] sm:$0xff] %v394_v47   ;;  %v225_v53 = vunpack.c.l.bf16 %v193_v46  ;;  %v229_v7 = vunpack.c.l.bf16 %v197_v58 }
  0xba   :  { %428 = vst [vmem:[%s572_s2 + $0x18] sm:$0xff] %v404_v48   ;;  %v270_v33 = vmul.f32 %v232_v24, %v232_v24 }
  0xbb   :  { %v240_v56 = vadd.f32 %v239_v51, %v225_v53  ;;  %v263_v57 = vmul.f32 %v225_v53, %v225_v53  ;;  %v267_v16 = vmul.f32 %v229_v7, %v229_v7 }
  0xbd   :  { %v241_v62 = vadd.f32 %v240_v56, %v226_v49  ;;  %v278_v63 = vadd.f32 %v277_v55, %v263_v57  ;;  %v177_v0 = vpop.f32.mrf.mxu2  ;;  %v187_v1 = vpop.f32.mrf.mxu3  ;;  %v274_v49 = vmul.f32 %v236_v26, %v236_v26 }
  0xbe   :  { %v414_v3 = vpack.c.bf16 %v177_v0, %v175_v38  ;;  %v424_v4 = vpack.c.bf16 %v187_v1, %v543_v39  ;;  %v201_v18 = vpack.c.bf16 %v177_v0, %v177_v0  ;;  %v205_v40 = vpack.c.bf16 %v187_v1, %v187_v1 }
  0xbf   :  { %v279_v6 = vadd.f32 %v278_v63, %v264_v60  ;;  %v242_v8 = vadd.f32 %v241_v62, %v227_v54 }
  0xc0   :  { %430 = vst [vmem:[%s572_s2 + $0x28] sm:$0xff] %v414_v3   ;;  %v233_v30 = vunpack.c.l.bf16 %v201_v18  ;;  %v237_v47 = vunpack.c.l.bf16 %v205_v40 }
  0xc1   :  { %v243_v11 = vadd.f32 %v242_v8, %v228_v61  ;;  %v280_v12 = vadd.f32 %v279_v6, %v265_v5  ;;  %432 = vst [vmem:[%s572_s2 + $0x38] sm:$0xff] %v424_v4  }
  0xc2   :  { %v271_v38 = vmul.f32 %v233_v30, %v233_v30  ;;  %v275_v53 = vmul.f32 %v237_v47, %v237_v47 }
  0xc3   :  { %v244_v15 = vadd.f32 %v243_v11, %v229_v7  ;;  %v281_v17 = vadd.f32 %v280_v12, %v266_v10 }
  0xc5   :  { %v245_v22 = vadd.f32 %v244_v15, %v230_v9  ;;  %v282_v23 = vadd.f32 %v281_v17, %v267_v16 }
  0xc7   :  { %v283_v28 = vadd.f32 %v282_v23, %v268_v21  ;;  %v246_v29 = vadd.f32 %v245_v22, %v231_v14 }
  0xc9   :  { %v247_v32 = vadd.f32 %v246_v29, %v232_v24  ;;  %v284_v34 = vadd.f32 %v283_v28, %v269_v27 }
  0xcb   :  { %v285_v19 = vadd.f32 %v284_v34, %v270_v33  ;;  %v248_v37 = vadd.f32 %v247_v32, %v233_v30 }
  0xcd   :  { %v249_v42 = vadd.f32 %v248_v37, %v234_v31  ;;  %v286_v43 = vadd.f32 %v285_v19, %v271_v38 }
  0xcf   :  { %v287_v45 = vadd.f32 %v286_v43, %v272_v41  ;;  %v250_v46 = vadd.f32 %v249_v42, %v235_v36 }
  0xd1   :  { %v251_v48 = vadd.f32 %v250_v46, %v236_v26  ;;  %v288_v50 = vadd.f32 %v287_v45, %v273_v44 }
  0xd3   :  { %v289_v51 = vadd.f32 %v288_v50, %v274_v49  ;;  %v252_v52 = vadd.f32 %v251_v48, %v237_v47 }
  0xd5   :  { %v253_v39 = vrot.slane %v252_v52, 4  ;;  %v290_v54 = vadd.f32 %v289_v51, %v275_v53 }
  0xd7   :  { %v254_v55 = vadd.f32 %v253_v39, %v252_v52  ;;  %v291_v56 = vrot.slane %v290_v54, 4 }
  0xd9   :  { %v255_v57 = vrot.slane %v254_v55, 2  ;;  %v292_v58 = vadd.f32 %v291_v56, %v290_v54 }
  0xdb   :  { %v256_v59 = vadd.f32 %v255_v57, %v254_v55  ;;  %v293_v60 = vrot.slane %v292_v58, 2 }
  0xdd   :  { %v257_v61 = vrot.slane %v256_v59, 1  ;;  %v294_v62 = vadd.f32 %v293_v60, %v292_v58 }
  0xdf   :  { %v258_v63 = vadd.f32 %v257_v61, %v256_v59  ;;  %v295_v0 = vrot.slane %v294_v62, 1 }
  0xe1   :  { %259 = vst [vmem:[%s573_s3] sm:$0x1] %v258_v63  ;;  %v296_v1 = vadd.f32 %v295_v0, %v294_v62 }
  0xe3   :  { %297 = vst [vmem:[%s573_s3 + $0x1] sm:$0x1] %v296_v1 }

// kernel: corblock_s_forward.12
= control target key start
LH: loop header
LB: loop body
LE: loop exit
PB: predicated region body
PF: predicated region fallthrough
CT: control target
= control target key end

     0   :  { %vm334_vm0 = vcmask 1041408   ;;  %vm237_vm1 = vcmask 31744   ;;  %s1267_s1 = inlined_call_operand.vmem [shape: bf16[4,128], index: 1, kind: input, shape index: {}]   ;;  %s1268_s0 = inlined_call_operand.vmem [shape: bf16[512,4], index: 0, kind: input, shape index: {}]   ;;  %s1269_s2 = inlined_call_operand.vmem [shape: bf16[512,128], index: 2, kind: output, shape index: {}]  }
   0x1   :  { %v76_v0 = vld [vmem:[%s1267_s1] sm:$0x3]  ;;  %v800_v6 = vld [vmem:[%s1268_s0 + $0x8] sm:$0xff]  ;;  %v801_v10 = vld [vmem:[%s1268_s0 + $0x10] sm:$0xff] }
   0x2   :  { %v336_v1 = vsel %vm334_vm0, %v76_v0, 0  ;;  %v799_v2 = vld [vmem:[%s1268_s0] sm:$0xff]  ;;  %v808_v7 = vld [vmem:[%s1268_s0 + $0x48] sm:$0xff]  ;;  %v809_v11 = vld [vmem:[%s1268_s0 + $0x50] sm:$0xff] }
   0x3   :  { %v807_v3 = vld [vmem:[%s1268_s0 + $0x40] sm:$0xff]  ;;  %345 = vmatpush.bf16.msra.mxu0 %v336_v1  ;;  %1022 = vmatpush.bf16.msra.mxu1 %v336_v1  ;;  %v816_v8 = vld [vmem:[%s1268_s0 + $0x88] sm:$0xff]  ;;  %v817_v12 = vld [vmem:[%s1268_s0 + $0x90] sm:$0xff] }
   0x4   :  { %v815_v4 = vld [vmem:[%s1268_s0 + $0x80] sm:$0xff]  ;;  %1023 = vmatpush.bf16.msra.mxu2 %v336_v1  ;;  %1024 = vmatpush.bf16.msra.mxu3 %v336_v1  ;;  %v824_v9 = vld [vmem:[%s1268_s0 + $0xc8] sm:$0xff]  ;;  %v825_v13 = vld [vmem:[%s1268_s0 + $0xd0] sm:$0xff] }
   0x5   :  { %v823_v5 = vld [vmem:[%s1268_s0 + $0xc0] sm:$0xff]  ;;  %v802_v14 = vld [vmem:[%s1268_s0 + $0x18] sm:$0xff]  ;;  %v804_v22 = vld [vmem:[%s1268_s0 + $0x28] sm:$0xff] }
   0x6   :  { %767 = vmatmul.msk.bf16.vlgmr.msra.gmra.mxu0 %vm237_vm1, %v799_v2  ;;  %775 = vmatmul.msk.bf16.vlgmr.msra.gmra.mxu1 %vm237_vm1, %v807_v3  ;;  %v810_v15 = vld [vmem:[%s1268_s0 + $0x58] sm:$0xff]  ;;  %v803_v18 = vld [vmem:[%s1268_s0 + $0x20] sm:$0xff]  ;;  %v812_v23 = vld [vmem:[%s1268_s0 + $0x68] sm:$0xff] }
   0x7   :  { %783 = vmatmul.msk.bf16.vlgmr.msra.gmra.mxu2 %vm237_vm1, %v815_v4  ;;  %791 = vmatmul.msk.bf16.vlgmr.msra.gmra.mxu3 %vm237_vm1, %v823_v5  ;;  %v818_v16 = vld [vmem:[%s1268_s0 + $0x98] sm:$0xff]  ;;  %v811_v19 = vld [vmem:[%s1268_s0 + $0x60] sm:$0xff]  ;;  %v820_v24 = vld [vmem:[%s1268_s0 + $0xa8] sm:$0xff] }
   0x8   :  { %v826_v17 = vld [vmem:[%s1268_s0 + $0xd8] sm:$0xff]  ;;  %v819_v20 = vld [vmem:[%s1268_s0 + $0xa0] sm:$0xff]  ;;  %v828_v25 = vld [vmem:[%s1268_s0 + $0xe8] sm:$0xff] }
   0x9   :  { %v827_v21 = vld [vmem:[%s1268_s0 + $0xe0] sm:$0xff]  ;;  %v805_v26 = vld [vmem:[%s1268_s0 + $0x30] sm:$0xff]  ;;  %v806_v30 = vld [vmem:[%s1268_s0 + $0x38] sm:$0xff] }
   0xa   :  { %v813_v27 = vld [vmem:[%s1268_s0 + $0x70] sm:$0xff]  ;;  %v814_v31 = vld [vmem:[%s1268_s0 + $0x78] sm:$0xff] }
   0xb   :  { %v821_v28 = vld [vmem:[%s1268_s0 + $0xb0] sm:$0xff]  ;;  %v822_v32 = vld [vmem:[%s1268_s0 + $0xb8] sm:$0xff] }
   0xc   :  { %v829_v29 = vld [vmem:[%s1268_s0 + $0xf0] sm:$0xff]  ;;  %v830_v33 = vld [vmem:[%s1268_s0 + $0xf8] sm:$0xff] }
  0x16   :  { %768 = vmatmul.msk.bf16.gmra.mxu0 %vm237_vm1, %v800_v6  ;;  %776 = vmatmul.msk.bf16.gmra.mxu1 %vm237_vm1, %v808_v7 }
  0x17   :  { %784 = vmatmul.msk.bf16.gmra.mxu2 %vm237_vm1, %v816_v8  ;;  %792 = vmatmul.msk.bf16.gmra.mxu3 %vm237_vm1, %v824_v9 }
  0x26   :  { %769 = vmatmul.msk.bf16.gmra.mxu0 %vm237_vm1, %v801_v10  ;;  %777 = vmatmul.msk.bf16.gmra.mxu1 %vm237_vm1, %v809_v11 }
  0x27   :  { %785 = vmatmul.msk.bf16.gmra.mxu2 %vm237_vm1, %v817_v12  ;;  %793 = vmatmul.msk.bf16.gmra.mxu3 %vm237_vm1, %v825_v13 }
  0x36   :  { %770 = vmatmul.msk.bf16.gmra.mxu0 %vm237_vm1, %v802_v14  ;;  %778 = vmatmul.msk.bf16.gmra.mxu1 %vm237_vm1, %v810_v15 }
  0x37   :  { %786 = vmatmul.msk.bf16.gmra.mxu2 %vm237_vm1, %v818_v16  ;;  %794 = vmatmul.msk.bf16.gmra.mxu3 %vm237_vm1, %v826_v17 }
  0x46   :  { %771 = vmatmul.msk.bf16.gmra.mxu0 %vm237_vm1, %v803_v18  ;;  %779 = vmatmul.msk.bf16.gmra.mxu1 %vm237_vm1, %v811_v19 }
  0x47   :  { %787 = vmatmul.msk.bf16.gmra.mxu2 %vm237_vm1, %v819_v20  ;;  %795 = vmatmul.msk.bf16.gmra.mxu3 %vm237_vm1, %v827_v21 }
  0x56   :  { %772 = vmatmul.msk.bf16.gmra.mxu0 %vm237_vm1, %v804_v22  ;;  %780 = vmatmul.msk.bf16.gmra.mxu1 %vm237_vm1, %v812_v23 }
  0x57   :  { %788 = vmatmul.msk.bf16.gmra.mxu2 %vm237_vm1, %v820_v24  ;;  %796 = vmatmul.msk.bf16.gmra.mxu3 %vm237_vm1, %v828_v25 }
  0x66   :  { %773 = vmatmul.msk.bf16.gmra.mxu0 %vm237_vm1, %v805_v26  ;;  %781 = vmatmul.msk.bf16.gmra.mxu1 %vm237_vm1, %v813_v27 }
  0x67   :  { %789 = vmatmul.msk.bf16.gmra.mxu2 %vm237_vm1, %v821_v28  ;;  %797 = vmatmul.msk.bf16.gmra.mxu3 %vm237_vm1, %v829_v29 }
  0x76   :  { %774 = vmatmul.msk.bf16.gmra.mxu0 %vm237_vm1, %v806_v30  ;;  %782 = vmatmul.msk.bf16.gmra.mxu1 %vm237_vm1, %v814_v31 }
  0x77   :  { %790 = vmatmul.msk.bf16.gmra.mxu2 %vm237_vm1, %v822_v32  ;;  %798 = vmatmul.msk.bf16.gmra.mxu3 %vm237_vm1, %v830_v33 }
  0x83   :  { %v347_v34 = vpop.f32.mrf.mxu0  ;;  %v387_v35 = vpop.f32.mrf.mxu1 }
  0x8a   :  { %v427_v36 = vpop.f32.mrf.mxu2  ;;  %v467_v37 = vpop.f32.mrf.mxu3 }
  0x8b   :  { %v349_v38 = vpop.f32.mrf.mxu0  ;;  %v389_v39 = vpop.f32.mrf.mxu1 }
  0x8c   :  { %v834_v40 = vpack.c.bf16 %v349_v38, %v347_v34  ;;  %v874_v41 = vpack.c.bf16 %v389_v39, %v387_v35 }
  0x8e   :  { %835 = vst [vmem:[%s1269_s2] sm:$0xff] %v834_v40  }
  0x8f   :  { %998 = vst [vmem:[%s1269_s2 + $0x40] sm:$0xff] %v874_v41  }
  0x92   :  { %v429_v42 = vpop.f32.mrf.mxu2  ;;  %v469_v43 = vpop.f32.mrf.mxu3 }
  0x93   :  { %v914_v44 = vpack.c.bf16 %v429_v42, %v427_v36  ;;  %v954_v45 = vpack.c.bf16 %v469_v43, %v467_v37  ;;  %v352_v46 = vpop.f32.mrf.mxu0  ;;  %v392_v47 = vpop.f32.mrf.mxu1 }
  0x95   :  { %1006 = vst [vmem:[%s1269_s2 + $0x80] sm:$0xff] %v914_v44  }
  0x96   :  { %1014 = vst [vmem:[%s1269_s2 + $0xc0] sm:$0xff] %v954_v45  }
  0x9a   :  { %v432_v48 = vpop.f32.mrf.mxu2  ;;  %v472_v49 = vpop.f32.mrf.mxu3 }
  0x9b   :  { %v354_v50 = vpop.f32.mrf.mxu0  ;;  %v394_v51 = vpop.f32.mrf.mxu1 }
  0x9c   :  { %v839_v52 = vpack.c.bf16 %v354_v50, %v352_v46  ;;  %v879_v53 = vpack.c.bf16 %v394_v51, %v392_v47 }
  0x9e   :  { %991 = vst [vmem:[%s1269_s2 + $0x8] sm:$0xff] %v839_v52  }
  0x9f   :  { %999 = vst [vmem:[%s1269_s2 + $0x48] sm:$0xff] %v879_v53  }
  0xa2   :  { %v434_v54 = vpop.f32.mrf.mxu2  ;;  %v474_v55 = vpop.f32.mrf.mxu3 }
  0xa3   :  { %v919_v56 = vpack.c.bf16 %v434_v54, %v432_v48  ;;  %v959_v57 = vpack.c.bf16 %v474_v55, %v472_v49  ;;  %v357_v58 = vpop.f32.mrf.mxu0  ;;  %v397_v59 = vpop.f32.mrf.mxu1 }
  0xa5   :  { %1007 = vst [vmem:[%s1269_s2 + $0x88] sm:$0xff] %v919_v56  }
  0xa6   :  { %1015 = vst [vmem:[%s1269_s2 + $0xc8] sm:$0xff] %v959_v57  }
  0xaa   :  { %v437_v60 = vpop.f32.mrf.mxu2  ;;  %v477_v61 = vpop.f32.mrf.mxu3 }
  0xab   :  { %v359_v62 = vpop.f32.mrf.mxu0  ;;  %v399_v63 = vpop.f32.mrf.mxu1 }
  0xac   :  { %v844_v0 = vpack.c.bf16 %v359_v62, %v357_v58  ;;  %v884_v1 = vpack.c.bf16 %v399_v63, %v397_v59 }
  0xae   :  { %992 = vst [vmem:[%s1269_s2 + $0x10] sm:$0xff] %v844_v0  }
  0xaf   :  { %1000 = vst [vmem:[%s1269_s2 + $0x50] sm:$0xff] %v884_v1  }
  0xb2   :  { %v439_v2 = vpop.f32.mrf.mxu2  ;;  %v479_v3 = vpop.f32.mrf.mxu3 }
  0xb3   :  { %v924_v4 = vpack.c.bf16 %v439_v2, %v437_v60  ;;  %v964_v5 = vpack.c.bf16 %v479_v3, %v477_v61  ;;  %v362_v6 = vpop.f32.mrf.mxu0  ;;  %v402_v7 = vpop.f32.mrf.mxu1 }
  0xb5   :  { %1008 = vst [vmem:[%s1269_s2 + $0x90] sm:$0xff] %v924_v4  }
  0xb6   :  { %1016 = vst [vmem:[%s1269_s2 + $0xd0] sm:$0xff] %v964_v5  }
  0xba   :  { %v442_v8 = vpop.f32.mrf.mxu2  ;;  %v482_v9 = vpop.f32.mrf.mxu3 }
  0xbb   :  { %v364_v10 = vpop.f32.mrf.mxu0  ;;  %v404_v11 = vpop.f32.mrf.mxu1 }
  0xbc   :  { %v849_v12 = vpack.c.bf16 %v364_v10, %v362_v6  ;;  %v889_v13 = vpack.c.bf16 %v404_v11, %v402_v7 }
  0xbe   :  { %993 = vst [vmem:[%s1269_s2 + $0x18] sm:$0xff] %v849_v12  }
  0xbf   :  { %1001 = vst [vmem:[%s1269_s2 + $0x58] sm:$0xff] %v889_v13  }
  0xc2   :  { %v444_v14 = vpop.f32.mrf.mxu2  ;;  %v484_v15 = vpop.f32.mrf.mxu3 }
  0xc3   :  { %v929_v16 = vpack.c.bf16 %v444_v14, %v442_v8  ;;  %v969_v17 = vpack.c.bf16 %v484_v15, %v482_v9  ;;  %v367_v18 = vpop.f32.mrf.mxu0  ;;  %v407_v19 = vpop.f32.mrf.mxu1 }
  0xc5   :  { %1009 = vst [vmem:[%s1269_s2 + $0x98] sm:$0xff] %v929_v16  }
  0xc6   :  { %1017 = vst [vmem:[%s1269_s2 + $0xd8] sm:$0xff] %v969_v17  }
  0xca   :  { %v447_v20 = vpop.f32.mrf.mxu2  ;;  %v487_v21 = vpop.f32.mrf.mxu3 }
  0xcb   :  { %v369_v22 = vpop.f32.mrf.mxu0  ;;  %v409_v23 = vpop.f32.mrf.mxu1 }
  0xcc   :  { %v854_v24 = vpack.c.bf16 %v369_v22, %v367_v18  ;;  %v894_v25 = vpack.c.bf16 %v409_v23, %v407_v19 }
  0xce   :  { %994 = vst [vmem:[%s1269_s2 + $0x20] sm:$0xff] %v854_v24  }
  0xcf   :  { %1002 = vst [vmem:[%s1269_s2 + $0x60] sm:$0xff] %v894_v25  }
  0xd2   :  { %v449_v26 = vpop.f32.mrf.mxu2  ;;  %v489_v27 = vpop.f32.mrf.mxu3 }
  0xd3   :  { %v934_v28 = vpack.c.bf16 %v449_v26, %v447_v20  ;;  %v974_v29 = vpack.c.bf16 %v489_v27, %v487_v21  ;;  %v372_v30 = vpop.f32.mrf.mxu0  ;;  %v412_v31 = vpop.f32.mrf.mxu1 }
  0xd5   :  { %1010 = vst [vmem:[%s1269_s2 + $0xa0] sm:$0xff] %v934_v28  }
  0xd6   :  { %1018 = vst [vmem:[%s1269_s2 + $0xe0] sm:$0xff] %v974_v29  }
  0xda   :  { %v452_v32 = vpop.f32.mrf.mxu2  ;;  %v492_v33 = vpop.f32.mrf.mxu3 }
  0xdb   :  { %v374_v34 = vpop.f32.mrf.mxu0  ;;  %v414_v35 = vpop.f32.mrf.mxu1 }
  0xdc   :  { %v859_v36 = vpack.c.bf16 %v374_v34, %v372_v30  ;;  %v899_v37 = vpack.c.bf16 %v414_v35, %v412_v31 }
  0xde   :  { %995 = vst [vmem:[%s1269_s2 + $0x28] sm:$0xff] %v859_v36  }
  0xdf   :  { %1003 = vst [vmem:[%s1269_s2 + $0x68] sm:$0xff] %v899_v37  }
  0xe2   :  { %v454_v38 = vpop.f32.mrf.mxu2  ;;  %v494_v39 = vpop.f32.mrf.mxu3 }
  0xe3   :  { %v939_v40 = vpack.c.bf16 %v454_v38, %v452_v32  ;;  %v979_v41 = vpack.c.bf16 %v494_v39, %v492_v33  ;;  %v377_v42 = vpop.f32.mrf.mxu0  ;;  %v417_v43 = vpop.f32.mrf.mxu1 }
  0xe5   :  { %1011 = vst [vmem:[%s1269_s2 + $0xa8] sm:$0xff] %v939_v40  }
  0xe6   :  { %1019 = vst [vmem:[%s1269_s2 + $0xe8] sm:$0xff] %v979_v41  }
  0xea   :  { %v457_v44 = vpop.f32.mrf.mxu2  ;;  %v497_v45 = vpop.f32.mrf.mxu3 }
  0xeb   :  { %v379_v46 = vpop.f32.mrf.mxu0  ;;  %v419_v47 = vpop.f32.mrf.mxu1 }
  0xec   :  { %v864_v48 = vpack.c.bf16 %v379_v46, %v377_v42  ;;  %v904_v49 = vpack.c.bf16 %v419_v47, %v417_v43 }
  0xee   :  { %996 = vst [vmem:[%s1269_s2 + $0x30] sm:$0xff] %v864_v48  }
  0xef   :  { %1004 = vst [vmem:[%s1269_s2 + $0x70] sm:$0xff] %v904_v49  }
  0xf2   :  { %v459_v50 = vpop.f32.mrf.mxu2  ;;  %v499_v51 = vpop.f32.mrf.mxu3 }
  0xf3   :  { %v944_v52 = vpack.c.bf16 %v459_v50, %v457_v44  ;;  %v984_v53 = vpack.c.bf16 %v499_v51, %v497_v45  ;;  %v382_v54 = vpop.f32.mrf.mxu0  ;;  %v422_v55 = vpop.f32.mrf.mxu1 }
  0xf5   :  { %1012 = vst [vmem:[%s1269_s2 + $0xb0] sm:$0xff] %v944_v52  }
  0xf6   :  { %1020 = vst [vmem:[%s1269_s2 + $0xf0] sm:$0xff] %v984_v53  }
  0xfa   :  { %v462_v56 = vpop.f32.mrf.mxu2  ;;  %v502_v57 = vpop.f32.mrf.mxu3 }
  0xfb   :  { %v384_v58 = vpop.f32.mrf.mxu0  ;;  %v424_v59 = vpop.f32.mrf.mxu1 }
  0xfc   :  { %v869_v60 = vpack.c.bf16 %v384_v58, %v382_v54  ;;  %v909_v61 = vpack.c.bf16 %v424_v59, %v422_v55 }
  0xfe   :  { %997 = vst [vmem:[%s1269_s2 + $0x38] sm:$0xff] %v869_v60  }
  0xff   :  { %1005 = vst [vmem:[%s1269_s2 + $0x78] sm:$0xff] %v909_v61  }
 0x102   :  { %v464_v62 = vpop.f32.mrf.mxu2  ;;  %v504_v63 = vpop.f32.mrf.mxu3 }
 0x103   :  { %v949_v0 = vpack.c.bf16 %v464_v62, %v462_v56  ;;  %v989_v1 = vpack.c.bf16 %v504_v63, %v502_v57 }
 0x105   :  { %1013 = vst [vmem:[%s1269_s2 + $0xb8] sm:$0xff] %v949_v0  }
 0x106   :  { %1021 = vst [vmem:[%s1269_s2 + $0xf8] sm:$0xff] %v989_v1  }

// kernel: corblock_s_forward.14
= control target key start
LH: loop header
LB: loop body
LE: loop exit
PB: predicated region body
PF: predicated region fallthrough
CT: control target
= control target key end

     0   :  { %s1809_s1 = inlined_call_operand.vmem [shape: bf16[128,128], index: 1, kind: input, shape index: {}]   ;;  %s1810_s0 = inlined_call_operand.vmem [shape: bf16[512,128], index: 0, kind: input, shape index: {}]   ;;  %s1811_s2 = inlined_call_operand.vmem [shape: bf16[512,128], index: 2, kind: output, shape index: {0}]   ;;  %s1812_s3 = inlined_call_operand.vmem [shape: f32[1,2,128], index: 3, kind: output, shape index: {1}]  }
   0x1   :  { %v1105_v0 = vld [vmem:[%s1809_s1 + $0x38] sm:$0xff]  ;;  %v1104_v1 = vld [vmem:[%s1809_s1 + $0x30] sm:$0xff]  ;;  %v1103_v2 = vld [vmem:[%s1809_s1 + $0x28] sm:$0xff] }
   0x2   :  { %333 = vmatpush.bf16.msra.mxu0 %v1105_v0  ;;  %1297 = vmatpush.bf16.msra.mxu1 %v1105_v0  ;;  %v1102_v3 = vld [vmem:[%s1809_s1 + $0x20] sm:$0xff]  ;;  %v1101_v4 = vld [vmem:[%s1809_s1 + $0x18] sm:$0xff]  ;;  %v1100_v5 = vld [vmem:[%s1809_s1 + $0x10] sm:$0xff] }
   0x3   :  { %1298 = vmatpush.bf16.msra.mxu2 %v1105_v0  ;;  %1299 = vmatpush.bf16.msra.mxu3 %v1105_v0  ;;  %v1099_v6 = vld [vmem:[%s1809_s1 + $0x8] sm:$0xff]  ;;  %v1098_v7 = vld [vmem:[%s1809_s1] sm:$0xff]  ;;  %v1068_v13 = vld [vmem:[%s1810_s0 + $0x10] sm:$0xff] }
   0x4   :  { %v1066_v8 = vld [vmem:[%s1810_s0] sm:$0xff]  ;;  %v1067_v10 = vld [vmem:[%s1810_s0 + $0x8] sm:$0xff]  ;;  %v1076_v14 = vld [vmem:[%s1810_s0 + $0x50] sm:$0xff] }
   0x5   :  { %v1074_v9 = vld [vmem:[%s1810_s0 + $0x40] sm:$0xff]  ;;  %v1075_v11 = vld [vmem:[%s1810_s0 + $0x48] sm:$0xff]  ;;  %v1069_v16 = vld [vmem:[%s1810_s0 + $0x18] sm:$0xff] }
   0x6   :  { %334 = vmatpush.bf16.msra.mxu0 %v1104_v1  ;;  %1300 = vmatpush.bf16.msra.mxu1 %v1104_v1  ;;  %v1082_v12 = vld [vmem:[%s1810_s0 + $0x80] sm:$0xff]  ;;  %v1083_v15 = vld [vmem:[%s1810_s0 + $0x88] sm:$0xff]  ;;  %v1077_v17 = vld [vmem:[%s1810_s0 + $0x58] sm:$0xff] }
   0x7   :  { %1301 = vmatpush.bf16.msra.mxu2 %v1104_v1  ;;  %1302 = vmatpush.bf16.msra.mxu3 %v1104_v1  ;;  %v1084_v18 = vld [vmem:[%s1810_s0 + $0x90] sm:$0xff]  ;;  %v1090_v19 = vld [vmem:[%s1810_s0 + $0xc0] sm:$0xff]  ;;  %v1085_v22 = vld [vmem:[%s1810_s0 + $0x98] sm:$0xff] }
   0x8   :  { %v1070_v20 = vld [vmem:[%s1810_s0 + $0x20] sm:$0xff]  ;;  %v1091_v23 = vld [vmem:[%s1810_s0 + $0xc8] sm:$0xff]  ;;  %v1092_v27 = vld [vmem:[%s1810_s0 + $0xd0] sm:$0xff] }
   0x9   :  { %v1078_v21 = vld [vmem:[%s1810_s0 + $0x60] sm:$0xff]  ;;  %v1071_v24 = vld [vmem:[%s1810_s0 + $0x28] sm:$0xff]  ;;  %v1072_v28 = vld [vmem:[%s1810_s0 + $0x30] sm:$0xff] }
   0xa   :  { %335 = vmatpush.bf16.msra.mxu0 %v1103_v2  ;;  %1303 = vmatpush.bf16.msra.mxu1 %v1103_v2  ;;  %v1079_v25 = vld [vmem:[%s1810_s0 + $0x68] sm:$0xff]  ;;  %v1086_v26 = vld [vmem:[%s1810_s0 + $0xa0] sm:$0xff]  ;;  %v1080_v29 = vld [vmem:[%s1810_s0 + $0x70] sm:$0xff] }
   0xb   :  { %1304 = vmatpush.bf16.msra.mxu2 %v1103_v2  ;;  %1305 = vmatpush.bf16.msra.mxu3 %v1103_v2  ;;  %v1087_v30 = vld [vmem:[%s1810_s0 + $0xa8] sm:$0xff]  ;;  %v1093_v31 = vld [vmem:[%s1810_s0 + $0xd8] sm:$0xff]  ;;  %v1088_v34 = vld [vmem:[%s1810_s0 + $0xb0] sm:$0xff] }
   0xc   :  { %v1073_v32 = vld [vmem:[%s1810_s0 + $0x38] sm:$0xff]  ;;  %v1094_v35 = vld [vmem:[%s1810_s0 + $0xe0] sm:$0xff]  ;;  %v1095_v39 = vld [vmem:[%s1810_s0 + $0xe8] sm:$0xff] }
   0xd   :  { %v1081_v33 = vld [vmem:[%s1810_s0 + $0x78] sm:$0xff]  ;;  %v1096_v56 = vld [vmem:[%s1810_s0 + $0xf0] sm:$0xff] }
   0xe   :  { %336 = vmatpush.bf16.msra.mxu0 %v1102_v3  ;;  %1306 = vmatpush.bf16.msra.mxu1 %v1102_v3  ;;  %v1089_v38 = vld [vmem:[%s1810_s0 + $0xb8] sm:$0xff] }
   0xf   :  { %1307 = vmatpush.bf16.msra.mxu2 %v1102_v3  ;;  %1308 = vmatpush.bf16.msra.mxu3 %v1102_v3 }
  0x12   :  { %337 = vmatpush.bf16.msra.mxu0 %v1101_v4  ;;  %1309 = vmatpush.bf16.msra.mxu1 %v1101_v4 }
  0x13   :  { %1310 = vmatpush.bf16.msra.mxu2 %v1101_v4  ;;  %1311 = vmatpush.bf16.msra.mxu3 %v1101_v4 }
  0x16   :  { %338 = vmatpush.bf16.msra.mxu0 %v1100_v5  ;;  %1312 = vmatpush.bf16.msra.mxu1 %v1100_v5 }
  0x17   :  { %1313 = vmatpush.bf16.msra.mxu2 %v1100_v5  ;;  %1314 = vmatpush.bf16.msra.mxu3 %v1100_v5 }
  0x1a   :  { %339 = vmatpush.bf16.msra.mxu0 %v1099_v6  ;;  %1315 = vmatpush.bf16.msra.mxu1 %v1099_v6 }
  0x1b   :  { %1316 = vmatpush.bf16.msra.mxu2 %v1099_v6  ;;  %1317 = vmatpush.bf16.msra.mxu3 %v1099_v6 }
  0x1e   :  { %340 = vmatpush.bf16.msra.mxu0 %v1098_v7  ;;  %1318 = vmatpush.bf16.msra.mxu1 %v1098_v7 }
  0x1f   :  { %1319 = vmatpush.bf16.msra.mxu2 %v1098_v7  ;;  %1320 = vmatpush.bf16.msra.mxu3 %v1098_v7 }
  0x21   :  { %341 = vmatmul.bf16.vlgmr.msra.gmra.mxu0 %v1066_v8  ;;  %381 = vmatmul.bf16.vlgmr.msra.gmra.mxu1 %v1074_v9 }
  0x22   :  { %421 = vmatmul.bf16.vlgmr.msra.gmra.mxu2 %v1082_v12  ;;  %461 = vmatmul.bf16.vlgmr.msra.gmra.mxu3 %v1090_v19  ;;  %v1097_v12 = vld [vmem:[%s1810_s0 + $0xf8] sm:$0xff] }
  0x31   :  { %346 = vmatmul.bf16.gmra.mxu0 %v1067_v10  ;;  %386 = vmatmul.bf16.gmra.mxu1 %v1075_v11 }
  0x32   :  { %426 = vmatmul.bf16.gmra.mxu2 %v1083_v15  ;;  %466 = vmatmul.bf16.gmra.mxu3 %v1091_v23 }
  0x41   :  { %351 = vmatmul.bf16.gmra.mxu0 %v1068_v13  ;;  %391 = vmatmul.bf16.gmra.mxu1 %v1076_v14 }
  0x42   :  { %431 = vmatmul.bf16.gmra.mxu2 %v1084_v18  ;;  %471 = vmatmul.bf16.gmra.mxu3 %v1092_v27 }
  0x51   :  { %356 = vmatmul.bf16.gmra.mxu0 %v1069_v16  ;;  %396 = vmatmul.bf16.gmra.mxu1 %v1077_v17 }
  0x52   :  { %436 = vmatmul.bf16.gmra.mxu2 %v1085_v22  ;;  %476 = vmatmul.bf16.gmra.mxu3 %v1093_v31 }
  0x61   :  { %361 = vmatmul.bf16.gmra.mxu0 %v1070_v20  ;;  %401 = vmatmul.bf16.gmra.mxu1 %v1078_v21 }
  0x62   :  { %441 = vmatmul.bf16.gmra.mxu2 %v1086_v26  ;;  %481 = vmatmul.bf16.gmra.mxu3 %v1094_v35 }
  0x71   :  { %366 = vmatmul.bf16.gmra.mxu0 %v1071_v24  ;;  %406 = vmatmul.bf16.gmra.mxu1 %v1079_v25 }
  0x72   :  { %446 = vmatmul.bf16.gmra.mxu2 %v1087_v30  ;;  %486 = vmatmul.bf16.gmra.mxu3 %v1095_v39 }
  0x81   :  { %371 = vmatmul.bf16.gmra.mxu0 %v1072_v28  ;;  %411 = vmatmul.bf16.gmra.mxu1 %v1080_v29 }
  0x82   :  { %451 = vmatmul.bf16.gmra.mxu2 %v1088_v34  ;;  %491 = vmatmul.bf16.gmra.mxu3 %v1096_v56 }
  0x91   :  { %376 = vmatmul.bf16.gmra.mxu0 %v1073_v32  ;;  %416 = vmatmul.bf16.gmra.mxu1 %v1081_v33 }
  0x92   :  { %456 = vmatmul.bf16.gmra.mxu2 %v1089_v38  ;;  %496 = vmatmul.bf16.gmra.mxu3 %v1097_v12 }
  0x9e   :  { %v342_v36 = vpop.f32.mrf.mxu0  ;;  %v1449_v37 = vpop.f32.mrf.mxu1 }
  0x9f   :  { %v502_v40 = vpack.c.bf16 %v342_v36, %v342_v36 }
  0xa1   :  { %v630_v43 = vunpack.c.l.bf16 %v502_v40 }
  0xa3   :  { %v764_v48 = vmul.f32 %v630_v43, %v630_v43 }
  0xa5   :  { %v1476_v1 = vpop.f32.mrf.mxu2  ;;  %v1527_v30 = vpop.f32.mrf.mxu3 }
  0xa6   :  { %v344_v41 = vpop.f32.mrf.mxu0  ;;  %v1457_v42 = vpop.f32.mrf.mxu1 }
  0xa7   :  { %v503_v44 = vpack.c.bf16 %v344_v41, %v344_v41  ;;  %v1109_v45 = vpack.c.bf16 %v344_v41, %v342_v36  ;;  %v1149_v46 = vpack.c.bf16 %v1457_v42, %v1449_v37 }
  0xa9   :  { %1110 = vst [vmem:[%s1811_s2] sm:$0xff] %v1109_v45   ;;  %v631_v47 = vunpack.c.l.bf16 %v503_v44 }
  0xaa   :  { %1273 = vst [vmem:[%s1811_s2 + $0x40] sm:$0xff] %v1149_v46  }
  0xab   :  { %v694_v49 = vadd.f32 %v631_v47, %v630_v43  ;;  %v765_v50 = vmul.f32 %v631_v47, %v631_v47 }
  0xad   :  { %v828_v51 = vadd.f32 %v765_v50, %v764_v48  ;;  %v1486_v9 = vpop.f32.mrf.mxu2  ;;  %v1539_v34 = vpop.f32.mrf.mxu3 }
  0xae   :  { %v347_v52 = vpop.f32.mrf.mxu0  ;;  %v1467_v53 = vpop.f32.mrf.mxu1  ;;  %v1189_v10 = vpack.c.bf16 %v1486_v9, %v1476_v1  ;;  %v1229_v36 = vpack.c.bf16 %v1539_v34, %v1527_v30 }
  0xaf   :  { %v504_v54 = vpack.c.bf16 %v347_v52, %v347_v52 }
  0xb0   :  { %1281 = vst [vmem:[%s1811_s2 + $0x80] sm:$0xff] %v1189_v10  }
  0xb1   :  { %v632_v55 = vunpack.c.l.bf16 %v504_v54  ;;  %1289 = vst [vmem:[%s1811_s2 + $0xc0] sm:$0xff] %v1229_v36  }
  0xb3   :  { %v695_v57 = vadd.f32 %v694_v49, %v632_v55  ;;  %v766_v58 = vmul.f32 %v632_v55, %v632_v55 }
  0xb5   :  { %v829_v59 = vadd.f32 %v828_v51, %v766_v58  ;;  %v1504_v20 = vpop.f32.mrf.mxu2  ;;  %v1557_v44 = vpop.f32.mrf.mxu3 }
  0xb6   :  { %v349_v60 = vpop.f32.mrf.mxu0  ;;  %v1472_v61 = vpop.f32.mrf.mxu1 }
  0xb7   :  { %v505_v62 = vpack.c.bf16 %v349_v60, %v349_v60  ;;  %v1114_v63 = vpack.c.bf16 %v349_v60, %v347_v52  ;;  %v1154_v0 = vpack.c.bf16 %v1472_v61, %v1467_v53 }
  0xb9   :  { %1266 = vst [vmem:[%s1811_s2 + $0x8] sm:$0xff] %v1114_v63   ;;  %v633_v2 = vunpack.c.l.bf16 %v505_v62 }
  0xba   :  { %1274 = vst [vmem:[%s1811_s2 + $0x48] sm:$0xff] %v1154_v0  }
  0xbb   :  { %v696_v3 = vadd.f32 %v695_v57, %v633_v2  ;;  %v767_v4 = vmul.f32 %v633_v2, %v633_v2 }
  0xbd   :  { %v830_v5 = vadd.f32 %v829_v59, %v767_v4  ;;  %v1514_v23 = vpop.f32.mrf.mxu2  ;;  %v1569_v48 = vpop.f32.mrf.mxu3 }
  0xbe   :  { %v352_v6 = vpop.f32.mrf.mxu0  ;;  %v1484_v7 = vpop.f32.mrf.mxu1  ;;  %v1194_v24 = vpack.c.bf16 %v1514_v23, %v1504_v20  ;;  %v1234_v50 = vpack.c.bf16 %v1569_v48, %v1557_v44 }
  0xbf   :  { %v506_v8 = vpack.c.bf16 %v352_v6, %v352_v6 }
  0xc0   :  { %1282 = vst [vmem:[%s1811_s2 + $0x88] sm:$0xff] %v1194_v24  }
  0xc1   :  { %v634_v11 = vunpack.c.l.bf16 %v506_v8  ;;  %1290 = vst [vmem:[%s1811_s2 + $0xc8] sm:$0xff] %v1234_v50  }
  0xc3   :  { %v1496_v13 = vadd.f32 %v696_v3, %v634_v11  ;;  %v768_v14 = vmul.f32 %v634_v11, %v634_v11 }
  0xc5   :  { %v1498_v15 = vadd.f32 %v830_v5, %v768_v14  ;;  %v1525_v29 = vpop.f32.mrf.mxu2  ;;  %v1587_v57 = vpop.f32.mrf.mxu3 }
  0xc6   :  { %v354_v16 = vpop.f32.mrf.mxu0  ;;  %v1500_v17 = vpop.f32.mrf.mxu1 }
  0xc7   :  { %v1119_v18 = vpack.c.bf16 %v354_v16, %v352_v6  ;;  %v1159_v19 = vpack.c.bf16 %v1500_v17, %v1484_v7  ;;  %v507_v58 = vpack.c.bf16 %v354_v16, %v354_v16 }
  0xc9   :  { %1267 = vst [vmem:[%s1811_s2 + $0x10] sm:$0xff] %v1119_v18   ;;  %v635_v60 = vunpack.c.l.bf16 %v507_v58 }
  0xca   :  { %1275 = vst [vmem:[%s1811_s2 + $0x50] sm:$0xff] %v1159_v19  }
  0xcb   :  { %v769_v10 = vmul.f32 %v635_v60, %v635_v60  ;;  %v698_v18 = vadd.f32 %v1496_v13, %v635_v60 }
  0xcd   :  { %v1537_v33 = vpop.f32.mrf.mxu2  ;;  %v1599_v3 = vpop.f32.mrf.mxu3  ;;  %v832_v19 = vadd.f32 %v1498_v15, %v769_v10 }
  0xce   :  { %v357_v21 = vpop.f32.mrf.mxu0  ;;  %v1512_v22 = vpop.f32.mrf.mxu1  ;;  %v1199_v35 = vpack.c.bf16 %v1537_v33, %v1525_v29  ;;  %v1239_v5 = vpack.c.bf16 %v1599_v3, %v1587_v57 }
  0xcf   :  { %v508_v59 = vpack.c.bf16 %v357_v21, %v357_v21 }
  0xd0   :  { %1283 = vst [vmem:[%s1811_s2 + $0x90] sm:$0xff] %v1199_v35  }
  0xd1   :  { %v636_v6 = vunpack.c.l.bf16 %v508_v59  ;;  %1291 = vst [vmem:[%s1811_s2 + $0xd0] sm:$0xff] %v1239_v5  }
  0xd3   :  { %v770_v14 = vmul.f32 %v636_v6, %v636_v6 }
  0xd5   :  { %v1555_v43 = vpop.f32.mrf.mxu2 }
  0xd6   :  { %v359_v25 = vpop.f32.mrf.mxu0  ;;  %v1521_v26 = vpop.f32.mrf.mxu1 }
  0xd7   :  { %v1124_v27 = vpack.c.bf16 %v359_v25, %v357_v21  ;;  %v1164_v28 = vpack.c.bf16 %v1521_v26, %v1512_v22  ;;  %v509_v0 = vpack.c.bf16 %v359_v25, %v359_v25 }
  0xd9   :  { %1268 = vst [vmem:[%s1811_s2 + $0x18] sm:$0xff] %v1124_v27   ;;  %v637_v11 = vunpack.c.l.bf16 %v509_v0 }
  0xda   :  { %1276 = vst [vmem:[%s1811_s2 + $0x58] sm:$0xff] %v1164_v28  }
  0xdb   :  { %v771_v27 = vmul.f32 %v637_v11, %v637_v11 }
  0xdd   :  { %v1567_v47 = vpop.f32.mrf.mxu2 }
  0xde   :  { %v362_v31 = vpop.f32.mrf.mxu0  ;;  %v1535_v32 = vpop.f32.mrf.mxu1  ;;  %v1204_v49 = vpack.c.bf16 %v1567_v47, %v1555_v43 }
  0xdf   :  { %v510_v8 = vpack.c.bf16 %v362_v31, %v362_v31 }
  0xe0   :  { %1284 = vst [vmem:[%s1811_s2 + $0x98] sm:$0xff] %v1204_v49   ;;  %v833_v49 = vadd.f32 %v832_v19, %v770_v14 }
  0xe1   :  { %v638_v16 = vunpack.c.l.bf16 %v510_v8 }
  0xe3   :  { %v772_v13 = vmul.f32 %v638_v16, %v638_v16 }
  0xe5   :  { %v1585_v56 = vpop.f32.mrf.mxu2 }
  0xe6   :  { %v364_v38 = vpop.f32.mrf.mxu0  ;;  %v1551_v39 = vpop.f32.mrf.mxu1 }
  0xe7   :  { %v1129_v40 = vpack.c.bf16 %v364_v38, %v362_v31  ;;  %v1169_v41 = vpack.c.bf16 %v1551_v39, %v1535_v32  ;;  %v511_v12 = vpack.c.bf16 %v364_v38, %v364_v38  ;;  %v1619_v38 = vpop.f32.mrf.mxu3 }
  0xe9   :  { %1269 = vst [vmem:[%s1811_s2 + $0x20] sm:$0xff] %v1129_v40   ;;  %v639_v28 = vunpack.c.l.bf16 %v511_v12  ;;  %v699_v40 = vadd.f32 %v698_v18, %v636_v6 }
  0xea   :  { %1277 = vst [vmem:[%s1811_s2 + $0x60] sm:$0xff] %v1169_v41  }
  0xeb   :  { %v700_v15 = vadd.f32 %v699_v40, %v637_v11 }
  0xed   :  { %v1597_v2 = vpop.f32.mrf.mxu2  ;;  %v701_v58 = vadd.f32 %v700_v15, %v638_v16 }
  0xee   :  { %v367_v45 = vpop.f32.mrf.mxu0  ;;  %v1565_v46 = vpop.f32.mrf.mxu1  ;;  %v1209_v4 = vpack.c.bf16 %v1597_v2, %v1585_v56 }
  0xef   :  { %v512_v21 = vpack.c.bf16 %v367_v45, %v367_v45 }
  0xf0   :  { %1285 = vst [vmem:[%s1811_s2 + $0xa0] sm:$0xff] %v1209_v4  }
  0xf5   :  { %v1617_v36 = vpop.f32.mrf.mxu2 }
  0xf6   :  { %v369_v51 = vpop.f32.mrf.mxu0  ;;  %v1581_v52 = vpop.f32.mrf.mxu1 }
  0xf7   :  { %v1134_v54 = vpack.c.bf16 %v369_v51, %v367_v45  ;;  %v1174_v55 = vpack.c.bf16 %v1581_v52, %v1565_v46  ;;  %v513_v41 = vpack.c.bf16 %v369_v51, %v369_v51  ;;  %v640_v45 = vunpack.c.l.bf16 %v512_v21 }
  0xf8   :  { %v702_v51 = vadd.f32 %v701_v58, %v639_v28 }
  0xf9   :  { %1270 = vst [vmem:[%s1811_s2 + $0x28] sm:$0xff] %v1134_v54   ;;  %v834_v54 = vadd.f32 %v833_v49, %v771_v27  ;;  %v641_v59 = vunpack.c.l.bf16 %v513_v41  ;;  %v774_v4 = vmul.f32 %v640_v45, %v640_v45 }
  0xfa   :  { %1278 = vst [vmem:[%s1811_s2 + $0x68] sm:$0xff] %v1174_v55   ;;  %v773_v55 = vmul.f32 %v639_v28, %v639_v28  ;;  %v703_v14 = vadd.f32 %v702_v51, %v640_v45 }
  0xfb   :  { %v835_v60 = vadd.f32 %v834_v54, %v772_v13  ;;  %v775_v18 = vmul.f32 %v641_v59, %v641_v59  ;;  %v519_v13 = vpack.c.bf16 %v1457_v42, %v1457_v42 }
  0xfc   :  { %v704_v27 = vadd.f32 %v703_v14, %v641_v59 }
  0xfd   :  { %v836_v10 = vadd.f32 %v835_v60, %v773_v55  ;;  %v1629_v12 = vpop.f32.mrf.mxu2 }
  0xfe   :  { %v372_v62 = vpop.f32.mrf.mxu0  ;;  %v1595_v63 = vpop.f32.mrf.mxu1  ;;  %v1214_v16 = vpack.c.bf16 %v1629_v12, %v1617_v36 }
  0xff   :  { %v514_v50 = vpack.c.bf16 %v372_v62, %v372_v62 }
 0x100   :  { %1286 = vst [vmem:[%s1811_s2 + $0xa8] sm:$0xff] %v1214_v16  }
 0x101   :  { %v642_v5 = vunpack.c.l.bf16 %v514_v50 }
 0x103   :  { %v776_v28 = vmul.f32 %v642_v5, %v642_v5  ;;  %v705_v41 = vadd.f32 %v704_v27, %v642_v5 }
 0x106   :  { %v374_v24 = vpop.f32.mrf.mxu0  ;;  %v1613_v25 = vpop.f32.mrf.mxu1 }
 0x107   :  { %v1139_v31 = vpack.c.bf16 %v374_v24, %v372_v62  ;;  %v1179_v35 = vpack.c.bf16 %v1613_v25, %v1595_v63  ;;  %v515_v0 = vpack.c.bf16 %v374_v24, %v374_v24  ;;  %v1631_v62 = vpop.f32.mrf.mxu3  ;;  %v837_v24 = vadd.f32 %v836_v10, %v774_v4 }
 0x108   :  { %v1244_v19 = vpack.c.bf16 %v1631_v62, %v1619_v38  ;;  %v520_v4 = vpack.c.bf16 %v1467_v53, %v1467_v53  ;;  %v522_v53 = vpack.c.bf16 %v1484_v7, %v1484_v7 }
 0x109   :  { %1271 = vst [vmem:[%s1811_s2 + $0x30] sm:$0xff] %v1139_v31   ;;  %v643_v21 = vunpack.c.l.bf16 %v515_v0  ;;  %v838_v40 = vadd.f32 %v837_v24, %v775_v18  ;;  %v1651_v0 = vpop.f32.mrf.mxu2 }
 0x10a   :  { %1279 = vst [vmem:[%s1811_s2 + $0x70] sm:$0xff] %v1179_v35   ;;  %v518_v35 = vpack.c.bf16 %v1449_v37, %v1449_v37 }
 0x10b   :  { %1292 = vst [vmem:[%s1811_s2 + $0xd8] sm:$0xff] %v1244_v19   ;;  %v777_v49 = vmul.f32 %v643_v21, %v643_v21  ;;  %v839_v15 = vadd.f32 %v838_v40, %v776_v28  ;;  %v706_v45 = vadd.f32 %v705_v41, %v643_v21  ;;  %v648_v21 = vunpack.c.l.bf16 %v520_v4 }
 0x10c   :  { %v646_v51 = vunpack.c.l.bf16 %v518_v35  ;;  %v523_v28 = vpack.c.bf16 %v1500_v17, %v1500_v17 }
 0x10d   :  { %v840_v42 = vadd.f32 %v839_v15, %v777_v49 }
 0x10e   :  { %v377_v6 = vpop.f32.mrf.mxu0  ;;  %v1627_v8 = vpop.f32.mrf.mxu1  ;;  %v780_v19 = vmul.f32 %v646_v51, %v646_v51 }
 0x10f   :  { %v516_v11 = vpack.c.bf16 %v377_v6, %v377_v6  ;;  %v1653_v37 = vpop.f32.mrf.mxu3 }
 0x111   :  { %v644_v31 = vunpack.c.l.bf16 %v516_v11  ;;  %v647_v11 = vunpack.c.l.bf16 %v519_v13  ;;  %v1669_v49 = vpop.f32.mrf.mxu2  ;;  %v650_v13 = vunpack.c.l.bf16 %v522_v53 }
 0x112   :  { %v1219_v15 = vpack.c.bf16 %v1669_v49, %v1651_v0 }
 0x113   :  { %v778_v55 = vmul.f32 %v644_v31, %v644_v31  ;;  %v707_v5 = vadd.f32 %v706_v45, %v644_v31  ;;  %v781_v31 = vmul.f32 %v647_v11, %v647_v11  ;;  %v782_v45 = vmul.f32 %v648_v21, %v648_v21 }
 0x114   :  { %1287 = vst [vmem:[%s1811_s2 + $0xb0] sm:$0xff] %v1219_v15  }
 0x115   :  { %v841_v14 = vadd.f32 %v840_v42, %v778_v55  ;;  %v784_v42 = vmul.f32 %v650_v13, %v650_v13 }
 0x116   :  { %v379_v50 = vpop.f32.mrf.mxu0  ;;  %v1647_v54 = vpop.f32.mrf.mxu1 }
 0x117   :  { %v517_v58 = vpack.c.bf16 %v379_v50, %v379_v50  ;;  %v1144_v59 = vpack.c.bf16 %v379_v50, %v377_v6  ;;  %v1184_v60 = vpack.c.bf16 %v1647_v54, %v1627_v8  ;;  %v521_v6 = vpack.c.bf16 %v1472_v61, %v1472_v61  ;;  %v1671_v61 = vpop.f32.mrf.mxu3 }
 0x118   :  { %v1249_v7 = vpack.c.bf16 %v1671_v61, %v1653_v37  ;;  %v524_v50 = vpack.c.bf16 %v1512_v22, %v1512_v22  ;;  %v526_v22 = vpack.c.bf16 %v1535_v32, %v1535_v32 }
 0x119   :  { %1272 = vst [vmem:[%s1811_s2 + $0x38] sm:$0xff] %v1144_v59   ;;  %v645_v10 = vunpack.c.l.bf16 %v517_v58  ;;  %v649_v35 = vunpack.c.l.bf16 %v521_v6  ;;  %v651_v58 = vunpack.c.l.bf16 %v523_v28  ;;  %v1691_v53 = vpop.f32.mrf.mxu2 }
 0x11a   :  { %1280 = vst [vmem:[%s1811_s2 + $0x78] sm:$0xff] %v1184_v60   ;;  %v525_v60 = vpack.c.bf16 %v1521_v26, %v1521_v26 }
 0x11b   :  { %v708_v18 = vadd.f32 %v707_v5, %v645_v10  ;;  %v779_v16 = vmul.f32 %v645_v10, %v645_v10  ;;  %v783_v59 = vmul.f32 %v649_v35, %v649_v35  ;;  %1293 = vst [vmem:[%s1811_s2 + $0xe0] sm:$0xff] %v1249_v7   ;;  %v652_v5 = vunpack.c.l.bf16 %v524_v50 }
 0x11c   :  { %v785_v6 = vmul.f32 %v651_v58, %v651_v58  ;;  %v530_v7 = vpack.c.bf16 %v1595_v63, %v1595_v63 }
 0x11d   :  { %v709_v24 = vadd.f32 %v708_v18, %v646_v51  ;;  %v842_v27 = vadd.f32 %v841_v14, %v779_v16  ;;  %v653_v14 = vunpack.c.l.bf16 %v525_v60  ;;  %v527_v18 = vpack.c.bf16 %v1551_v39, %v1551_v39 }
 0x11f   :  { %v710_v40 = vadd.f32 %v709_v24, %v647_v11  ;;  %v843_v41 = vadd.f32 %v842_v27, %v780_v19  ;;  %v1693_v19 = vpop.f32.mrf.mxu3  ;;  %v786_v24 = vmul.f32 %v652_v5, %v652_v5  ;;  %v654_v27 = vunpack.c.l.bf16 %v526_v22 }
 0x121   :  { %v711_v17 = vadd.f32 %v710_v40, %v648_v21  ;;  %v844_v55 = vadd.f32 %v843_v41, %v781_v31  ;;  %v528_v21 = vpack.c.bf16 %v1565_v46, %v1565_v46  ;;  %v529_v31 = vpack.c.bf16 %v1581_v52, %v1581_v52  ;;  %v1703_v60 = vpop.f32.mrf.mxu2 }
 0x122   :  { %v655_v40 = vunpack.c.l.bf16 %v527_v18  ;;  %v788_v15 = vmul.f32 %v654_v27, %v654_v27  ;;  %v533_v18 = vpack.c.bf16 %v1647_v54, %v1647_v54 }
 0x123   :  { %v712_v51 = vadd.f32 %v711_v17, %v649_v35  ;;  %v845_v4 = vadd.f32 %v844_v55, %v782_v45  ;;  %v787_v35 = vmul.f32 %v653_v14, %v653_v14  ;;  %v657_v17 = vunpack.c.l.bf16 %v529_v31 }
 0x124   :  { %v789_v46 = vmul.f32 %v655_v40, %v655_v40 }
 0x125   :  { %v713_v10 = vadd.f32 %v712_v51, %v650_v13  ;;  %v846_v11 = vadd.f32 %v845_v4, %v783_v59  ;;  %v656_v13 = vunpack.c.l.bf16 %v528_v21  ;;  %v531_v59 = vpack.c.bf16 %v1613_v25, %v1613_v25 }
 0x126   :  { %v1224_v4 = vpack.c.bf16 %v1703_v60, %v1691_v53 }
 0x127   :  { %v714_v16 = vadd.f32 %v713_v10, %v651_v58  ;;  %v847_v26 = vadd.f32 %v846_v11, %v784_v42  ;;  %v1705_v52 = vpop.f32.mrf.mxu3  ;;  %v790_v51 = vmul.f32 %v656_v13, %v656_v13  ;;  %v658_v42 = vunpack.c.l.bf16 %v530_v7 }
 0x128   :  { %v1254_v63 = vpack.c.bf16 %v1705_v52, %v1693_v19  ;;  %v532_v10 = vpack.c.bf16 %v1627_v8, %v1627_v8  ;;  %v791_v11 = vmul.f32 %v657_v17, %v657_v17  ;;  %1288 = vst [vmem:[%s1811_s2 + $0xb8] sm:$0xff] %v1224_v4   ;;  %v537_v7 = vpack.c.bf16 %v1514_v23, %v1514_v23 }
 0x129   :  { %v848_v28 = vadd.f32 %v847_v26, %v785_v6  ;;  %v715_v32 = vadd.f32 %v714_v16, %v652_v5  ;;  %v534_v16 = vpack.c.bf16 %v1476_v1, %v1476_v1  ;;  %v792_v8 = vmul.f32 %v658_v42, %v658_v42 }
 0x12a   :  { %1294 = vst [vmem:[%s1811_s2 + $0xe8] sm:$0xff] %v1254_v63   ;;  %v665_v4 = vunpack.c.l.bf16 %v537_v7 }
 0x12b   :  { %v716_v41 = vadd.f32 %v715_v32, %v653_v14  ;;  %v849_v39 = vadd.f32 %v848_v28, %v786_v24  ;;  %v659_v14 = vunpack.c.l.bf16 %v531_v59  ;;  %v660_v24 = vunpack.c.l.bf16 %v532_v10 }
 0x12c   :  { %v662_v54 = vunpack.c.l.bf16 %v534_v16 }
 0x12d   :  { %v717_v45 = vadd.f32 %v716_v41, %v654_v27  ;;  %v850_v50 = vadd.f32 %v849_v39, %v787_v35  ;;  %v535_v27 = vpack.c.bf16 %v1486_v9, %v1486_v9  ;;  %v793_v31 = vmul.f32 %v659_v14, %v659_v14 }
 0x12e   :  { %v661_v35 = vunpack.c.l.bf16 %v533_v18  ;;  %v536_v41 = vpack.c.bf16 %v1504_v20, %v1504_v20  ;;  %v794_v1 = vmul.f32 %v660_v24, %v660_v24  ;;  %v539_v20 = vpack.c.bf16 %v1537_v33, %v1537_v33 }
 0x12f   :  { %v718_v55 = vadd.f32 %v717_v45, %v655_v40  ;;  %v851_v58 = vadd.f32 %v850_v50, %v788_v15  ;;  %v1725_v40 = vpop.f32.mrf.mxu3  ;;  %v663_v15 = vunpack.c.l.bf16 %v535_v27  ;;  %v799_v33 = vmul.f32 %v665_v4, %v665_v4 }
 0x130   :  { %v795_v9 = vmul.f32 %v661_v35, %v661_v35 }
 0x131   :  { %v719_v5 = vadd.f32 %v718_v55, %v656_v13  ;;  %v852_v22 = vadd.f32 %v851_v58, %v789_v46  ;;  %v796_v46 = vmul.f32 %v662_v54, %v662_v54  ;;  %v664_v55 = vunpack.c.l.bf16 %v536_v41 }
 0x133   :  { %v720_v25 = vadd.f32 %v719_v5, %v657_v17  ;;  %v853_v6 = vadd.f32 %v852_v22, %v790_v51  ;;  %v538_v17 = vpack.c.bf16 %v1525_v29, %v1525_v29  ;;  %v797_v51 = vmul.f32 %v663_v15, %v663_v15 }
 0x134   :  { %v798_v10 = vmul.f32 %v664_v55, %v664_v55  ;;  %v540_v29 = vpack.c.bf16 %v1555_v43, %v1555_v43 }
 0x135   :  { %v721_v26 = vadd.f32 %v720_v25, %v658_v42  ;;  %v854_v21 = vadd.f32 %v853_v6, %v791_v11  ;;  %v666_v23 = vunpack.c.l.bf16 %v538_v17  ;;  %v667_v6 = vunpack.c.l.bf16 %v539_v20 }
 0x137   :  { %v855_v28 = vadd.f32 %v854_v21, %v792_v8  ;;  %v722_v32 = vadd.f32 %v721_v26, %v659_v14  ;;  %v1735_v5 = vpop.f32.mrf.mxu3  ;;  %v541_v14 = vpack.c.bf16 %v1567_v47, %v1567_v47  ;;  %v800_v26 = vmul.f32 %v666_v23, %v666_v23 }
 0x138   :  { %v1259_v22 = vpack.c.bf16 %v1735_v5, %v1725_v40  ;;  %v668_v8 = vunpack.c.l.bf16 %v540_v29  ;;  %v542_v21 = vpack.c.bf16 %v1585_v56, %v1585_v56  ;;  %v801_v27 = vmul.f32 %v667_v6, %v667_v6 }
 0x139   :  { %v856_v39 = vadd.f32 %v855_v28, %v793_v31  ;;  %v723_v13 = vadd.f32 %v722_v32, %v660_v24  ;;  %v669_v28 = vunpack.c.l.bf16 %v541_v14  ;;  %v543_v32 = vpack.c.bf16 %v1597_v2, %v1597_v2 }
 0x13a   :  { %1295 = vst [vmem:[%s1811_s2 + $0xf0] sm:$0xff] %v1259_v22   ;;  %v544_v47 = vpack.c.bf16 %v1617_v36, %v1617_v36  ;;  %v802_v41 = vmul.f32 %v668_v8, %v668_v8  ;;  %v545_v56 = vpack.c.bf16 %v1629_v12, %v1629_v12 }
 0x13b   :  { %v857_v45 = vadd.f32 %v856_v39, %v794_v1  ;;  %v724_v50 = vadd.f32 %v723_v13, %v661_v35  ;;  %v670_v39 = vunpack.c.l.bf16 %v542_v21  ;;  %v671_v7 = vunpack.c.l.bf16 %v543_v32 }
 0x13d   :  { %v725_v58 = vadd.f32 %v724_v50, %v662_v54  ;;  %v858_v59 = vadd.f32 %v857_v45, %v795_v9  ;;  %v672_v9 = vunpack.c.l.bf16 %v544_v47  ;;  %v804_v2 = vmul.f32 %v670_v39, %v670_v39 }
 0x13e   :  { %v805_v36 = vmul.f32 %v671_v7, %v671_v7 }
 0x13f   :  { %v726_v63 = vadd.f32 %v725_v58, %v663_v15  ;;  %v859_v42 = vadd.f32 %v858_v59, %v796_v46  ;;  %v1750_v54 = vpop.f32.mrf.mxu3  ;;  %v803_v15 = vmul.f32 %v669_v28, %v669_v28  ;;  %v673_v58 = vunpack.c.l.bf16 %v545_v56 }
 0x140   :  { %v806_v12 = vmul.f32 %v672_v9, %v672_v9 }
 0x141   :  { %v727_v11 = vadd.f32 %v726_v63, %v664_v55  ;;  %v860_v25 = vadd.f32 %v859_v42, %v797_v51  ;;  %v546_v55 = vpack.c.bf16 %v1651_v0, %v1651_v0  ;;  %v547_v51 = vpack.c.bf16 %v1669_v49, %v1669_v49 }
 0x142   :  { %v807_v0 = vmul.f32 %v673_v58, %v673_v58 }
 0x143   :  { %v728_v18 = vadd.f32 %v727_v11, %v665_v4  ;;  %v861_v16 = vadd.f32 %v860_v25, %v798_v10  ;;  %v674_v22 = vunpack.c.l.bf16 %v546_v55  ;;  %v548_v10 = vpack.c.bf16 %v1691_v53, %v1691_v53 }
 0x144   :  { %v675_v49 = vunpack.c.l.bf16 %v547_v51  ;;  %v549_v25 = vpack.c.bf16 %v1703_v60, %v1703_v60  ;;  %v551_v53 = vpack.c.bf16 %v1539_v34, %v1539_v34  ;;  %v554_v34 = vpack.c.bf16 %v1587_v57, %v1587_v57 }
 0x145   :  { %v729_v24 = vadd.f32 %v728_v18, %v666_v23  ;;  %v862_v43 = vadd.f32 %v861_v16, %v799_v33  ;;  %v808_v18 = vmul.f32 %v674_v22, %v674_v22  ;;  %v676_v16 = vunpack.c.l.bf16 %v548_v10 }
 0x146   :  { %v809_v21 = vmul.f32 %v675_v49, %v675_v49  ;;  %v558_v51 = vpack.c.bf16 %v1653_v37, %v1653_v37 }
 0x147   :  { %v730_v31 = vadd.f32 %v729_v24, %v667_v6  ;;  %v863_v35 = vadd.f32 %v862_v43, %v800_v26  ;;  %v1760_v4 = vpop.f32.mrf.mxu3  ;;  %v550_v6 = vpack.c.bf16 %v1527_v30, %v1527_v30  ;;  %v677_v24 = vunpack.c.l.bf16 %v549_v25 }
 0x148   :  { %v1264_v63 = vpack.c.bf16 %v1760_v4, %v1750_v54  ;;  %v810_v32 = vmul.f32 %v676_v16, %v676_v16  ;;  %v553_v30 = vpack.c.bf16 %v1569_v48, %v1569_v48  ;;  %v556_v48 = vpack.c.bf16 %v1619_v38, %v1619_v38 }
 0x149   :  { %v864_v13 = vadd.f32 %v863_v35, %v801_v27  ;;  %v731_v1 = vadd.f32 %v730_v31, %v668_v8  ;;  %v678_v43 = vunpack.c.l.bf16 %v550_v6  ;;  %v552_v27 = vpack.c.bf16 %v1557_v44, %v1557_v44 }
 0x14a   :  { %1296 = vst [vmem:[%s1811_s2 + $0xf8] sm:$0xff] %v1264_v63   ;;  %v679_v31 = vunpack.c.l.bf16 %v551_v53  ;;  %v555_v44 = vpack.c.bf16 %v1599_v3, %v1599_v3  ;;  %v684_v3 = vunpack.c.l.bf16 %v556_v48  ;;  %v559_v38 = vpack.c.bf16 %v1671_v61, %v1671_v61 }
 0x14b   :  { %v732_v45 = vadd.f32 %v731_v1, %v669_v28  ;;  %v865_v50 = vadd.f32 %v864_v13, %v802_v41  ;;  %v811_v41 = vmul.f32 %v677_v24, %v677_v24  ;;  %v680_v13 = vunpack.c.l.bf16 %v552_v27 }
 0x14c   :  { %v683_v55 = vunpack.c.l.bf16 %v555_v44  ;;  %v561_v25 = vpack.c.bf16 %v1705_v52, %v1705_v52  ;;  %v687_v6 = vunpack.c.l.bf16 %v559_v38 }
 0x14d   :  { %v733_v17 = vadd.f32 %v732_v45, %v670_v39  ;;  %v866_v46 = vadd.f32 %v865_v50, %v803_v15  ;;  %v812_v39 = vmul.f32 %v678_v43, %v678_v43  ;;  %v813_v15 = vmul.f32 %v679_v31, %v679_v31 }
 0x14f   :  { %v734_v59 = vadd.f32 %v733_v17, %v671_v7  ;;  %v867_v20 = vadd.f32 %v866_v46, %v804_v2  ;;  %v681_v7 = vunpack.c.l.bf16 %v553_v30  ;;  %v814_v2 = vmul.f32 %v680_v13, %v680_v13 }
 0x151   :  { %v735_v42 = vadd.f32 %v734_v59, %v672_v9  ;;  %v868_v23 = vadd.f32 %v867_v20, %v805_v36  ;;  %v682_v9 = vunpack.c.l.bf16 %v554_v34  ;;  %v815_v57 = vmul.f32 %v681_v7, %v681_v7 }
 0x153   :  { %v736_v29 = vadd.f32 %v735_v42, %v673_v58  ;;  %v869_v11 = vadd.f32 %v868_v23, %v806_v12  ;;  %v557_v58 = vpack.c.bf16 %v1631_v62, %v1631_v62  ;;  %v816_v20 = vmul.f32 %v682_v9, %v682_v9 }
 0x154   :  { %v817_v42 = vmul.f32 %v683_v55, %v683_v55  ;;  %v818_v62 = vmul.f32 %v684_v3, %v684_v3 }
 0x155   :  { %v870_v33 = vadd.f32 %v869_v11, %v807_v0  ;;  %v737_v14 = vadd.f32 %v736_v29, %v674_v22  ;;  %v685_v23 = vunpack.c.l.bf16 %v557_v58  ;;  %v560_v0 = vpack.c.bf16 %v1693_v19, %v1693_v19 }
 0x156   :  { %v686_v29 = vunpack.c.l.bf16 %v558_v51  ;;  %v821_v19 = vmul.f32 %v687_v6, %v687_v6 }
 0x157   :  { %v871_v26 = vadd.f32 %v870_v33, %v808_v18  ;;  %v738_v8 = vadd.f32 %v737_v14, %v675_v49  ;;  %v819_v37 = vmul.f32 %v685_v23, %v685_v23  ;;  %v688_v18 = vunpack.c.l.bf16 %v560_v0 }
 0x159   :  { %v872_v28 = vadd.f32 %v871_v26, %v809_v21  ;;  %v739_v60 = vadd.f32 %v738_v8, %v676_v16  ;;  %v820_v16 = vmul.f32 %v686_v29, %v686_v29  ;;  %v562_v26 = vpack.c.bf16 %v1725_v40, %v1725_v40 }
 0x15a   :  { %v689_v8 = vunpack.c.l.bf16 %v561_v25  ;;  %v822_v27 = vmul.f32 %v688_v18, %v688_v18  ;;  %v565_v40 = vpack.c.bf16 %v1760_v4, %v1760_v4 }
 0x15b   :  { %v873_v35 = vadd.f32 %v872_v28, %v810_v32  ;;  %v740_v47 = vadd.f32 %v739_v60, %v677_v24  ;;  %v690_v60 = vunpack.c.l.bf16 %v562_v26  ;;  %v564_v32 = vpack.c.bf16 %v1750_v54, %v1750_v54 }
 0x15c   :  { %v693_v44 = vunpack.c.l.bf16 %v565_v40 }
 0x15d   :  { %v741_v1 = vadd.f32 %v740_v47, %v678_v43  ;;  %v874_v56 = vadd.f32 %v873_v35, %v811_v41  ;;  %v563_v43 = vpack.c.bf16 %v1735_v5, %v1735_v5 }
 0x15f   :  { %v742_v45 = vadd.f32 %v741_v1, %v679_v31  ;;  %v875_v50 = vadd.f32 %v874_v56, %v812_v39  ;;  %v823_v31 = vmul.f32 %v689_v8, %v689_v8  ;;  %v691_v47 = vunpack.c.l.bf16 %v563_v43 }
 0x160   :  { %v824_v39 = vmul.f32 %v690_v60, %v690_v60 }
 0x161   :  { %v743_v17 = vadd.f32 %v742_v45, %v680_v13  ;;  %v876_v46 = vadd.f32 %v875_v50, %v813_v15  ;;  %v692_v13 = vunpack.c.l.bf16 %v564_v32  ;;  %v825_v56 = vmul.f32 %v691_v47, %v691_v47 }
 0x163   :  { %v744_v36 = vadd.f32 %v743_v17, %v681_v7  ;;  %v877_v59 = vadd.f32 %v876_v46, %v814_v2  ;;  %v826_v45 = vmul.f32 %v692_v13, %v692_v13 }
 0x165   :  { %v745_v12 = vadd.f32 %v744_v36, %v682_v9  ;;  %v878_v63 = vadd.f32 %v877_v59, %v815_v57  ;;  %v827_v9 = vmul.f32 %v693_v44, %v693_v44 }
 0x167   :  { %v746_v22 = vadd.f32 %v745_v12, %v683_v55  ;;  %v879_v10 = vadd.f32 %v878_v63, %v816_v20 }
 0x169   :  { %v880_v11 = vadd.f32 %v879_v10, %v817_v42  ;;  %v747_v49 = vadd.f32 %v746_v22, %v684_v3 }
 0x16b   :  { %v748_v33 = vadd.f32 %v747_v49, %v685_v23  ;;  %v881_v14 = vadd.f32 %v880_v11, %v818_v62 }
 0x16d   :  { %v749_v53 = vadd.f32 %v748_v33, %v686_v29  ;;  %v882_v61 = vadd.f32 %v881_v14, %v819_v37 }
 0x16f   :  { %v750_v21 = vadd.f32 %v749_v53, %v687_v6  ;;  %v883_v24 = vadd.f32 %v882_v61, %v820_v16 }
 0x171   :  { %v751_v52 = vadd.f32 %v750_v21, %v688_v18  ;;  %v884_v28 = vadd.f32 %v883_v24, %v821_v19 }
 0x173   :  { %v752_v30 = vadd.f32 %v751_v52, %v689_v8  ;;  %v885_v35 = vadd.f32 %v884_v28, %v822_v27 }
 0x175   :  { %v886_v41 = vadd.f32 %v885_v35, %v823_v31  ;;  %v753_v34 = vadd.f32 %v752_v30, %v690_v60 }
 0x177   :  { %v887_v1 = vadd.f32 %v886_v41, %v824_v39  ;;  %v754_v5 = vadd.f32 %v753_v34, %v691_v47 }
 0x179   :  { %v888_v15 = vadd.f32 %v887_v1, %v825_v56  ;;  %v755_v7 = vadd.f32 %v754_v5, %v692_v13 }
 0x17b   :  { %v889_v50 = vadd.f32 %v888_v15, %v826_v45  ;;  %v756_v54 = vadd.f32 %v755_v7, %v693_v44 }
 0x17d   :  { %v757_v2 = vrot.slane %v756_v54, 4  ;;  %v890_v48 = vadd.f32 %v889_v50, %v827_v9 }
 0x17f   :  { %v758_v17 = vadd.f32 %v757_v2, %v756_v54  ;;  %v891_v46 = vrot.slane %v890_v48, 4 }
 0x181   :  { %v759_v55 = vrot.slane %v758_v17, 2  ;;  %v892_v4 = vadd.f32 %v891_v46, %v890_v48 }
 0x183   :  { %v760_v57 = vadd.f32 %v759_v55, %v758_v17  ;;  %v893_v58 = vrot.slane %v892_v4, 2 }
 0x185   :  { %v761_v36 = vrot.slane %v760_v57, 1  ;;  %v894_v59 = vadd.f32 %v893_v58, %v892_v4 }
 0x187   :  { %v762_v20 = vadd.f32 %v761_v36, %v760_v57  ;;  %v895_v3 = vrot.slane %v894_v59, 1 }
 0x189   :  { %763 = vst [vmem:[%s1812_s3] sm:$0x1] %v762_v20  ;;  %v896_v51 = vadd.f32 %v895_v3, %v894_v59 }
 0x18b   :  { %897 = vst [vmem:[%s1812_s3 + $0x1] sm:$0x1] %v896_v51 }

// kernel: corblock_s_forward.15
= control target key start
LH: loop header
LB: loop body
LE: loop exit
PB: predicated region body
PF: predicated region fallthrough
CT: control target
= control target key end

     0   :  { %s1133_s12 = smov 0   ;;  %s1720_s0 = inlined_call_operand.vmem [shape: bf16[2,16,16,128], index: 0, kind: input, shape index: {}]   ;;  %s1721_s1 = inlined_call_operand.vmem [shape: f32[1,128], index: 1, kind: input, shape index: {}]   ;;  %s1722_s2 = inlined_call_operand.vmem [shape: f32[1,128], index: 2, kind: input, shape index: {}]   ;;  %s1723_s3 = inlined_call_operand.vmem [shape: bf16[2,18,18,128], index: 3, kind: output, shape index: {}]  }
   0x1 LB: > { %s922_s13 = sadd.s32 4294967295, %s1110_s12   ;;  %p926_p0 = scmp.ge.s32.totalorder %s1110_s12, 1  ;;  %s1110_s12 = sphi %s1133_s12, %s13_s12  }
   0x2   : > { %p137_p1 = scmp.lt.s32.totalorder %s1110_s12, 3 }
   0x4   : > { %p138_p2 = pnand %p926_p0, %p137_p1 }
   0x5   : > { %p161_p3 = scmp.lt.s32.totalorder (!%p138_p2), %s922_s13, 1 }
   0x6   : > { %141 = sbr.rel (%p138_p2) target bundleno = 124 (0x7c), region = 32 }
   0xb   : > { %s1731_s13 = smov (!%p161_p3, %s922_s13), 1  ;;  %v1112_v0 = vmov 0   ;;  %v1179_v5 = vld [vmem:[%s1721_s1] ss:$0 sm:$0xff]  ;;  %vm750_vm0 = vcmask 1043456   ;;  %vm757_vm6 = vcmask 1040384  }
   0xc   : > { %s1092_s14 = smul.u32 216, %s1731_s13  ;;  %s1012_s18 = sshll.u32 %s1731_s13, 7  ;;  %v1189_v12 = vld [vmem:[%s1722_s2] ss:$0 sm:$0xff]  ;;  %vm751_vm1 = vsmask.f32 7938 }
   0xd   : > { %s1163_s21 = scalar_lea.vmem %s1720_s0, %s1012_s18  ;;  %vm1244_vm2 = vmand %vm750_vm0, %vm751_vm1  ;;  %vm426_vm3 = vsmask.f32 256  ;;  %vm427_vm4 = vsmask.f32 4368 }
   0xe   : > { %s1144_s17 = scalar_lea.vmem %s1723_s3, %s1092_s14  ;;  %v1014_v1 = vld [vmem:[%s1163_s21] sm:$0xff]   ;;  %v1077_v2 = vld [vmem:[%s1163_s21 + $0x8] sm:$0xff]   ;;  %v1078_v3 = vld [vmem:[%s1163_s21 + $0x10] sm:$0xff]  }
   0xf   : > { %175 = vst [vmem:[%s1144_s17 + $0xc] sm:$0xf] %v1112_v0  ;;  %v1015_v4 = vunpack.c.l.bf16 %v1014_v1  ;;  %v1016_v6 = vunpack.c.h.bf16 %v1014_v1  ;;  %v1019_v7 = vunpack.c.l.bf16 %v1077_v2  ;;  %v1020_v8 = vunpack.c.h.bf16 %v1077_v2  ;;  %v1079_v16 = vld [vmem:[%s1163_s21 + $0x18] sm:$0xff]   ;;  %v1080_v44 = vld [vmem:[%s1163_s21 + $0x20] sm:$0xff]   ;;  %v1229_v45 = vld [vmem:[%s1163_s21 + $0x28] sm:$0xff]  }
  0x10   : > { %172 = vst [vmem:[%s1144_s17] sm:$0xf] %v1112_v0  ;;  %v1023_v9 = vunpack.c.l.bf16 %v1078_v3  ;;  %v1024_v10 = vunpack.c.h.bf16 %v1078_v3  ;;  %v1027_v19 = vunpack.c.l.bf16 %v1079_v16  ;;  %v1028_v27 = vunpack.c.h.bf16 %v1079_v16  ;;  %vm1257_vm5 = vmor %vm426_vm3, %vm427_vm4 }
  0x11   : > { %173 = vst [vmem:[%s1144_s17 + $0x4] sm:$0xf] %v1112_v0  ;;  %v294_v11 = vmul.f32 %v1179_v5, %v1015_v4  ;;  %v295_v13 = vmul.f32 %v1179_v5, %v1016_v6  ;;  %v296_v14 = vmul.f32 %v1179_v5, %v1019_v7  ;;  %v297_v15 = vmul.f32 %v1179_v5, %v1020_v8  ;;  %vm1271_vm7 = vmand %vm757_vm6, %vm426_vm3 }
  0x12   : > { %174 = vst [vmem:[%s1144_s17 + $0x8] sm:$0x1] %v1112_v0  ;;  %v298_v17 = vmul.f32 %v1179_v5, %v1023_v9  ;;  %v299_v18 = vmul.f32 %v1179_v5, %v1024_v10  ;;  %v300_v26 = vmul.f32 %v1179_v5, %v1027_v19  ;;  %v301_v35 = vmul.f32 %v1179_v5, %v1028_v27 }
  0x13   : > { %176 = vst [vmem:[%s1144_s17 + $0x10] sm:$0xf] %v1112_v0  ;;  %v330_v20 = vadd.f32 %v1189_v12, %v294_v11  ;;  %v331_v21 = vadd.f32 %v1189_v12, %v295_v13  ;;  %v332_v22 = vadd.f32 %v1189_v12, %v296_v14  ;;  %v333_v23 = vadd.f32 %v1189_v12, %v297_v15 }
  0x14   : > { %177 = vst [vmem:[%s1144_s17 + $0x14] sm:$0x1] %v1112_v0  ;;  %v334_v24 = vadd.f32 %v1189_v12, %v298_v17  ;;  %v335_v25 = vadd.f32 %v1189_v12, %v299_v18  ;;  %v336_v34 = vadd.f32 %v1189_v12, %v300_v26  ;;  %v1225_v43 = vadd.f32 %v1189_v12, %v301_v35 }
  0x15   : > { %178 = vst [vmem:[%s1144_s17 + $0x18] sm:$0xf] %v1112_v0  ;;  %v362_v28 = vmax.f32 %v330_v20, 0.0  ;;  %v363_v29 = vmax.f32 %v331_v21, 0.0  ;;  %v364_v30 = vmax.f32 %v332_v22, 0.0  ;;  %v365_v31 = vmax.f32 %v333_v23, 0.0 }
  0x16   : > { %179 = vst [vmem:[%s1144_s17 + $0x1c] sm:$0xf] %v1112_v0  ;;  %v366_v32 = vmax.f32 %v334_v24, 0.0  ;;  %v367_v33 = vmax.f32 %v335_v25, 0.0  ;;  %v368_v42 = vmax.f32 %v336_v34, 0.0  ;;  %v1031_v55 = vunpack.c.l.bf16 %v1080_v44 }
  0x17   : > { %180 = vst [vmem:[%s1144_s17 + $0x20] sm:$0x1] %v1112_v0  ;;  %v394_v36 = vpack.c.bf16 %v362_v28, %v362_v28  ;;  %v395_v37 = vpack.c.bf16 %v363_v29, %v363_v29  ;;  %v396_v38 = vpack.c.bf16 %v364_v30, %v364_v30  ;;  %v397_v39 = vpack.c.bf16 %v365_v31, %v365_v31  ;;  %v1240_v53 = vld [vmem:[%s1144_s17 + $0xc] sm:$0xf] }
  0x18   : > { %181 = vst [vmem:[%s1144_s17 + $0x24] sm:$0xf] %v1112_v0  ;;  %v1220_v40 = vpack.c.bf16 %v366_v32, %v366_v32  ;;  %v1222_v41 = vpack.c.bf16 %v367_v33, %v367_v33  ;;  %v1235_v51 = vpack.c.bf16 %v368_v42, %v368_v42  ;;  %v1032_v56 = vunpack.c.h.bf16 %v1080_v44 }
  0x19   : > { %182 = vst [vmem:[%s1144_s17 + $0x28] sm:$0xf] %v1112_v0  ;;  %v430_v46 = vshrl.u32 %v394_v36, 16  ;;  %v438_v47 = vshrl.u32 %v395_v37, 16  ;;  %v447_v48 = vshrl.u32 %v396_v38, 16  ;;  %v455_v49 = vshrl.u32 %v397_v39, 16 }
  0x1a   : > { %183 = vst [vmem:[%s1144_s17 + $0x2c] sm:$0x1] %v1112_v0  ;;  %v433_v50 = vshll.u32 %v394_v36, 16  ;;  %v1035_v58 = vunpack.c.l.bf16 %v1229_v45  ;;  %v1036_v59 = vunpack.c.h.bf16 %v1229_v45  ;;  %v441_v62 = vshll.u32 %v395_v37, 16 }
  0x1b   : > { %184 = vst [vmem:[%s1144_s17 + $0x30] sm:$0xf] %v1112_v0  ;;  %v432_v52 = vrot.slane %v430_v46, 7  ;;  %v440_v54 = vrot.slane %v438_v47, 7  ;;  %v933_v2 = vld [vmem:[%s1144_s17 + $0x14] sm:$0x1]  ;;  %v302_v4 = vmul.f32 %v1179_v5, %v1031_v55  ;;  %v303_v6 = vmul.f32 %v1179_v5, %v1032_v56 }
  0x1c   : > { %185 = vst [vmem:[%s1144_s17 + $0x34] sm:$0xf] %v1112_v0  ;;  %v449_v3 = vrot.slane %v447_v48, 7  ;;  %v450_v10 = vshll.u32 %v396_v38, 16  ;;  %v1276_v11 = vld [vmem:[%s1144_s17 + $0x18] sm:$0xf]  ;;  %v304_v47 = vmul.f32 %v1179_v5, %v1035_v58 }
  0x1d   : > { %186 = vst [vmem:[%s1144_s17 + $0x38] sm:$0x1] %v1112_v0  ;;  %v1252_v60 = vor.u32 %v433_v50, %v432_v52  ;;  %v436_v61 = vrot.slane %v432_v52, 4  ;;  %v445_v63 = vrot.slane %v440_v54, 4  ;;  %v443_v8 = vor.u32 %v441_v62, %v440_v54  ;;  %v1082_v56 = vld [vmem:[%s1163_s21 + $0x30] sm:$0xff]  }
  0x1e   : > { %187 = vst [vmem:[%s1144_s17 + $0x3c] sm:$0xf] %v1112_v0  ;;  %v457_v13 = vrot.slane %v455_v49, 7  ;;  %v453_v15 = vrot.slane %v449_v3, 4  ;;  %v458_v16 = vshll.u32 %v397_v39, 16  ;;  %v338_v18 = vadd.f32 %v1189_v12, %v302_v4 }
  0x1f   : > { %188 = vst [vmem:[%s1144_s17 + $0x40] sm:$0xf] %v1112_v0  ;;  %v754_v7 = vsel %vm1244_vm2, %v1252_v60, %v1240_v53  ;;  %v1282_v14 = vsel %vm1271_vm7, %v445_v63, %v933_v2  ;;  %v938_v17 = vld [vmem:[%s1144_s17 + $0x20] sm:$0x1]  ;;  %v1290_v19 = vsel %vm1257_vm5, %v436_v61, %v443_v8  ;;  %v1292_v20 = vor.u32 %v450_v10, %v449_v3  ;;  %v1311_v30 = vld [vmem:[%s1144_s17 + $0x24] sm:$0xf] }
  0x20   : > { %189 = vst [vmem:[%s1144_s17 + $0x44] sm:$0x1] %v1112_v0  ;;  %v462_v21 = vrot.slane %v457_v13, 4  ;;  %v464_v22 = vshrl.u32 %v1220_v40, 16  ;;  %v460_v23 = vor.u32 %v458_v16, %v457_v13  ;;  %v467_v24 = vshll.u32 %v1220_v40, 16 }
  0x21   : > { %190 = vst [vmem:[%s1144_s17 + $0x48] sm:$0xf] %v1112_v0  ;;  %v472_v25 = vshrl.u32 %v1222_v41, 16  ;;  %v475_v26 = vshll.u32 %v1222_v41, 16  ;;  %v763_v27 = vsel %vm1244_vm2, %v1292_v20, %v1276_v11  ;;  %v481_v31 = vshrl.u32 %v1235_v51, 16 }
  0x22   : > { %191 = vst [vmem:[%s1144_s17 + $0x4c] sm:$0xf] %v1112_v0  ;;  %v1308_v28 = vsel %vm1271_vm7, %v462_v21, %v938_v17  ;;  %v466_v29 = vrot.slane %v464_v22, 7  ;;  %v1318_v32 = vsel %vm1257_vm5, %v453_v15, %v460_v23  ;;  %v943_v34 = vld [vmem:[%s1144_s17 + $0x2c] sm:$0x1]  ;;  %v484_v35 = vshll.u32 %v1235_v51, 16 }
  0x23   : > { %192 = vst [vmem:[%s1144_s17 + $0x50] sm:$0x1] %v1112_v0  ;;  %v474_v33 = vrot.slane %v472_v25, 7  ;;  %v339_v36 = vadd.f32 %v1189_v12, %v303_v6  ;;  %v483_v39 = vrot.slane %v481_v31, 7  ;;  %v369_v40 = vmax.f32 %v1225_v43, 0.0 }
  0x24   : > { %193 = vst [vmem:[%s1144_s17 + $0x54] sm:$0xf] %v1112_v0  ;;  %v1325_v37 = vor.u32 %v467_v24, %v466_v29  ;;  %v470_v38 = vrot.slane %v466_v29, 4  ;;  %v1331_v44 = vld [vmem:[%s1144_s17 + $0x30] sm:$0xf]  ;;  %v370_v46 = vmax.f32 %v338_v18, 0.0  ;;  %v340_v63 = vadd.f32 %v1189_v12, %v304_v47 }
  0x25   : > { %194 = vst [vmem:[%s1144_s17 + $0x58] sm:$0xf] %v1112_v0  ;;  %v477_v41 = vor.u32 %v475_v26, %v474_v33  ;;  %v479_v42 = vrot.slane %v474_v33, 4  ;;  %v1340_v43 = vor.u32 %v484_v35, %v483_v39  ;;  %v401_v49 = vpack.c.bf16 %v369_v40, %v369_v40  ;;  %v948_v10 = vld [vmem:[%s1144_s17 + $0x38] sm:$0x1] }
  0x26   : > { %195 = vst [vmem:[%s1144_s17 + $0x5c] sm:$0x1] %v1112_v0  ;;  %v770_v48 = vsel %vm1244_vm2, %v1325_v37, %v1311_v30  ;;  %v487_v50 = vrot.slane %v483_v39, 4  ;;  %v402_v54 = vpack.c.bf16 %v370_v46, %v370_v46  ;;  %v371_v55 = vmax.f32 %v339_v36, 0.0  ;;  %v1374_v23 = vld [vmem:[%s1144_s17 + $0x3c] sm:$0xf] }
  0x27   : > { %196 = vst [vmem:[%s1144_s17 + $0x60] sm:$0xf] %v1112_v0  ;;  %v1346_v51 = vsel %vm1257_vm5, %v470_v38, %v477_v41  ;;  %v1350_v52 = vsel %vm1271_vm7, %v479_v42, %v943_v34  ;;  %v777_v58 = vsel %vm1244_vm2, %v1340_v43, %v1331_v44  ;;  %v489_v61 = vshrl.u32 %v401_v49, 16  ;;  %v1083_v34 = vld [vmem:[%s1163_s21 + $0x38] sm:$0xff]   ;;  %v953_v38 = vld [vmem:[%s1144_s17 + $0x44] sm:$0x1] }
  0x28   : > { %197 = vst [vmem:[%s1144_s17 + $0x64] sm:$0xf] %v1112_v0  ;;  %v492_v62 = vshll.u32 %v401_v49, 16  ;;  %v498_v2 = vshrl.u32 %v402_v54, 16  ;;  %v501_v3 = vshll.u32 %v402_v54, 16  ;;  %v403_v4 = vpack.c.bf16 %v371_v55, %v371_v55 }
  0x29   : > { %198 = vst [vmem:[%s1144_s17 + $0x68] sm:$0x1] %v1112_v0  ;;  %v305_v6 = vmul.f32 %v1179_v5, %v1036_v59  ;;  %v491_v8 = vrot.slane %v489_v61, 7  ;;  %v372_v13 = vmax.f32 %v340_v63, 0.0  ;;  %v1039_v15 = vunpack.c.l.bf16 %v1082_v56  ;;  %v1415_v63 = vld [vmem:[%s1144_s17 + $0x48] sm:$0xf] }
  0x2a   : > { %199 = vst [vmem:[%s1144_s17 + $0x6c] sm:$0xf] %v1112_v0  ;;  %v1040_v16 = vunpack.c.h.bf16 %v1082_v56  ;;  %v500_v17 = vrot.slane %v498_v2, 7  ;;  %v506_v18 = vshrl.u32 %v403_v4, 16  ;;  %v509_v21 = vshll.u32 %v403_v4, 16  ;;  %v1084_v56 = vld [vmem:[%s1163_s21 + $0x40] sm:$0xff]  }
  0x2b   : > { %200 = vst [vmem:[%s1144_s17 + $0x70] sm:$0xf] %v1112_v0  ;;  %v341_v45 = vadd.f32 %v1189_v12, %v305_v6  ;;  %v494_v59 = vor.u32 %v492_v62, %v491_v8  ;;  %v496_v22 = vrot.slane %v491_v8, 4  ;;  %v404_v24 = vpack.c.bf16 %v372_v13, %v372_v13 }
  0x2c   : > { %201 = vst [vmem:[%s1144_s17 + $0x74] sm:$0x1] %v1112_v0  ;;  %v306_v25 = vmul.f32 %v1179_v5, %v1039_v15  ;;  %v1379_v26 = vor.u32 %v501_v3, %v500_v17  ;;  %v504_v29 = vrot.slane %v500_v17, 4  ;;  %v508_v31 = vrot.slane %v506_v18, 7 }
  0x2d   : > { %202 = vst [vmem:[%s1144_s17 + $0x78] sm:$0xf] %v1112_v0  ;;  %v373_v33 = vmax.f32 %v341_v45, 0.0  ;;  %v1386_v35 = vsel %vm1257_vm5, %v487_v50, %v494_v59  ;;  %v1390_v36 = vsel %vm1271_vm7, %v496_v22, %v948_v10  ;;  %v515_v39 = vshrl.u32 %v404_v24, 16 }
  0x2e   : > { %203 = vst [vmem:[%s1144_s17 + $0x7c] sm:$0xf] %v1112_v0  ;;  %v518_v40 = vshll.u32 %v404_v24, 16  ;;  %v784_v41 = vsel %vm1244_vm2, %v1379_v26, %v1374_v23  ;;  %v511_v42 = vor.u32 %v509_v21, %v508_v31  ;;  %v513_v46 = vrot.slane %v508_v31, 4  ;;  %v958_v21 = vld [vmem:[%s1144_s17 + $0x50] sm:$0x1] }
  0x2f   : > { %204 = vst [vmem:[%s1144_s17 + $0x80] sm:$0x1] %v1112_v0  ;;  %v405_v47 = vpack.c.bf16 %v373_v33, %v373_v33  ;;  %v517_v49 = vrot.slane %v515_v39, 7  ;;  %v342_v50 = vadd.f32 %v1189_v12, %v306_v25  ;;  %v307_v54 = vmul.f32 %v1179_v5, %v1040_v16 }
  0x30   : > { %205 = vst [vmem:[%s1144_s17 + $0x84] sm:$0xf] %v1112_v0  ;;  %v1043_v55 = vunpack.c.l.bf16 %v1083_v34  ;;  %v1408_v61 = vsel %vm1257_vm5, %v504_v29, %v511_v42  ;;  %v1412_v62 = vsel %vm1271_vm7, %v513_v46, %v953_v38  ;;  %v1044_v16 = vunpack.c.h.bf16 %v1083_v34 }
  0x31   : > { %206 = vst [vmem:[%s1144_s17 + $0x88] sm:$0xf] %v1112_v0  ;;  %v523_v2 = vshrl.u32 %v405_v47, 16  ;;  %v526_v3 = vshll.u32 %v405_v47, 16  ;;  %v1419_v4 = vor.u32 %v518_v40, %v517_v49  ;;  %v521_v6 = vrot.slane %v517_v49, 4  ;;  %v1440_v40 = vld [vmem:[%s1163_s21 + $0x48] sm:$0xff]  }
  0x32   : > { %207 = vst [vmem:[%s1144_s17 + $0x8c] sm:$0x1] %v1112_v0  ;;  %v374_v8 = vmax.f32 %v342_v50, 0.0  ;;  %v343_v10 = vadd.f32 %v1189_v12, %v307_v54  ;;  %v308_v15 = vmul.f32 %v1179_v5, %v1043_v55  ;;  %v1047_v17 = vunpack.c.l.bf16 %v1084_v56  ;;  %v1521_v37 = vld [vmem:[%s1144_s17 + $0x6c] sm:$0xf] }
  0x33   : > { %208 = vst [vmem:[%s1144_s17 + $0x90] sm:$0xf] %v1112_v0  ;;  %v525_v13 = vrot.slane %v523_v2, 7  ;;  %v791_v18 = vsel %vm1244_vm2, %v1419_v4, %v1415_v63  ;;  %v1048_v22 = vunpack.c.h.bf16 %v1084_v56  ;;  %v309_v31 = vmul.f32 %v1179_v5, %v1044_v16  ;;  %v1459_v2 = vld [vmem:[%s1144_s17 + $0x54] sm:$0xf] }
  0x34   : > { %209 = vst [vmem:[%s1144_s17 + $0x94] sm:$0xf] %v1112_v0  ;;  %v406_v45 = vpack.c.bf16 %v374_v8, %v374_v8  ;;  %v375_v59 = vmax.f32 %v343_v10, 0.0  ;;  %v344_v29 = vadd.f32 %v1189_v12, %v308_v15  ;;  %v310_v39 = vmul.f32 %v1179_v5, %v1047_v17  ;;  %v963_v17 = vld [vmem:[%s1144_s17 + $0x5c] sm:$0x1] }
  0x35   : > { %210 = vst [vmem:[%s1144_s17 + $0x98] sm:$0x1] %v1112_v0  ;;  %v528_v24 = vor.u32 %v526_v3, %v525_v13  ;;  %v530_v25 = vrot.slane %v525_v13, 4  ;;  %v345_v49 = vadd.f32 %v1189_v12, %v309_v31  ;;  %v311_v8 = vmul.f32 %v1179_v5, %v1048_v22  ;;  %v973_v43 = vld [vmem:[%s1144_s17 + $0x74] sm:$0x1] }
  0x36   : > { %211 = vst [vmem:[%s1144_s17 + $0x9c] sm:$0xf] %v1112_v0  ;;  %v532_v33 = vshrl.u32 %v406_v45, 16  ;;  %v535_v34 = vshll.u32 %v406_v45, 16  ;;  %v407_v38 = vpack.c.bf16 %v375_v59, %v375_v59  ;;  %v376_v47 = vmax.f32 %v344_v29, 0.0 }
  0x37   : > { %212 = vst [vmem:[%s1144_s17 + $0xa0] sm:$0xf] %v1112_v0  ;;  %v1446_v42 = vsel %vm1257_vm5, %v521_v6, %v528_v24  ;;  %v1450_v46 = vsel %vm1271_vm7, %v530_v25, %v958_v21  ;;  %v346_v56 = vadd.f32 %v1189_v12, %v310_v39  ;;  %v377_v6 = vmax.f32 %v345_v49, 0.0  ;;  %v968_v49 = vld [vmem:[%s1144_s17 + $0x68] sm:$0x1] }
  0x38   : > { %213 = vst [vmem:[%s1144_s17 + $0xa4] sm:$0x1] %v1112_v0  ;;  %v534_v50 = vrot.slane %v532_v33, 7  ;;  %v540_v54 = vshrl.u32 %v407_v38, 16  ;;  %v543_v55 = vshll.u32 %v407_v38, 16  ;;  %v408_v3 = vpack.c.bf16 %v376_v47, %v376_v47 }
  0x39   : > { %214 = vst [vmem:[%s1144_s17 + $0xa8] sm:$0xf] %v1112_v0  ;;  %v1051_v10 = vunpack.c.l.bf16 %v1440_v40  ;;  %v378_v16 = vmax.f32 %v346_v56, 0.0  ;;  %v409_v59 = vpack.c.bf16 %v377_v6, %v377_v6  ;;  %v347_v22 = vadd.f32 %v1189_v12, %v311_v8  ;;  %v1499_v38 = vld [vmem:[%s1144_s17 + $0x60] sm:$0xf] }
  0x3a   : > { %215 = vst [vmem:[%s1144_s17 + $0xac] sm:$0xf] %v1112_v0  ;;  %v1469_v13 = vor.u32 %v535_v34, %v534_v50  ;;  %v542_v15 = vrot.slane %v540_v54, 7  ;;  %v549_v21 = vshrl.u32 %v408_v3, 16  ;;  %v552_v45 = vshll.u32 %v408_v3, 16 }
  0x3b   : > { %216 = vst [vmem:[%s1144_s17 + $0xb0] sm:$0x1] %v1112_v0  ;;  %v410_v24 = vpack.c.bf16 %v378_v16, %v378_v16  ;;  %v560_v29 = vshll.u32 %v409_v59, 16  ;;  %v379_v31 = vmax.f32 %v347_v22, 0.0  ;;  %v312_v54 = vmul.f32 %v1179_v5, %v1051_v10  ;;  %v1087_v10 = vld [vmem:[%s1163_s21 + $0x58] sm:$0xff]  }
  0x3c   : > { %217 = vst [vmem:[%s1144_s17 + $0xb4] sm:$0xf] %v1112_v0  ;;  %v798_v53 = vsel %vm1244_vm2, %v1469_v13, %v1459_v2  ;;  %v545_v60 = vor.u32 %v543_v55, %v542_v15  ;;  %v551_v25 = vrot.slane %v549_v21, 7 }
  0x3d   : > { %218 = vst [vmem:[%s1144_s17 + $0xb8] sm:$0xf] %v1112_v0  ;;  %v566_v11 = vshrl.u32 %v410_v24, 16  ;;  %v569_v20 = vshll.u32 %v410_v24, 16  ;;  %v411_v47 = vpack.c.bf16 %v379_v31, %v379_v31 }
  0x3e   : > { %219 = vst [vmem:[%s1144_s17 + $0xbc] sm:$0x1] %v1112_v0 }
  0x3f   : > { %220 = vst [vmem:[%s1144_s17 + $0xc0] sm:$0xf] %v1112_v0  ;;  %v577_v8 = vshll.u32 %v411_v47, 16 }
  0x40   : > { %221 = vst [vmem:[%s1144_s17 + $0xc4] sm:$0xf] %v1112_v0 }
  0x41   : > { %222 = vst [vmem:[%s1144_s17 + $0xc8] sm:$0x1] %v1112_v0 }
  0x42   : > { %223 = vst [vmem:[%s1144_s17 + $0xcc] sm:$0xf] %v1112_v0 }
  0x43   : > { %224 = vst [vmem:[%s1144_s17 + $0xd0] sm:$0xf] %v1112_v0 }
  0x44   : > { %225 = vst [vmem:[%s1144_s17 + $0xd4] sm:$0x1] %v1112_v0  ;;  %v538_v0 = vrot.slane %v534_v50, 4  ;;  %v568_v50 = vrot.slane %v566_v11, 7 }
  0x45   : > { %931 = vst [vmem:[%s1144_s17 + $0xc] sm:$0xf] %v754_v7  ;;  %v547_v7 = vrot.slane %v542_v15, 4 }
  0x46   : > { %932 = vst [vmem:[%s1144_s17 + $0x10] sm:$0xf] %v1290_v19  ;;  %v1086_v19 = vld [vmem:[%s1163_s21 + $0x50] sm:$0xff]   ;;  %v1492_v33 = vsel %vm1257_vm5, %v538_v0, %v545_v60  ;;  %v1525_v6 = vor.u32 %v569_v20, %v568_v50 }
  0x47   : > { %934 = vst [vmem:[%s1144_s17 + $0x14] sm:$0x1] %v1282_v14  ;;  %v557_v14 = vshrl.u32 %v409_v59, 16  ;;  %v1496_v34 = vsel %vm1271_vm7, %v547_v7, %v963_v17  ;;  %v1055_v55 = vunpack.c.l.bf16 %v1086_v19  ;;  %v1056_v21 = vunpack.c.h.bf16 %v1086_v19 }
  0x48   : > { %936 = vst [vmem:[%s1144_s17 + $0x18] sm:$0xf] %v763_v27  ;;  %v1503_v27 = vor.u32 %v552_v45, %v551_v25  ;;  %v812_v44 = vsel %vm1244_vm2, %v1525_v6, %v1521_v37  ;;  %v1060_v19 = vunpack.c.h.bf16 %v1087_v10 }
  0x49   : > { %937 = vst [vmem:[%s1144_s17 + $0x1c] sm:$0xf] %v1318_v32  ;;  %v555_v32 = vrot.slane %v551_v25, 4  ;;  %v559_v39 = vrot.slane %v557_v14, 7  ;;  %v314_v17 = vmul.f32 %v1179_v5, %v1055_v55  ;;  %v315_v24 = vmul.f32 %v1179_v5, %v1056_v21 }
  0x4a   : > { %939 = vst [vmem:[%s1144_s17 + $0x20] sm:$0x1] %v1308_v28  ;;  %v1052_v28 = vunpack.c.h.bf16 %v1440_v40  ;;  %v805_v56 = vsel %vm1244_vm2, %v1503_v27, %v1499_v38  ;;  %v572_v40 = vrot.slane %v568_v50, 4 }
  0x4b   : > { %941 = vst [vmem:[%s1144_s17 + $0x24] sm:$0xf] %v770_v48  ;;  %v562_v3 = vor.u32 %v560_v29, %v559_v39  ;;  %v564_v30 = vrot.slane %v559_v39, 4  ;;  %v574_v48 = vshrl.u32 %v411_v47, 16  ;;  %v350_v7 = vadd.f32 %v1189_v12, %v314_v17  ;;  %v975_v47 = vld [vmem:[%s1144_s17 + $0x78] sm:$0xf] }
  0x4c   : > { %942 = vst [vmem:[%s1144_s17 + $0x28] sm:$0xf] %v1346_v51  ;;  %v348_v51 = vadd.f32 %v1189_v12, %v312_v54  ;;  %v313_v16 = vmul.f32 %v1179_v5, %v1052_v28 }
  0x4d   : > { %944 = vst [vmem:[%s1144_s17 + $0x2c] sm:$0x1] %v1350_v52  ;;  %v1537_v0 = vsel %vm1257_vm5, %v555_v32, %v562_v3  ;;  %v1541_v52 = vsel %vm1271_vm7, %v564_v30, %v968_v49  ;;  %v576_v15 = vrot.slane %v574_v48, 7  ;;  %v382_v31 = vmax.f32 %v350_v7, 0.0  ;;  %v978_v48 = vld [vmem:[%s1144_s17 + $0x80] sm:$0x1] }
  0x4e   : > { %946 = vst [vmem:[%s1144_s17 + $0x30] sm:$0xf] %v777_v58  ;;  %v380_v58 = vmax.f32 %v348_v51, 0.0  ;;  %v349_v22 = vadd.f32 %v1189_v12, %v313_v16  ;;  %v317_v32 = vmul.f32 %v1179_v5, %v1060_v19 }
  0x4f   : > { %947 = vst [vmem:[%s1144_s17 + $0x34] sm:$0xf] %v1386_v35  ;;  %v579_v45 = vor.u32 %v577_v8, %v576_v15  ;;  %v581_v59 = vrot.slane %v576_v15, 4  ;;  %v1059_v35 = vunpack.c.l.bf16 %v1087_v10  ;;  %v414_v49 = vpack.c.bf16 %v382_v31, %v382_v31 }
  0x50   : > { %949 = vst [vmem:[%s1144_s17 + $0x38] sm:$0x1] %v1390_v36  ;;  %v412_v60 = vpack.c.bf16 %v380_v58, %v380_v58  ;;  %v1088_v36 = vld [vmem:[%s1163_s21 + $0x60] sm:$0xff]   ;;  %v381_v26 = vmax.f32 %v349_v22, 0.0  ;;  %v353_v28 = vadd.f32 %v1189_v12, %v317_v32 }
  0x51   : > { %951 = vst [vmem:[%s1144_s17 + $0x3c] sm:$0xf] %v784_v41  ;;  %v1568_v25 = vsel %vm1257_vm5, %v572_v40, %v579_v45  ;;  %v1572_v23 = vsel %vm1271_vm7, %v581_v59, %v973_v43  ;;  %v316_v41 = vmul.f32 %v1179_v5, %v1059_v35  ;;  %v1063_v39 = vunpack.c.l.bf16 %v1088_v36  ;;  %v983_v59 = vld [vmem:[%s1144_s17 + $0x8c] sm:$0x1]  ;;  %v985_v35 = vld [vmem:[%s1144_s17 + $0x90] sm:$0xf] }
  0x52   : > { %952 = vst [vmem:[%s1144_s17 + $0x40] sm:$0xf] %v1408_v61  ;;  %v583_v14 = vshrl.u32 %v412_v60, 16  ;;  %v586_v29 = vshll.u32 %v412_v60, 16  ;;  %v351_v61 = vadd.f32 %v1189_v12, %v315_v24  ;;  %v413_v11 = vpack.c.bf16 %v381_v26, %v381_v26  ;;  %v1089_v24 = vld [vmem:[%s1163_s21 + $0x68] sm:$0xff]  }
  0x53   : > { %954 = vst [vmem:[%s1144_s17 + $0x44] sm:$0x1] %v1412_v62  ;;  %v352_v20 = vadd.f32 %v1189_v12, %v316_v41  ;;  %v1064_v54 = vunpack.c.h.bf16 %v1088_v36  ;;  %v600_v3 = vshrl.u32 %v414_v49, 16  ;;  %v603_v30 = vshll.u32 %v414_v49, 16 }
  0x54   : > { %956 = vst [vmem:[%s1144_s17 + $0x48] sm:$0xf] %v791_v18  ;;  %v585_v62 = vrot.slane %v583_v14, 7  ;;  %v383_v50 = vmax.f32 %v351_v61, 0.0  ;;  %v591_v63 = vshrl.u32 %v413_v11, 16  ;;  %v594_v4 = vshll.u32 %v413_v11, 16 }
  0x55   : > { %957 = vst [vmem:[%s1144_s17 + $0x4c] sm:$0xf] %v1446_v42  ;;  %v384_v18 = vmax.f32 %v352_v20, 0.0  ;;  %v385_v51 = vmax.f32 %v353_v28, 0.0  ;;  %v602_v13 = vrot.slane %v600_v3, 7  ;;  %v318_v10 = vmul.f32 %v1179_v5, %v1063_v39 }
  0x56   : > { %959 = vst [vmem:[%s1144_s17 + $0x50] sm:$0x1] %v1450_v46  ;;  %v588_v42 = vor.u32 %v586_v29, %v585_v62  ;;  %v589_v55 = vrot.slane %v585_v62, 4  ;;  %v593_v46 = vrot.slane %v591_v63, 7  ;;  %v415_v40 = vpack.c.bf16 %v383_v50, %v383_v50  ;;  %v1090_v29 = vld [vmem:[%s1163_s21 + $0x70] sm:$0xff]   ;;  %v1091_v63 = vld [vmem:[%s1163_s21 + $0x78] sm:$0xff]  }
  0x57   : > { %961 = vst [vmem:[%s1144_s17 + $0x54] sm:$0xf] %v798_v53  ;;  %v416_v8 = vpack.c.bf16 %v384_v18, %v384_v18  ;;  %v980_v53 = vld [vmem:[%s1144_s17 + $0x84] sm:$0xf]  ;;  %v319_v15 = vmul.f32 %v1179_v5, %v1064_v54  ;;  %v605_v58 = vor.u32 %v603_v30, %v602_v13  ;;  %v606_v17 = vrot.slane %v602_v13, 4 }
  0x58   : > { %962 = vst [vmem:[%s1144_s17 + $0x58] sm:$0xf] %v1492_v33  ;;  %v819_v2 = vsel %vm1244_vm2, %v588_v42, %v975_v47  ;;  %v596_v33 = vor.u32 %v594_v4, %v593_v46  ;;  %v608_v16 = vshrl.u32 %v415_v40, 16  ;;  %v611_v43 = vshll.u32 %v415_v40, 16  ;;  %v988_v20 = vld [vmem:[%s1144_s17 + $0x98] sm:$0x1] }
  0x59   : > { %964 = vst [vmem:[%s1144_s17 + $0x5c] sm:$0x1] %v1496_v34  ;;  %v598_v34 = vrot.slane %v593_v46, 4  ;;  %v617_v21 = vshrl.u32 %v416_v8, 16  ;;  %v620_v45 = vshll.u32 %v416_v8, 16  ;;  %v417_v22 = vpack.c.bf16 %v385_v51, %v385_v51 }
  0x5a   : > { %966 = vst [vmem:[%s1144_s17 + $0x60] sm:$0xf] %v805_v56  ;;  %v597_v38 = vsel %vm1257_vm5, %v589_v55, %v596_v33  ;;  %v610_v56 = vrot.slane %v608_v16, 7  ;;  %v354_v60 = vadd.f32 %v1189_v12, %v318_v10  ;;  %v355_v7 = vadd.f32 %v1189_v12, %v319_v15  ;;  %v990_v40 = vld [vmem:[%s1144_s17 + $0x9c] sm:$0xf] }
  0x5b   : > { %967 = vst [vmem:[%s1144_s17 + $0x64] sm:$0xf] %v1537_v0  ;;  %v823_v27 = vsel %vm1271_vm7, %v598_v34, %v978_v48  ;;  %v826_v0 = vsel %vm1244_vm2, %v605_v58, %v980_v53  ;;  %v625_v37 = vshrl.u32 %v417_v22, 16  ;;  %v628_v6 = vshll.u32 %v417_v22, 16  ;;  %v993_v13 = vld [vmem:[%s1144_s17 + $0xa4] sm:$0x1] }
  0x5c   : > { %969 = vst [vmem:[%s1144_s17 + $0x68] sm:$0x1] %v1541_v52  ;;  %v619_v52 = vrot.slane %v617_v21, 7  ;;  %v613_v19 = vor.u32 %v611_v43, %v610_v56  ;;  %v615_v36 = vrot.slane %v610_v56, 4  ;;  %v386_v41 = vmax.f32 %v354_v60, 0.0 }
  0x5d   : > { %971 = vst [vmem:[%s1144_s17 + $0x6c] sm:$0xf] %v812_v44  ;;  %v387_v14 = vmax.f32 %v355_v7, 0.0  ;;  %v627_v61 = vrot.slane %v625_v37, 7  ;;  %v1067_v11 = vunpack.c.l.bf16 %v1089_v24  ;;  %v1068_v62 = vunpack.c.h.bf16 %v1089_v24 }
  0x5e   : > { %972 = vst [vmem:[%s1144_s17 + $0x70] sm:$0xf] %v1568_v25  ;;  %v622_v44 = vor.u32 %v620_v45, %v619_v52  ;;  %v623_v26 = vrot.slane %v619_v52, 4  ;;  %v614_v31 = vsel %vm1257_vm5, %v606_v17, %v613_v19  ;;  %v830_v25 = vsel %vm1271_vm7, %v615_v36, %v983_v59 }
  0x5f   : > { %974 = vst [vmem:[%s1144_s17 + $0x74] sm:$0x1] %v1572_v23  ;;  %v418_v32 = vpack.c.bf16 %v386_v41, %v386_v41  ;;  %v419_v39 = vpack.c.bf16 %v387_v14, %v387_v14  ;;  %v630_v47 = vor.u32 %v628_v6, %v627_v61  ;;  %v632_v49 = vrot.slane %v627_v61, 4 }
  0x60   : > { %976 = vst [vmem:[%s1144_s17 + $0x78] sm:$0xf] %v819_v2  ;;  %v833_v23 = vsel %vm1244_vm2, %v622_v44, %v985_v35  ;;  %v320_v50 = vmul.f32 %v1179_v5, %v1067_v11  ;;  %v1071_v54 = vunpack.c.l.bf16 %v1090_v29  ;;  %v321_v46 = vmul.f32 %v1179_v5, %v1068_v62 }
  0x61   : > { %977 = vst [vmem:[%s1144_s17 + $0x7c] sm:$0xf] %v597_v38  ;;  %v634_v4 = vshrl.u32 %v418_v32, 16  ;;  %v637_v18 = vshll.u32 %v418_v32, 16  ;;  %v642_v28 = vshrl.u32 %v419_v39, 16  ;;  %v645_v42 = vshll.u32 %v419_v39, 16 }
  0x62   : > { %979 = vst [vmem:[%s1144_s17 + $0x80] sm:$0x1] %v823_v27  ;;  %v631_v55 = vsel %vm1257_vm5, %v623_v26, %v630_v47  ;;  %v837_v3 = vsel %vm1271_vm7, %v632_v49, %v988_v20  ;;  %v356_v30 = vadd.f32 %v1189_v12, %v320_v50  ;;  %v322_v51 = vmul.f32 %v1179_v5, %v1071_v54  ;;  %v995_v26 = vld [vmem:[%s1144_s17 + $0xa8] sm:$0xf]  ;;  %v1000_v54 = vld [vmem:[%s1144_s17 + $0xb4] sm:$0xf] }
  0x63   : > { %981 = vst [vmem:[%s1144_s17 + $0x84] sm:$0xf] %v826_v0  ;;  %v636_v48 = vrot.slane %v634_v4, 7  ;;  %v644_v8 = vrot.slane %v642_v28, 7  ;;  %v1072_v2 = vunpack.c.h.bf16 %v1090_v29  ;;  %v357_v10 = vadd.f32 %v1189_v12, %v321_v46 }
  0x64   : > { %982 = vst [vmem:[%s1144_s17 + $0x88] sm:$0xf] %v614_v31  ;;  %v388_v53 = vmax.f32 %v356_v30, 0.0  ;;  %v1075_v15 = vunpack.c.l.bf16 %v1091_v63  ;;  %v1076_v33 = vunpack.c.h.bf16 %v1091_v63  ;;  %v358_v45 = vadd.f32 %v1189_v12, %v322_v51  ;;  %v1005_v51 = vld [vmem:[%s1144_s17 + $0xc0] sm:$0xf] }
  0x65   : > { %984 = vst [vmem:[%s1144_s17 + $0x8c] sm:$0x1] %v830_v25  ;;  %v639_v34 = vor.u32 %v637_v18, %v636_v48  ;;  %v640_v16 = vrot.slane %v636_v48, 4  ;;  %v647_v43 = vor.u32 %v645_v42, %v644_v8  ;;  %v649_v58 = vrot.slane %v644_v8, 4  ;;  %v1003_v8 = vld [vmem:[%s1144_s17 + $0xbc] sm:$0x1] }
  0x66   : > { %986 = vst [vmem:[%s1144_s17 + $0x90] sm:$0xf] %v833_v23  ;;  %v420_v17 = vpack.c.bf16 %v388_v53, %v388_v53  ;;  %v389_v21 = vmax.f32 %v357_v10, 0.0  ;;  %v323_v38 = vmul.f32 %v1179_v5, %v1072_v2  ;;  %v324_v22 = vmul.f32 %v1179_v5, %v1075_v15  ;;  %v998_v23 = vld [vmem:[%s1144_s17 + $0xb0] sm:$0x1] }
  0x67   : > { %987 = vst [vmem:[%s1144_s17 + $0x94] sm:$0xf] %v631_v55  ;;  %v840_v27 = vsel %vm1244_vm2, %v639_v34, %v990_v40  ;;  %v648_v56 = vsel %vm1257_vm5, %v640_v16, %v647_v43  ;;  %v844_v59 = vsel %vm1271_vm7, %v649_v58, %v993_v13  ;;  %v390_v60 = vmax.f32 %v358_v45, 0.0 }
  0x68   : > { %989 = vst [vmem:[%s1144_s17 + $0x98] sm:$0x1] %v837_v3  ;;  %v651_v0 = vshrl.u32 %v420_v17, 16  ;;  %v654_v52 = vshll.u32 %v420_v17, 16  ;;  %v421_v35 = vpack.c.bf16 %v389_v21, %v389_v21  ;;  %v359_v7 = vadd.f32 %v1189_v12, %v323_v38  ;;  %v1008_v17 = vld [vmem:[%s1144_s17 + $0xc8] sm:$0x1] }
  0x69   : > { %991 = vst [vmem:[%s1144_s17 + $0x9c] sm:$0xf] %v840_v27  ;;  %v360_v24 = vadd.f32 %v1189_v12, %v324_v22  ;;  %v325_v19 = vmul.f32 %v1179_v5, %v1076_v33  ;;  %v422_v44 = vpack.c.bf16 %v390_v60, %v390_v60 }
  0x6a   : > { %992 = vst [vmem:[%s1144_s17 + $0xa0] sm:$0xf] %v648_v56  ;;  %v653_v36 = vrot.slane %v651_v0, 7  ;;  %v659_v37 = vshrl.u32 %v421_v35, 16  ;;  %v662_v6 = vshll.u32 %v421_v35, 16  ;;  %v391_v41 = vmax.f32 %v359_v7, 0.0 }
  0x6b   : > { %994 = vst [vmem:[%s1144_s17 + $0xa4] sm:$0x1] %v844_v59  ;;  %v392_v14 = vmax.f32 %v360_v24, 0.0  ;;  %v361_v29 = vadd.f32 %v1189_v12, %v325_v19  ;;  %v668_v11 = vshrl.u32 %v422_v44, 16  ;;  %v671_v20 = vshll.u32 %v422_v44, 16 }
  0x6c   : > { %v656_v31 = vor.u32 %v654_v52, %v653_v36  ;;  %v657_v25 = vrot.slane %v653_v36, 4  ;;  %v661_v61 = vrot.slane %v659_v37, 7  ;;  %v423_v32 = vpack.c.bf16 %v391_v41, %v391_v41 }
  0x6d   : > { %v424_v5 = vpack.c.bf16 %v392_v14, %v392_v14  ;;  %v393_v39 = vmax.f32 %v361_v29, 0.0  ;;  %v670_v50 = vrot.slane %v668_v11, 7 }
  0x6e   : > { %v847_v62 = vsel %vm1244_vm2, %v656_v31, %v995_v26  ;;  %v664_v47 = vor.u32 %v662_v6, %v661_v61  ;;  %v666_v49 = vrot.slane %v661_v61, 4  ;;  %v676_v12 = vshrl.u32 %v423_v32, 16 }
  0x6f   : > { %996 = vst [vmem:[%s1144_s17 + $0xa8] sm:$0xf] %v847_v62  ;;  %v679_v63 = vshll.u32 %v423_v32, 16  ;;  %v685_v4 = vshrl.u32 %v424_v5, 16  ;;  %v688_v18 = vshll.u32 %v424_v5, 16  ;;  %v673_v55 = vor.u32 %v671_v20, %v670_v50 }
  0x70   : > { %v665_v28 = vsel %vm1257_vm5, %v657_v25, %v664_v47  ;;  %v851_v42 = vsel %vm1271_vm7, %v666_v49, %v998_v23  ;;  %v674_v3 = vrot.slane %v670_v50, 4  ;;  %v678_v30 = vrot.slane %v676_v12, 7 }
  0x71   : > { %997 = vst [vmem:[%s1144_s17 + $0xac] sm:$0xf] %v665_v28  ;;  %v687_v46 = vrot.slane %v685_v4, 7  ;;  %v425_v48 = vpack.c.bf16 %v393_v39, %v393_v39  ;;  %v854_v40 = vsel %vm1244_vm2, %v673_v55, %v1000_v54 }
  0x72   : > { %999 = vst [vmem:[%s1144_s17 + $0xb0] sm:$0x1] %v851_v42  ;;  %v681_v2 = vor.u32 %v679_v63, %v678_v30  ;;  %v683_v13 = vrot.slane %v678_v30, 4 }
  0x73   : > { %1001 = vst [vmem:[%s1144_s17 + $0xb4] sm:$0xf] %v854_v40  ;;  %v690_v53 = vor.u32 %v688_v18, %v687_v46  ;;  %v693_v10 = vshrl.u32 %v425_v48, 16  ;;  %v696_v15 = vshll.u32 %v425_v48, 16  ;;  %v691_v43 = vrot.slane %v687_v46, 4 }
  0x74   : > { %v682_v33 = vsel %vm1257_vm5, %v674_v3, %v681_v2  ;;  %v858_v34 = vsel %vm1271_vm7, %v683_v13, %v1003_v8 }
  0x75   : > { %v861_v16 = vsel %vm1244_vm2, %v690_v53, %v1005_v51  ;;  %1002 = vst [vmem:[%s1144_s17 + $0xb8] sm:$0xf] %v682_v33  ;;  %v695_v58 = vrot.slane %v693_v10, 7 }
  0x76   : > { %1004 = vst [vmem:[%s1144_s17 + $0xbc] sm:$0x1] %v858_v34 }
  0x77   : > { %1006 = vst [vmem:[%s1144_s17 + $0xc0] sm:$0xf] %v861_v16  ;;  %v698_v21 = vor.u32 %v696_v15, %v695_v58  ;;  %v700_v45 = vrot.slane %v695_v58, 4 }
  0x79   : > { %v699_v38 = vsel %vm1257_vm5, %v691_v43, %v698_v21  ;;  %v865_v27 = vsel %vm1271_vm7, %v700_v45, %v1008_v17 }
  0x7a   : > { %1007 = vst [vmem:[%s1144_s17 + $0xc4] sm:$0xf] %v699_v38 }
  0x7b   : > { %1009 = vst [vmem:[%s1144_s17 + $0xc8] sm:$0x1] %v865_v27 }
  0x7c PF: > { %s13_s12 = sadd.s32 1, %s1110_s12  }
  0x7d   : > { %p10_p4 = scmp.ge.s32.totalorder %s13_s12, 4  }
  0x7f   :  { %12 = sbr.rel (!%p10_p4) target bundleno = 1 (0x1), region = 63 }

// kernel: corblock_s_forward.17
= control target key start
LH: loop header
LB: loop body
LE: loop exit
PB: predicated region body
PF: predicated region fallthrough
CT: control target
= control target key end

     0   :  { %s661_s1 = inlined_call_operand.vmem [shape: bf16[128,128], index: 1, kind: input, shape index: {}]   ;;  %s662_s2 = inlined_call_operand.vmem [shape: f32[1,128], index: 2, kind: input, shape index: {}]   ;;  %s663_s3 = inlined_call_operand.vmem [shape: f32[1,128], index: 3, kind: input, shape index: {}]   ;;  %s664_s0 = inlined_call_operand.vmem [shape: bf16[128,128], index: 0, kind: input, shape index: {}]   ;;  %s665_s4 = inlined_call_operand.vmem [shape: bf16[128,128], index: 4, kind: output, shape index: {0}]   ;;  %s666_s5 = inlined_call_operand.vmem [shape: f32[1,2,128], index: 5, kind: output, shape index: {1}]  }
   0x1   :  { %v383_v0 = vld [vmem:[%s661_s1 + $0x38] sm:$0xff]  ;;  %v382_v1 = vld [vmem:[%s661_s1 + $0x30] sm:$0xff]  ;;  %v381_v2 = vld [vmem:[%s661_s1 + $0x28] sm:$0xff] }
   0x2   :  { %179 = vmatpush.bf16.msra.mxu0 %v383_v0  ;;  %470 = vmatpush.bf16.msra.mxu1 %v383_v0  ;;  %v385_v3 = vld [vmem:[%s664_s0] sm:$0xff]   ;;  %v457_v5 = vld [vmem:[%s664_s0 + $0x10] sm:$0xff]   ;;  %v379_v15 = vld [vmem:[%s661_s1 + $0x18] sm:$0xff] }
   0x3   :  { %471 = vmatpush.bf16.msra.mxu2 %v383_v0  ;;  %472 = vmatpush.bf16.msra.mxu3 %v383_v0  ;;  %v380_v4 = vld [vmem:[%s661_s1 + $0x20] sm:$0xff]  ;;  %v461_v7 = vld [vmem:[%s664_s0 + $0x30] sm:$0xff]   ;;  %v386_v8 = vunpack.c.l.bf16 %v385_v3  ;;  %v387_v9 = vunpack.c.h.bf16 %v385_v3  ;;  %v394_v11 = vunpack.c.l.bf16 %v457_v5  ;;  %v395_v12 = vunpack.c.h.bf16 %v457_v5  ;;  %v377_v34 = vld [vmem:[%s661_s1 + $0x8] sm:$0xff] }
   0x4   :  { %v459_v6 = vld [vmem:[%s664_s0 + $0x20] sm:$0xff]   ;;  %v410_v16 = vunpack.c.l.bf16 %v461_v7  ;;  %v411_v17 = vunpack.c.h.bf16 %v461_v7  ;;  %v378_v25 = vld [vmem:[%s661_s1 + $0x10] sm:$0xff]  ;;  %v456_v43 = vld [vmem:[%s664_s0 + $0x8] sm:$0xff]  }
   0x5   :  { %v553_v10 = vld [vmem:[%s662_s2] ss:$0 sm:$0xff]  ;;  %v402_v13 = vunpack.c.l.bf16 %v459_v6  ;;  %v403_v14 = vunpack.c.h.bf16 %v459_v6  ;;  %v458_v44 = vld [vmem:[%s664_s0 + $0x18] sm:$0xff]   ;;  %v460_v48 = vld [vmem:[%s664_s0 + $0x28] sm:$0xff]   ;;  %v390_v51 = vunpack.c.l.bf16 %v456_v43  ;;  %v391_v52 = vunpack.c.h.bf16 %v456_v43 }
   0x6   :  { %180 = vmatpush.bf16.msra.mxu0 %v382_v1  ;;  %473 = vmatpush.bf16.msra.mxu1 %v382_v1  ;;  %v55_v18 = vmul.f32 %v553_v10, %v386_v8  ;;  %v56_v19 = vmul.f32 %v553_v10, %v387_v9  ;;  %v563_v20 = vld [vmem:[%s663_s3] ss:$0 sm:$0xff]  ;;  %v59_v21 = vmul.f32 %v553_v10, %v394_v11  ;;  %v462_v49 = vld [vmem:[%s664_s0 + $0x38] sm:$0xff]   ;;  %v398_v53 = vunpack.c.l.bf16 %v458_v44 }
   0x7   :  { %474 = vmatpush.bf16.msra.mxu2 %v382_v1  ;;  %475 = vmatpush.bf16.msra.mxu3 %v382_v1  ;;  %v60_v22 = vmul.f32 %v553_v10, %v395_v12  ;;  %v63_v23 = vmul.f32 %v553_v10, %v402_v13  ;;  %v64_v24 = vmul.f32 %v553_v10, %v403_v14  ;;  %v376_v45 = vld [vmem:[%s661_s1] sm:$0xff]  ;;  %v399_v56 = vunpack.c.h.bf16 %v458_v44 }
   0x8   :  { %v67_v26 = vmul.f32 %v553_v10, %v410_v16  ;;  %v68_v27 = vmul.f32 %v553_v10, %v411_v17  ;;  %v75_v28 = vadd.f32 %v563_v20, %v55_v18  ;;  %v76_v29 = vadd.f32 %v563_v20, %v56_v19 }
   0x9   :  { %v79_v30 = vadd.f32 %v563_v20, %v59_v21  ;;  %v80_v31 = vadd.f32 %v563_v20, %v60_v22  ;;  %v83_v32 = vadd.f32 %v563_v20, %v63_v23  ;;  %v84_v33 = vadd.f32 %v563_v20, %v64_v24 }
   0xa   :  { %181 = vmatpush.bf16.msra.mxu0 %v381_v2  ;;  %476 = vmatpush.bf16.msra.mxu1 %v381_v2  ;;  %v87_v35 = vadd.f32 %v563_v20, %v67_v26  ;;  %v88_v36 = vadd.f32 %v563_v20, %v68_v27  ;;  %v91_v37 = vmax.f32 %v75_v28, 0.0  ;;  %v92_v38 = vmax.f32 %v76_v29, 0.0 }
   0xb   :  { %477 = vmatpush.bf16.msra.mxu2 %v381_v2  ;;  %478 = vmatpush.bf16.msra.mxu3 %v381_v2  ;;  %v95_v39 = vmax.f32 %v79_v30, 0.0  ;;  %v96_v40 = vmax.f32 %v80_v31, 0.0  ;;  %v99_v41 = vmax.f32 %v83_v32, 0.0  ;;  %v100_v42 = vmax.f32 %v84_v33, 0.0 }
   0xc   :  { %v103_v46 = vmax.f32 %v87_v35, 0.0  ;;  %v104_v47 = vmax.f32 %v88_v36, 0.0  ;;  %v107_v50 = vpack.c.bf16 %v92_v38, %v91_v37  ;;  %v406_v57 = vunpack.c.l.bf16 %v460_v48 }
   0xd   :  { %v109_v54 = vpack.c.bf16 %v96_v40, %v95_v39  ;;  %v111_v55 = vpack.c.bf16 %v100_v42, %v99_v41  ;;  %v407_v59 = vunpack.c.h.bf16 %v460_v48  ;;  %v414_v60 = vunpack.c.l.bf16 %v462_v49 }
   0xe   :  { %182 = vmatpush.bf16.msra.mxu0 %v380_v4  ;;  %479 = vmatpush.bf16.msra.mxu1 %v380_v4  ;;  %v113_v58 = vpack.c.bf16 %v104_v47, %v103_v46  ;;  %v415_v61 = vunpack.c.h.bf16 %v462_v49  ;;  %v57_v62 = vmul.f32 %v553_v10, %v390_v51  ;;  %v58_v63 = vmul.f32 %v553_v10, %v391_v52 }
   0xf   :  { %480 = vmatpush.bf16.msra.mxu2 %v380_v4  ;;  %481 = vmatpush.bf16.msra.mxu3 %v380_v4  ;;  %v61_v0 = vmul.f32 %v553_v10, %v398_v53  ;;  %v62_v1 = vmul.f32 %v553_v10, %v399_v56  ;;  %v65_v2 = vmul.f32 %v553_v10, %v406_v57 }
  0x10   :  { %v66_v3 = vmul.f32 %v553_v10, %v407_v59  ;;  %v69_v4 = vmul.f32 %v553_v10, %v414_v60  ;;  %v70_v5 = vmul.f32 %v553_v10, %v415_v61  ;;  %v77_v6 = vadd.f32 %v563_v20, %v57_v62 }
  0x11   :  { %v78_v7 = vadd.f32 %v563_v20, %v58_v63  ;;  %v81_v8 = vadd.f32 %v563_v20, %v61_v0  ;;  %v82_v9 = vadd.f32 %v563_v20, %v62_v1  ;;  %v85_v11 = vadd.f32 %v563_v20, %v65_v2 }
  0x12   :  { %183 = vmatpush.bf16.msra.mxu0 %v379_v15  ;;  %482 = vmatpush.bf16.msra.mxu1 %v379_v15  ;;  %v86_v12 = vadd.f32 %v563_v20, %v66_v3  ;;  %v89_v13 = vadd.f32 %v563_v20, %v69_v4  ;;  %v90_v14 = vadd.f32 %v563_v20, %v70_v5 }
  0x13   :  { %483 = vmatpush.bf16.msra.mxu2 %v379_v15  ;;  %484 = vmatpush.bf16.msra.mxu3 %v379_v15  ;;  %v93_v15 = vmax.f32 %v77_v6, 0.0  ;;  %v94_v16 = vmax.f32 %v78_v7, 0.0  ;;  %v97_v17 = vmax.f32 %v81_v8, 0.0  ;;  %v98_v10 = vmax.f32 %v82_v9, 0.0 }
  0x14   :  { %v101_v18 = vmax.f32 %v85_v11, 0.0  ;;  %v102_v19 = vmax.f32 %v86_v12, 0.0  ;;  %v105_v21 = vmax.f32 %v89_v13, 0.0  ;;  %v106_v22 = vmax.f32 %v90_v14, 0.0 }
  0x15   :  { %v108_v23 = vpack.c.bf16 %v94_v16, %v93_v15  ;;  %v110_v24 = vpack.c.bf16 %v98_v10, %v97_v17 }
  0x16   :  { %184 = vmatpush.bf16.msra.mxu0 %v378_v25  ;;  %485 = vmatpush.bf16.msra.mxu1 %v378_v25  ;;  %v114_v26 = vpack.c.bf16 %v106_v22, %v105_v21 }
  0x17   :  { %486 = vmatpush.bf16.msra.mxu2 %v378_v25  ;;  %487 = vmatpush.bf16.msra.mxu3 %v378_v25  ;;  %v112_v25 = vpack.c.bf16 %v102_v19, %v101_v18 }
  0x1a   :  { %185 = vmatpush.bf16.msra.mxu0 %v377_v34  ;;  %488 = vmatpush.bf16.msra.mxu1 %v377_v34 }
  0x1b   :  { %489 = vmatpush.bf16.msra.mxu2 %v377_v34  ;;  %490 = vmatpush.bf16.msra.mxu3 %v377_v34 }
  0x1e   :  { %186 = vmatpush.bf16.msra.mxu0 %v376_v45  ;;  %491 = vmatpush.bf16.msra.mxu1 %v376_v45 }
  0x1f   :  { %492 = vmatpush.bf16.msra.mxu2 %v376_v45  ;;  %493 = vmatpush.bf16.msra.mxu3 %v376_v45 }
  0x21   :  { %187 = vmatmul.bf16.vlgmr.msra.gmra.mxu0 %v107_v50  ;;  %197 = vmatmul.bf16.vlgmr.msra.gmra.mxu1 %v109_v54 }
  0x22   :  { %207 = vmatmul.bf16.vlgmr.msra.gmra.mxu2 %v111_v55  ;;  %217 = vmatmul.bf16.vlgmr.msra.gmra.mxu3 %v113_v58 }
  0x31   :  { %192 = vmatmul.bf16.gmra.mxu0 %v108_v23  ;;  %202 = vmatmul.bf16.gmra.mxu1 %v110_v24 }
  0x32   :  { %212 = vmatmul.bf16.gmra.mxu2 %v112_v25  ;;  %222 = vmatmul.bf16.gmra.mxu3 %v114_v26 }
  0x9e   :  { %v188_v27 = vpop.f32.mrf.mxu0  ;;  %v198_v28 = vpop.f32.mrf.mxu1 }
  0x9f   :  { %v228_v37 = vpack.c.bf16 %v188_v27, %v188_v27  ;;  %v232_v46 = vpack.c.bf16 %v198_v28, %v198_v28 }
  0xa1   :  { %v260_v44 = vunpack.c.l.bf16 %v228_v37  ;;  %v264_v59 = vunpack.c.l.bf16 %v232_v46 }
  0xa3   :  { %v298_v50 = vmul.f32 %v260_v44, %v260_v44  ;;  %v302_v6 = vmul.f32 %v264_v59, %v264_v59 }
  0xa5   :  { %v208_v29 = vpop.f32.mrf.mxu2  ;;  %v616_v20 = vpop.f32.mrf.mxu3 }
  0xa6   :  { %v190_v30 = vpop.f32.mrf.mxu0  ;;  %v200_v31 = vpop.f32.mrf.mxu1  ;;  %v236_v5 = vpack.c.bf16 %v208_v29, %v208_v29 }
  0xa7   :  { %v419_v32 = vpack.c.bf16 %v190_v30, %v188_v27  ;;  %v429_v33 = vpack.c.bf16 %v200_v31, %v198_v28  ;;  %v229_v34 = vpack.c.bf16 %v190_v30, %v190_v30  ;;  %v233_v52 = vpack.c.bf16 %v200_v31, %v200_v31 }
  0xa8   :  { %v268_v19 = vunpack.c.l.bf16 %v236_v5  ;;  %v240_v30 = vpack.c.bf16 %v616_v20, %v616_v20 }
  0xa9   :  { %420 = vst [vmem:[%s665_s4] sm:$0xff] %v419_v32   ;;  %v261_v43 = vunpack.c.l.bf16 %v229_v34  ;;  %v265_v0 = vunpack.c.l.bf16 %v233_v52 }
  0xaa   :  { %464 = vst [vmem:[%s665_s4 + $0x10] sm:$0xff] %v429_v33   ;;  %v306_v31 = vmul.f32 %v268_v19, %v268_v19 }
  0xab   :  { %v299_v47 = vmul.f32 %v261_v43, %v261_v43  ;;  %v276_v51 = vadd.f32 %v261_v43, %v260_v44  ;;  %v303_v16 = vmul.f32 %v265_v0, %v265_v0 }
  0xad   :  { %v210_v35 = vpop.f32.mrf.mxu2  ;;  %v624_v36 = vpop.f32.mrf.mxu3  ;;  %v314_v60 = vadd.f32 %v299_v47, %v298_v50 }
  0xae   :  { %v193_v38 = vpop.f32.mrf.mxu0  ;;  %v203_v39 = vpop.f32.mrf.mxu1  ;;  %v439_v40 = vpack.c.bf16 %v210_v35, %v208_v29  ;;  %v449_v41 = vpack.c.bf16 %v624_v36, %v616_v20  ;;  %v237_v13 = vpack.c.bf16 %v210_v35, %v210_v35  ;;  %v241_v35 = vpack.c.bf16 %v624_v36, %v624_v36 }
  0xaf   :  { %v230_v42 = vpack.c.bf16 %v193_v38, %v193_v38  ;;  %v234_v62 = vpack.c.bf16 %v203_v39, %v203_v39 }
  0xb0   :  { %466 = vst [vmem:[%s665_s4 + $0x20] sm:$0xff] %v439_v40   ;;  %v269_v25 = vunpack.c.l.bf16 %v237_v13  ;;  %v273_v46 = vunpack.c.l.bf16 %v241_v35 }
  0xb1   :  { %468 = vst [vmem:[%s665_s4 + $0x30] sm:$0xff] %v449_v41   ;;  %v262_v45 = vunpack.c.l.bf16 %v230_v42  ;;  %v266_v7 = vunpack.c.l.bf16 %v234_v62  ;;  %v272_v41 = vunpack.c.l.bf16 %v240_v30 }
  0xb2   :  { %v307_v37 = vmul.f32 %v269_v25, %v269_v25 }
  0xb3   :  { %v300_v55 = vmul.f32 %v262_v45, %v262_v45  ;;  %v277_v61 = vadd.f32 %v276_v51, %v262_v45  ;;  %v304_v21 = vmul.f32 %v266_v7, %v266_v7  ;;  %v310_v51 = vmul.f32 %v272_v41, %v272_v41 }
  0xb5   :  { %v213_v48 = vpop.f32.mrf.mxu2  ;;  %v634_v49 = vpop.f32.mrf.mxu3  ;;  %v315_v1 = vadd.f32 %v314_v60, %v300_v55 }
  0xb6   :  { %v195_v53 = vpop.f32.mrf.mxu0  ;;  %v205_v54 = vpop.f32.mrf.mxu1  ;;  %v238_v24 = vpack.c.bf16 %v213_v48, %v213_v48  ;;  %v242_v45 = vpack.c.bf16 %v634_v49, %v634_v49 }
  0xb7   :  { %v231_v56 = vpack.c.bf16 %v195_v53, %v195_v53  ;;  %v424_v57 = vpack.c.bf16 %v195_v53, %v193_v38  ;;  %v434_v58 = vpack.c.bf16 %v205_v54, %v203_v39  ;;  %v235_v4 = vpack.c.bf16 %v205_v54, %v205_v54 }
  0xb8   :  { %v270_v34 = vunpack.c.l.bf16 %v238_v24  ;;  %v274_v36 = vunpack.c.l.bf16 %v242_v45  ;;  %v311_v54 = vmul.f32 %v273_v46, %v273_v46 }
  0xb9   :  { %463 = vst [vmem:[%s665_s4 + $0x8] sm:$0xff] %v424_v57   ;;  %v263_v63 = vunpack.c.l.bf16 %v231_v56  ;;  %v267_v10 = vunpack.c.l.bf16 %v235_v4 }
  0xba   :  { %465 = vst [vmem:[%s665_s4 + $0x18] sm:$0xff] %v434_v58   ;;  %v308_v43 = vmul.f32 %v270_v34, %v270_v34 }
  0xbb   :  { %v278_v2 = vadd.f32 %v277_v61, %v263_v63  ;;  %v301_v3 = vmul.f32 %v263_v63, %v263_v63  ;;  %v305_v27 = vmul.f32 %v267_v10, %v267_v10 }
  0xbd   :  { %v279_v8 = vadd.f32 %v278_v2, %v264_v59  ;;  %v316_v9 = vadd.f32 %v315_v1, %v301_v3  ;;  %v215_v11 = vpop.f32.mrf.mxu2  ;;  %v225_v12 = vpop.f32.mrf.mxu3  ;;  %v312_v59 = vmul.f32 %v274_v36, %v274_v36 }
  0xbe   :  { %v444_v14 = vpack.c.bf16 %v215_v11, %v213_v48  ;;  %v454_v15 = vpack.c.bf16 %v225_v12, %v634_v49  ;;  %v239_v29 = vpack.c.bf16 %v215_v11, %v215_v11  ;;  %v243_v50 = vpack.c.bf16 %v225_v12, %v225_v12 }
  0xbf   :  { %v317_v17 = vadd.f32 %v316_v9, %v302_v6  ;;  %v280_v18 = vadd.f32 %v279_v8, %v265_v0 }
  0xc0   :  { %467 = vst [vmem:[%s665_s4 + $0x28] sm:$0xff] %v444_v14   ;;  %v271_v40 = vunpack.c.l.bf16 %v239_v29  ;;  %v275_v57 = vunpack.c.l.bf16 %v243_v50 }
  0xc1   :  { %v281_v22 = vadd.f32 %v280_v18, %v266_v7  ;;  %v318_v23 = vadd.f32 %v317_v17, %v303_v16  ;;  %469 = vst [vmem:[%s665_s4 + $0x38] sm:$0xff] %v454_v15  }
  0xc2   :  { %v309_v48 = vmul.f32 %v271_v40, %v271_v40  ;;  %v313_v63 = vmul.f32 %v275_v57, %v275_v57 }
  0xc3   :  { %v282_v26 = vadd.f32 %v281_v22, %v267_v10  ;;  %v319_v28 = vadd.f32 %v318_v23, %v304_v21 }
  0xc5   :  { %v283_v32 = vadd.f32 %v282_v26, %v268_v19  ;;  %v320_v33 = vadd.f32 %v319_v28, %v305_v27 }
  0xc7   :  { %v321_v38 = vadd.f32 %v320_v33, %v306_v31  ;;  %v284_v39 = vadd.f32 %v283_v32, %v269_v25 }
  0xc9   :  { %v285_v42 = vadd.f32 %v284_v39, %v270_v34  ;;  %v322_v44 = vadd.f32 %v321_v38, %v307_v37 }
  0xcb   :  { %v323_v20 = vadd.f32 %v322_v44, %v308_v43  ;;  %v286_v47 = vadd.f32 %v285_v42, %v271_v40 }
  0xcd   :  { %v287_v52 = vadd.f32 %v286_v47, %v272_v41  ;;  %v324_v53 = vadd.f32 %v323_v20, %v309_v48 }
  0xcf   :  { %v325_v55 = vadd.f32 %v324_v53, %v310_v51  ;;  %v288_v56 = vadd.f32 %v287_v52, %v273_v46 }
  0xd1   :  { %v289_v58 = vadd.f32 %v288_v56, %v274_v36  ;;  %v326_v60 = vadd.f32 %v325_v55, %v311_v54 }
  0xd3   :  { %v327_v61 = vadd.f32 %v326_v60, %v312_v59  ;;  %v290_v62 = vadd.f32 %v289_v58, %v275_v57 }
  0xd5   :  { %v291_v49 = vrot.slane %v290_v62, 4  ;;  %v328_v0 = vadd.f32 %v327_v61, %v313_v63 }
  0xd7   :  { %v292_v1 = vadd.f32 %v291_v49, %v290_v62  ;;  %v329_v2 = vrot.slane %v328_v0, 4 }
  0xd9   :  { %v293_v3 = vrot.slane %v292_v1, 2  ;;  %v330_v4 = vadd.f32 %v329_v2, %v328_v0 }
  0xdb   :  { %v294_v5 = vadd.f32 %v293_v3, %v292_v1  ;;  %v331_v6 = vrot.slane %v330_v4, 2 }
  0xdd   :  { %v295_v7 = vrot.slane %v294_v5, 1  ;;  %v332_v8 = vadd.f32 %v331_v6, %v330_v4 }
  0xdf   :  { %v296_v9 = vadd.f32 %v295_v7, %v294_v5  ;;  %v333_v11 = vrot.slane %v332_v8, 1 }
  0xe1   :  { %297 = vst [vmem:[%s666_s5] sm:$0x1] %v296_v9  ;;  %v334_v12 = vadd.f32 %v333_v11, %v332_v8 }
  0xe3   :  { %335 = vst [vmem:[%s666_s5 + $0x1] sm:$0x1] %v334_v12 }

// kernel: corblock_s_forward.20
= control target key start
LH: loop header
LB: loop body
LE: loop exit
PB: predicated region body
PF: predicated region fallthrough
CT: control target
= control target key end

     0   :  { %s541_s12 = smov 0   ;;  %s682_s0 = inlined_call_operand.vmem [shape: bf16[2,8,8,128], index: 0, kind: input, shape index: {}]   ;;  %s683_s1 = inlined_call_operand.vmem [shape: f32[1,128], index: 1, kind: input, shape index: {}]   ;;  %s684_s2 = inlined_call_operand.vmem [shape: f32[1,128], index: 2, kind: input, shape index: {}]   ;;  %s685_s3 = inlined_call_operand.vmem [shape: bf16[2,10,10,128], index: 3, kind: output, shape index: {}]  }
   0x1 LB: > { %s438_s13 = sadd.s32 4294967295, %s518_s12   ;;  %p442_p0 = scmp.ge.s32.totalorder %s518_s12, 1  ;;  %s518_s12 = sphi %s541_s12, %s13_s12  }
   0x2   : > { %p137_p1 = scmp.lt.s32.totalorder %s518_s12, 3 }
   0x4   : > { %p138_p2 = pnand %p442_p0, %p137_p1 }
   0x5   : > { %p161_p3 = scmp.lt.s32.totalorder (!%p138_p2), %s438_s13, 1 }
   0x6   : > { %141 = sbr.rel (%p138_p2) target bundleno = 51 (0x33), region = 32 }
   0xb   : > { %s691_s13 = smov (!%p161_p3, %s438_s13), 1  ;;  %v510_v0 = vld [vmem:[%s683_s1] ss:$0 sm:$0xff]  ;;  %v520_v4 = vmov 0   ;;  %vm329_vm0 = vcmask 1043456   ;;  %vm335_vm2 = vcmask 1040384  }
   0xc   : > { %s500_s14 = smul.u32 80, %s691_s13  ;;  %s480_s15 = sshll.u32 %s691_s13, 5  ;;  %v511_v6 = vld [vmem:[%s684_s2] ss:$0 sm:$0xff]  ;;  %vm330_vm1 = vsmask.f32 7938 }
   0xd   : > { %s165_s18 = scalar_lea.vmem %s682_s0, %s480_s15  ;;  %vm336_vm3 = vsmask.f32 256  ;;  %vm597_vm4 = vmand %vm329_vm0, %vm330_vm1 }
   0xe   : > { %s558_s23 = scalar_lea.vmem %s685_s3, %s500_s14  ;;  %v482_v1 = vld [vmem:[%s165_s18] sm:$0xff]   ;;  %v497_v2 = vld [vmem:[%s165_s18 + $0x8] sm:$0xff]   ;;  %v498_v3 = vld [vmem:[%s165_s18 + $0x10] sm:$0xff]  }
   0xf   : > { %174 = vst [vmem:[%s558_s23 + $0x8] sm:$0xf] %v520_v4  ;;  %v483_v5 = vunpack.c.l.bf16 %v482_v1  ;;  %v484_v7 = vunpack.c.h.bf16 %v482_v1  ;;  %v487_v8 = vunpack.c.l.bf16 %v497_v2  ;;  %v488_v9 = vunpack.c.h.bf16 %v497_v2  ;;  %v499_v10 = vld [vmem:[%s165_s18 + $0x18] sm:$0xff]   ;;  %vm606_vm5 = vmand %vm335_vm2, %vm336_vm3 }
  0x10   : > { %172 = vst [vmem:[%s558_s23] sm:$0xf] %v520_v4  ;;  %v491_v11 = vunpack.c.l.bf16 %v498_v3  ;;  %v492_v12 = vunpack.c.h.bf16 %v498_v3  ;;  %v495_v13 = vunpack.c.l.bf16 %v499_v10  ;;  %v496_v14 = vunpack.c.h.bf16 %v499_v10 }
  0x11   : > { %173 = vst [vmem:[%s558_s23 + $0x4] sm:$0x1] %v520_v4  ;;  %v212_v15 = vmul.f32 %v510_v0, %v483_v5  ;;  %v213_v16 = vmul.f32 %v510_v0, %v484_v7  ;;  %v214_v17 = vmul.f32 %v510_v0, %v487_v8  ;;  %v215_v18 = vmul.f32 %v510_v0, %v488_v9 }
  0x12   : > { %175 = vst [vmem:[%s558_s23 + $0xc] sm:$0x1] %v520_v4  ;;  %v216_v19 = vmul.f32 %v510_v0, %v491_v11  ;;  %v217_v20 = vmul.f32 %v510_v0, %v492_v12  ;;  %v218_v21 = vmul.f32 %v510_v0, %v495_v13  ;;  %v219_v22 = vmul.f32 %v510_v0, %v496_v14 }
  0x13   : > { %176 = vst [vmem:[%s558_s23 + $0x10] sm:$0xf] %v520_v4  ;;  %v224_v23 = vadd.f32 %v511_v6, %v212_v15  ;;  %v225_v24 = vadd.f32 %v511_v6, %v213_v16  ;;  %v226_v25 = vadd.f32 %v511_v6, %v214_v17  ;;  %v227_v26 = vadd.f32 %v511_v6, %v215_v18 }
  0x14   : > { %177 = vst [vmem:[%s558_s23 + $0x14] sm:$0x1] %v520_v4  ;;  %v228_v27 = vadd.f32 %v511_v6, %v216_v19  ;;  %v229_v31 = vadd.f32 %v511_v6, %v217_v20  ;;  %v230_v33 = vadd.f32 %v511_v6, %v218_v21  ;;  %v231_v37 = vadd.f32 %v511_v6, %v219_v22 }
  0x15   : > { %178 = vst [vmem:[%s558_s23 + $0x18] sm:$0xf] %v520_v4  ;;  %v232_v28 = vmax.f32 %v224_v23, 0.0  ;;  %v233_v29 = vmax.f32 %v225_v24, 0.0  ;;  %v234_v30 = vmax.f32 %v226_v25, 0.0  ;;  %v235_v32 = vmax.f32 %v227_v26, 0.0 }
  0x16   : > { %179 = vst [vmem:[%s558_s23 + $0x1c] sm:$0x1] %v520_v4  ;;  %v236_v38 = vmax.f32 %v228_v27, 0.0  ;;  %v237_v41 = vmax.f32 %v229_v31, 0.0  ;;  %v446_v46 = vld [vmem:[%s558_s23 + $0x8] sm:$0xf] }
  0x17   : > { %180 = vst [vmem:[%s558_s23 + $0x20] sm:$0xf] %v520_v4  ;;  %v240_v34 = vpack.c.bf16 %v232_v28, %v232_v28  ;;  %v241_v35 = vpack.c.bf16 %v233_v29, %v233_v29  ;;  %v242_v36 = vpack.c.bf16 %v234_v30, %v234_v30  ;;  %v243_v44 = vpack.c.bf16 %v235_v32, %v235_v32 }
  0x18   : > { %181 = vst [vmem:[%s558_s23 + $0x24] sm:$0x1] %v520_v4  ;;  %v238_v48 = vmax.f32 %v230_v33, 0.0  ;;  %v239_v49 = vmax.f32 %v231_v37, 0.0  ;;  %v244_v53 = vpack.c.bf16 %v236_v38, %v236_v38  ;;  %v245_v59 = vpack.c.bf16 %v237_v41, %v237_v41 }
  0x19   : > { %182 = vst [vmem:[%s558_s23 + $0x28] sm:$0xf] %v520_v4  ;;  %v249_v39 = vshrl.u32 %v240_v34, 16  ;;  %v252_v40 = vshll.u32 %v240_v34, 16  ;;  %v257_v42 = vshrl.u32 %v241_v35, 16  ;;  %v260_v43 = vshll.u32 %v241_v35, 16 }
  0x1a   : > { %183 = vst [vmem:[%s558_s23 + $0x2c] sm:$0x1] %v520_v4  ;;  %v265_v47 = vshrl.u32 %v242_v36, 16  ;;  %v448_v50 = vld [vmem:[%s558_s23 + $0xc] sm:$0x1]  ;;  %v268_v52 = vshll.u32 %v242_v36, 16  ;;  %v246_v3 = vpack.c.bf16 %v238_v48, %v238_v48  ;;  %v247_v18 = vpack.c.bf16 %v239_v49, %v239_v49 }
  0x1b   : > { %184 = vst [vmem:[%s558_s23 + $0x30] sm:$0xf] %v520_v4  ;;  %v251_v45 = vrot.slane %v249_v39, 7  ;;  %v259_v51 = vrot.slane %v257_v42, 7  ;;  %v450_v57 = vld [vmem:[%s558_s23 + $0x10] sm:$0xf] }
  0x1c   : > { %185 = vst [vmem:[%s558_s23 + $0x34] sm:$0x1] %v520_v4  ;;  %v267_v58 = vrot.slane %v265_v47, 7  ;;  %v452_v62 = vld [vmem:[%s558_s23 + $0x14] sm:$0x1]  ;;  %v273_v63 = vshrl.u32 %v243_v44, 16 }
  0x1d   : > { %186 = vst [vmem:[%s558_s23 + $0x38] sm:$0xf] %v520_v4  ;;  %v254_v54 = vor.u32 %v252_v40, %v251_v45  ;;  %v255_v56 = vrot.slane %v251_v45, 4  ;;  %v262_v61 = vor.u32 %v260_v43, %v259_v51  ;;  %v276_v0 = vshll.u32 %v243_v44, 16  ;;  %v454_v2 = vld [vmem:[%s558_s23 + $0x18] sm:$0xf] }
  0x1e   : > { %187 = vst [vmem:[%s558_s23 + $0x3c] sm:$0x1] %v520_v4  ;;  %v263_v1 = vrot.slane %v259_v51, 4  ;;  %v270_v6 = vor.u32 %v268_v52, %v267_v58  ;;  %v456_v7 = vld [vmem:[%s558_s23 + $0x1c] sm:$0x1]  ;;  %v275_v8 = vrot.slane %v273_v63, 7 }
  0x1f   : > { %188 = vst [vmem:[%s558_s23 + $0x40] sm:$0xf] %v520_v4  ;;  %v333_v5 = vsel %vm597_vm4, %v254_v54, %v446_v46  ;;  %v281_v9 = vshrl.u32 %v244_v53, 16  ;;  %v339_v10 = vsel %vm606_vm5, %v255_v56, %v448_v50  ;;  %v271_v11 = vrot.slane %v267_v58, 4  ;;  %v458_v16 = vld [vmem:[%s558_s23 + $0x20] sm:$0xf] }
  0x20   : > { %189 = vst [vmem:[%s558_s23 + $0x44] sm:$0x1] %v520_v4  ;;  %v284_v12 = vshll.u32 %v244_v53, 16  ;;  %v289_v13 = vshrl.u32 %v245_v59, 16  ;;  %v342_v14 = vsel %vm597_vm4, %v262_v61, %v450_v57  ;;  %v278_v15 = vor.u32 %v276_v0, %v275_v8  ;;  %v460_v23 = vld [vmem:[%s558_s23 + $0x24] sm:$0x1] }
  0x21   : > { %190 = vst [vmem:[%s558_s23 + $0x48] sm:$0xf] %v520_v4  ;;  %v283_v17 = vrot.slane %v281_v9, 7  ;;  %v345_v19 = vsel %vm606_vm5, %v263_v1, %v452_v62  ;;  %v279_v20 = vrot.slane %v275_v8, 4  ;;  %v292_v22 = vshll.u32 %v245_v59, 16 }
  0x22   : > { %191 = vst [vmem:[%s558_s23 + $0x4c] sm:$0x1] %v520_v4  ;;  %v291_v21 = vrot.slane %v289_v13, 7  ;;  %v348_v4 = vsel %vm597_vm4, %v270_v6, %v454_v2  ;;  %v462_v25 = vld [vmem:[%s558_s23 + $0x28] sm:$0xf]  ;;  %v351_v26 = vsel %vm606_vm5, %v271_v11, %v456_v7  ;;  %v297_v28 = vshrl.u32 %v246_v3, 16 }
  0x23   : > { %447 = vst [vmem:[%s558_s23 + $0x8] sm:$0xf] %v333_v5  ;;  %v286_v24 = vor.u32 %v284_v12, %v283_v17  ;;  %v287_v27 = vrot.slane %v283_v17, 4  ;;  %v300_v29 = vshll.u32 %v246_v3, 16  ;;  %v354_v30 = vsel %vm597_vm4, %v278_v15, %v458_v16  ;;  %v464_v31 = vld [vmem:[%s558_s23 + $0x2c] sm:$0x1] }
  0x24   : > { %449 = vst [vmem:[%s558_s23 + $0xc] sm:$0x1] %v339_v10  ;;  %v294_v32 = vor.u32 %v292_v22, %v291_v21  ;;  %v466_v33 = vld [vmem:[%s558_s23 + $0x30] sm:$0xf]  ;;  %v357_v34 = vsel %vm606_vm5, %v279_v20, %v460_v23  ;;  %v295_v35 = vrot.slane %v291_v21, 4  ;;  %v299_v36 = vrot.slane %v297_v28, 7 }
  0x25   : > { %451 = vst [vmem:[%s558_s23 + $0x10] sm:$0xf] %v342_v14  ;;  %v305_v37 = vshrl.u32 %v247_v18, 16  ;;  %v360_v38 = vsel %vm597_vm4, %v286_v24, %v462_v25  ;;  %v468_v39 = vld [vmem:[%s558_s23 + $0x34] sm:$0x1]  ;;  %v308_v40 = vshll.u32 %v247_v18, 16  ;;  %v363_v41 = vsel %vm606_vm5, %v287_v27, %v464_v31 }
  0x26   : > { %453 = vst [vmem:[%s558_s23 + $0x14] sm:$0x1] %v345_v19  ;;  %v302_v42 = vor.u32 %v300_v29, %v299_v36  ;;  %v470_v43 = vld [vmem:[%s558_s23 + $0x38] sm:$0xf]  ;;  %v303_v44 = vrot.slane %v299_v36, 4  ;;  %v366_v46 = vsel %vm597_vm4, %v294_v32, %v466_v33  ;;  %v369_v48 = vsel %vm606_vm5, %v295_v35, %v468_v39 }
  0x27   : > { %455 = vst [vmem:[%s558_s23 + $0x18] sm:$0xf] %v348_v4  ;;  %v307_v45 = vrot.slane %v305_v37, 7  ;;  %v472_v47 = vld [vmem:[%s558_s23 + $0x3c] sm:$0x1] }
  0x28   : > { %457 = vst [vmem:[%s558_s23 + $0x1c] sm:$0x1] %v351_v26  ;;  %v474_v50 = vld [vmem:[%s558_s23 + $0x40] sm:$0xf]  ;;  %v372_v52 = vsel %vm597_vm4, %v302_v42, %v470_v43  ;;  %v476_v53 = vld [vmem:[%s558_s23 + $0x44] sm:$0x1]  ;;  %v375_v54 = vsel %vm606_vm5, %v303_v44, %v472_v47 }
  0x29   : > { %459 = vst [vmem:[%s558_s23 + $0x20] sm:$0xf] %v354_v30  ;;  %v310_v49 = vor.u32 %v308_v40, %v307_v45  ;;  %v311_v51 = vrot.slane %v307_v45, 4 }
  0x2a   : > { %461 = vst [vmem:[%s558_s23 + $0x24] sm:$0x1] %v357_v34 }
  0x2b   : > { %463 = vst [vmem:[%s558_s23 + $0x28] sm:$0xf] %v360_v38  ;;  %v378_v56 = vsel %vm597_vm4, %v310_v49, %v474_v50  ;;  %v381_v57 = vsel %vm606_vm5, %v311_v51, %v476_v53 }
  0x2c   : > { %465 = vst [vmem:[%s558_s23 + $0x2c] sm:$0x1] %v363_v41 }
  0x2d   : > { %467 = vst [vmem:[%s558_s23 + $0x30] sm:$0xf] %v366_v46 }
  0x2e   : > { %469 = vst [vmem:[%s558_s23 + $0x34] sm:$0x1] %v369_v48 }
  0x2f   : > { %471 = vst [vmem:[%s558_s23 + $0x38] sm:$0xf] %v372_v52 }
  0x30   : > { %473 = vst [vmem:[%s558_s23 + $0x3c] sm:$0x1] %v375_v54 }
  0x31   : > { %475 = vst [vmem:[%s558_s23 + $0x40] sm:$0xf] %v378_v56 }
  0x32   : > { %477 = vst [vmem:[%s558_s23 + $0x44] sm:$0x1] %v381_v57 }
  0x33 PF: > { %s13_s12 = sadd.s32 1, %s518_s12  }
  0x34   : > { %p10_p4 = scmp.ge.s32.totalorder %s13_s12, 4  }
  0x36   :  { %12 = sbr.rel (!%p10_p4) target bundleno = 1 (0x1), region = 63 }

// kernel: corblock_s_forward.18
= control target key start
LH: loop header
LB: loop body
LE: loop exit
PB: predicated region body
PF: predicated region fallthrough
CT: control target
= control target key end

     0   :  { %s555_s0 = inlined_call_operand.vmem [shape: bf16[128,128], index: 0, kind: input, shape index: {}]   ;;  %s556_s1 = inlined_call_operand.vmem [shape: f32[1,128], index: 1, kind: input, shape index: {}]   ;;  %s557_s2 = inlined_call_operand.vmem [shape: f32[1,128], index: 2, kind: input, shape index: {}]   ;;  %s558_s3 = inlined_call_operand.vmem [shape: bf16[128,128], index: 3, kind: input, shape index: {}]   ;;  %s559_s4 = inlined_call_operand.vmem [shape: f32[1,128], index: 4, kind: input, shape index: {}]   ;;  %s560_s5 = inlined_call_operand.vmem [shape: f32[1,128], index: 5, kind: input, shape index: {}]   ;;  %s561_s6 = inlined_call_operand.vmem [shape: bf16[128,128], index: 6, kind: output, shape index: {}]  }
   0x1   :  { %v236_v0 = vld [vmem:[%s555_s0] sm:$0xff]   ;;  %v339_v12 = vld [vmem:[%s555_s0 + $0x8] sm:$0xff]   ;;  %v340_v18 = vld [vmem:[%s555_s0 + $0x10] sm:$0xff]  }
   0x2   :  { %v405_v1 = vld [vmem:[%s556_s1] ss:$0 sm:$0xff]  ;;  %v237_v2 = vunpack.c.l.bf16 %v236_v0  ;;  %v238_v3 = vunpack.c.h.bf16 %v236_v0  ;;  %v346_v13 = vld [vmem:[%s558_s3 + $0x8] sm:$0xff]   ;;  %v241_v16 = vunpack.c.l.bf16 %v339_v12  ;;  %v242_v17 = vunpack.c.h.bf16 %v339_v12  ;;  %v347_v31 = vld [vmem:[%s558_s3 + $0x10] sm:$0xff]  }
   0x3   :  { %v410_v4 = vld [vmem:[%s557_s2] ss:$0 sm:$0xff]  ;;  %v273_v21 = vunpack.c.l.bf16 %v346_v13  ;;  %v274_v22 = vunpack.c.h.bf16 %v346_v13  ;;  %v245_v29 = vunpack.c.l.bf16 %v340_v18  ;;  %v246_v30 = vunpack.c.h.bf16 %v340_v18  ;;  %v341_v40 = vld [vmem:[%s555_s0 + $0x18] sm:$0xff]  }
   0x4   :  { %v268_v5 = vld [vmem:[%s558_s3] sm:$0xff]   ;;  %v59_v9 = vmul.f32 %v405_v1, %v237_v2  ;;  %v60_v10 = vmul.f32 %v405_v1, %v238_v3  ;;  %v61_v25 = vmul.f32 %v405_v1, %v241_v16  ;;  %v62_v26 = vmul.f32 %v405_v1, %v242_v17  ;;  %v348_v45 = vld [vmem:[%s558_s3 + $0x18] sm:$0xff]   ;;  %v343_v16 = vld [vmem:[%s555_s0 + $0x28] sm:$0xff]  }
   0x5   :  { %v269_v6 = vunpack.c.l.bf16 %v268_v5  ;;  %v270_v7 = vunpack.c.h.bf16 %v268_v5  ;;  %v418_v8 = vld [vmem:[%s559_s4] ss:$0 sm:$0xff]  ;;  %v63_v38 = vmul.f32 %v405_v1, %v245_v29  ;;  %v64_v39 = vmul.f32 %v405_v1, %v246_v30  ;;  %v344_v30 = vld [vmem:[%s555_s0 + $0x30] sm:$0xff]  }
   0x6   :  { %v425_v11 = vld [vmem:[%s560_s5] ss:$0 sm:$0xff]  ;;  %v79_v19 = vadd.f32 %v410_v4, %v59_v9  ;;  %v80_v20 = vadd.f32 %v410_v4, %v60_v10  ;;  %v133_v27 = vmul.f32 %v418_v8, %v273_v21  ;;  %v134_v28 = vmul.f32 %v418_v8, %v274_v22 }
   0x7   :  { %v131_v14 = vmul.f32 %v418_v8, %v269_v6  ;;  %v132_v15 = vmul.f32 %v418_v8, %v270_v7  ;;  %v81_v34 = vadd.f32 %v410_v4, %v61_v25  ;;  %v82_v35 = vadd.f32 %v410_v4, %v62_v26  ;;  %v342_v54 = vld [vmem:[%s555_s0 + $0x20] sm:$0xff]   ;;  %v350_v25 = vld [vmem:[%s558_s3 + $0x28] sm:$0xff]  }
   0x8   :  { %v153_v36 = vadd.f32 %v425_v11, %v133_v27  ;;  %v154_v37 = vadd.f32 %v425_v11, %v134_v28  ;;  %v277_v43 = vunpack.c.l.bf16 %v347_v31  ;;  %v278_v44 = vunpack.c.h.bf16 %v347_v31  ;;  %v349_v5 = vld [vmem:[%s558_s3 + $0x20] sm:$0xff]  }
   0x9   :  { %v151_v23 = vadd.f32 %v425_v11, %v131_v14  ;;  %v152_v24 = vadd.f32 %v425_v11, %v132_v15  ;;  %v83_v48 = vadd.f32 %v410_v4, %v63_v38  ;;  %v84_v49 = vadd.f32 %v410_v4, %v64_v39 }
   0xa   :  { %v169_v46 = vadd.f32 %v153_v36, %v81_v34  ;;  %v170_v47 = vadd.f32 %v154_v37, %v82_v35  ;;  %v135_v51 = vmul.f32 %v418_v8, %v277_v43  ;;  %v136_v52 = vmul.f32 %v418_v8, %v278_v44  ;;  %v351_v43 = vld [vmem:[%s558_s3 + $0x30] sm:$0xff]  }
   0xb   :  { %v167_v32 = vadd.f32 %v151_v23, %v79_v19  ;;  %v168_v33 = vadd.f32 %v152_v24, %v80_v20  ;;  %v249_v53 = vunpack.c.l.bf16 %v341_v40  ;;  %v250_v57 = vunpack.c.h.bf16 %v341_v40 }
   0xc   :  { %v185_v55 = vmax.f32 %v169_v46, 0.0  ;;  %v186_v56 = vmax.f32 %v170_v47, 0.0  ;;  %v281_v58 = vunpack.c.l.bf16 %v348_v45  ;;  %v155_v59 = vadd.f32 %v425_v11, %v135_v51 }
   0xd   :  { %v183_v41 = vmax.f32 %v167_v32, 0.0  ;;  %v184_v42 = vmax.f32 %v168_v33, 0.0  ;;  %v156_v60 = vadd.f32 %v425_v11, %v136_v52  ;;  %v65_v61 = vmul.f32 %v405_v1, %v249_v53  ;;  %v345_v52 = vld [vmem:[%s555_s0 + $0x38] sm:$0xff]  }
   0xe   :  { %v282_v62 = vunpack.c.h.bf16 %v348_v45  ;;  %v307_v63 = vpack.c.bf16 %v186_v56, %v185_v55  ;;  %v66_v0 = vmul.f32 %v405_v1, %v250_v57  ;;  %v137_v2 = vmul.f32 %v418_v8, %v281_v58 }
   0xf   :  { %v302_v50 = vpack.c.bf16 %v184_v42, %v183_v41  ;;  %v253_v3 = vunpack.c.l.bf16 %v342_v54  ;;  %v171_v6 = vadd.f32 %v155_v59, %v83_v48  ;;  %v172_v7 = vadd.f32 %v156_v60, %v84_v49 }
  0x10   :  { %v85_v9 = vadd.f32 %v410_v4, %v65_v61  ;;  %v138_v10 = vmul.f32 %v418_v8, %v282_v62  ;;  %353 = vst [vmem:[%s561_s6 + $0x8] sm:$0xff] %v307_v63   ;;  %v86_v12 = vadd.f32 %v410_v4, %v66_v0  ;;  %v157_v13 = vadd.f32 %v425_v11, %v137_v2  ;;  %v352_v2 = vld [vmem:[%s558_s3 + $0x38] sm:$0xff]  }
  0x11   :  { %303 = vst [vmem:[%s561_s6] sm:$0xff] %v302_v50   ;;  %v254_v14 = vunpack.c.h.bf16 %v342_v54  ;;  %v67_v15 = vmul.f32 %v405_v1, %v253_v3  ;;  %v187_v17 = vmax.f32 %v171_v6, 0.0  ;;  %v188_v18 = vmax.f32 %v172_v7, 0.0 }
  0x12   :  { %v158_v19 = vadd.f32 %v425_v11, %v138_v10  ;;  %v285_v20 = vunpack.c.l.bf16 %v349_v5  ;;  %v173_v21 = vadd.f32 %v157_v13, %v85_v9  ;;  %v286_v24 = vunpack.c.h.bf16 %v349_v5 }
  0x13   :  { %v68_v22 = vmul.f32 %v405_v1, %v254_v14  ;;  %v87_v23 = vadd.f32 %v410_v4, %v67_v15  ;;  %v312_v26 = vpack.c.bf16 %v188_v18, %v187_v17  ;;  %v257_v29 = vunpack.c.l.bf16 %v343_v16 }
  0x14   :  { %v174_v27 = vadd.f32 %v158_v19, %v86_v12  ;;  %v139_v28 = vmul.f32 %v418_v8, %v285_v20  ;;  %v189_v31 = vmax.f32 %v173_v21, 0.0  ;;  %v140_v33 = vmul.f32 %v418_v8, %v286_v24 }
  0x15   :  { %v88_v32 = vadd.f32 %v410_v4, %v68_v22  ;;  %v258_v34 = vunpack.c.h.bf16 %v343_v16  ;;  %354 = vst [vmem:[%s561_s6 + $0x10] sm:$0xff] %v312_v26   ;;  %v69_v37 = vmul.f32 %v405_v1, %v257_v29  ;;  %v289_v38 = vunpack.c.l.bf16 %v350_v25 }
  0x16   :  { %v190_v35 = vmax.f32 %v174_v27, 0.0  ;;  %v159_v36 = vadd.f32 %v425_v11, %v139_v28  ;;  %v160_v39 = vadd.f32 %v425_v11, %v140_v33  ;;  %v290_v41 = vunpack.c.h.bf16 %v350_v25 }
  0x17   :  { %v70_v40 = vmul.f32 %v405_v1, %v258_v34  ;;  %v261_v42 = vunpack.c.l.bf16 %v344_v30  ;;  %v89_v46 = vadd.f32 %v410_v4, %v69_v37  ;;  %v141_v47 = vmul.f32 %v418_v8, %v289_v38 }
  0x18   :  { %v317_v44 = vpack.c.bf16 %v190_v35, %v189_v31  ;;  %v175_v45 = vadd.f32 %v159_v36, %v87_v23  ;;  %v176_v48 = vadd.f32 %v160_v39, %v88_v32  ;;  %v142_v50 = vmul.f32 %v418_v8, %v290_v41 }
  0x19   :  { %v90_v49 = vadd.f32 %v410_v4, %v70_v40  ;;  %v262_v51 = vunpack.c.h.bf16 %v344_v30  ;;  %v161_v54 = vadd.f32 %v425_v11, %v141_v47  ;;  %v71_v55 = vmul.f32 %v405_v1, %v261_v42 }
  0x1a   :  { %355 = vst [vmem:[%s561_s6 + $0x18] sm:$0xff] %v317_v44   ;;  %v191_v53 = vmax.f32 %v175_v45, 0.0  ;;  %v293_v56 = vunpack.c.l.bf16 %v351_v43  ;;  %v192_v57 = vmax.f32 %v176_v48, 0.0  ;;  %v162_v58 = vadd.f32 %v425_v11, %v142_v50 }
  0x1b   :  { %v72_v59 = vmul.f32 %v405_v1, %v262_v51  ;;  %v294_v60 = vunpack.c.h.bf16 %v351_v43  ;;  %v177_v61 = vadd.f32 %v161_v54, %v89_v46  ;;  %v91_v62 = vadd.f32 %v410_v4, %v71_v55 }
  0x1c   :  { %v143_v63 = vmul.f32 %v418_v8, %v293_v56  ;;  %v265_v0 = vunpack.c.l.bf16 %v345_v52  ;;  %v322_v3 = vpack.c.bf16 %v192_v57, %v191_v53  ;;  %v178_v5 = vadd.f32 %v162_v58, %v90_v49 }
  0x1d   :  { %v92_v6 = vadd.f32 %v410_v4, %v72_v59  ;;  %v144_v7 = vmul.f32 %v418_v8, %v294_v60  ;;  %v193_v9 = vmax.f32 %v177_v61, 0.0  ;;  %v266_v12 = vunpack.c.h.bf16 %v345_v52 }
  0x1e   :  { %v163_v10 = vadd.f32 %v425_v11, %v143_v63  ;;  %v73_v13 = vmul.f32 %v405_v1, %v265_v0  ;;  %356 = vst [vmem:[%s561_s6 + $0x20] sm:$0xff] %v322_v3   ;;  %v194_v14 = vmax.f32 %v178_v5, 0.0  ;;  %v297_v16 = vunpack.c.l.bf16 %v352_v2 }
  0x1f   :  { %v164_v15 = vadd.f32 %v425_v11, %v144_v7  ;;  %v298_v17 = vunpack.c.h.bf16 %v352_v2  ;;  %v74_v19 = vmul.f32 %v405_v1, %v266_v12 }
  0x20   :  { %v179_v18 = vadd.f32 %v163_v10, %v91_v62  ;;  %v93_v20 = vadd.f32 %v410_v4, %v73_v13  ;;  %v327_v21 = vpack.c.bf16 %v194_v14, %v193_v9  ;;  %v145_v23 = vmul.f32 %v418_v8, %v297_v16 }
  0x21   :  { %v180_v22 = vadd.f32 %v164_v15, %v92_v6  ;;  %v146_v24 = vmul.f32 %v418_v8, %v298_v17  ;;  %v94_v26 = vadd.f32 %v410_v4, %v74_v19 }
  0x22   :  { %v195_v25 = vmax.f32 %v179_v18, 0.0  ;;  %357 = vst [vmem:[%s561_s6 + $0x28] sm:$0xff] %v327_v21   ;;  %v165_v28 = vadd.f32 %v425_v11, %v145_v23 }
  0x23   :  { %v196_v27 = vmax.f32 %v180_v22, 0.0  ;;  %v166_v1 = vadd.f32 %v425_v11, %v146_v24 }
  0x24   :  { %v181_v30 = vadd.f32 %v165_v28, %v93_v20 }
  0x25   :  { %v332_v29 = vpack.c.bf16 %v196_v27, %v195_v25  ;;  %v182_v31 = vadd.f32 %v166_v1, %v94_v26 }
  0x26   :  { %v197_v8 = vmax.f32 %v181_v30, 0.0 }
  0x27   :  { %358 = vst [vmem:[%s561_s6 + $0x30] sm:$0xff] %v332_v29   ;;  %v198_v32 = vmax.f32 %v182_v31, 0.0 }
  0x29   :  { %v337_v33 = vpack.c.bf16 %v198_v32, %v197_v8 }
  0x2b   :  { %359 = vst [vmem:[%s561_s6 + $0x38] sm:$0xff] %v337_v33  }

// kernel: corblock_s_forward.16
= control target key start
LH: loop header
LB: loop body
LE: loop exit
PB: predicated region body
PF: predicated region fallthrough
CT: control target
= control target key end

     0   :  { %s2755_s12 = smov 0   ;;  %s2757_s13 = smov 0   ;;  %s3207_s0 = inlined_call_operand.vmem [shape: bf16[2,2,2,9,9,128], index: 0, kind: input, shape index: {}]   ;;  %s3208_s1 = inlined_call_operand.vmem [shape: bf16[9,128,128], index: 1, kind: input, shape index: {}]   ;;  %s3209_s2 = inlined_call_operand.vmem [shape: bf16[2,8,8,128], index: 2, kind: output, shape index: {0}]   ;;  %s3210_s3 = inlined_call_operand.vmem [shape: f32[2,2,128], index: 3, kind: output, shape index: {1}]  }
   0x1   :  { %s2759_s14 = smov 0  }
   0x2 LB: > { %s26_s15 = sadd.s32 1, %s2729_s13  ;;  %p1959_p0 = scmp.ge.s32.totalorder %s2733_s14, 1  ;;  %s2733_s14 = sphi %s2759_s14, %s14_s14   ;;  %s2729_s13 = sphi %s2757_s13, %s3214_s13   ;;  %s2725_s12 = sphi %s2755_s12, %s3213_s12  }
   0x3   : > { %p28_p1 = scmp.ge.s32.totalorder %s26_s15, 2  ;;  %p165_p2 = scmp.lt.s32.totalorder %s2733_s14, 3 }
   0x5   : > { %s3216_s15 = smov (%p28_p1, %s26_s15), 0  ;;  %p166_p3 = pnand %p1959_p0, %p165_p2 }
   0x6   : > { %p203_p4 = scmp.lt.s32.totalorder (!%p166_p3), %s2725_s12, 1 }
   0x7   : > { %169 = sbr.rel (%p166_p3) target bundleno = 351 (0x15f), region = 28 }
   0xc   : > { %v2574_v0 = vld [vmem:[%s3208_s1 + $0x78] sm:$0xff]  ;;  %v2573_v2 = vld [vmem:[%s3208_s1 + $0x70] sm:$0xff]  ;;  %s3218_s12 = smov (!%p203_p4, %s2725_s12), 1  ;;  %v2572_v6 = vld [vmem:[%s3208_s1 + $0x68] sm:$0xff]  ;;  %vm495_vm0 = vsmask.f32 3328 }
   0xd   : > { %v2582_v1 = vld [vmem:[%s3208_s1 + $0xb8] sm:$0xff]  ;;  %2670 = vmatpush.bf16.msra.mxu1 %v2574_v0  ;;  %349 = vmatpush.bf16.msra.mxu0 %v2574_v0  ;;  %v2581_v3 = vld [vmem:[%s3208_s1 + $0xb0] sm:$0xff]  ;;  %s2686_s26 = smul.u32 288, %s3218_s12  ;;  %v2580_v7 = vld [vmem:[%s3208_s1 + $0xa8] sm:$0xff]  ;;  %vm496_vm1 = vsmask.f32 7440 }
   0xe   : > { %691 = vmatpush.bf16.msra.mxu2 %v2582_v1  ;;  %v2594_v4 = vld [vmem:[%s3208_s1 + $0xf8] sm:$0xff]  ;;  %v2593_v5 = vld [vmem:[%s3208_s1 + $0xf0] sm:$0xff]  ;;  %v2592_v8 = vld [vmem:[%s3208_s1 + $0xe8] sm:$0xff]  ;;  %s1963_s8 = sshll.u32 %s3218_s12, 1 }
   0xf   : > { %826 = vmatpush.bf16.msra.mxu3 %v2594_v4  ;;  %s2800_s6 = scalar_lea.vmem %s3207_s0, %s2686_s26  ;;  %v2571_v10 = vld [vmem:[%s3208_s1 + $0x60] sm:$0xff]  ;;  %v2570_v23 = vld [vmem:[%s3208_s1 + $0x58] sm:$0xff]  ;;  %v2569_v31 = vld [vmem:[%s3208_s1 + $0x50] sm:$0xff]  ;;  %s226_s11 = scalar_lea.vmem %s3210_s3, %s1963_s8 }
  0x10   : > { %v479_v9 = vld [vmem:[%s2800_s6] sm:$0xf]  ;;  %v481_v11 = vld [vmem:[%s2800_s6 + $0x8] sm:$0xf]  ;;  %v480_v16 = vld [vmem:[%s2800_s6 + $0x4] sm:$0x1] }
  0x11   : > { %2671 = vmatpush.bf16.msra.mxu1 %v2573_v2  ;;  %350 = vmatpush.bf16.msra.mxu0 %v2573_v2  ;;  %v2579_v12 = vld [vmem:[%s3208_s1 + $0xa0] sm:$0xff]  ;;  %v499_v13 = vshrl.u32 %v479_v9, 16  ;;  %v502_v14 = vshll.u32 %v479_v9, 16  ;;  %v513_v15 = vshrl.u32 %v481_v11, 16  ;;  %v482_v17 = vld [vmem:[%s2800_s6 + $0xc] sm:$0x1]  ;;  %vm2838_vm2 = vmor %vm495_vm0, %vm496_vm1 }
  0x12   : > { %692 = vmatpush.bf16.msra.mxu2 %v2581_v3  ;;  %v516_v18 = vshll.u32 %v481_v11, 16  ;;  %v2591_v19 = vld [vmem:[%s3208_s1 + $0xe0] sm:$0xff]  ;;  %v2578_v25 = vld [vmem:[%s3208_s1 + $0x98] sm:$0xff]  ;;  %v508_v27 = vshll.u32 %v480_v16, 16  ;;  %v522_v28 = vshll.u32 %v482_v17, 16  ;;  %v2577_v34 = vld [vmem:[%s3208_s1 + $0x90] sm:$0xff] }
  0x13   : > { %827 = vmatpush.bf16.msra.mxu3 %v2593_v5  ;;  %v501_v20 = vrot.slane %v499_v13, 4  ;;  %v504_v21 = vrot.slane %v502_v14, 5  ;;  %v515_v22 = vrot.slane %v513_v15, 4  ;;  %v2590_v30 = vld [vmem:[%s3208_s1 + $0xd8] sm:$0xff]  ;;  %v483_v32 = vld [vmem:[%s2800_s6 + $0x10] sm:$0xf] }
  0x14   : > { %v518_v24 = vrot.slane %v516_v18, 5  ;;  %v485_v33 = vld [vmem:[%s2800_s6 + $0x18] sm:$0xf]  ;;  %v510_v36 = vrot.slane %v508_v27, 5  ;;  %v524_v38 = vrot.slane %v522_v28, 5  ;;  %v2589_v40 = vld [vmem:[%s3208_s1 + $0xd0] sm:$0xff] }
  0x15   : > { %2672 = vmatpush.bf16.msra.mxu1 %v2572_v6  ;;  %351 = vmatpush.bf16.msra.mxu0 %v2572_v6  ;;  %v505_v26 = vor.u32 %v504_v21, %v501_v20  ;;  %v527_v41 = vshrl.u32 %v483_v32, 16  ;;  %v530_v42 = vshll.u32 %v483_v32, 16  ;;  %v541_v43 = vshrl.u32 %v485_v33, 16  ;;  %v2568_v45 = vld [vmem:[%s3208_s1 + $0x48] sm:$0xff]  ;;  %v2567_v49 = vld [vmem:[%s3208_s1 + $0x40] sm:$0xff]  ;;  %v2562_v63 = vld [vmem:[%s3208_s1 + $0x38] sm:$0xff] }
  0x16   : > { %693 = vmatpush.bf16.msra.mxu2 %v2580_v7  ;;  %v519_v29 = vor.u32 %v518_v24, %v515_v22  ;;  %v544_v44 = vshll.u32 %v485_v33, 16  ;;  %v2576_v46 = vld [vmem:[%s3208_s1 + $0x88] sm:$0xff]  ;;  %v2565_v51 = vld [vmem:[%s2800_s6 + $0x6c] sm:$0xf0]  ;;  %v484_v53 = vld [vmem:[%s2800_s6 + $0x14] sm:$0x1] }
  0x17   : > { %828 = vmatpush.bf16.msra.mxu3 %v2592_v8  ;;  %v506_v35 = vrot.slane %v505_v26, 4  ;;  %v1998_v50 = vld [vmem:[%s2800_s6 + $0x68] sm:$0xf]  ;;  %v529_v54 = vrot.slane %v527_v41, 4  ;;  %v532_v55 = vrot.slane %v530_v42, 5  ;;  %v543_v56 = vrot.slane %v541_v43, 4 }
  0x18   : > { %v520_v37 = vrot.slane %v519_v29, 4  ;;  %v2588_v52 = vld [vmem:[%s3208_s1 + $0xc8] sm:$0xff]  ;;  %v546_v57 = vrot.slane %v544_v44, 5  ;;  %v2563_v59 = vld [vmem:[%s2800_s6 + $0x4c] sm:$0xf0]  ;;  %v2575_v0 = vld [vmem:[%s3208_s1 + $0x80] sm:$0xff]  ;;  %v1999_v1 = vor.u32 %v2565_v51, %v1998_v50 }
  0x19   : > { %2673 = vmatpush.bf16.msra.mxu1 %v2571_v10  ;;  %352 = vmatpush.bf16.msra.mxu0 %v2571_v10  ;;  %v511_v47 = vsel %vm2838_vm2, %v506_v35, %v510_v36  ;;  %v1990_v58 = vld [vmem:[%s2800_s6 + $0x48] sm:$0xf]  ;;  %v486_v62 = vld [vmem:[%s2800_s6 + $0x1c] sm:$0x1]  ;;  %v536_v4 = vshll.u32 %v484_v53, 16  ;;  %v533_v6 = vor.u32 %v532_v55, %v529_v54  ;;  %v2587_v10 = vld [vmem:[%s3208_s1 + $0xc0] sm:$0xff] }
  0x1a   : > { %694 = vmatpush.bf16.msra.mxu2 %v2579_v12  ;;  %v525_v48 = vsel %vm2838_vm2, %v520_v37, %v524_v38  ;;  %v627_v60 = vunpack.c.l.b16 %v511_v47  ;;  %v2606_v2 = vld [vmem:[%s3208_s1 + $0x138] sm:$0xff]  ;;  %v1991_v5 = vor.u32 %v2563_v59, %v1990_v58  ;;  %v547_v7 = vor.u32 %v546_v57, %v543_v56  ;;  %v2158_v11 = vld [vmem:[%s2800_s6 + $0x90] sm:$0xf]  ;;  %v2560_v22 = vld [vmem:[%s3208_s1 + $0x28] sm:$0xff] }
  0x1b   : > { %829 = vmatpush.bf16.msra.mxu3 %v2591_v19  ;;  %v628_v61 = vunpack.c.l.b16 %v525_v48  ;;  %v2626_v3 = vld [vmem:[%s3208_s1 + $0x1b8] sm:$0xff]  ;;  %v550_v8 = vshll.u32 %v486_v62, 16  ;;  %v2561_v13 = vld [vmem:[%s3208_s1 + $0x30] sm:$0xff]  ;;  %v538_v16 = vrot.slane %v536_v4, 5  ;;  %v534_v19 = vrot.slane %v533_v6, 4  ;;  %v2604_v26 = vld [vmem:[%s3208_s1 + $0x128] sm:$0xff] }
  0x1c   : > { %v2583_v12 = vld [vmem:[%s2800_s6 + $0x94] sm:$0xf0]  ;;  %v2605_v15 = vld [vmem:[%s3208_s1 + $0x130] sm:$0xff]  ;;  %v548_v20 = vrot.slane %v547_v7, 4  ;;  %v487_v24 = vld [vmem:[%s2800_s6 + $0x20] sm:$0xf] }
  0x1d   : > { %2674 = vmatpush.bf16.msra.mxu1 %v2570_v23  ;;  %353 = vmatpush.bf16.msra.mxu0 %v2570_v23  ;;  %v635_v9 = vpack.c.b16 %v628_v61, %v627_v60  ;;  %v2638_v14 = vld [vmem:[%s3208_s1 + $0x1f8] sm:$0xff]  ;;  %v2625_v17 = vld [vmem:[%s3208_s1 + $0x1b0] sm:$0xff]  ;;  %v2159_v18 = vor.u32 %v2583_v12, %v2158_v11  ;;  %v552_v21 = vrot.slane %v550_v8, 5  ;;  %v2624_v27 = vld [vmem:[%s3208_s1 + $0x1a8] sm:$0xff]  ;;  %v539_v28 = vsel %vm2838_vm2, %v534_v19, %v538_v16 }
  0x1e   : > { %695 = vmatpush.bf16.msra.mxu2 %v2578_v25  ;;  %v2637_v23 = vld [vmem:[%s3208_s1 + $0x1f0] sm:$0xff]  ;;  %v489_v25 = vld [vmem:[%s2800_s6 + $0x28] sm:$0xf]  ;;  %v2603_v36 = vld [vmem:[%s3208_s1 + $0x120] sm:$0xff]  ;;  %v629_v42 = vunpack.c.l.b16 %v539_v28 }
  0x1f   : > { %830 = vmatpush.bf16.msra.mxu3 %v2590_v30  ;;  %v553_v29 = vsel %vm2838_vm2, %v548_v20, %v552_v21  ;;  %v555_v30 = vshrl.u32 %v487_v24, 16  ;;  %v569_v32 = vshrl.u32 %v489_v25, 16  ;;  %v572_v33 = vshll.u32 %v489_v25, 16  ;;  %v2636_v35 = vld [vmem:[%s3208_s1 + $0x1e8] sm:$0xff]  ;;  %v2623_v37 = vld [vmem:[%s3208_s1 + $0x1a0] sm:$0xff]  ;;  %v2557_v62 = vld [vmem:[%s3208_s1 + $0x10] sm:$0xff] }
  0x20   : > { %v2002_v38 = vld [vmem:[%s2800_s6 + $0x78] sm:$0xf]  ;;  %v630_v43 = vunpack.c.l.b16 %v553_v29  ;;  %v2564_v44 = vld [vmem:[%s2800_s6 + $0x5c] sm:$0xf0]  ;;  %v488_v50 = vld [vmem:[%s2800_s6 + $0x24] sm:$0x1] }
  0x21   : > { %2675 = vmatpush.bf16.msra.mxu1 %v2569_v31  ;;  %354 = vmatpush.bf16.msra.mxu0 %v2569_v31  ;;  %v558_v31 = vshll.u32 %v487_v24, 16  ;;  %v1994_v41 = vld [vmem:[%s2800_s6 + $0x58] sm:$0xf]  ;;  %v571_v47 = vrot.slane %v569_v32, 4  ;;  %v574_v48 = vrot.slane %v572_v33, 5  ;;  %v564_v59 = vshll.u32 %v488_v50, 16 }
  0x22   : > { %696 = vmatpush.bf16.msra.mxu2 %v2577_v34  ;;  %v2559_v34 = vld [vmem:[%s3208_s1 + $0x20] sm:$0xff]  ;;  %v490_v51 = vld [vmem:[%s2800_s6 + $0x2c] sm:$0x1]  ;;  %v1995_v54 = vor.u32 %v2564_v44, %v1994_v41  ;;  %v636_v55 = vpack.c.b16 %v630_v43, %v629_v42  ;;  %v2584_v57 = vld [vmem:[%s2800_s6 + $0xa4] sm:$0xf0] }
  0x23   : > { %831 = vmatpush.bf16.msra.mxu3 %v2589_v40  ;;  %v2566_v40 = vld [vmem:[%s2800_s6 + $0x7c] sm:$0xf0]  ;;  %v575_v60 = vor.u32 %v574_v48, %v571_v47  ;;  %v578_v61 = vshll.u32 %v490_v51, 16  ;;  %v2556_v6 = vld [vmem:[%s3208_s1 + $0x8] sm:$0xff]  ;;  %v2621_v11 = vld [vmem:[%s3208_s1 + $0x190] sm:$0xff] }
  0x24   : > { %v2003_v53 = vor.u32 %v2566_v40, %v2002_v38  ;;  %v2162_v56 = vld [vmem:[%s2800_s6 + $0xa0] sm:$0xf]  ;;  %v2600_v7 = vld [vmem:[%s3208_s1 + $0x108] sm:$0xff]  ;;  %v2614_v20 = vld [vmem:[%s3208_s1 + $0x178] sm:$0xff] }
  0x25   : > { %2676 = vmatpush.bf16.msra.mxu1 %v2568_v45  ;;  %355 = vmatpush.bf16.msra.mxu0 %v2568_v45  ;;  %v557_v45 = vrot.slane %v555_v30, 4  ;;  %v576_v4 = vrot.slane %v575_v60, 4  ;;  %v2635_v8 = vld [vmem:[%s3208_s1 + $0x1e0] sm:$0xff]  ;;  %v2551_v24 = vld [vmem:[%s2800_s6 + $0x4] sm:$0xf0]  ;;  %v2613_v33 = vld [vmem:[%s3208_s1 + $0x170] sm:$0xff] }
  0x26   : > { %697 = vmatpush.bf16.msra.mxu2 %v2576_v46  ;;  %v560_v46 = vrot.slane %v558_v31, 5  ;;  %v2599_v21 = vld [vmem:[%s3208_s1 + $0x100] sm:$0xff]  ;;  %v2230_v25 = vld [vmem:[%s2800_s6 + $0xd8] sm:$0xf]  ;;  %v2166_v40 = vld [vmem:[%s2800_s6 + $0xb0] sm:$0xf] }
  0x27   : > { %832 = vmatpush.bf16.msra.mxu3 %v2588_v52  ;;  %v2602_v52 = vld [vmem:[%s3208_s1 + $0x118] sm:$0xff]  ;;  %v2645_v42 = vld [vmem:[%s3208_s1 + $0x230] sm:$0xff]  ;;  %v2612_v47 = vld [vmem:[%s3208_s1 + $0x168] sm:$0xff] }
  0x28   : > { %v561_v58 = vor.u32 %v560_v46, %v557_v45  ;;  %v2585_v41 = vld [vmem:[%s2800_s6 + $0xb4] sm:$0xf0]  ;;  %v2620_v48 = vld [vmem:[%s3208_s1 + $0x188] sm:$0xff] }
  0x29   : > { %2677 = vmatpush.bf16.msra.mxu1 %v2567_v49  ;;  %356 = vmatpush.bf16.msra.mxu0 %v2567_v49  ;;  %v2558_v49 = vld [vmem:[%s3208_s1 + $0x18] sm:$0xff]  ;;  %v2644_v50 = vld [vmem:[%s3208_s1 + $0x228] sm:$0xff] }
  0x2a   : > { %698 = vmatpush.bf16.msra.mxu2 %v2575_v0  ;;  %v2163_v0 = vor.u32 %v2584_v57, %v2162_v56  ;;  %v2633_v56 = vld [vmem:[%s3208_s1 + $0x1d0] sm:$0xff]  ;;  %v2611_v57 = vld [vmem:[%s3208_s1 + $0x160] sm:$0xff] }
  0x2b   : > { %833 = vmatpush.bf16.msra.mxu3 %v2587_v10  ;;  %v493_v10 = vld [vmem:[%s2800_s6 + $0x38] sm:$0xf] }
  0x2c   : > { %367 = vmatmul.bf16.vlgmr.msra.gmra.mxu1 %v1999_v1  ;;  %357 = vmatmul.bf16.vlgmr.msra.gmra.mxu0 %v1991_v5  ;;  %v2622_v1 = vld [vmem:[%s3208_s1 + $0x198] sm:$0xff]  ;;  %v580_v5 = vrot.slane %v578_v61, 5  ;;  %v600_v19 = vshll.u32 %v493_v10, 16 }
  0x2d   : > { %450 = vmatpush.bf16.msrb.mxu1 %v2562_v63  ;;  %961 = vmatpush.bf16.msrb.mxu0 %v2606_v2  ;;  %v2601_v63 = vld [vmem:[%s3208_s1 + $0x110] sm:$0xff]  ;;  %v562_v2 = vrot.slane %v561_v58, 4  ;;  %v2643_v58 = vld [vmem:[%s3208_s1 + $0x220] sm:$0xff] }
  0x2e   : > { %1342 = vmatpush.bf16.msrb.mxu2 %v2626_v3  ;;  %834 = vmatmul.bf16.vlgmr.msra.gmra.mxu3 %v2159_v18  ;;  %v566_v3 = vrot.slane %v564_v59, 5  ;;  %v597_v18 = vshrl.u32 %v493_v10, 16  ;;  %v602_v32 = vrot.slane %v600_v19, 5  ;;  %v2632_v59 = vld [vmem:[%s3208_s1 + $0x1c8] sm:$0xff] }
  0x2f   : > { %699 = vmatmul.bf16.vlgmr.msra.gmra.mxu2 %v635_v9  ;;  %1477 = vmatpush.bf16.msrb.mxu3 %v2638_v14  ;;  %v491_v9 = vld [vmem:[%s2800_s6 + $0x30] sm:$0xf]  ;;  %v2634_v14 = vld [vmem:[%s3208_s1 + $0x1d8] sm:$0xff]  ;;  %v2586_v10 = vld [vmem:[%s2800_s6 + $0xc4] sm:$0xf0] }
  0x30   : > { %v567_v12 = vsel %vm2838_vm2, %v562_v2, %v566_v3  ;;  %v583_v16 = vshrl.u32 %v491_v9, 16  ;;  %v599_v31 = vrot.slane %v597_v18, 4  ;;  %v2596_v2 = vld [vmem:[%s2800_s6 + $0xec] sm:$0xf0]  ;;  %v2046_v18 = vld [vmem:[%s2800_s6 + $0x20] sm:$0xf] }
  0x31   : > { %451 = vmatpush.bf16.msrb.mxu1 %v2561_v13  ;;  %962 = vmatpush.bf16.msrb.mxu0 %v2605_v15  ;;  %v581_v13 = vsel %vm2838_vm2, %v576_v4, %v580_v5  ;;  %v2555_v15 = vld [vmem:[%s3208_s1] sm:$0xff]  ;;  %v2609_v5 = vld [vmem:[%s3208_s1 + $0x150] sm:$0xff]  ;;  %v2553_v19 = vld [vmem:[%s2800_s6 + $0x24] sm:$0xf0] }
  0x32   : > { %1343 = vmatpush.bf16.msrb.mxu2 %v2625_v17  ;;  %v586_v17 = vshll.u32 %v491_v9, 16  ;;  %v632_v28 = vunpack.c.l.b16 %v581_v13  ;;  %v585_v29 = vrot.slane %v583_v16, 4  ;;  %v603_v45 = vor.u32 %v602_v32, %v599_v31  ;;  %v2170_v9 = vld [vmem:[%s2800_s6 + $0xc0] sm:$0xf]  ;;  %v2642_v13 = vld [vmem:[%s3208_s1 + $0x218] sm:$0xff]  ;;  %v2641_v16 = vld [vmem:[%s3208_s1 + $0x210] sm:$0xff] }
  0x33   : > { %1478 = vmatpush.bf16.msrb.mxu3 %v2637_v23  ;;  %v2646_v23 = vld [vmem:[%s3208_s1 + $0x238] sm:$0xff]  ;;  %v2276_v31 = vld [vmem:[%s2800_s6 + $0x90] sm:$0xf] }
  0x34   : > { %v588_v30 = vrot.slane %v586_v17, 5  ;;  %v2640_v17 = vld [vmem:[%s3208_s1 + $0x208] sm:$0xff]  ;;  %v2278_v32 = vld [vmem:[%s2800_s6 + $0x98] sm:$0xf] }
  0x35   : > { %452 = vmatpush.bf16.msrb.mxu1 %v2560_v22  ;;  %963 = vmatpush.bf16.msrb.mxu0 %v2604_v26  ;;  %v2038_v22 = vld [vmem:[%s2800_s6] sm:$0xf] }
  0x36   : > { %1344 = vmatpush.bf16.msrb.mxu2 %v2624_v27  ;;  %v2595_v26 = vld [vmem:[%s2800_s6 + $0xdc] sm:$0xf0]  ;;  %v631_v27 = vunpack.c.l.b16 %v567_v12  ;;  %v589_v43 = vor.u32 %v588_v30, %v585_v29  ;;  %v2608_v12 = vld [vmem:[%s3208_s1 + $0x148] sm:$0xff] }
  0x37   : > { %1479 = vmatpush.bf16.msrb.mxu3 %v2636_v35  ;;  %v494_v35 = vld [vmem:[%s2800_s6 + $0x3c] sm:$0x1]  ;;  %v2639_v30 = vld [vmem:[%s3208_s1 + $0x200] sm:$0xff] }
  0x38   : > { %v637_v38 = vpack.c.b16 %v632_v28, %v631_v27  ;;  %v606_v46 = vshll.u32 %v494_v35, 16  ;;  %v590_v51 = vrot.slane %v589_v43, 4  ;;  %v2438_v27 = vld [vmem:[%s2800_s6 + $0x50] sm:$0xf]  ;;  %v2627_v28 = vld [vmem:[%s2800_s6 + $0x54] sm:$0xf0] }
  0x39   : > { %453 = vmatpush.bf16.msrb.mxu1 %v2559_v34  ;;  %964 = vmatpush.bf16.msrb.mxu0 %v2603_v36  ;;  %v492_v34 = vld [vmem:[%s2800_s6 + $0x34] sm:$0x1]  ;;  %v2039_v36 = vor.u32 %v2551_v24, %v2038_v22  ;;  %v2366_v22 = vld [vmem:[%s2800_s6 + $0x8] sm:$0xf]  ;;  %v2047_v24 = vor.u32 %v2553_v19, %v2046_v18  ;;  %v2439_v29 = vor.u32 %v2627_v28, %v2438_v27  ;;  %v1015_v35 = vshrl.u32 %v2276_v31, 16 }
  0x3a   : > { %1345 = vmatpush.bf16.msrb.mxu2 %v2623_v37  ;;  %v2231_v37 = vor.u32 %v2595_v26, %v2230_v25  ;;  %v592_v44 = vshll.u32 %v492_v34, 16  ;;  %v2486_v34 = vld [vmem:[%s2800_s6 + $0x10] sm:$0xf]  ;;  %v2488_v18 = vld [vmem:[%s2800_s6 + $0x18] sm:$0xf] }
  0x3b   : > { %1480 = vmatpush.bf16.msrb.mxu3 %v2635_v8  ;;  %v1548_v43 = vshll.u32 %v2486_v34, 16  ;;  %v2490_v19 = vld [vmem:[%s2800_s6 + $0x20] sm:$0xf]  ;;  %v1559_v28 = vshrl.u32 %v2488_v18, 16 }
  0x3c   : > { %372 = vmatmul.bf16.gmra.mxu1 %v2003_v53  ;;  %362 = vmatmul.bf16.gmra.mxu0 %v1995_v54  ;;  %v604_v53 = vrot.slane %v603_v45, 4  ;;  %v608_v54 = vrot.slane %v606_v46, 5  ;;  %v2554_v45 = vld [vmem:[%s2800_s6 + $0x34] sm:$0xf0]  ;;  %v2242_v46 = vld [vmem:[%s2800_s6 + $0x108] sm:$0xf] }
  0x3d   : > { %454 = vmatpush.bf16.msrb.mxu1 %v2558_v49  ;;  %965 = vmatpush.bf16.msrb.mxu0 %v2602_v52  ;;  %v2167_v49 = vor.u32 %v2585_v41, %v2166_v40  ;;  %v594_v52 = vrot.slane %v592_v44, 5  ;;  %v2050_v44 = vld [vmem:[%s2800_s6 + $0x30] sm:$0xf] }
  0x3e   : > { %1346 = vmatpush.bf16.msrb.mxu2 %v2622_v1  ;;  %839 = vmatmul.bf16.gmra.mxu3 %v2163_v0  ;;  %v609_v61 = vsel %vm2838_vm2, %v604_v53, %v608_v54  ;;  %v2552_v0 = vld [vmem:[%s2800_s6 + $0x14] sm:$0xf0]  ;;  %v2234_v1 = vld [vmem:[%s2800_s6 + $0xe8] sm:$0xf] }
  0x3f   : > { %704 = vmatmul.bf16.gmra.mxu2 %v636_v55  ;;  %1481 = vmatpush.bf16.msrb.mxu3 %v2634_v14  ;;  %v2619_v55 = vld [vmem:[%s3208_s1 + $0x180] sm:$0xff]  ;;  %v595_v60 = vsel %vm2838_vm2, %v590_v51, %v594_v52  ;;  %v634_v4 = vunpack.c.l.b16 %v609_v61  ;;  %v1017_v51 = vrot.slane %v1015_v35, 4  ;;  %v2487_v61 = vld [vmem:[%s2800_s6 + $0x14] sm:$0x1] }
  0x40   : > { %v633_v3 = vunpack.c.l.b16 %v595_v60  ;;  %v2631_v14 = vld [vmem:[%s3208_s1 + $0x1c0] sm:$0xff]  ;;  %v2485_v60 = vld [vmem:[%s2800_s6 + $0xc] sm:$0x1] }
  0x41   : > { %455 = vmatpush.bf16.msrb.mxu1 %v2557_v62  ;;  %966 = vmatpush.bf16.msrb.mxu0 %v2601_v63  ;;  %v2610_v62 = vld [vmem:[%s3208_s1 + $0x158] sm:$0xff]  ;;  %v2042_v63 = vld [vmem:[%s2800_s6 + $0x10] sm:$0xf] }
  0x42   : > { %1347 = vmatpush.bf16.msrb.mxu2 %v2621_v11  ;;  %v638_v8 = vpack.c.b16 %v634_v4, %v633_v3  ;;  %v2171_v11 = vor.u32 %v2586_v10, %v2170_v9  ;;  %v1554_v10 = vshll.u32 %v2487_v61, 16 }
  0x43   : > { %1482 = vmatpush.bf16.msrb.mxu3 %v2633_v56 }
  0x45   : > { %456 = vmatpush.bf16.msrb.mxu1 %v2556_v6  ;;  %967 = vmatpush.bf16.msrb.mxu0 %v2600_v7  ;;  %v2043_v6 = vor.u32 %v2552_v0, %v2042_v63  ;;  %v2235_v7 = vor.u32 %v2596_v2, %v2234_v1 }
  0x46   : > { %1348 = vmatpush.bf16.msrb.mxu2 %v2620_v48  ;;  %v2370_v48 = vld [vmem:[%s2800_s6 + $0x18] sm:$0xf] }
  0x47   : > { %1483 = vmatpush.bf16.msrb.mxu3 %v2632_v59  ;;  %v1550_v59 = vrot.slane %v1548_v43, 5  ;;  %v1561_v43 = vrot.slane %v1559_v28, 4 }
  0x49   : > { %457 = vmatpush.bf16.msrb.mxu1 %v2555_v15  ;;  %968 = vmatpush.bf16.msrb.mxu0 %v2599_v21  ;;  %v2607_v15 = vld [vmem:[%s3208_s1 + $0x140] sm:$0xff] }
  0x4a   : > { %1349 = vmatpush.bf16.msrb.mxu2 %v2619_v55  ;;  %v2597_v21 = vld [vmem:[%s2800_s6 + $0xfc] sm:$0xf0] }
  0x4b   : > { %1484 = vmatpush.bf16.msrb.mxu3 %v2631_v14  ;;  %v2616_v55 = vld [vmem:[%s2800_s6 + $0x1c] sm:$0xf0]  ;;  %v2282_v14 = vld [vmem:[%s2800_s6 + $0xa8] sm:$0xf] }
  0x4c   : > { %458 = vmatmul.bf16.vlgmr.msrb.gmra.mxu1 %v2039_v36  ;;  %969 = vmatmul.bf16.vlgmr.msrb.gmra.mxu0 %v2231_v37  ;;  %v1018_v36 = vshll.u32 %v2276_v31, 16  ;;  %v1029_v37 = vshrl.u32 %v2278_v32, 16  ;;  %v2371_v2 = vor.u32 %v2616_v55, %v2370_v48  ;;  %v1060_v27 = vshll.u32 %v2282_v14, 16 }
  0x4d   : > { %1207 = vmatpush.bf16.msra.mxu1 %v2614_v20  ;;  %1723 = vmatpush.bf16.msra.mxu0 %v2646_v23  ;;  %v2238_v20 = vld [vmem:[%s2800_s6 + $0xf8] sm:$0xf]  ;;  %v1576_v31 = vshll.u32 %v2490_v19, 16 }
  0x4e   : > { %844 = vmatmul.bf16.gmra.mxu3 %v2167_v49  ;;  %2678 = vmatpush.bf16.msra.mxu2 %v2646_v23  ;;  %v2615_v23 = vld [vmem:[%s2800_s6 + $0xc] sm:$0xf0]  ;;  %v2239_v25 = vor.u32 %v2597_v21, %v2238_v20  ;;  %v2277_v49 = vld [vmem:[%s2800_s6 + $0x94] sm:$0x1]  ;;  %v1020_v52 = vrot.slane %v1018_v36, 5  ;;  %v1031_v53 = vrot.slane %v1029_v37, 4 }
  0x4f   : > { %709 = vmatmul.bf16.gmra.mxu2 %v637_v38  ;;  %v2367_v26 = vor.u32 %v2615_v23, %v2366_v22  ;;  %v1032_v38 = vshll.u32 %v2278_v32, 16  ;;  %v1024_v63 = vshll.u32 %v2277_v49, 16  ;;  %v1556_v23 = vrot.slane %v1554_v10, 5  ;;  %v2281_v36 = vld [vmem:[%s2800_s6 + $0xa4] sm:$0x1] }
  0x50   : > { %v1021_v3 = vor.u32 %v1020_v52, %v1017_v51  ;;  %v2489_v51 = vld [vmem:[%s2800_s6 + $0x1c] sm:$0x1]  ;;  %v2491_v52 = vld [vmem:[%s2800_s6 + $0x24] sm:$0x1] }
  0x51   : > { %1208 = vmatpush.bf16.msra.mxu1 %v2613_v33  ;;  %1724 = vmatpush.bf16.msra.mxu0 %v2645_v42  ;;  %v2484_v33 = vld [vmem:[%s2800_s6 + $0x8] sm:$0xf]  ;;  %v1034_v54 = vrot.slane %v1032_v38, 5 }
  0x52   : > { %2679 = vmatpush.bf16.msra.mxu2 %v2645_v42  ;;  %v1531_v40 = vshrl.u32 %v2484_v33, 16  ;;  %v1534_v41 = vshll.u32 %v2484_v33, 16  ;;  %v1545_v42 = vshrl.u32 %v2486_v34, 16 }
  0x53   : > { %v1035_v4 = vor.u32 %v1034_v54, %v1031_v53  ;;  %v2374_v53 = vld [vmem:[%s2800_s6 + $0x28] sm:$0xf]  ;;  %v2617_v54 = vld [vmem:[%s2800_s6 + $0x2c] sm:$0xf0] }
  0x54   : > { %v1533_v56 = vrot.slane %v1531_v40, 4 }
  0x55   : > { %1209 = vmatpush.bf16.msra.mxu1 %v2612_v47  ;;  %1725 = vmatpush.bf16.msra.mxu0 %v2644_v50  ;;  %v2598_v47 = vld [vmem:[%s2800_s6 + $0x10c] sm:$0xf0] }
  0x56   : > { %2680 = vmatpush.bf16.msra.mxu2 %v2644_v50  ;;  %v2279_v50 = vld [vmem:[%s2800_s6 + $0x9c] sm:$0x1]  ;;  %v2243_v1 = vor.u32 %v2598_v47, %v2242_v46  ;;  %v1578_v46 = vrot.slane %v1576_v31, 5 }
  0x57   : > { %v1038_v0 = vshll.u32 %v2279_v50, 16 }
  0x59   : > { %1210 = vmatpush.bf16.msra.mxu1 %v2611_v57  ;;  %1726 = vmatpush.bf16.msra.mxu0 %v2643_v58  ;;  %v1536_v57 = vrot.slane %v1534_v41, 5  ;;  %v1062_v41 = vrot.slane %v1060_v27, 5 }
  0x5a   : > { %2681 = vmatpush.bf16.msra.mxu2 %v2643_v58  ;;  %v1547_v58 = vrot.slane %v1545_v42, 4  ;;  %v2283_v42 = vld [vmem:[%s2800_s6 + $0xac] sm:$0x1] }
  0x5c   : > { %463 = vmatmul.bf16.gmra.mxu1 %v2043_v6  ;;  %974 = vmatmul.bf16.gmra.mxu0 %v2235_v7  ;;  %v2628_v6 = vld [vmem:[%s2800_s6 + $0x64] sm:$0xf0]  ;;  %v1537_v7 = vor.u32 %v1536_v57, %v1533_v56  ;;  %v1551_v9 = vor.u32 %v1550_v59, %v1547_v58  ;;  %v1052_v56 = vshll.u32 %v2281_v36, 16  ;;  %v1066_v58 = vshll.u32 %v2283_v42, 16  ;;  %v2285_v42 = vld [vmem:[%s2800_s6 + $0xb4] sm:$0x1] }
  0x5d   : > { %1211 = vmatpush.bf16.msra.mxu1 %v2610_v62  ;;  %1727 = vmatpush.bf16.msra.mxu0 %v2642_v13  ;;  %v2051_v62 = vor.u32 %v2554_v45, %v2050_v44 }
  0x5e   : > { %849 = vmatmul.bf16.gmra.mxu3 %v2171_v11  ;;  %2682 = vmatpush.bf16.msra.mxu2 %v2642_v13  ;;  %v1026_v11 = vrot.slane %v1024_v63, 5  ;;  %v2280_v13 = vld [vmem:[%s2800_s6 + $0xa0] sm:$0xf]  ;;  %v1538_v20 = vrot.slane %v1537_v7, 4  ;;  %v1552_v22 = vrot.slane %v1551_v9, 4  ;;  %v1068_v7 = vrot.slane %v1066_v58, 5 }
  0x5f   : > { %714 = vmatmul.bf16.gmra.mxu2 %v638_v8  ;;  %v1540_v8 = vshll.u32 %v2485_v60, 16  ;;  %v1568_v60 = vshll.u32 %v2489_v51, 16  ;;  %v2378_v51 = vld [vmem:[%s2800_s6 + $0x38] sm:$0xf]  ;;  %v2497_v58 = vld [vmem:[%s2800_s6 + $0x3c] sm:$0x1] }
  0x60   : > { %v1557_v35 = vsel %vm2838_vm2, %v1552_v22, %v1556_v23 }
  0x61   : > { %1212 = vmatpush.bf16.msra.mxu1 %v2609_v5  ;;  %1728 = vmatpush.bf16.msra.mxu0 %v2641_v16  ;;  %v2442_v5 = vld [vmem:[%s2800_s6 + $0x60] sm:$0xf]  ;;  %v1542_v21 = vrot.slane %v1540_v8, 5  ;;  %v1660_v50 = vunpack.c.l.b16 %v1557_v35  ;;  %v1570_v9 = vrot.slane %v1568_v60, 5 }
  0x62   : > { %2683 = vmatpush.bf16.msra.mxu2 %v2641_v16  ;;  %v1036_v16 = vrot.slane %v1035_v4, 4 }
  0x63   : > { %v1543_v34 = vsel %vm2838_vm2, %v1538_v20, %v1542_v21  ;;  %v2496_v21 = vld [vmem:[%s2800_s6 + $0x38] sm:$0xf] }
  0x64   : > { %v1659_v49 = vunpack.c.l.b16 %v1543_v34  ;;  %v1618_v34 = vshll.u32 %v2496_v21, 16 }
  0x65   : > { %1213 = vmatpush.bf16.msra.mxu1 %v2608_v12  ;;  %1729 = vmatpush.bf16.msra.mxu0 %v2640_v17  ;;  %v1040_v12 = vrot.slane %v1038_v0, 5 }
  0x66   : > { %2684 = vmatpush.bf16.msra.mxu2 %v2640_v17  ;;  %v2443_v17 = vor.u32 %v2628_v6, %v2442_v5  ;;  %v1667_v0 = vpack.c.b16 %v1660_v50, %v1659_v49  ;;  %v1054_v5 = vrot.slane %v1052_v56, 5  ;;  %v2618_v56 = vld [vmem:[%s2800_s6 + $0x3c] sm:$0xf0] }
  0x67   : > { %v1041_v33 = vsel %vm2838_vm2, %v1036_v16, %v1040_v12  ;;  %v2284_v12 = vld [vmem:[%s2800_s6 + $0xb0] sm:$0xf] }
  0x68   : > { %v1144_v48 = vunpack.c.l.b16 %v1041_v33  ;;  %v2494_v16 = vld [vmem:[%s2800_s6 + $0x30] sm:$0xf]  ;;  %v1074_v20 = vshll.u32 %v2284_v12, 16  ;;  %v1615_v33 = vshrl.u32 %v2496_v21, 16 }
  0x69   : > { %1214 = vmatpush.bf16.msra.mxu1 %v2607_v15  ;;  %1730 = vmatpush.bf16.msra.mxu0 %v2639_v30  ;;  %v1022_v15 = vrot.slane %v1021_v3, 4  ;;  %v2629_v3 = vld [vmem:[%s2800_s6 + $0x74] sm:$0xf0] }
  0x6a   : > { %2685 = vmatpush.bf16.msra.mxu2 %v2639_v30  ;;  %v1573_v30 = vshrl.u32 %v2490_v19, 16  ;;  %v1071_v19 = vshrl.u32 %v2284_v12, 16  ;;  %v1076_v36 = vrot.slane %v1074_v20, 5 }
  0x6b   : > { %v1027_v32 = vsel %vm2838_vm2, %v1022_v15, %v1026_v11  ;;  %v2492_v15 = vld [vmem:[%s2800_s6 + $0x28] sm:$0xf] }
  0x6c   : > { %468 = vmatmul.bf16.gmra.mxu1 %v2047_v24  ;;  %979 = vmatmul.bf16.gmra.mxu0 %v2239_v25  ;;  %v1043_v24 = vshrl.u32 %v2280_v13, 16  ;;  %v1046_v25 = vshll.u32 %v2280_v13, 16  ;;  %v1575_v45 = vrot.slane %v1573_v30, 4  ;;  %v1143_v47 = vunpack.c.l.b16 %v1027_v32 }
  0x6d   : > { %v1587_v27 = vshrl.u32 %v2492_v15, 16  ;;  %v1590_v28 = vshll.u32 %v2492_v15, 16  ;;  %v1604_v30 = vshll.u32 %v2494_v16, 16  ;;  %v1073_v35 = vrot.slane %v1071_v19, 4 }
  0x6e   : > { %1485 = vmatmul.bf16.vlgmr.msrb.gmra.mxu3 %v2439_v29  ;;  %v1562_v29 = vshll.u32 %v2488_v18, 16  ;;  %v1045_v37 = vrot.slane %v1043_v24, 4  ;;  %v1048_v38 = vrot.slane %v1046_v25, 5  ;;  %v1579_v61 = vor.u32 %v1578_v46, %v1575_v45  ;;  %v2493_v46 = vld [vmem:[%s2800_s6 + $0x2c] sm:$0x1] }
  0x6f   : > { %1350 = vmatmul.bf16.vlgmr.msrb.gmra.mxu2 %v2367_v26  ;;  %v1057_v26 = vshrl.u32 %v2282_v14, 16  ;;  %v1151_v63 = vpack.c.b16 %v1144_v48, %v1143_v47  ;;  %v2286_v14 = vld [vmem:[%s2800_s6 + $0xb8] sm:$0xf]  ;;  %v1589_v47 = vrot.slane %v1587_v27, 4  ;;  %v1592_v48 = vrot.slane %v1590_v28, 5 }
  0x70   : > { %v1564_v44 = vrot.slane %v1562_v29, 5  ;;  %v1049_v55 = vor.u32 %v1048_v38, %v1045_v37  ;;  %v1580_v10 = vrot.slane %v1579_v61, 4  ;;  %v1085_v24 = vshrl.u32 %v2286_v14, 16  ;;  %v2290_v27 = vld [vmem:[%s2800_s6 + $0xc8] sm:$0xf] }
  0x71   : > { %v1059_v40 = vrot.slane %v1057_v26, 4  ;;  %v1088_v25 = vshll.u32 %v2286_v14, 16  ;;  %v2498_v26 = vld [vmem:[%s2800_s6 + $0x40] sm:$0xf]  ;;  %v1601_v29 = vshrl.u32 %v2494_v16, 16  ;;  %v1606_v50 = vrot.slane %v1604_v30, 5 }
  0x72   : > { %v1565_v59 = vor.u32 %v1564_v44, %v1561_v43  ;;  %v1050_v4 = vrot.slane %v1049_v55, 4  ;;  %v1629_v37 = vshrl.u32 %v2498_v26, 16  ;;  %v1632_v38 = vshll.u32 %v2498_v26, 16  ;;  %v2287_v43 = vld [vmem:[%s2800_s6 + $0xbc] sm:$0x1] }
  0x73   : > { %v1063_v57 = vor.u32 %v1062_v41, %v1059_v40  ;;  %v1087_v44 = vrot.slane %v1085_v24, 4  ;;  %v1090_v45 = vrot.slane %v1088_v25, 5  ;;  %v1603_v49 = vrot.slane %v1601_v29, 4  ;;  %v2288_v24 = vld [vmem:[%s2800_s6 + $0xc0] sm:$0xf] }
  0x74   : > { %v1566_v8 = vrot.slane %v1565_v59, 4  ;;  %v1631_v59 = vrot.slane %v1629_v37, 4  ;;  %v1634_v60 = vrot.slane %v1632_v38, 5  ;;  %v1080_v61 = vshll.u32 %v2285_v42, 16 }
  0x75   : > { %v1064_v6 = vrot.slane %v1063_v57, 4  ;;  %v1077_v57 = vor.u32 %v1076_v36, %v1073_v35  ;;  %v1113_v35 = vshrl.u32 %v2290_v27, 16  ;;  %v1116_v36 = vshll.u32 %v2290_v27, 16 }
  0x76   : > { %v1571_v22 = vsel %vm2838_vm2, %v1566_v8, %v1570_v9  ;;  %v2630_v8 = vld [vmem:[%s2800_s6 + $0x84] sm:$0xf0]  ;;  %v1635_v12 = vor.u32 %v1634_v60, %v1631_v59  ;;  %v1082_v14 = vrot.slane %v1080_v61, 5 }
  0x77   : > { %v1069_v18 = vsel %vm2838_vm2, %v1064_v6, %v1068_v7  ;;  %v1661_v40 = vunpack.c.l.b16 %v1571_v22  ;;  %v2379_v6 = vor.u32 %v2618_v56, %v2378_v51  ;;  %v2450_v7 = vld [vmem:[%s2800_s6 + $0x80] sm:$0xf] }
  0x78   : > { %v1146_v32 = vunpack.c.l.b16 %v1069_v18  ;;  %v2451_v18 = vor.u32 %v2630_v8, %v2450_v7  ;;  %v1636_v25 = vrot.slane %v1635_v12, 4 }
  0x7c   : > { %473 = vmatmul.bf16.gmra.mxu1 %v2051_v62  ;;  %984 = vmatmul.bf16.gmra.mxu0 %v2243_v1  ;;  %v1582_v62 = vshll.u32 %v2491_v52, 16  ;;  %v2375_v1 = vor.u32 %v2617_v54, %v2374_v53  ;;  %v2495_v52 = vld [vmem:[%s2800_s6 + $0x34] sm:$0x1]  ;;  %v1617_v53 = vrot.slane %v1615_v33, 4  ;;  %v1620_v54 = vrot.slane %v1618_v34, 5 }
  0x7d   : > { %v1102_v34 = vshll.u32 %v2288_v24, 16 }
  0x7e   : > { %1490 = vmatmul.bf16.gmra.mxu3 %v2443_v17  ;;  %v1584_v11 = vrot.slane %v1582_v62, 5  ;;  %v1055_v17 = vsel %vm2838_vm2, %v1050_v4, %v1054_v5  ;;  %v1091_v62 = vor.u32 %v1090_v45, %v1087_v44  ;;  %v1607_v4 = vor.u32 %v1606_v50, %v1603_v49  ;;  %v2291_v50 = vld [vmem:[%s2800_s6 + $0xcc] sm:$0x1] }
  0x7f   : > { %1355 = vmatmul.bf16.gmra.mxu2 %v2371_v2  ;;  %v2446_v2 = vld [vmem:[%s2800_s6 + $0x70] sm:$0xf]  ;;  %v1145_v31 = vunpack.c.l.b16 %v1055_v17  ;;  %v1610_v5 = vshll.u32 %v2495_v52, 16  ;;  %v1621_v9 = vor.u32 %v1620_v54, %v1617_v53  ;;  %v1118_v49 = vrot.slane %v1116_v36, 5 }
  0x80   : > { %v2447_v13 = vor.u32 %v2629_v3, %v2446_v2  ;;  %v1585_v23 = vsel %vm2838_vm2, %v1580_v10, %v1584_v11  ;;  %v1593_v3 = vor.u32 %v1592_v48, %v1589_v47  ;;  %v1624_v10 = vshll.u32 %v2497_v58, 16 }
  0x81   : > { %v1662_v41 = vunpack.c.l.b16 %v1585_v23  ;;  %v1152_v55 = vpack.c.b16 %v1146_v32, %v1145_v31  ;;  %v1078_v11 = vrot.slane %v1077_v57, 4  ;;  %v1092_v15 = vrot.slane %v1091_v62, 4 }
  0x82   : > { %v1594_v19 = vrot.slane %v1593_v3, 4  ;;  %v1608_v20 = vrot.slane %v1607_v4, 4  ;;  %v1612_v21 = vrot.slane %v1610_v5, 5  ;;  %v1622_v22 = vrot.slane %v1621_v9, 4 }
  0x83   : > { %v1668_v2 = vpack.c.b16 %v1662_v41, %v1661_v40  ;;  %v1626_v23 = vrot.slane %v1624_v10, 5  ;;  %v1083_v28 = vsel %vm2838_vm2, %v1078_v11, %v1082_v14  ;;  %v1099_v32 = vshrl.u32 %v2288_v24, 16 }
  0x84   : > { %v1613_v31 = vsel %vm2838_vm2, %v1608_v20, %v1612_v21  ;;  %v1147_v38 = vunpack.c.l.b16 %v1083_v28  ;;  %v1104_v47 = vrot.slane %v1102_v34, 5  ;;  %v1115_v48 = vrot.slane %v1113_v35, 4 }
  0x85   : > { %v1627_v33 = vsel %vm2838_vm2, %v1622_v22, %v1626_v23  ;;  %v1664_v42 = vunpack.c.l.b16 %v1613_v31  ;;  %v1101_v44 = vrot.slane %v1099_v32, 4  ;;  %v1122_v59 = vshll.u32 %v2291_v50, 16 }
  0x86   : > { %v1119_v58 = vor.u32 %v1118_v49, %v1115_v48 }
  0x87   : > { %v1105_v57 = vor.u32 %v1104_v47, %v1101_v44 }
  0x88   : > { %v1120_v62 = vrot.slane %v1119_v58, 4 }
  0x89   : > { %v1106_v60 = vrot.slane %v1105_v57, 4 }
  0x8c   : > { %1215 = vmatmul.bf16.vlgmr.msra.gmra.mxu1 %v1151_v63  ;;  %1731 = vmatmul.bf16.vlgmr.msra.gmra.mxu0 %v1667_v0  ;;  %v1094_v63 = vshll.u32 %v2287_v43, 16  ;;  %v1596_v0 = vshll.u32 %v2493_v46, 16  ;;  %v1665_v43 = vunpack.c.l.b16 %v1627_v33  ;;  %v2289_v46 = vld [vmem:[%s2800_s6 + $0xc4] sm:$0x1] }
  0x8d   : > { %v1108_v53 = vshll.u32 %v2289_v46, 16 }
  0x8e   : > { %1495 = vmatmul.bf16.gmra.mxu3 %v2447_v13  ;;  %v1096_v16 = vrot.slane %v1094_v63, 5  ;;  %v1598_v17 = vrot.slane %v1596_v0, 5  ;;  %v1124_v63 = vrot.slane %v1122_v59, 5 }
  0x8f   : > { %1360 = vmatmul.bf16.gmra.mxu2 %v2375_v1  ;;  %v2499_v1 = vld [vmem:[%s2800_s6 + $0x44] sm:$0x1]  ;;  %v1110_v61 = vrot.slane %v1108_v53, 5  ;;  %s2550_s6 = sshll.u32 %s3218_s12, 5 }
  0x90   : > { %v1638_v13 = vshll.u32 %v2499_v1, 16  ;;  %v1097_v29 = vsel %vm2838_vm2, %v1092_v15, %v1096_v16  ;;  %v1599_v30 = vsel %vm2838_vm2, %v1594_v19, %v1598_v17  ;;  %v1125_v4 = vsel %vm2838_vm2, %v1120_v62, %v1124_v63  ;;  %s3176_s7 = scalar_lea.vmem %s3209_s2, %s2550_s6 }
  0x91   : > { %v1148_v40 = vunpack.c.l.b16 %v1097_v29  ;;  %v1663_v41 = vunpack.c.l.b16 %v1599_v30  ;;  %v1111_v3 = vsel %vm2838_vm2, %v1106_v60, %v1110_v61  ;;  %v1150_v7 = vunpack.c.l.b16 %v1125_v4 }
  0x92   : > { %v1640_v26 = vrot.slane %v1638_v13, 5 }
  0x93   : > { %v1153_v51 = vpack.c.b16 %v1148_v40, %v1147_v38  ;;  %v1669_v52 = vpack.c.b16 %v1664_v42, %v1663_v41 }
  0x94   : > { %v1641_v37 = vsel %vm2838_vm2, %v1636_v25, %v1640_v26 }
  0x95   : > { %v1666_v45 = vunpack.c.l.b16 %v1641_v37 }
  0x97   : > { %v1670_v56 = vpack.c.b16 %v1666_v45, %v1665_v43 }
  0x9c   : > { %1220 = vmatmul.bf16.gmra.mxu1 %v1152_v55  ;;  %1736 = vmatmul.bf16.gmra.mxu0 %v1668_v2 }
  0x9e   : > { %1500 = vmatmul.bf16.gmra.mxu3 %v2451_v18 }
  0x9f   : > { %1365 = vmatmul.bf16.gmra.mxu2 %v2379_v6  ;;  %v1149_v6 = vunpack.c.l.b16 %v1111_v3 }
  0xa1   : > { %v1154_v8 = vpack.c.b16 %v1150_v7, %v1149_v6 }
  0xa9   : > { %v368_v54 = vpop.f32.mrf.mxu1  ;;  %v358_v55 = vpop.f32.mrf.mxu0 }
  0xac   : > { %1225 = vmatmul.bf16.gmra.mxu1 %v1153_v51  ;;  %1741 = vmatmul.bf16.gmra.mxu0 %v1669_v52 }
  0xaf   : > { %1746 = vmatmul.bf16.vlgmr.msra.gmra.mxu2 %v1670_v56 }
  0xb1   : > { %v370_v1 = vpop.f32.mrf.mxu1  ;;  %v360_v2 = vpop.f32.mrf.mxu0 }
  0xb2   : > { %v700_v0 = vpop.f32.mrf.mxu2  ;;  %v835_v5 = vpop.f32.mrf.mxu3 }
  0xb9   : > { %v373_v10 = vpop.f32.mrf.mxu1  ;;  %v363_v11 = vpop.f32.mrf.mxu0 }
  0xba   : > { %v702_v9 = vpop.f32.mrf.mxu2  ;;  %v3145_v12 = vpop.f32.mrf.mxu3 }
  0xbc   : > { %1230 = vmatmul.bf16.gmra.mxu1 %v1154_v8 }
  0xc1   : > { %v375_v14 = vpop.f32.mrf.mxu1  ;;  %v365_v15 = vpop.f32.mrf.mxu0 }
  0xc2   : > { %v705_v13 = vpop.f32.mrf.mxu2  ;;  %v840_v16 = vpop.f32.mrf.mxu3 }
  0xc9   : > { %v459_v18 = vpop.f32.mrf.mxu1  ;;  %v970_v19 = vpop.f32.mrf.mxu0 }
  0xca   : > { %v707_v17 = vpop.f32.mrf.mxu2  ;;  %v460_v20 = vadd.f32 %v459_v18, %v358_v55  ;;  %v3147_v21 = vpop.f32.mrf.mxu3 }
  0xcc   : > { %v720_v39 = vadd.f32 %v700_v0, %v460_v20 }
  0xce   : > { %v855_v22 = vadd.f32 %v835_v5, %v720_v39 }
  0xd0   : > { %v990_v23 = vadd.f32 %v970_v19, %v855_v22 }
  0xd1   : > { %v461_v25 = vpop.f32.mrf.mxu1  ;;  %v972_v26 = vpop.f32.mrf.mxu0 }
  0xd2   : > { %v710_v24 = vpop.f32.mrf.mxu2  ;;  %v462_v27 = vadd.f32 %v461_v25, %v360_v2  ;;  %v845_v29 = vpop.f32.mrf.mxu3 }
  0xd4   : > { %v721_v28 = vadd.f32 %v702_v9, %v462_v27 }
  0xd9   : > { %v464_v31 = vpop.f32.mrf.mxu1  ;;  %v975_v32 = vpop.f32.mrf.mxu0 }
  0xda   : > { %v712_v30 = vpop.f32.mrf.mxu2  ;;  %v465_v33 = vadd.f32 %v464_v31, %v363_v11  ;;  %v3149_v38 = vpop.f32.mrf.mxu3  ;;  %v856_v11 = vadd.f32 %v3145_v12, %v721_v28 }
  0xdc   : > { %v722_v34 = vadd.f32 %v705_v13, %v465_v33 }
  0xde   : > { %v857_v35 = vadd.f32 %v840_v16, %v722_v34 }
  0xe0   : > { %v992_v36 = vadd.f32 %v975_v32, %v857_v35 }
  0xe1   : > { %v466_v40 = vpop.f32.mrf.mxu1  ;;  %v3151_v41 = vpop.f32.mrf.mxu0 }
  0xe2   : > { %v715_v37 = vpop.f32.mrf.mxu2  ;;  %v467_v42 = vadd.f32 %v466_v40, %v365_v15  ;;  %v3153_v48 = vpop.f32.mrf.mxu3  ;;  %v991_v15 = vadd.f32 %v972_v26, %v856_v11 }
  0xe4   : > { %v723_v43 = vadd.f32 %v707_v17, %v467_v42 }
  0xe9   : > { %v469_v45 = vpop.f32.mrf.mxu1  ;;  %v980_v46 = vpop.f32.mrf.mxu0 }
  0xea   : > { %v717_v44 = vpop.f32.mrf.mxu2  ;;  %v470_v47 = vadd.f32 %v469_v45, %v368_v54  ;;  %v3161_v58 = vpop.f32.mrf.mxu3 }
  0xec   : > { %v724_v49 = vadd.f32 %v710_v24, %v470_v47 }
  0xee   : > { %v859_v50 = vadd.f32 %v845_v29, %v724_v49 }
  0xf0   : > { %v3155_v51 = vadd.f32 %v980_v46, %v859_v50 }
  0xf1   : > { %v471_v53 = vpop.f32.mrf.mxu1  ;;  %v3157_v55 = vpop.f32.mrf.mxu0 }
  0xf2   : > { %v1351_v52 = vpop.f32.mrf.mxu2  ;;  %v472_v56 = vadd.f32 %v471_v53, %v370_v1  ;;  %v1486_v63 = vpop.f32.mrf.mxu3 }
  0xf4   : > { %v3159_v57 = vadd.f32 %v712_v30, %v472_v56  ;;  %v858_v30 = vadd.f32 %v3147_v21, %v723_v43 }
  0xf9   : > { %v474_v60 = vpop.f32.mrf.mxu1  ;;  %v3163_v61 = vpop.f32.mrf.mxu0 }
  0xfa   : > { %v1353_v59 = vpop.f32.mrf.mxu2  ;;  %v475_v54 = vadd.f32 %v474_v60, %v373_v10  ;;  %v1488_v1 = vpop.f32.mrf.mxu3 }
  0xfc   : > { %v3165_v62 = vadd.f32 %v715_v37, %v475_v54 }
 0x101   : > { %v476_v2 = vpop.f32.mrf.mxu1  ;;  %v3167_v3 = vpop.f32.mrf.mxu0 }
 0x102   : > { %v1356_v0 = vpop.f32.mrf.mxu2  ;;  %v477_v4 = vadd.f32 %v476_v2, %v375_v14  ;;  %v1491_v20 = vpop.f32.mrf.mxu3 }
 0x104   : > { %v3169_v5 = vadd.f32 %v717_v44, %v477_v4  ;;  %v993_v44 = vadd.f32 %v3151_v41, %v858_v30 }
 0x109   : > { %v1216_v6 = vpop.f32.mrf.mxu1  ;;  %v1732_v7 = vpop.f32.mrf.mxu0 }
 0x10a   : > { %v1236_v8 = vadd.f32 %v1216_v6, %v990_v23  ;;  %v1358_v9 = vpop.f32.mrf.mxu2  ;;  %v1493_v33 = vpop.f32.mrf.mxu3  ;;  %v860_v6 = vadd.f32 %v3149_v38, %v3159_v57 }
 0x10c   : > { %v1371_v13 = vadd.f32 %v1351_v52, %v1236_v8 }
 0x10e   : > { %v1506_v10 = vadd.f32 %v1486_v63, %v1371_v13 }
 0x110   : > { %v1752_v18 = vadd.f32 %v1732_v7, %v1506_v10  ;;  %v995_v10 = vadd.f32 %v3157_v55, %v860_v6 }
 0x111   : > { %v1218_v16 = vpop.f32.mrf.mxu1  ;;  %v1734_v17 = vpop.f32.mrf.mxu0 }
 0x112   : > { %v1237_v19 = vadd.f32 %v1218_v16, %v991_v15  ;;  %v1361_v14 = vpop.f32.mrf.mxu2  ;;  %v1760_v22 = vpack.c.bf16 %v1752_v18, %v1752_v18 }
 0x114   : > { %v1372_v39 = vadd.f32 %v1353_v59, %v1237_v19  ;;  %v1776_v26 = vunpack.c.l.bf16 %v1760_v22  ;;  %v1496_v59 = vpop.f32.mrf.mxu3 }
 0x116   : > { %v1507_v24 = vadd.f32 %v1488_v1, %v1372_v39  ;;  %v1798_v34 = vmul.f32 %v1776_v26, %v1776_v26 }
 0x118   : > { %v1753_v25 = vadd.f32 %v1734_v17, %v1507_v24 }
 0x119   : > { %v1221_v12 = vpop.f32.mrf.mxu1  ;;  %v1737_v23 = vpop.f32.mrf.mxu0 }
 0x11a   : > { %v1761_v27 = vpack.c.bf16 %v1753_v25, %v1753_v25  ;;  %v2650_v28 = vpack.c.bf16 %v1753_v25, %v1752_v18  ;;  %v1238_v29 = vadd.f32 %v1221_v12, %v992_v36  ;;  %v1363_v42 = vpop.f32.mrf.mxu2 }
 0x11c   : > { %2651 = vst [vmem:[%s3176_s7] sm:$0xff] %v2650_v28   ;;  %v1777_v31 = vunpack.c.l.bf16 %v1761_v27  ;;  %v1373_v32 = vadd.f32 %v1356_v0, %v1238_v29  ;;  %v1498_v17 = vpop.f32.mrf.mxu3 }
 0x11e   : > { %v1784_v35 = vadd.f32 %v1777_v31, %v1776_v26  ;;  %v1799_v37 = vmul.f32 %v1777_v31, %v1777_v31  ;;  %v1508_v40 = vadd.f32 %v1491_v20, %v1373_v32  ;;  %v862_v31 = vadd.f32 %v3161_v58, %v3169_v5 }
 0x120   : > { %v1806_v45 = vadd.f32 %v1799_v37, %v1798_v34  ;;  %v1754_v46 = vadd.f32 %v1737_v23, %v1508_v40  ;;  %v997_v37 = vadd.f32 %v3167_v3, %v862_v31 }
 0x121   : > { %v1223_v47 = vpop.f32.mrf.mxu1  ;;  %v1739_v49 = vpop.f32.mrf.mxu0 }
 0x122   : > { %v1762_v50 = vpack.c.bf16 %v1754_v46, %v1754_v46  ;;  %v1239_v52 = vadd.f32 %v1223_v47, %v993_v44  ;;  %v1366_v63 = vpop.f32.mrf.mxu2 }
 0x124   : > { %v1778_v36 = vunpack.c.l.bf16 %v1762_v50  ;;  %v1374_v21 = vadd.f32 %v1358_v9, %v1239_v52  ;;  %v1501_v30 = vpop.f32.mrf.mxu3 }
 0x126   : > { %v1785_v43 = vadd.f32 %v1784_v35, %v1778_v36  ;;  %v1800_v53 = vmul.f32 %v1778_v36, %v1778_v36  ;;  %v1509_v56 = vadd.f32 %v1493_v33, %v1374_v21 }
 0x128   : > { %v1807_v60 = vadd.f32 %v1806_v45, %v1800_v53  ;;  %v1755_v54 = vadd.f32 %v1739_v49, %v1509_v56 }
 0x129   : > { %v1226_v0 = vpop.f32.mrf.mxu1  ;;  %v1742_v1 = vpop.f32.mrf.mxu0 }
 0x12a   : > { %v1763_v2 = vpack.c.bf16 %v1755_v54, %v1755_v54  ;;  %v2655_v4 = vpack.c.bf16 %v1755_v54, %v1754_v46  ;;  %v1240_v41 = vadd.f32 %v1226_v0, %v3155_v51  ;;  %v1368_v39 = vpop.f32.mrf.mxu2  ;;  %v861_v51 = vadd.f32 %v3153_v48, %v3165_v62 }
 0x12c   : > { %2667 = vst [vmem:[%s3176_s7 + $0x8] sm:$0xff] %v2655_v4   ;;  %v1779_v7 = vunpack.c.l.bf16 %v1763_v2  ;;  %v1375_v8 = vadd.f32 %v1361_v14, %v1240_v41  ;;  %v996_v12 = vadd.f32 %v3163_v61, %v861_v51  ;;  %v1503_v49 = vpop.f32.mrf.mxu3 }
 0x12e   : > { %v1786_v9 = vadd.f32 %v1785_v43, %v1779_v7  ;;  %v1801_v11 = vmul.f32 %v1779_v7, %v1779_v7  ;;  %v1510_v13 = vadd.f32 %v1496_v59, %v1375_v8 }
 0x130   : > { %v1808_v15 = vadd.f32 %v1807_v60, %v1801_v11  ;;  %v1756_v16 = vadd.f32 %v1742_v1, %v1510_v13 }
 0x131   : > { %v1228_v18 = vpop.f32.mrf.mxu1  ;;  %v1744_v22 = vpop.f32.mrf.mxu0 }
 0x132   : > { %v1764_v19 = vpack.c.bf16 %v1756_v16, %v1756_v16  ;;  %v1241_v20 = vadd.f32 %v1228_v18, %v995_v10  ;;  %v1747_v32 = vpop.f32.mrf.mxu2 }
 0x134   : > { %v1780_v38 = vunpack.c.l.bf16 %v1764_v19  ;;  %v1376_v57 = vadd.f32 %v1363_v42, %v1241_v20 }
 0x136   : > { %v1787_v14 = vadd.f32 %v1786_v9, %v1780_v38  ;;  %v1802_v24 = vmul.f32 %v1780_v38, %v1780_v38  ;;  %v1511_v25 = vadd.f32 %v1498_v17, %v1376_v57 }
 0x138   : > { %v1809_v55 = vadd.f32 %v1808_v15, %v1802_v24  ;;  %v1757_v23 = vadd.f32 %v1744_v22, %v1511_v25 }
 0x139   : > { %v1231_v26 = vpop.f32.mrf.mxu1 }
 0x13a   : > { %v1765_v27 = vpack.c.bf16 %v1757_v23, %v1757_v23  ;;  %v2660_v28 = vpack.c.bf16 %v1757_v23, %v1756_v16  ;;  %v1242_v29 = vadd.f32 %v1231_v26, %v996_v12  ;;  %v1749_v52 = vpop.f32.mrf.mxu2 }
 0x13c   : > { %2668 = vst [vmem:[%s3176_s7 + $0x10] sm:$0xff] %v2660_v28   ;;  %v1781_v48 = vunpack.c.l.bf16 %v1765_v27  ;;  %v1377_v62 = vadd.f32 %v1366_v63, %v1242_v29 }
 0x13e   : > { %v1788_v33 = vadd.f32 %v1787_v14, %v1781_v48  ;;  %v1803_v34 = vmul.f32 %v1781_v48, %v1781_v48  ;;  %v1512_v35 = vadd.f32 %v1501_v30, %v1377_v62 }
 0x140   : > { %v1810_v61 = vadd.f32 %v1809_v55, %v1803_v34  ;;  %v1758_v40 = vadd.f32 %v1747_v32, %v1512_v35 }
 0x141   : > { %v1233_v42 = vpop.f32.mrf.mxu1 }
 0x142   : > { %v1766_v44 = vpack.c.bf16 %v1758_v40, %v1758_v40  ;;  %v1243_v45 = vadd.f32 %v1233_v42, %v997_v37 }
 0x144   : > { %v1782_v46 = vunpack.c.l.bf16 %v1766_v44  ;;  %v1378_v47 = vadd.f32 %v1368_v39, %v1243_v45 }
 0x146   : > { %v1789_v50 = vadd.f32 %v1788_v33, %v1782_v46  ;;  %v1804_v58 = vmul.f32 %v1782_v46, %v1782_v46  ;;  %v1513_v5 = vadd.f32 %v1503_v49, %v1378_v47 }
 0x148   : > { %v1811_v36 = vadd.f32 %v1810_v61, %v1804_v58  ;;  %v1759_v21 = vadd.f32 %v1749_v52, %v1513_v5 }
 0x14a   : > { %v1767_v43 = vpack.c.bf16 %v1759_v21, %v1759_v21  ;;  %v2665_v53 = vpack.c.bf16 %v1759_v21, %v1758_v40 }
 0x14c   : > { %2669 = vst [vmem:[%s3176_s7 + $0x18] sm:$0xff] %v2665_v53   ;;  %v1783_v3 = vunpack.c.l.bf16 %v1767_v43 }
 0x14e   : > { %v1790_v56 = vadd.f32 %v1789_v50, %v1783_v3  ;;  %v1805_v59 = vmul.f32 %v1783_v3, %v1783_v3 }
 0x150   : > { %v1791_v60 = vrot.slane %v1790_v56, 4  ;;  %v1812_v54 = vadd.f32 %v1811_v36, %v1805_v59 }
 0x152   : > { %v1792_v63 = vadd.f32 %v1791_v60, %v1790_v56  ;;  %v1813_v0 = vrot.slane %v1812_v54, 4 }
 0x154   : > { %v1793_v2 = vrot.slane %v1792_v63, 2  ;;  %v1814_v4 = vadd.f32 %v1813_v0, %v1812_v54 }
 0x156   : > { %v1794_v41 = vadd.f32 %v1793_v2, %v1792_v63  ;;  %v1815_v1 = vrot.slane %v1814_v4, 2 }
 0x158   : > { %v1795_v6 = vrot.slane %v1794_v41, 1  ;;  %v1816_v7 = vadd.f32 %v1815_v1, %v1814_v4 }
 0x15a   : > { %v1796_v8 = vadd.f32 %v1795_v6, %v1794_v41  ;;  %v1817_v9 = vrot.slane %v1816_v7, 1 }
 0x15c   : > { %1797 = vst [vmem:[%s226_s11] sm:$0x1] %v1796_v8  ;;  %v1818_v11 = vadd.f32 %v1817_v9, %v1816_v7 }
 0x15e   : > { %1819 = vst [vmem:[%s226_s11 + $0x1] sm:$0x1] %v1818_v11 }
 0x15f PF: > { %s14_s14 = sadd.s32 1, %s2733_s14   ;;  %s3213_s12 = smov %s2729_s13 }
 0x160   : > { %p11_p5 = scmp.ge.s32.totalorder %s14_s14, 4   ;;  %s3214_s13 = smov %s3216_s15 }
 0x162   :  { %13 = sbr.rel (!%p11_p5) target bundleno = 2 (0x2), region = 86 }

// kernel: corblock_s_forward.21
= control target key start
LH: loop header
LB: loop body
LE: loop exit
PB: predicated region body
PF: predicated region fallthrough
CT: control target
= control target key end

     0   :  { %s2823_s12 = smov 0   ;;  %s2825_s13 = smov 0   ;;  %s3455_s0 = inlined_call_operand.vmem [shape: bf16[2,1,1,10,10,128], index: 0, kind: input, shape index: {}]   ;;  %s3456_s1 = inlined_call_operand.vmem [shape: bf16[9,128,128], index: 1, kind: input, shape index: {}]   ;;  %s3457_s2 = inlined_call_operand.vmem [shape: bf16[2,8,8,128], index: 2, kind: output, shape index: {0}]   ;;  %s3458_s3 = inlined_call_operand.vmem [shape: f32[2,2,128], index: 3, kind: output, shape index: {1}]  }
   0x1   :  { %s2827_s14 = smov 0  }
   0x2 LB: > { %s26_s15 = sadd.s32 1, %s2797_s13  ;;  %p2071_p0 = scmp.ge.s32.totalorder %s2801_s14, 1  ;;  %s2801_s14 = sphi %s2827_s14, %s14_s14   ;;  %s2797_s13 = sphi %s2825_s13, %s3464_s13   ;;  %s2793_s12 = sphi %s2823_s12, %s3463_s12  }
   0x3   : > { %p28_p1 = scmp.ge.s32.totalorder %s26_s15, 2  ;;  %p165_p2 = scmp.lt.s32.totalorder %s2801_s14, 3 }
   0x5   : > { %s3466_s15 = smov (%p28_p1, %s26_s15), 0  ;;  %p166_p3 = pnand %p2071_p0, %p165_p2 }
   0x6   : > { %p203_p4 = scmp.lt.s32.totalorder (!%p166_p3), %s2793_s12, 1 }
   0x7   : > { %169 = sbr.rel (%p166_p3) target bundleno = 351 (0x15f), region = 28 }
   0xc   : > { %v2650_v0 = vld [vmem:[%s3456_s1 + $0x78] sm:$0xff]  ;;  %v2649_v2 = vld [vmem:[%s3456_s1 + $0x70] sm:$0xff]  ;;  %s3468_s12 = smov (!%p203_p4, %s2793_s12), 1  ;;  %v2648_v6 = vld [vmem:[%s3456_s1 + $0x68] sm:$0xff]  ;;  %vm259_vm0 = vsmask.f32 3328 }
   0xd   : > { %v2658_v1 = vld [vmem:[%s3456_s1 + $0xb8] sm:$0xff]  ;;  %2738 = vmatpush.bf16.msra.mxu1 %v2650_v0  ;;  %455 = vmatpush.bf16.msra.mxu0 %v2650_v0  ;;  %v2657_v3 = vld [vmem:[%s3456_s1 + $0xb0] sm:$0xff]  ;;  %s2754_s26 = smul.u32 80, %s3468_s12  ;;  %v2656_v7 = vld [vmem:[%s3456_s1 + $0xa8] sm:$0xff]  ;;  %vm260_vm1 = vsmask.f32 7440 }
   0xe   : > { %725 = vmatpush.bf16.msra.mxu2 %v2658_v1  ;;  %v2670_v4 = vld [vmem:[%s3456_s1 + $0xf8] sm:$0xff]  ;;  %v2669_v5 = vld [vmem:[%s3456_s1 + $0xf0] sm:$0xff]  ;;  %v2647_v11 = vld [vmem:[%s3456_s1 + $0x60] sm:$0xff]  ;;  %vm609_vm2 = vcmask 1042432   ;;  %vm610_vm3 = vcmask 1046532   ;;  %s2075_s7 = sshll.u32 %s3468_s12, 1 }
   0xf   : > { %860 = vmatpush.bf16.msra.mxu3 %v2670_v4  ;;  %s2871_s8 = scalar_lea.vmem %s3455_s0, %s2754_s26  ;;  %v2655_v16 = vld [vmem:[%s3456_s1 + $0xa0] sm:$0xff]  ;;  %v2668_v17 = vld [vmem:[%s3456_s1 + $0xe8] sm:$0xff]  ;;  %v2646_v29 = vld [vmem:[%s3456_s1 + $0x58] sm:$0xff]  ;;  %s226_s11 = scalar_lea.vmem %s3458_s3, %s2075_s7 }
  0x10   : > { %v231_v8 = vld [vmem:[%s2871_s8 + $0x20] sm:$0xf]  ;;  %v232_v9 = vld [vmem:[%s2871_s8 + $0x28] sm:$0xf]  ;;  %v2876_v10 = vld [vmem:[%s2871_s8 + $0x24] sm:$0x1] }
  0x11   : > { %2739 = vmatpush.bf16.msra.mxu1 %v2649_v2  ;;  %456 = vmatpush.bf16.msra.mxu0 %v2649_v2  ;;  %v2882_v12 = vld [vmem:[%s2871_s8 + $0x2c] sm:$0x1]  ;;  %v319_v13 = vshrl.u32 %v231_v8, 16  ;;  %v322_v14 = vshll.u32 %v231_v8, 16  ;;  %v333_v15 = vshrl.u32 %v232_v9, 16  ;;  %v336_v18 = vshll.u32 %v232_v9, 16  ;;  %vm2909_vm4 = vmor %vm259_vm0, %vm260_vm1 }
  0x12   : > { %726 = vmatpush.bf16.msra.mxu2 %v2657_v3  ;;  %v227_v19 = vld [vmem:[%s2871_s8] sm:$0xf]  ;;  %v328_v22 = vshll.u32 %v2876_v10, 16  ;;  %v228_v24 = vld [vmem:[%s2871_s8 + $0x8] sm:$0xf]  ;;  %v342_v26 = vshll.u32 %v2882_v12, 16  ;;  %vm2918_vm5 = vmor %vm609_vm2, %vm610_vm3 }
  0x13   : > { %861 = vmatpush.bf16.msra.mxu3 %v2669_v5  ;;  %v321_v20 = vrot.slane %v319_v13, 4  ;;  %v324_v21 = vrot.slane %v322_v14, 5  ;;  %v335_v23 = vrot.slane %v333_v15, 4  ;;  %v338_v25 = vrot.slane %v336_v18, 5  ;;  %v251_v27 = vld [vmem:[%s2871_s8 + $0x4] sm:$0x1] }
  0x14   : > { %v252_v28 = vld [vmem:[%s2871_s8 + $0xc] sm:$0x1]  ;;  %v263_v31 = vshrl.u32 %v227_v19, 16  ;;  %v266_v32 = vshll.u32 %v227_v19, 16  ;;  %v2667_v34 = vld [vmem:[%s3456_s1 + $0xe0] sm:$0xff]  ;;  %v272_v35 = vshll.u32 %v251_v27, 16 }
  0x15   : > { %2740 = vmatpush.bf16.msra.mxu1 %v2648_v6  ;;  %457 = vmatpush.bf16.msra.mxu0 %v2648_v6  ;;  %v325_v30 = vor.u32 %v324_v21, %v321_v20  ;;  %v339_v33 = vor.u32 %v338_v25, %v335_v23  ;;  %v277_v36 = vshrl.u32 %v228_v24, 16  ;;  %v280_v37 = vshll.u32 %v228_v24, 16  ;;  %v585_v38 = vld [vmem:[%s2871_s8] sm:$0xe]  ;;  %v586_v43 = vld [vmem:[%s2871_s8 + $0x8] sm:$0xe] }
  0x16   : > { %727 = vmatpush.bf16.msra.mxu2 %v2656_v7  ;;  %v330_v39 = vrot.slane %v328_v22, 5  ;;  %v265_v40 = vrot.slane %v263_v31, 4  ;;  %v268_v41 = vrot.slane %v266_v32, 5  ;;  %v286_v42 = vshll.u32 %v252_v28, 16  ;;  %v2654_v44 = vld [vmem:[%s3456_s1 + $0x98] sm:$0xff]  ;;  %v2645_v60 = vld [vmem:[%s3456_s1 + $0x50] sm:$0xff] }
  0x17   : > { %862 = vmatpush.bf16.msra.mxu3 %v2668_v17  ;;  %v326_v45 = vrot.slane %v325_v30, 4  ;;  %v344_v46 = vrot.slane %v342_v26, 5  ;;  %v279_v47 = vrot.slane %v277_v36, 4  ;;  %v282_v48 = vrot.slane %v280_v37, 5  ;;  %v2666_v56 = vld [vmem:[%s3456_s1 + $0xd8] sm:$0xff]  ;;  %v2653_v0 = vld [vmem:[%s3456_s1 + $0x90] sm:$0xff] }
  0x18   : > { %v340_v50 = vrot.slane %v339_v33, 4  ;;  %v269_v51 = vor.u32 %v268_v41, %v265_v40  ;;  %v2172_v52 = vrot.slane %v585_v38, 9  ;;  %v614_v53 = vrot.slane %v251_v27, 5  ;;  %v233_v59 = vld [vmem:[%s2871_s8 + $0x30] sm:$0xf]  ;;  %v2644_v14 = vld [vmem:[%s3456_s1 + $0x48] sm:$0xff] }
  0x19   : > { %2741 = vmatpush.bf16.msra.mxu1 %v2647_v11  ;;  %458 = vmatpush.bf16.msra.mxu0 %v2647_v11  ;;  %v274_v54 = vrot.slane %v272_v35, 5  ;;  %v283_v55 = vor.u32 %v282_v48, %v279_v47  ;;  %v2173_v58 = vrot.slane %v586_v43, 9  ;;  %v288_v62 = vrot.slane %v286_v42, 5  ;;  %v234_v3 = vld [vmem:[%s2871_s8 + $0x38] sm:$0xf]  ;;  %v2665_v11 = vld [vmem:[%s3456_s1 + $0xd0] sm:$0xff] }
  0x1a   : > { %728 = vmatpush.bf16.msra.mxu2 %v2655_v16  ;;  %v270_v61 = vrot.slane %v269_v51, 4  ;;  %v618_v63 = vrot.slane %v252_v28, 5  ;;  %v331_v1 = vsel %vm2909_vm4, %v326_v45, %v330_v39  ;;  %v345_v4 = vsel %vm2909_vm4, %v340_v50, %v344_v46  ;;  %v229_v7 = vld [vmem:[%s2871_s8 + $0x10] sm:$0xf]  ;;  %v2652_v19 = vld [vmem:[%s3456_s1 + $0x88] sm:$0xff]  ;;  %v2643_v24 = vld [vmem:[%s3456_s1 + $0x40] sm:$0xff] }
  0x1b   : > { %863 = vmatpush.bf16.msra.mxu3 %v2667_v34  ;;  %v284_v2 = vrot.slane %v283_v55, 4  ;;  %v615_v5 = vsel %vm2918_vm5, %v2172_v52, %v614_v53  ;;  %v347_v6 = vshrl.u32 %v233_v59, 16  ;;  %v350_v13 = vshll.u32 %v233_v59, 16  ;;  %v230_v22 = vld [vmem:[%s2871_s8 + $0x18] sm:$0xf]  ;;  %v2664_v31 = vld [vmem:[%s3456_s1 + $0xc8] sm:$0xff] }
  0x1c   : > { %v275_v8 = vsel %vm2909_vm4, %v270_v61, %v274_v54  ;;  %v619_v9 = vsel %vm2918_vm5, %v2173_v58, %v618_v63  ;;  %v2947_v15 = vunpack.c.l.b16 %v331_v1  ;;  %v361_v17 = vshrl.u32 %v234_v3, 16  ;;  %v2965_v32 = vld [vmem:[%s2871_s8 + $0x34] sm:$0x1]  ;;  %v2968_v36 = vld [vmem:[%s2871_s8 + $0x3c] sm:$0x1]  ;;  %v2651_v42 = vld [vmem:[%s3456_s1 + $0x80] sm:$0xff] }
  0x1d   : > { %2742 = vmatpush.bf16.msra.mxu1 %v2646_v29  ;;  %459 = vmatpush.bf16.msra.mxu0 %v2646_v29  ;;  %v289_v16 = vsel %vm2909_vm4, %v284_v2, %v288_v62  ;;  %v396_v18 = vunpack.c.l.b16 %v345_v4  ;;  %v661_v20 = vunpack.c.l.b16 %v615_v5  ;;  %v364_v21 = vshll.u32 %v234_v3, 16  ;;  %v2642_v29 = vld [vmem:[%s3456_s1 + $0x38] sm:$0xff]  ;;  %v2975_v43 = vld [vmem:[%s2871_s8 + $0x14] sm:$0x1]  ;;  %v2254_v62 = vld [vmem:[%s2871_s8 + $0x8] sm:$0xf] }
  0x1e   : > { %729 = vmatpush.bf16.msra.mxu2 %v2654_v44  ;;  %v291_v23 = vshrl.u32 %v229_v7, 16  ;;  %v391_v25 = vunpack.c.l.b16 %v275_v8  ;;  %v662_v26 = vunpack.c.l.b16 %v619_v9  ;;  %v349_v27 = vrot.slane %v347_v6, 4  ;;  %v2978_v44 = vld [vmem:[%s2871_s8 + $0x1c] sm:$0x1]  ;;  %v2659_v63 = vld [vmem:[%s2871_s8 + $0xc] sm:$0xf0] }
  0x1f   : > { %864 = vmatpush.bf16.msra.mxu3 %v2666_v56  ;;  %v294_v28 = vshll.u32 %v229_v7, 16  ;;  %v392_v30 = vunpack.c.l.b16 %v289_v16  ;;  %v352_v33 = vrot.slane %v350_v13, 5  ;;  %v363_v34 = vrot.slane %v361_v17, 4  ;;  %v2678_v45 = vld [vmem:[%s3456_s1 + $0x138] sm:$0xff]  ;;  %v2663_v56 = vld [vmem:[%s3456_s1 + $0xc0] sm:$0xff]  ;;  %v2677_v1 = vld [vmem:[%s3456_s1 + $0x130] sm:$0xff] }
  0x20   : > { %v366_v35 = vrot.slane %v364_v21, 5  ;;  %v293_v37 = vrot.slane %v291_v23, 4  ;;  %v305_v39 = vshrl.u32 %v230_v22, 16  ;;  %v308_v40 = vshll.u32 %v230_v22, 16  ;;  %v2698_v48 = vld [vmem:[%s3456_s1 + $0x1b8] sm:$0xff]  ;;  %v2697_v6 = vld [vmem:[%s3456_s1 + $0x1b0] sm:$0xff] }
  0x21   : > { %2743 = vmatpush.bf16.msra.mxu1 %v2645_v60  ;;  %460 = vmatpush.bf16.msra.mxu0 %v2645_v60  ;;  %v296_v38 = vrot.slane %v294_v28, 5  ;;  %v401_v41 = vpack.c.b16 %v396_v18, %v2947_v15  ;;  %v669_v46 = vpack.c.b16 %v662_v26, %v661_v20  ;;  %v356_v47 = vshll.u32 %v2965_v32, 16  ;;  %v2706_v2 = vld [vmem:[%s3456_s1 + $0x1f8] sm:$0xff]  ;;  %v587_v4 = vld [vmem:[%s2871_s8 + $0x10] sm:$0xe]  ;;  %v2696_v26 = vld [vmem:[%s3456_s1 + $0x1a8] sm:$0xff] }
  0x22   : > { %730 = vmatpush.bf16.msra.mxu2 %v2653_v0  ;;  %v307_v50 = vrot.slane %v305_v39, 4  ;;  %v310_v51 = vrot.slane %v308_v40, 5  ;;  %v399_v52 = vpack.c.b16 %v392_v30, %v391_v25  ;;  %v353_v53 = vor.u32 %v352_v33, %v349_v27  ;;  %v2641_v0 = vld [vmem:[%s3456_s1 + $0x30] sm:$0xff]  ;;  %v588_v5 = vld [vmem:[%s2871_s8 + $0x18] sm:$0xe]  ;;  %v2676_v25 = vld [vmem:[%s3456_s1 + $0x128] sm:$0xff] }
  0x23   : > { %865 = vmatpush.bf16.msra.mxu3 %v2665_v11  ;;  %v367_v54 = vor.u32 %v366_v35, %v363_v34  ;;  %v370_v55 = vshll.u32 %v2968_v36, 16  ;;  %v297_v58 = vor.u32 %v296_v38, %v293_v37  ;;  %v300_v59 = vshll.u32 %v2975_v43, 16  ;;  %v2300_v13 = vld [vmem:[%s2871_s8 + $0x8] sm:$0xf]  ;;  %v2302_v18 = vld [vmem:[%s2871_s8 + $0x10] sm:$0xf] }
  0x24   : > { %v311_v60 = vor.u32 %v310_v51, %v307_v50  ;;  %v314_v61 = vshll.u32 %v2978_v44, 16  ;;  %v358_v3 = vrot.slane %v356_v47, 5  ;;  %v354_v7 = vrot.slane %v353_v53, 4  ;;  %v2639_v37 = vld [vmem:[%s3456_s1 + $0x20] sm:$0xff]  ;;  %v2704_v40 = vld [vmem:[%s3456_s1 + $0x1e8] sm:$0xff] }
  0x25   : > { %2744 = vmatpush.bf16.msra.mxu1 %v2644_v14  ;;  %461 = vmatpush.bf16.msra.mxu0 %v2644_v14  ;;  %v368_v8 = vrot.slane %v367_v54, 4  ;;  %v372_v9 = vrot.slane %v370_v55, 5  ;;  %v2255_v11 = vor.u32 %v2659_v63, %v2254_v62  ;;  %v298_v14 = vrot.slane %v297_v58, 4  ;;  %v3050_v47 = vld [vmem:[%s2871_s8 + $0xc] sm:$0x1]  ;;  %v2638_v55 = vld [vmem:[%s3456_s1 + $0x18] sm:$0xff] }
  0x26   : > { %731 = vmatpush.bf16.msra.mxu2 %v2652_v19  ;;  %v302_v15 = vrot.slane %v300_v59, 5  ;;  %v312_v16 = vrot.slane %v311_v60, 4  ;;  %v316_v17 = vrot.slane %v314_v61, 5  ;;  %v2640_v19 = vld [vmem:[%s3456_s1 + $0x28] sm:$0xff]  ;;  %v2174_v20 = vrot.slane %v587_v4, 9  ;;  %v2674_v58 = vld [vmem:[%s3456_s1 + $0x118] sm:$0xff] }
  0x27   : > { %866 = vmatpush.bf16.msra.mxu3 %v2664_v31  ;;  %v622_v21 = vrot.slane %v2975_v43, 5  ;;  %v2175_v22 = vrot.slane %v588_v5, 9  ;;  %v626_v23 = vrot.slane %v2978_v44, 5  ;;  %v359_v27 = vsel %vm2909_vm4, %v354_v7, %v358_v3  ;;  %v2675_v43 = vld [vmem:[%s3456_s1 + $0x120] sm:$0xff]  ;;  %v2258_v62 = vld [vmem:[%s2871_s8 + $0x18] sm:$0xf] }
  0x28   : > { %v373_v28 = vsel %vm2909_vm4, %v368_v8, %v372_v9  ;;  %v917_v30 = vshll.u32 %v2300_v13, 16  ;;  %v303_v31 = vsel %vm2909_vm4, %v298_v14, %v302_v15  ;;  %v317_v33 = vsel %vm2909_vm4, %v312_v16, %v316_v17  ;;  %v2695_v44 = vld [vmem:[%s3456_s1 + $0x1a0] sm:$0xff]  ;;  %v590_v5 = vld [vmem:[%s2871_s8 + $0x28] sm:$0xe]  ;;  %v2673_v7 = vld [vmem:[%s3456_s1 + $0x110] sm:$0xff] }
  0x29   : > { %2745 = vmatpush.bf16.msra.mxu1 %v2643_v24  ;;  %462 = vmatpush.bf16.msra.mxu0 %v2643_v24  ;;  %v2705_v24 = vld [vmem:[%s3456_s1 + $0x1f0] sm:$0xff]  ;;  %v928_v34 = vshrl.u32 %v2302_v18, 16  ;;  %v931_v35 = vshll.u32 %v2302_v18, 16  ;;  %v623_v38 = vsel %vm2918_vm5, %v2174_v20, %v622_v21  ;;  %v627_v39 = vsel %vm2918_vm5, %v2175_v22, %v626_v23  ;;  %v2660_v63 = vld [vmem:[%s2871_s8 + $0x1c] sm:$0xf0]  ;;  %v2694_v17 = vld [vmem:[%s3456_s1 + $0x198] sm:$0xff] }
  0x2a   : > { %732 = vmatpush.bf16.msra.mxu2 %v2651_v42  ;;  %v398_v42 = vunpack.c.l.b16 %v373_v28  ;;  %v919_v50 = vrot.slane %v917_v30, 5  ;;  %v663_v51 = vunpack.c.l.b16 %v623_v38  ;;  %v923_v59 = vshll.u32 %v3050_v47, 16  ;;  %v2304_v20 = vld [vmem:[%s2871_s8 + $0x18] sm:$0xf]  ;;  %v2703_v21 = vld [vmem:[%s3456_s1 + $0x1e0] sm:$0xff]  ;;  %v2693_v23 = vld [vmem:[%s3456_s1 + $0x190] sm:$0xff] }
  0x2b   : > { %867 = vmatpush.bf16.msra.mxu3 %v2663_v56  ;;  %v930_v53 = vrot.slane %v928_v34, 4  ;;  %v933_v54 = vrot.slane %v931_v35, 5  ;;  %v3056_v56 = vld [vmem:[%s2871_s8 + $0x14] sm:$0x1]  ;;  %v2259_v8 = vor.u32 %v2660_v63, %v2258_v62  ;;  %v630_v14 = vrot.slane %v2876_v10, 5  ;;  %v2636_v10 = vld [vmem:[%s3456_s1 + $0x8] sm:$0xff] }
  0x2c   : > { %473 = vmatmul.bf16.vlgmr.msra.gmra.mxu1 %v401_v41  ;;  %463 = vmatmul.bf16.vlgmr.msra.gmra.mxu0 %v399_v52  ;;  %v397_v41 = vunpack.c.l.b16 %v359_v27  ;;  %v664_v52 = vunpack.c.l.b16 %v627_v39  ;;  %v937_v4 = vshll.u32 %v3056_v56, 16  ;;  %v925_v9 = vrot.slane %v923_v59, 5  ;;  %v2306_v22 = vld [vmem:[%s2871_s8 + $0x20] sm:$0xf]  ;;  %v2631_v39 = vld [vmem:[%s2871_s8 + $0x4] sm:$0xf0] }
  0x2d   : > { %556 = vmatpush.bf16.msrb.mxu1 %v2642_v29  ;;  %1106 = vmatpush.bf16.msrb.mxu0 %v2678_v45  ;;  %v914_v29 = vshrl.u32 %v2300_v13, 16  ;;  %v393_v45 = vunpack.c.l.b16 %v303_v31  ;;  %v934_v3 = vor.u32 %v933_v54, %v930_v53  ;;  %v2177_v15 = vrot.slane %v590_v5, 9  ;;  %v2635_v34 = vld [vmem:[%s3456_s1] sm:$0xff]  ;;  %v2685_v53 = vld [vmem:[%s3456_s1 + $0x170] sm:$0xff]  ;;  %v592_v5 = vld [vmem:[%s2871_s8 + $0x38] sm:$0xe] }
  0x2e   : > { %1415 = vmatpush.bf16.msrb.mxu2 %v2698_v48  ;;  %868 = vmatmul.bf16.vlgmr.msra.gmra.mxu3 %v2255_v11  ;;  %v402_v60 = vpack.c.b16 %v398_v42, %v397_v41  ;;  %v634_v16 = vrot.slane %v2882_v12, 5  ;;  %v2672_v12 = vld [vmem:[%s3456_s1 + $0x108] sm:$0xff]  ;;  %v942_v28 = vshrl.u32 %v2304_v20, 16  ;;  %v945_v30 = vshll.u32 %v2304_v20, 16  ;;  %v2126_v35 = vld [vmem:[%s2871_s8] sm:$0xf] }
  0x2f   : > { %733 = vmatmul.bf16.vlgmr.msra.gmra.mxu2 %v669_v46  ;;  %1661 = vmatpush.bf16.msrb.mxu3 %v2706_v2  ;;  %v394_v46 = vunpack.c.l.b16 %v317_v33  ;;  %v916_v48 = vrot.slane %v914_v29, 4  ;;  %v670_v2 = vpack.c.b16 %v664_v52, %v663_v51  ;;  %v935_v18 = vrot.slane %v934_v3, 4  ;;  %v2671_v38 = vld [vmem:[%s3456_s1 + $0x100] sm:$0xff]  ;;  %v2661_v62 = vld [vmem:[%s2871_s8 + $0x2c] sm:$0xf0] }
  0x30   : > { %v635_v27 = vsel %vm2918_vm5, %v2177_v15, %v634_v16  ;;  %v956_v31 = vshrl.u32 %v2306_v22, 16  ;;  %v959_v33 = vshll.u32 %v2306_v22, 16  ;;  %v2127_v54 = vor.u32 %v2631_v39, %v2126_v35  ;;  %v2308_v3 = vld [vmem:[%s2871_s8 + $0x28] sm:$0xf]  ;;  %v2691_v22 = vld [vmem:[%s3456_s1 + $0x180] sm:$0xff] }
  0x31   : > { %557 = vmatpush.bf16.msrb.mxu1 %v2641_v0  ;;  %1107 = vmatpush.bf16.msrb.mxu0 %v2677_v1  ;;  %v400_v61 = vpack.c.b16 %v394_v46, %v393_v45  ;;  %v920_v0 = vor.u32 %v919_v50, %v916_v48  ;;  %v589_v1 = vld [vmem:[%s2871_s8 + $0x20] sm:$0xe]  ;;  %v3120_v45 = vld [vmem:[%s2871_s8 + $0x1c] sm:$0x1]  ;;  %v3123_v46 = vld [vmem:[%s2871_s8 + $0x24] sm:$0x1] }
  0x32   : > { %1416 = vmatpush.bf16.msrb.mxu2 %v2697_v6  ;;  %v2637_v6 = vld [vmem:[%s3456_s1 + $0x10] sm:$0xff]  ;;  %v2176_v11 = vrot.slane %v589_v1, 9  ;;  %v944_v48 = vrot.slane %v942_v28, 4  ;;  %v947_v50 = vrot.slane %v945_v30, 5  ;;  %v958_v51 = vrot.slane %v956_v31, 4  ;;  %v3152_v15 = vld [vmem:[%s3456_s1 + $0x228] sm:$0xff] }
  0x33   : > { %1662 = vmatpush.bf16.msrb.mxu3 %v2705_v24  ;;  %v921_v13 = vrot.slane %v920_v0, 4  ;;  %v2702_v24 = vld [vmem:[%s3456_s1 + $0x1d8] sm:$0xff]  ;;  %v961_v52 = vrot.slane %v959_v33, 5  ;;  %v965_v59 = vshll.u32 %v3123_v46, 16  ;;  %v3136_v1 = vld [vmem:[%s3456_s1 + $0x230] sm:$0xff]  ;;  %v970_v16 = vshrl.u32 %v2308_v3, 16 }
  0x34   : > { %v948_v63 = vor.u32 %v947_v50, %v944_v48  ;;  %v638_v20 = vrot.slane %v2965_v32, 5  ;;  %v2700_v32 = vld [vmem:[%s3456_s1 + $0x1c8] sm:$0xff]  ;;  %v3176_v28 = vld [vmem:[%s3456_s1 + $0x220] sm:$0xff]  ;;  %v2682_v31 = vld [vmem:[%s3456_s1 + $0x158] sm:$0xff] }
  0x35   : > { %558 = vmatpush.bf16.msrb.mxu1 %v2640_v19  ;;  %1108 = vmatpush.bf16.msrb.mxu0 %v2676_v25  ;;  %v939_v19 = vrot.slane %v937_v4, 5  ;;  %v926_v25 = vsel %vm2909_vm4, %v921_v13, %v925_v9  ;;  %v962_v0 = vor.u32 %v961_v52, %v958_v51  ;;  %v591_v4 = vld [vmem:[%s2871_s8 + $0x30] sm:$0xe]  ;;  %v967_v9 = vrot.slane %v965_v59, 5  ;;  %v3186_v33 = vld [vmem:[%s2871_s8 + $0x2c] sm:$0x1] }
  0x36   : > { %1417 = vmatpush.bf16.msrb.mxu2 %v2696_v26  ;;  %v631_v26 = vsel %vm2918_vm5, %v2176_v11, %v630_v14  ;;  %v2310_v11 = vld [vmem:[%s2871_s8 + $0x30] sm:$0xf]  ;;  %v949_v13 = vrot.slane %v948_v63, 4  ;;  %v3189_v39 = vld [vmem:[%s2871_s8 + $0x34] sm:$0x1]  ;;  %v979_v52 = vshll.u32 %v3186_v33, 16 }
  0x37   : > { %1663 = vmatpush.bf16.msrb.mxu3 %v2704_v40  ;;  %v940_v29 = vsel %vm2909_vm4, %v935_v18, %v939_v19  ;;  %v1042_v40 = vunpack.c.l.b16 %v926_v25  ;;  %v665_v42 = vunpack.c.l.b16 %v631_v26  ;;  %v963_v14 = vrot.slane %v962_v0, 4  ;;  %v2701_v18 = vld [vmem:[%s3456_s1 + $0x1d0] sm:$0xff]  ;;  %v2502_v51 = vld [vmem:[%s2871_s8 + $0x18] sm:$0xf]  ;;  %v2662_v63 = vld [vmem:[%s2871_s8 + $0x3c] sm:$0xf0] }
  0x38   : > { %v1043_v41 = vunpack.c.l.b16 %v940_v29  ;;  %v2178_v19 = vrot.slane %v591_v4, 9  ;;  %v972_v26 = vrot.slane %v970_v16, 4  ;;  %v993_v59 = vshll.u32 %v3189_v39, 16  ;;  %v2312_v0 = vld [vmem:[%s2871_s8 + $0x38] sm:$0xf] }
  0x39   : > { %559 = vmatpush.bf16.msrb.mxu1 %v2639_v37  ;;  %1109 = vmatpush.bf16.msrb.mxu0 %v2675_v43  ;;  %v2686_v37 = vld [vmem:[%s3456_s1 + $0x178] sm:$0xff]  ;;  %v666_v43 = vunpack.c.l.b16 %v635_v27  ;;  %v968_v25 = vsel %vm2909_vm4, %v963_v14, %v967_v9 }
  0x3a   : > { %1418 = vmatpush.bf16.msrb.mxu2 %v2695_v44  ;;  %v3117_v44 = vld [vmem:[%s3456_s1 + $0x238] sm:$0xff]  ;;  %v639_v29 = vsel %vm2918_vm5, %v2178_v19, %v638_v20  ;;  %v995_v16 = vrot.slane %v993_v59, 5  ;;  %v2699_v20 = vld [vmem:[%s3456_s1 + $0x1c0] sm:$0xff] }
  0x3b   : > { %1664 = vmatpush.bf16.msrb.mxu3 %v2703_v21  ;;  %v2179_v21 = vrot.slane %v592_v5, 9  ;;  %v3207_v5 = vld [vmem:[%s2871_s8 + $0x14] sm:$0x1]  ;;  %v3219_v19 = vld [vmem:[%s3456_s1 + $0x218] sm:$0xff] }
  0x3c   : > { %478 = vmatmul.bf16.gmra.mxu1 %v402_v60  ;;  %468 = vmatmul.bf16.gmra.mxu0 %v400_v61  ;;  %v671_v60 = vpack.c.b16 %v666_v43, %v665_v42  ;;  %v2262_v61 = vld [vmem:[%s2871_s8 + $0x28] sm:$0xf]  ;;  %v2632_v42 = vld [vmem:[%s2871_s8 + $0x14] sm:$0xf0]  ;;  %v667_v43 = vunpack.c.l.b16 %v639_v29 }
  0x3d   : > { %560 = vmatpush.bf16.msrb.mxu1 %v2638_v55  ;;  %1110 = vmatpush.bf16.msrb.mxu0 %v2674_v58  ;;  %v1050_v55 = vpack.c.b16 %v1043_v41, %v1042_v40  ;;  %v951_v58 = vshll.u32 %v3120_v45, 16  ;;  %v2500_v40 = vld [vmem:[%s2871_s8 + $0x10] sm:$0xf]  ;;  %v2364_v29 = vld [vmem:[%s2871_s8 + $0x8] sm:$0xe] }
  0x3e   : > { %1419 = vmatpush.bf16.msrb.mxu2 %v2694_v17  ;;  %873 = vmatmul.bf16.gmra.mxu3 %v2259_v8  ;;  %v973_v17 = vshll.u32 %v2308_v3, 16  ;;  %v2130_v41 = vld [vmem:[%s2871_s8 + $0x10] sm:$0xf] }
  0x3f   : > { %738 = vmatmul.bf16.gmra.mxu2 %v670_v2  ;;  %1665 = vmatpush.bf16.msrb.mxu3 %v2702_v24  ;;  %v2684_v2 = vld [vmem:[%s3456_s1 + $0x168] sm:$0xff]  ;;  %v953_v8 = vrot.slane %v951_v58, 5  ;;  %v987_v24 = vshll.u32 %v2310_v11, 16 }
  0x40   : > { %v975_v27 = vrot.slane %v973_v17, 5  ;;  %v2314_v17 = vld [vmem:[%s2871_s8 + $0x40] sm:$0xf] }
  0x41   : > { %561 = vmatpush.bf16.msrb.mxu1 %v2637_v6  ;;  %1111 = vmatpush.bf16.msrb.mxu0 %v2673_v7  ;;  %v2692_v6 = vld [vmem:[%s3456_s1 + $0x188] sm:$0xff]  ;;  %v2263_v7 = vor.u32 %v2661_v62, %v2262_v61  ;;  %v989_v35 = vrot.slane %v987_v24, 5  ;;  %v2131_v61 = vor.u32 %v2632_v42, %v2130_v41  ;;  %v3245_v42 = vld [vmem:[%s2871_s8 + $0x3c] sm:$0x1] }
  0x42   : > { %1420 = vmatpush.bf16.msrb.mxu2 %v2693_v23  ;;  %v984_v23 = vshrl.u32 %v2310_v11, 16  ;;  %v976_v50 = vor.u32 %v975_v27, %v972_v26  ;;  %v3232_v27 = vld [vmem:[%s3456_s1 + $0x210] sm:$0xff] }
  0x43   : > { %1666 = vmatpush.bf16.msrb.mxu3 %v2701_v18  ;;  %v998_v18 = vshrl.u32 %v2312_v0, 16 }
  0x44   : > { %v977_v4 = vrot.slane %v976_v50, 4 }
  0x45   : > { %562 = vmatpush.bf16.msrb.mxu1 %v2636_v10  ;;  %1112 = vmatpush.bf16.msrb.mxu0 %v2672_v12  ;;  %v642_v10 = vrot.slane %v2968_v36, 5  ;;  %v2683_v12 = vld [vmem:[%s3456_s1 + $0x160] sm:$0xff]  ;;  %v954_v36 = vsel %vm2909_vm4, %v949_v13, %v953_v8 }
  0x46   : > { %1421 = vmatpush.bf16.msrb.mxu2 %v2692_v6  ;;  %v981_v6 = vrot.slane %v979_v52, 5 }
  0x47   : > { %v643_v30 = vsel %vm2918_vm5, %v2179_v21, %v642_v10  ;;  %1667 = vmatpush.bf16.msrb.mxu3 %v2700_v32  ;;  %v1001_v21 = vshll.u32 %v2312_v0, 16  ;;  %v1173_v32 = vrot.slane %v3056_v56, 5  ;;  %v1000_v56 = vrot.slane %v998_v18, 4 }
  0x48   : > { %v668_v48 = vunpack.c.l.b16 %v643_v30 }
  0x49   : > { %563 = vmatpush.bf16.msrb.mxu1 %v2635_v34  ;;  %1113 = vmatpush.bf16.msrb.mxu0 %v2671_v38  ;;  %v986_v34 = vrot.slane %v984_v23, 4  ;;  %v1045_v38 = vunpack.c.l.b16 %v968_v25  ;;  %v1169_v23 = vrot.slane %v3050_v47, 5  ;;  %v1015_v25 = vshll.u32 %v2314_v17, 16 }
  0x4a   : > { %1422 = vmatpush.bf16.msrb.mxu2 %v2691_v22  ;;  %v672_v3 = vpack.c.b16 %v668_v48, %v667_v43  ;;  %v1478_v22 = vshll.u32 %v3207_v5, 16  ;;  %v982_v47 = vsel %vm2909_vm4, %v977_v4, %v981_v6  ;;  %v2454_v4 = vld [vmem:[%s2871_s8 + $0x10] sm:$0xf] }
  0x4b   : > { %v990_v58 = vor.u32 %v989_v35, %v986_v34  ;;  %1668 = vmatpush.bf16.msrb.mxu3 %v2699_v20  ;;  %v2365_v34 = vld [vmem:[%s2871_s8 + $0x10] sm:$0xe]  ;;  %v2372_v35 = vrot.slane %v2364_v29, 9  ;;  %v1017_v52 = vrot.slane %v1015_v25, 5 }
  0x4c   : > { %564 = vmatmul.bf16.vlgmr.msrb.gmra.mxu1 %v2127_v54  ;;  %1114 = vmatmul.bf16.vlgmr.msrb.gmra.mxu0 %v1050_v55  ;;  %v1472_v54 = vshll.u32 %v2500_v40, 16  ;;  %v1483_v55 = vshrl.u32 %v2502_v51, 16  ;;  %v2373_v41 = vrot.slane %v2365_v34, 9  ;;  %v2707_v34 = vld [vmem:[%s3456_s1 + $0x200] sm:$0xff] }
  0x4d   : > { %1280 = vmatpush.bf16.msra.mxu1 %v2686_v37  ;;  %1835 = vmatpush.bf16.msra.mxu0 %v3117_v44  ;;  %v1044_v37 = vunpack.c.l.b16 %v954_v36  ;;  %v991_v14 = vrot.slane %v990_v58, 4  ;;  %v1012_v36 = vshrl.u32 %v2314_v17, 16  ;;  %v1170_v50 = vsel %vm2918_vm5, %v2372_v35, %v1169_v23  ;;  %v3278_v23 = vld [vmem:[%s2871_s8 + $0x2c] sm:$0x1] }
  0x4e   : > { %878 = vmatmul.bf16.gmra.mxu3 %v2263_v7  ;;  %2746 = vmatpush.bf16.msra.mxu2 %v3117_v44  ;;  %v2266_v44 = vld [vmem:[%s2871_s8 + $0x38] sm:$0xf]  ;;  %v3210_v7 = vld [vmem:[%s2871_s8 + $0x1c] sm:$0x1]  ;;  %v1474_v9 = vrot.slane %v1472_v54, 5  ;;  %v1485_v11 = vrot.slane %v1483_v55, 4  ;;  %v1216_v54 = vunpack.c.l.b16 %v1170_v50  ;;  %v1046_v58 = vunpack.c.l.b16 %v982_v47 }
  0x4f   : > { %743 = vmatmul.bf16.gmra.mxu2 %v671_v60  ;;  %v2681_v60 = vld [vmem:[%s3456_s1 + $0x150] sm:$0xff]  ;;  %v1051_v62 = vpack.c.b16 %v1045_v38, %v1044_v37  ;;  %v2267_v13 = vor.u32 %v2662_v63, %v2266_v44  ;;  %v1492_v24 = vshll.u32 %v3210_v7, 16  ;;  %v996_v30 = vsel %vm2909_vm4, %v991_v14, %v995_v16  ;;  %v2134_v55 = vld [vmem:[%s2871_s8 + $0x20] sm:$0xf]  ;;  %v2633_v44 = vld [vmem:[%s2871_s8 + $0x24] sm:$0xf0] }
  0x50   : > { %v1003_v37 = vrot.slane %v1001_v21, 5  ;;  %v1047_v59 = vunpack.c.l.b16 %v996_v30  ;;  %v1007_v63 = vshll.u32 %v3245_v42, 16  ;;  %v2135_v18 = vor.u32 %v2633_v44, %v2134_v55  ;;  %v2138_v55 = vld [vmem:[%s2871_s8 + $0x30] sm:$0xf] }
  0x51   : > { %1281 = vmatpush.bf16.msra.mxu1 %v2685_v53  ;;  %1836 = vmatpush.bf16.msra.mxu0 %v3136_v1  ;;  %v1469_v53 = vshrl.u32 %v2500_v40, 16  ;;  %v1480_v40 = vrot.slane %v1478_v22, 5  ;;  %v1494_v48 = vrot.slane %v1492_v24, 5 }
  0x52   : > { %2747 = vmatpush.bf16.msra.mxu2 %v3136_v1  ;;  %v2680_v1 = vld [vmem:[%s3456_s1 + $0x148] sm:$0xff] }
  0x53   : > { %v1471_v8 = vrot.slane %v1469_v53, 4  ;;  %v1174_v53 = vsel %vm2918_vm5, %v2373_v41, %v1173_v32 }
  0x55   : > { %1282 = vmatpush.bf16.msra.mxu1 %v2684_v2  ;;  %1837 = vmatpush.bf16.msra.mxu0 %v3152_v15  ;;  %v1486_v2 = vshll.u32 %v2502_v51, 16  ;;  %v1475_v10 = vor.u32 %v1474_v9, %v1471_v8  ;;  %v1014_v51 = vrot.slane %v1012_v36, 4 }
  0x56   : > { %2748 = vmatpush.bf16.msra.mxu2 %v3152_v15  ;;  %v2708_v15 = vld [vmem:[%s3456_s1 + $0x208] sm:$0xff] }
  0x57   : > { %v1476_v38 = vrot.slane %v1475_v10, 4 }
  0x59   : > { %1283 = vmatpush.bf16.msra.mxu1 %v2683_v12  ;;  %1838 = vmatpush.bf16.msra.mxu0 %v3176_v28  ;;  %v1488_v12 = vrot.slane %v1486_v2, 5  ;;  %v1481_v0 = vsel %vm2909_vm4, %v1476_v38, %v1480_v40  ;;  %v2504_v2 = vld [vmem:[%s2871_s8 + $0x20] sm:$0xf] }
  0x5a   : > { %2749 = vmatpush.bf16.msra.mxu2 %v3176_v28  ;;  %v1497_v9 = vshrl.u32 %v2504_v2, 16  ;;  %v1018_v28 = vor.u32 %v1017_v52, %v1014_v51  ;;  %v1597_v10 = vunpack.c.l.b16 %v1481_v0  ;;  %v2367_v38 = vld [vmem:[%s2871_s8 + $0x20] sm:$0xe]  ;;  %v1177_v52 = vrot.slane %v3120_v45, 5 }
  0x5b   : > { %v1489_v26 = vor.u32 %v1488_v12, %v1485_v11  ;;  %v1500_v11 = vshll.u32 %v2504_v2, 16  ;;  %v3275_v12 = vld [vmem:[%s2871_s8 + $0x24] sm:$0x1] }
  0x5c   : > { %569 = vmatmul.bf16.gmra.mxu1 %v2131_v61  ;;  %1119 = vmatmul.bf16.gmra.mxu0 %v1051_v62  ;;  %v1217_v61 = vunpack.c.l.b16 %v1174_v53  ;;  %v1004_v62 = vor.u32 %v1003_v37, %v1000_v56  ;;  %v1499_v20 = vrot.slane %v1497_v9, 4  ;;  %v1019_v29 = vrot.slane %v1018_v28, 4  ;;  %v2366_v37 = vld [vmem:[%s2871_s8 + $0x18] sm:$0xe] }
  0x5d   : > { %1284 = vmatpush.bf16.msra.mxu1 %v2682_v31  ;;  %1839 = vmatpush.bf16.msra.mxu0 %v3219_v19  ;;  %v2679_v31 = vld [vmem:[%s3456_s1 + $0x140] sm:$0xff]  ;;  %v1490_v43 = vrot.slane %v1489_v26, 4  ;;  %v1502_v21 = vrot.slane %v1500_v11, 5  ;;  %v1009_v26 = vrot.slane %v1007_v63, 5  ;;  %v1506_v56 = vshll.u32 %v3275_v12, 16 }
  0x5e   : > { %883 = vmatmul.bf16.gmra.mxu3 %v2267_v13  ;;  %v3269_v8 = vpack.c.b16 %v1217_v61, %v1216_v54  ;;  %v2687_v13 = vld [vmem:[%s2871_s8 + $0x14] sm:$0xf0]  ;;  %2750 = vmatpush.bf16.msra.mxu2 %v3219_v19  ;;  %v1005_v25 = vrot.slane %v1004_v62, 4  ;;  %v1520_v19 = vshll.u32 %v3278_v23, 16  ;;  %v2374_v50 = vrot.slane %v2366_v37, 9 }
  0x5f   : > { %748 = vmatmul.bf16.gmra.mxu2 %v672_v3  ;;  %v2506_v3 = vld [vmem:[%s2871_s8 + $0x28] sm:$0xf]  ;;  %v1495_v6 = vsel %vm2909_vm4, %v1490_v43, %v1494_v48  ;;  %v2455_v36 = vor.u32 %v2687_v13, %v2454_v4  ;;  %v1503_v30 = vor.u32 %v1502_v21, %v1499_v20  ;;  %v1508_v43 = vrot.slane %v1506_v56, 5  ;;  %v2564_v63 = vld [vmem:[%s2871_s8 + $0x10] sm:$0xe] }
  0x60   : > { %v1511_v16 = vshrl.u32 %v2506_v3, 16  ;;  %v1514_v17 = vshll.u32 %v2506_v3, 16  ;;  %v1598_v22 = vunpack.c.l.b16 %v1495_v6  ;;  %v1010_v40 = vsel %vm2909_vm4, %v1005_v25, %v1009_v26  ;;  %v2565_v3 = vld [vmem:[%s2871_s8 + $0x18] sm:$0xe]  ;;  %v2508_v4 = vld [vmem:[%s2871_s8 + $0x30] sm:$0xf] }
  0x61   : > { %1285 = vmatpush.bf16.msra.mxu1 %v2681_v60  ;;  %1840 = vmatpush.bf16.msra.mxu0 %v3232_v27  ;;  %v3258_v60 = vld [vmem:[%s2871_s8 + $0x44] sm:$0x1]  ;;  %v1522_v48 = vrot.slane %v1520_v19, 5  ;;  %v2375_v53 = vrot.slane %v2367_v38, 9  ;;  %v1181_v54 = vrot.slane %v3123_v46, 5  ;;  %v1048_v44 = vunpack.c.l.b16 %v1010_v40 }
  0x62   : > { %v1021_v14 = vshll.u32 %v3258_v60, 16  ;;  %v1513_v24 = vrot.slane %v1511_v16, 4  ;;  %v1516_v32 = vrot.slane %v1514_v17, 5  ;;  %2751 = vmatpush.bf16.msra.mxu2 %v3232_v27  ;;  %v1504_v27 = vrot.slane %v1503_v30, 4  ;;  %v2510_v6 = vld [vmem:[%s2871_s8 + $0x38] sm:$0xf] }
  0x63   : > { %v1182_v61 = vsel %vm2918_vm5, %v2375_v53, %v1181_v54  ;;  %v1724_v62 = vrot.slane %v3207_v5, 5  ;;  %v1525_v11 = vshrl.u32 %v2508_v4, 16  ;;  %v1528_v13 = vshll.u32 %v2508_v4, 16  ;;  %v2458_v17 = vld [vmem:[%s2871_s8 + $0x20] sm:$0xf] }
  0x64   : > { %v1023_v47 = vrot.slane %v1021_v14, 5  ;;  %v1517_v35 = vor.u32 %v1516_v32, %v1513_v24  ;;  %v1219_v0 = vunpack.c.l.b16 %v1182_v61  ;;  %v1509_v46 = vsel %vm2909_vm4, %v1504_v27, %v1508_v43  ;;  %v2368_v53 = vld [vmem:[%s2871_s8 + $0x28] sm:$0xe]  ;;  %v2369_v54 = vld [vmem:[%s2871_s8 + $0x30] sm:$0xe] }
  0x65   : > { %1286 = vmatpush.bf16.msra.mxu1 %v2680_v1  ;;  %1841 = vmatpush.bf16.msra.mxu0 %v2708_v15  ;;  %v1052_v1 = vpack.c.b16 %v1047_v59, %v1046_v58  ;;  %v1178_v59 = vsel %vm2918_vm5, %v2374_v50, %v1177_v52  ;;  %v1539_v5 = vshrl.u32 %v2510_v6, 16  ;;  %v1728_v16 = vrot.slane %v3210_v7, 5  ;;  %v2462_v50 = vld [vmem:[%s2871_s8 + $0x30] sm:$0xf]  ;;  %v2566_v4 = vld [vmem:[%s2871_s8 + $0x20] sm:$0xe] }
  0x66   : > { %v1024_v41 = vsel %vm2909_vm4, %v1019_v29, %v1023_v47  ;;  %2752 = vmatpush.bf16.msra.mxu2 %v2708_v15  ;;  %v1518_v51 = vrot.slane %v1517_v35, 4  ;;  %v2634_v15 = vld [vmem:[%s2871_s8 + $0x34] sm:$0xf0]  ;;  %v1218_v45 = vunpack.c.l.b16 %v1178_v59  ;;  %v1599_v20 = vunpack.c.l.b16 %v1509_v46  ;;  %v3315_v29 = vld [vmem:[%s2871_s8 + $0x34] sm:$0x1] }
  0x67   : > { %v1049_v58 = vunpack.c.l.b16 %v1024_v41  ;;  %v2139_v28 = vor.u32 %v2634_v15, %v2138_v55  ;;  %v1527_v24 = vrot.slane %v1525_v11, 4  ;;  %v1530_v32 = vrot.slane %v1528_v13, 5  ;;  %v3318_v47 = vld [vmem:[%s2871_s8 + $0x3c] sm:$0x1]  ;;  %v2512_v55 = vld [vmem:[%s2871_s8 + $0x40] sm:$0xf] }
  0x68   : > { %v1523_v2 = vsel %vm2909_vm4, %v1518_v51, %v1522_v48  ;;  %v3309_v9 = vpack.c.b16 %v1219_v0, %v1218_v45  ;;  %v1548_v35 = vshll.u32 %v3318_v47, 16  ;;  %v2377_v59 = vrot.slane %v2369_v54, 9  ;;  %v2514_v15 = vld [vmem:[%s2871_s8 + $0x48] sm:$0xf] }
  0x69   : > { %1287 = vmatpush.bf16.msra.mxu1 %v2679_v31  ;;  %v1605_v31 = vpack.c.b16 %v1598_v22, %v1597_v10  ;;  %1842 = vmatpush.bf16.msra.mxu0 %v2707_v34  ;;  %v1053_v14 = vpack.c.b16 %v1049_v58, %v1048_v44  ;;  %v1600_v21 = vunpack.c.l.b16 %v1523_v2  ;;  %v2572_v10 = vrot.slane %v2564_v63, 9  ;;  %v2567_v11 = vld [vmem:[%s2871_s8 + $0x28] sm:$0xe] }
  0x6a   : > { %2753 = vmatpush.bf16.msra.mxu2 %v2707_v34  ;;  %v2573_v22 = vrot.slane %v2565_v3, 9  ;;  %v1531_v19 = vor.u32 %v1530_v32, %v1527_v24  ;;  %v1550_v43 = vrot.slane %v1548_v35, 5  ;;  %v2376_v44 = vrot.slane %v2368_v53, 9 }
  0x6b   : > { %v1606_v30 = vpack.c.b16 %v1600_v21, %v1599_v20  ;;  %v1725_v7 = vsel %vm2918_vm5, %v2572_v10, %v1724_v62  ;;  %v1185_v58 = vrot.slane %v3186_v33, 5  ;;  %v1189_v61 = vrot.slane %v3189_v39, 5  ;;  %v2689_v62 = vld [vmem:[%s2871_s8 + $0x34] sm:$0xf0] }
  0x6c   : > { %574 = vmatmul.bf16.gmra.mxu1 %v2135_v18  ;;  %1124 = vmatmul.bf16.gmra.mxu0 %v1052_v1  ;;  %v2688_v18 = vld [vmem:[%s2871_s8 + $0x24] sm:$0xf0]  ;;  %v1542_v1 = vshll.u32 %v2510_v6, 16  ;;  %v1729_v56 = vsel %vm2918_vm5, %v2573_v22, %v1728_v16  ;;  %v1771_v37 = vunpack.c.l.b16 %v1725_v7  ;;  %v1532_v40 = vrot.slane %v1531_v19, 4  ;;  %v3345_v16 = vld [vmem:[%s2871_s8 + $0x44] sm:$0x1] }
  0x6d   : > { %v2459_v26 = vor.u32 %v2688_v18, %v2458_v17  ;;  %v1772_v38 = vunpack.c.l.b16 %v1729_v56  ;;  %v1553_v63 = vshrl.u32 %v2512_v55, 16  ;;  %v1556_v45 = vshll.u32 %v2512_v55, 16  ;;  %v3348_v17 = vld [vmem:[%s2871_s8 + $0x4c] sm:$0x1] }
  0x6e   : > { %1669 = vmatmul.bf16.vlgmr.msrb.gmra.mxu3 %v1605_v31  ;;  %v1544_v25 = vrot.slane %v1542_v1, 5  ;;  %v1534_v31 = vshll.u32 %v3315_v29, 16  ;;  %v1567_v0 = vshrl.u32 %v2514_v15, 16  ;;  %v1570_v46 = vshll.u32 %v2514_v15, 16 }
  0x6f   : > { %1423 = vmatmul.bf16.vlgmr.msrb.gmra.mxu2 %v2455_v36  ;;  %v1541_v36 = vrot.slane %v1539_v5, 4  ;;  %v1779_v48 = vpack.c.b16 %v1772_v38, %v1771_v37  ;;  %v1186_v6 = vsel %vm2918_vm5, %v2376_v44, %v1185_v58  ;;  %v1190_v33 = vsel %vm2918_vm5, %v2377_v59, %v1189_v61  ;;  %v2370_v38 = vld [vmem:[%s2871_s8 + $0x38] sm:$0xe] }
  0x70   : > { %v1536_v41 = vrot.slane %v1534_v31, 5  ;;  %v1220_v13 = vunpack.c.l.b16 %v1186_v6  ;;  %v1221_v39 = vunpack.c.l.b16 %v1190_v33  ;;  %v1555_v5 = vrot.slane %v1553_v63, 4  ;;  %v2569_v61 = vld [vmem:[%s2871_s8 + $0x38] sm:$0xe]  ;;  %v2571_v63 = vld [vmem:[%s2871_s8 + $0x48] sm:$0xe] }
  0x71   : > { %v1545_v34 = vor.u32 %v1544_v25, %v1541_v36  ;;  %v1569_v18 = vrot.slane %v1567_v0, 4  ;;  %v1572_v1 = vrot.slane %v1570_v46, 5  ;;  %v2574_v20 = vrot.slane %v2566_v4, 9 }
  0x72   : > { %v1537_v51 = vsel %vm2909_vm4, %v1532_v40, %v1536_v41  ;;  %v3350_v21 = vpack.c.b16 %v1221_v39, %v1220_v13  ;;  %v1732_v22 = vrot.slane %v3275_v12, 5  ;;  %v2575_v24 = vrot.slane %v2567_v11, 9  ;;  %v2371_v40 = vld [vmem:[%s2871_s8 + $0x40] sm:$0xe] }
  0x73   : > { %v1546_v27 = vrot.slane %v1545_v34, 4  ;;  %v1601_v2 = vunpack.c.l.b16 %v1537_v51  ;;  %v1736_v32 = vrot.slane %v3278_v23, 5  ;;  %v1562_v25 = vshll.u32 %v3345_v16, 16  ;;  %v2690_v51 = vld [vmem:[%s2871_s8 + $0x44] sm:$0xf0] }
  0x74   : > { %v1733_v7 = vsel %vm2918_vm5, %v2574_v20, %v1732_v22  ;;  %v2378_v41 = vrot.slane %v2370_v38, 9  ;;  %v1740_v0 = vrot.slane %v3315_v29, 5  ;;  %v2577_v46 = vrot.slane %v2569_v61, 9 }
  0x75   : > { %v1551_v52 = vsel %vm2909_vm4, %v1546_v27, %v1550_v43  ;;  %v1737_v12 = vsel %vm2918_vm5, %v2575_v24, %v1736_v32  ;;  %v1564_v23 = vrot.slane %v1562_v25, 5  ;;  %v1773_v31 = vunpack.c.l.b16 %v1733_v7 }
  0x76   : > { %v1602_v3 = vunpack.c.l.b16 %v1551_v52  ;;  %v1774_v34 = vunpack.c.l.b16 %v1737_v12  ;;  %v1193_v27 = vrot.slane %v3245_v42, 5  ;;  %v2379_v43 = vrot.slane %v2371_v40, 9  ;;  %v2568_v42 = vld [vmem:[%s2871_s8 + $0x30] sm:$0xe] }
  0x77   : > { %v1752_v4 = vrot.slane %v3348_v17, 5  ;;  %v2579_v33 = vrot.slane %v2571_v63, 9 }
  0x78   : > { %v1607_v10 = vpack.c.b16 %v1602_v3, %v1601_v2  ;;  %v1780_v52 = vpack.c.b16 %v1774_v34, %v1773_v31  ;;  %v1194_v53 = vsel %vm2918_vm5, %v2378_v41, %v1193_v27  ;;  %v1744_v2 = vrot.slane %v3318_v47, 5 }
  0x79   : > { %v1222_v44 = vunpack.c.l.b16 %v1194_v53  ;;  %v1748_v3 = vrot.slane %v3345_v16, 5  ;;  %v1753_v29 = vsel %vm2918_vm5, %v2579_v33, %v1752_v4 }
  0x7c   : > { %579 = vmatmul.bf16.gmra.mxu1 %v2139_v28  ;;  %1129 = vmatmul.bf16.gmra.mxu0 %v1053_v14  ;;  %v1558_v28 = vrot.slane %v1556_v45, 5  ;;  %v2463_v14 = vor.u32 %v2689_v62, %v2462_v50  ;;  %v2466_v50 = vld [vmem:[%s2871_s8 + $0x40] sm:$0xf]  ;;  %v2576_v45 = vrot.slane %v2568_v42, 9 }
  0x7d   : > { %v2467_v59 = vor.u32 %v2690_v51, %v2466_v50  ;;  %v2570_v62 = vld [vmem:[%s2871_s8 + $0x40] sm:$0xe]  ;;  %s2630_s8 = sshll.u32 %s3468_s12, 5 }
  0x7e   : > { %1674 = vmatmul.bf16.gmra.mxu3 %v1606_v30  ;;  %v1559_v36 = vor.u32 %v1558_v28, %v1555_v5  ;;  %v1576_v30 = vshll.u32 %v3348_v17, 16  ;;  %v2578_v6 = vrot.slane %v2570_v62, 9  ;;  %v1741_v11 = vsel %vm2918_vm5, %v2576_v45, %v1740_v0  ;;  %s3424_s6 = scalar_lea.vmem %s3457_s2, %s2630_s8 }
  0x7f   : > { %1428 = vmatmul.bf16.gmra.mxu2 %v2459_v26  ;;  %v1573_v26 = vor.u32 %v1572_v1, %v1569_v18  ;;  %v1775_v47 = vunpack.c.l.b16 %v1741_v11  ;;  %v1778_v28 = vunpack.c.l.b16 %v1753_v29 }
  0x80   : > { %v1578_v19 = vrot.slane %v1576_v30, 5  ;;  %v1749_v13 = vsel %vm2918_vm5, %v2578_v6, %v1748_v3 }
  0x81   : > { %v1574_v56 = vrot.slane %v1573_v26, 4  ;;  %v1777_v5 = vunpack.c.l.b16 %v1749_v13 }
  0x83   : > { %v1579_v37 = vsel %vm2909_vm4, %v1574_v56, %v1578_v19  ;;  %v1782_v18 = vpack.c.b16 %v1778_v28, %v1777_v5 }
  0x84   : > { %v1604_v55 = vunpack.c.l.b16 %v1579_v37 }
  0x8c   : > { %1288 = vmatmul.bf16.vlgmr.msra.gmra.mxu1 %v3269_v8  ;;  %1843 = vmatmul.bf16.vlgmr.msra.gmra.mxu0 %v1779_v48  ;;  %v1560_v8 = vrot.slane %v1559_v36, 4  ;;  %v1197_v48 = vrot.slane %v3258_v60, 5 }
  0x8e   : > { %1679 = vmatmul.bf16.gmra.mxu3 %v1607_v10  ;;  %v1565_v35 = vsel %vm2909_vm4, %v1560_v8, %v1564_v23  ;;  %v1198_v49 = vsel %vm2918_vm5, %v2379_v43, %v1197_v48 }
  0x8f   : > { %1433 = vmatmul.bf16.gmra.mxu2 %v2463_v14  ;;  %v1603_v54 = vunpack.c.l.b16 %v1565_v35  ;;  %v1223_v58 = vunpack.c.l.b16 %v1198_v49 }
  0x91   : > { %v1227_v15 = vpack.c.b16 %v1223_v58, %v1222_v44  ;;  %v1608_v60 = vpack.c.b16 %v1604_v55, %v1603_v54 }
  0x9c   : > { %1293 = vmatmul.bf16.gmra.mxu1 %v3309_v9  ;;  %1848 = vmatmul.bf16.gmra.mxu0 %v1780_v52  ;;  %v1745_v9 = vsel %vm2918_vm5, %v2577_v46, %v1744_v2 }
  0x9d   : > { %v1776_v39 = vunpack.c.l.b16 %v1745_v9 }
  0x9e   : > { %1684 = vmatmul.bf16.gmra.mxu3 %v1608_v60 }
  0x9f   : > { %1438 = vmatmul.bf16.gmra.mxu2 %v2467_v59  ;;  %v1781_v14 = vpack.c.b16 %v1776_v39, %v1775_v47 }
  0xa9   : > { %v474_v16 = vpop.f32.mrf.mxu1  ;;  %v464_v17 = vpop.f32.mrf.mxu0 }
  0xac   : > { %1298 = vmatmul.bf16.gmra.mxu1 %v3350_v21  ;;  %1853 = vmatmul.bf16.gmra.mxu0 %v1781_v14 }
  0xaf   : > { %1858 = vmatmul.bf16.vlgmr.msra.gmra.mxu2 %v1782_v18 }
  0xb1   : > { %v476_v20 = vpop.f32.mrf.mxu1  ;;  %v466_v10 = vpop.f32.mrf.mxu0 }
  0xb2   : > { %v734_v1 = vpop.f32.mrf.mxu2  ;;  %v869_v22 = vpop.f32.mrf.mxu3 }
  0xb9   : > { %v479_v32 = vpop.f32.mrf.mxu1  ;;  %v469_v57 = vpop.f32.mrf.mxu0 }
  0xba   : > { %v736_v24 = vpop.f32.mrf.mxu2  ;;  %v3393_v36 = vpop.f32.mrf.mxu3 }
  0xbc   : > { %1303 = vmatmul.bf16.gmra.mxu1 %v1227_v15 }
  0xc1   : > { %v481_v26 = vpop.f32.mrf.mxu1  ;;  %v471_v30 = vpop.f32.mrf.mxu0 }
  0xc2   : > { %v739_v25 = vpop.f32.mrf.mxu2  ;;  %v874_v7 = vpop.f32.mrf.mxu3 }
  0xc9   : > { %v565_v8 = vpop.f32.mrf.mxu1  ;;  %v1115_v23 = vpop.f32.mrf.mxu0 }
  0xca   : > { %v741_v12 = vpop.f32.mrf.mxu2  ;;  %v566_v21 = vadd.f32 %v565_v8, %v464_v17  ;;  %v3395_v19 = vpop.f32.mrf.mxu3 }
  0xcc   : > { %v754_v56 = vadd.f32 %v734_v1, %v566_v21 }
  0xce   : > { %v889_v31 = vadd.f32 %v869_v22, %v754_v56 }
  0xd0   : > { %v1135_v34 = vadd.f32 %v1115_v23, %v889_v31 }
  0xd1   : > { %v567_v37 = vpop.f32.mrf.mxu1  ;;  %v1117_v38 = vpop.f32.mrf.mxu0 }
  0xd2   : > { %v744_v35 = vpop.f32.mrf.mxu2  ;;  %v568_v40 = vadd.f32 %v567_v37, %v466_v10  ;;  %v879_v27 = vpop.f32.mrf.mxu3 }
  0xd4   : > { %v755_v41 = vadd.f32 %v736_v24, %v568_v40 }
  0xd9   : > { %v570_v48 = vpop.f32.mrf.mxu1  ;;  %v1120_v50 = vpop.f32.mrf.mxu0 }
  0xda   : > { %v746_v43 = vpop.f32.mrf.mxu2  ;;  %v571_v51 = vadd.f32 %v570_v48, %v469_v57  ;;  %v3397_v55 = vpop.f32.mrf.mxu3  ;;  %v890_v57 = vadd.f32 %v3393_v36, %v755_v41 }
  0xdc   : > { %v756_v52 = vadd.f32 %v739_v25, %v571_v51 }
  0xde   : > { %v891_v53 = vadd.f32 %v874_v7, %v756_v52 }
  0xe0   : > { %v1137_v49 = vadd.f32 %v1120_v50, %v891_v53 }
  0xe1   : > { %v572_v44 = vpop.f32.mrf.mxu1  ;;  %v3399_v58 = vpop.f32.mrf.mxu0 }
  0xe2   : > { %v749_v54 = vpop.f32.mrf.mxu2  ;;  %v573_v59 = vadd.f32 %v572_v44, %v471_v30  ;;  %v3401_v60 = vpop.f32.mrf.mxu3  ;;  %v1136_v30 = vadd.f32 %v1117_v38, %v890_v57 }
  0xe4   : > { %v757_v42 = vadd.f32 %v741_v12, %v573_v59 }
  0xe9   : > { %v575_v15 = vpop.f32.mrf.mxu1  ;;  %v1125_v62 = vpop.f32.mrf.mxu0 }
  0xea   : > { %v751_v61 = vpop.f32.mrf.mxu2  ;;  %v576_v63 = vadd.f32 %v575_v15, %v474_v16  ;;  %v3409_v11 = vpop.f32.mrf.mxu3 }
  0xec   : > { %v758_v45 = vadd.f32 %v744_v35, %v576_v63 }
  0xee   : > { %v893_v0 = vadd.f32 %v879_v27, %v758_v45 }
  0xf0   : > { %v3403_v46 = vadd.f32 %v1125_v62, %v893_v0 }
  0xf1   : > { %v577_v3 = vpop.f32.mrf.mxu1  ;;  %v3405_v4 = vpop.f32.mrf.mxu0 }
  0xf2   : > { %v1424_v2 = vpop.f32.mrf.mxu2  ;;  %v578_v6 = vadd.f32 %v577_v3, %v476_v20  ;;  %v1670_v5 = vpop.f32.mrf.mxu3 }
  0xf4   : > { %v3407_v33 = vadd.f32 %v746_v43, %v578_v6  ;;  %v892_v43 = vadd.f32 %v3395_v19, %v757_v42 }
  0xf9   : > { %v580_v13 = vpop.f32.mrf.mxu1  ;;  %v3411_v29 = vpop.f32.mrf.mxu0 }
  0xfa   : > { %v1426_v9 = vpop.f32.mrf.mxu2  ;;  %v581_v47 = vadd.f32 %v580_v13, %v479_v32  ;;  %v1672_v1 = vpop.f32.mrf.mxu3 }
  0xfc   : > { %v3413_v39 = vadd.f32 %v749_v54, %v581_v47 }
 0x101   : > { %v582_v14 = vpop.f32.mrf.mxu1  ;;  %v3415_v16 = vpop.f32.mrf.mxu0 }
 0x102   : > { %v1429_v28 = vpop.f32.mrf.mxu2  ;;  %v583_v17 = vadd.f32 %v582_v14, %v481_v26  ;;  %v1675_v21 = vpop.f32.mrf.mxu3 }
 0x104   : > { %v3417_v18 = vadd.f32 %v751_v61, %v583_v17  ;;  %v1138_v61 = vadd.f32 %v3399_v58, %v892_v43 }
 0x109   : > { %v1289_v20 = vpop.f32.mrf.mxu1  ;;  %v1844_v10 = vpop.f32.mrf.mxu0 }
 0x10a   : > { %v1309_v22 = vadd.f32 %v1289_v20, %v1135_v34  ;;  %v1431_v24 = vpop.f32.mrf.mxu2  ;;  %v1677_v51 = vpop.f32.mrf.mxu3  ;;  %v894_v20 = vadd.f32 %v3397_v55, %v3407_v33 }
 0x10c   : > { %v1444_v25 = vadd.f32 %v1424_v2, %v1309_v22 }
 0x10e   : > { %v1690_v32 = vadd.f32 %v1670_v5, %v1444_v25 }
 0x110   : > { %v1864_v8 = vadd.f32 %v1844_v10, %v1690_v32  ;;  %v1140_v32 = vadd.f32 %v3405_v4, %v894_v20 }
 0x111   : > { %v1291_v7 = vpop.f32.mrf.mxu1  ;;  %v1846_v12 = vpop.f32.mrf.mxu0 }
 0x112   : > { %v1310_v23 = vadd.f32 %v1291_v7, %v1136_v30  ;;  %v1434_v26 = vpop.f32.mrf.mxu2  ;;  %v1872_v31 = vpack.c.bf16 %v1864_v8, %v1864_v8 }
 0x114   : > { %v1445_v56 = vadd.f32 %v1426_v9, %v1310_v23  ;;  %v1888_v38 = vunpack.c.l.bf16 %v1872_v31  ;;  %v1680_v9 = vpop.f32.mrf.mxu3 }
 0x116   : > { %v1691_v35 = vadd.f32 %v1672_v1, %v1445_v56  ;;  %v1910_v52 = vmul.f32 %v1888_v38, %v1888_v38 }
 0x118   : > { %v1865_v37 = vadd.f32 %v1846_v12, %v1691_v35 }
 0x119   : > { %v1294_v36 = vpop.f32.mrf.mxu1  ;;  %v1849_v34 = vpop.f32.mrf.mxu0 }
 0x11a   : > { %v1873_v40 = vpack.c.bf16 %v1865_v37, %v1865_v37  ;;  %v2718_v41 = vpack.c.bf16 %v1865_v37, %v1864_v8  ;;  %v1311_v27 = vadd.f32 %v1294_v36, %v1137_v49  ;;  %v1436_v59 = vpop.f32.mrf.mxu2 }
 0x11c   : > { %2719 = vst [vmem:[%s3424_s6] sm:$0xff] %v2718_v41   ;;  %v1889_v48 = vunpack.c.l.bf16 %v1873_v40  ;;  %v1446_v50 = vadd.f32 %v1429_v28, %v1311_v27  ;;  %v1682_v12 = vpop.f32.mrf.mxu3 }
 0x11e   : > { %v1896_v53 = vadd.f32 %v1889_v48, %v1888_v38  ;;  %v1911_v54 = vmul.f32 %v1889_v48, %v1889_v48  ;;  %v1692_v44 = vadd.f32 %v1675_v21, %v1446_v50  ;;  %v896_v48 = vadd.f32 %v3409_v11, %v3417_v18 }
 0x120   : > { %v1918_v15 = vadd.f32 %v1911_v54, %v1910_v52  ;;  %v1866_v62 = vadd.f32 %v1849_v34, %v1692_v44  ;;  %v1142_v54 = vadd.f32 %v3415_v16, %v896_v48 }
 0x121   : > { %v1296_v63 = vpop.f32.mrf.mxu1  ;;  %v1851_v45 = vpop.f32.mrf.mxu0 }
 0x122   : > { %v1874_v0 = vpack.c.bf16 %v1866_v62, %v1866_v62  ;;  %v1312_v2 = vadd.f32 %v1296_v63, %v1138_v61  ;;  %v1439_v5 = vpop.f32.mrf.mxu2 }
 0x124   : > { %v1890_v49 = vunpack.c.l.bf16 %v1874_v0  ;;  %v1447_v19 = vadd.f32 %v1431_v24, %v1312_v2  ;;  %v1685_v43 = vpop.f32.mrf.mxu3 }
 0x126   : > { %v1897_v42 = vadd.f32 %v1896_v53, %v1890_v49  ;;  %v1912_v3 = vmul.f32 %v1890_v49, %v1890_v49  ;;  %v1693_v6 = vadd.f32 %v1677_v51, %v1447_v19 }
 0x128   : > { %v1919_v13 = vadd.f32 %v1918_v15, %v1912_v3  ;;  %v1867_v47 = vadd.f32 %v1851_v45, %v1693_v6 }
 0x129   : > { %v1299_v28 = vpop.f32.mrf.mxu1  ;;  %v1854_v1 = vpop.f32.mrf.mxu0 }
 0x12a   : > { %v1875_v14 = vpack.c.bf16 %v1867_v47, %v1867_v47  ;;  %v2723_v17 = vpack.c.bf16 %v1867_v47, %v1866_v62  ;;  %v1313_v58 = vadd.f32 %v1299_v28, %v3403_v46  ;;  %v1441_v56 = vpop.f32.mrf.mxu2  ;;  %v895_v46 = vadd.f32 %v3401_v60, %v3413_v39 }
 0x12c   : > { %2735 = vst [vmem:[%s3424_s6 + $0x8] sm:$0xff] %v2723_v17   ;;  %v1891_v10 = vunpack.c.l.bf16 %v1875_v14  ;;  %v1448_v22 = vadd.f32 %v1434_v26, %v1313_v58  ;;  %v1141_v36 = vadd.f32 %v3411_v29, %v895_v46  ;;  %v1687_v45 = vpop.f32.mrf.mxu3 }
 0x12e   : > { %v1898_v24 = vadd.f32 %v1897_v42, %v1891_v10  ;;  %v1913_v57 = vmul.f32 %v1891_v10, %v1891_v10  ;;  %v1694_v25 = vadd.f32 %v1680_v9, %v1448_v22 }
 0x130   : > { %v1920_v30 = vadd.f32 %v1919_v13, %v1913_v57  ;;  %v1868_v7 = vadd.f32 %v1854_v1, %v1694_v25 }
 0x131   : > { %v1301_v8 = vpop.f32.mrf.mxu1  ;;  %v1856_v31 = vpop.f32.mrf.mxu0 }
 0x132   : > { %v1876_v23 = vpack.c.bf16 %v1868_v7, %v1868_v7  ;;  %v1314_v21 = vadd.f32 %v1301_v8, %v1140_v32  ;;  %v1859_v50 = vpop.f32.mrf.mxu2 }
 0x134   : > { %v1892_v55 = vunpack.c.l.bf16 %v1876_v23  ;;  %v1449_v33 = vadd.f32 %v1436_v59, %v1314_v21 }
 0x136   : > { %v1899_v26 = vadd.f32 %v1898_v24, %v1892_v55  ;;  %v1914_v35 = vmul.f32 %v1892_v55, %v1892_v55  ;;  %v1695_v37 = vadd.f32 %v1682_v12, %v1449_v33 }
 0x138   : > { %v1921_v4 = vadd.f32 %v1920_v30, %v1914_v35  ;;  %v1869_v34 = vadd.f32 %v1856_v31, %v1695_v37 }
 0x139   : > { %v1304_v38 = vpop.f32.mrf.mxu1 }
 0x13a   : > { %v1877_v40 = vpack.c.bf16 %v1869_v34, %v1869_v34  ;;  %v2728_v41 = vpack.c.bf16 %v1869_v34, %v1868_v7  ;;  %v1315_v27 = vadd.f32 %v1304_v38, %v1141_v36  ;;  %v1861_v2 = vpop.f32.mrf.mxu2 }
 0x13c   : > { %2736 = vst [vmem:[%s3424_s6 + $0x10] sm:$0xff] %v2728_v41   ;;  %v1893_v60 = vunpack.c.l.bf16 %v1877_v40  ;;  %v1450_v39 = vadd.f32 %v1439_v5, %v1315_v27 }
 0x13e   : > { %v1900_v51 = vadd.f32 %v1899_v26, %v1893_v60  ;;  %v1915_v52 = vmul.f32 %v1893_v60, %v1893_v60  ;;  %v1696_v53 = vadd.f32 %v1685_v43, %v1450_v39 }
 0x140   : > { %v1922_v29 = vadd.f32 %v1921_v4, %v1915_v52  ;;  %v1870_v44 = vadd.f32 %v1859_v50, %v1696_v53 }
 0x141   : > { %v1306_v59 = vpop.f32.mrf.mxu1 }
 0x142   : > { %v1878_v61 = vpack.c.bf16 %v1870_v44, %v1870_v44  ;;  %v1316_v15 = vadd.f32 %v1306_v59, %v1142_v54 }
 0x144   : > { %v1894_v62 = vunpack.c.l.bf16 %v1878_v61  ;;  %v1451_v63 = vadd.f32 %v1441_v56, %v1316_v15 }
 0x146   : > { %v1901_v0 = vadd.f32 %v1900_v51, %v1894_v62  ;;  %v1916_v11 = vmul.f32 %v1894_v62, %v1894_v62  ;;  %v1697_v18 = vadd.f32 %v1687_v45, %v1451_v63 }
 0x148   : > { %v1923_v49 = vadd.f32 %v1922_v29, %v1916_v11  ;;  %v1871_v19 = vadd.f32 %v1861_v2, %v1697_v18 }
 0x14a   : > { %v1879_v42 = vpack.c.bf16 %v1871_v19, %v1871_v19  ;;  %v2733_v3 = vpack.c.bf16 %v1871_v19, %v1870_v44 }
 0x14c   : > { %2737 = vst [vmem:[%s3424_s6 + $0x18] sm:$0xff] %v2733_v3   ;;  %v1895_v16 = vunpack.c.l.bf16 %v1879_v42 }
 0x14e   : > { %v1902_v6 = vadd.f32 %v1901_v0, %v1895_v16  ;;  %v1917_v9 = vmul.f32 %v1895_v16, %v1895_v16 }
 0x150   : > { %v1903_v13 = vrot.slane %v1902_v6, 4  ;;  %v1924_v47 = vadd.f32 %v1923_v49, %v1917_v9 }
 0x152   : > { %v1904_v5 = vadd.f32 %v1903_v13, %v1902_v6  ;;  %v1925_v28 = vrot.slane %v1924_v47, 4 }
 0x154   : > { %v1905_v14 = vrot.slane %v1904_v5, 2  ;;  %v1926_v17 = vadd.f32 %v1925_v28, %v1924_v47 }
 0x156   : > { %v1906_v58 = vadd.f32 %v1905_v14, %v1904_v5  ;;  %v1927_v1 = vrot.slane %v1926_v17, 2 }
 0x158   : > { %v1907_v20 = vrot.slane %v1906_v58, 1  ;;  %v1928_v10 = vadd.f32 %v1927_v1, %v1926_v17 }
 0x15a   : > { %v1908_v22 = vadd.f32 %v1907_v20, %v1906_v58  ;;  %v1929_v24 = vrot.slane %v1928_v10, 1 }
 0x15c   : > { %1909 = vst [vmem:[%s226_s11] sm:$0x1] %v1908_v22  ;;  %v1930_v57 = vadd.f32 %v1929_v24, %v1928_v10 }
 0x15e   : > { %1931 = vst [vmem:[%s226_s11 + $0x1] sm:$0x1] %v1930_v57 }
 0x15f PF: > { %s14_s14 = sadd.s32 1, %s2801_s14   ;;  %s3463_s12 = smov %s2797_s13 }
 0x160   : > { %p11_p5 = scmp.ge.s32.totalorder %s14_s14, 4   ;;  %s3464_s13 = smov %s3466_s15 }
 0x162   :  { %13 = sbr.rel (!%p11_p5) target bundleno = 2 (0x2), region = 83 }

</bundles_post_ra>
